<compile_context>
chip_gen: v5e
topology: v5e:2x2
jax: 0.10.0
libtpu: 0.0.40
codegen_flags: <defaults>
</compile_context>

<pallas_src>
import functools

import jax
import jax.numpy as jnp
from jax import lax
from jax.experimental import pallas as pl
from jax.experimental.pallas import tpu as pltpu


def _fused_conv_bn_relu_kernel(p_ref, w_ref, gamma_ref, beta_ref, o_ref, *, eps):
    """One grid step = one block of Gb channel groups, conv+BN+ReLU fully fused.

    p_ref:     (Gb, R, 9*Ci)  bf16 im2col patches (K axis is tap-major, ci-minor)
    w_ref:     (Gb, 9*Ci, Co) bf16 per-group weight matrices
    gamma_ref: (Gb, 1, Co)    f32 BN scale
    beta_ref:  (Gb, 1, Co)    f32 BN shift
    o_ref:     (1, R, Gb*Co)  f32 normalized + ReLU'd output rows
    """
    gb = p_ref.shape[0]
    r = p_ref.shape[1]
    inv_r = 1.0 / r
    outs = []
    for g in range(gb):  # static unroll over the groups in this block
        # Single K=9*Ci MXU matmul per group, f32 accumulation.
        acc = jnp.dot(p_ref[g], w_ref[g], preferred_element_type=jnp.float32)
        # Train-mode BatchNorm over the R = N*OH*OW rows (biased variance), f32.
        mean = jnp.sum(acc, axis=0, keepdims=True) * inv_r
        d = acc - mean
        var = jnp.sum(d * d, axis=0, keepdims=True) * inv_r
        scale = gamma_ref[g] * lax.rsqrt(var + eps)
        outs.append(jnp.maximum(d * scale + beta_ref[g], 0.0))
    # One wide (R, Gb*Co) store instead of Gb narrow masked stores.
    o_ref[0] = jnp.concatenate(outs, axis=-1).astype(o_ref.dtype)


def _pick_groups_per_step(G, R, K9, Co):
    """Largest divisor of G whose double-buffered working set stays well inside VMEM."""
    budget = 32 * 1024 * 1024  # conservative vs. v7x 64 MiB physical VMEM
    per_group = R * K9 * 2 + K9 * Co * 2 + 2 * Co * 4 + R * Co * 4
    gb = 1
    for d in range(1, G + 1):
        if G % d == 0 and 2 * d * per_group <= budget:
            gb = d
    return gb


def conv_bn_relu(x, w, gamma, beta, *, groups, eps=1e-5, compute_dtype=jnp.bfloat16):
    """x: (N, C, H, W) f32; w: (C_out, C_in/groups, 3, 3); returns NCHW f32."""
    N, C, H, W = x.shape
    Cout = w.shape[0]
    G = groups
    Ci = C // G
    Co = Cout // G
    OH = (H + 2 - 3) // 2 + 1
    OW = (W + 2 - 3) // 2 + 1
    R = N * OH * OW
    K9 = 9 * Ci

    # --- glue: group-major channels-last input, pad=1, tap-folded im2col patches
    # TODO(synk): the im2col slab could be generated in-kernel from the padded
    # input with strided pl.ds loads to save one HBM pass; kept in XLA here for
    # layout safety at these lane-sparse (Ci=8) shapes.
    xg = x.reshape(N, G, Ci, H, W).transpose(1, 0, 3, 4, 2)          # (G, N, H, W, Ci)
    xp = jnp.pad(xg, ((0, 0), (0, 0), (1, 1), (1, 1), (0, 0)))
    taps = []
    for kh in range(3):
        for kw in range(3):
            t = xp[:, :, kh : kh + 2 * OH - 1 : 2, kw : kw + 2 * OW - 1 : 2, :]
            taps.append(t.reshape(G, R, Ci))
    patches = jnp.concatenate(taps, axis=-1).astype(compute_dtype)   # (G, R, 9*Ci)

    # --- glue: (Cout, Ci, 3, 3) -> (G, 9*Ci, Co), K axis tap-major / ci-minor
    wk = (
        w.reshape(G, Co, Ci, 3, 3)
        .transpose(0, 3, 4, 2, 1)                                    # (G, 3, 3, Ci, Co)
        .reshape(G, K9, Co)
        .astype(compute_dtype)
    )
    gamma_g = gamma.astype(jnp.float32).reshape(G, 1, Co)
    beta_g = beta.astype(jnp.float32).reshape(G, 1, Co)

    Gb = _pick_groups_per_step(G, R, K9, Co)
    nb = G // Gb

    out = pl.pallas_call(
        functools.partial(_fused_conv_bn_relu_kernel, eps=eps),
        out_shape=jax.ShapeDtypeStruct((nb, R, Gb * Co), jnp.float32),
        grid=(nb,),
        in_specs=[
            pl.BlockSpec((Gb, R, K9), lambda i: (i, 0, 0)),
            pl.BlockSpec((Gb, K9, Co), lambda i: (i, 0, 0)),
            pl.BlockSpec((Gb, 1, Co), lambda i: (i, 0, 0)),
            pl.BlockSpec((Gb, 1, Co), lambda i: (i, 0, 0)),
        ],
        out_specs=pl.BlockSpec((1, R, Gb * Co), lambda i: (i, 0, 0)),
        compiler_params=pltpu.CompilerParams(dimension_semantics=("parallel",)),
    )(patches, wk, gamma_g, beta_g)

    # --- glue: (nb, R, Gb*Co) -> NCHW; global channel c = g*Co + co
    out = (
        out.reshape(nb, N, OH, OW, Gb * Co)
        .transpose(1, 2, 3, 0, 4)
        .reshape(N, OH, OW, C)
    )
    return out.transpose(0, 3, 1, 2)


def _reference(x, w, gamma, beta, *, groups, eps=1e-5):
    """Plain-JAX reference mirroring PyTorch grouped conv + train-mode BN + ReLU."""
    y = lax.conv_general_dilated(
        x,
        w,
        window_strides=(2, 2),
        padding=((1, 1), (1, 1)),
        feature_group_count=groups,
        dimension_numbers=("NCHW", "OIHW", "NCHW"),
    )
    mean = jnp.mean(y, axis=(0, 2, 3), keepdims=True)
    var = jnp.var(y, axis=(0, 2, 3), keepdims=True)  # biased, as in torch train mode
    C = y.shape[1]
    g = gamma.reshape(1, C, 1, 1)
    b = beta.reshape(1, C, 1, 1)
    return jnp.maximum((y - mean) * g * lax.rsqrt(var + eps) + b, 0.0)


if __name__ == "__main__":
    # Small analog of the original (1, 2520, 14, 14), groups=15:
    # keep groups=15 and 14x14 spatial, shrink channels-per-group 168 -> 8.
    N, groups, Ci_per_group, H, W = 2, 15, 8, 14, 14
    C = groups * Ci_per_group  # 120 in and out channels

    key = jax.random.PRNGKey(0)
    kx, kw, kg, kb = jax.random.split(key, 4)
    x = jax.random.normal(kx, (N, C, H, W), dtype=jnp.float32)
    w = 0.1 * jax.random.normal(kw, (C, Ci_per_group, 3, 3), dtype=jnp.float32)
    gamma = 1.0 + 0.1 * jax.random.normal(kg, (C,), dtype=jnp.float32)
    beta = 0.1 * jax.random.normal(kb, (C,), dtype=jnp.float32)

    out = conv_bn_relu(x, w, gamma, beta, groups=groups)
    out = jax.block_until_ready(out)

    ref = jax.block_until_ready(_reference(x, w, gamma, beta, groups=groups))
    assert out.shape == ref.shape == (N, C, 7, 7), (out.shape, ref.shape)
    max_err = float(jnp.max(jnp.abs(out - ref)))
    # bf16 MXU operands with f32 accumulation / f32 BN statistics.
    assert jnp.allclose(out, ref, atol=3e-2, rtol=3e-2), f"max_err={max_err}"

    print("KERNEL_OK")
</pallas_src>

<mosaic_0001>
module attributes {stable_mosaic.version = 11 : i64} {
  func.func @_fused_conv_bn_relu_kernel(%arg0: i32, %arg1: memref<15x98x72xbf16, #tpu.memory_space<vmem>>, %arg2: memref<15x72x8xbf16, #tpu.memory_space<vmem>>, %arg3: memref<15x1x8xf32, #tpu.memory_space<vmem>>, %arg4: memref<15x1x8xf32, #tpu.memory_space<vmem>>, %arg5: memref<1x98x120xf32, #tpu.memory_space<vmem>>) attributes {dimension_semantics = [#tpu.dimension_semantics<parallel>], iteration_bounds = array<i64: 1>, scalar_prefetch = 0 : i64, scratch_operands = 0 : i64, tpu.core_type = #tpu.core_type<tc>, window_params = [{transform_indices = @transform_0, window_bounds = array<i64: 15, 98, 72>}, {transform_indices = @transform_1, window_bounds = array<i64: 15, 72, 8>}, {transform_indices = @transform_2, window_bounds = array<i64: 15, 1, 8>}, {transform_indices = @transform_3, window_bounds = array<i64: 15, 1, 8>}, {transform_indices = @transform_4, window_bounds = array<i64: 1, 98, 120>}]} {
    %c0 = arith.constant 0 : index
    %c0_0 = arith.constant 0 : index
    %c0_1 = arith.constant 0 : index
    %0 = vector.load %arg1[%c0, %c0_0, %c0_1] : memref<15x98x72xbf16, #tpu.memory_space<vmem>>, vector<1x98x72xbf16>
    %1 = vector.shape_cast %0 : vector<1x98x72xbf16> to vector<98x72xbf16>
    %c0_2 = arith.constant 0 : index
    %c0_3 = arith.constant 0 : index
    %c0_4 = arith.constant 0 : index
    %2 = vector.load %arg2[%c0_2, %c0_3, %c0_4] : memref<15x72x8xbf16, #tpu.memory_space<vmem>>, vector<1x72x8xbf16>
    %3 = vector.shape_cast %2 : vector<1x72x8xbf16> to vector<72x8xbf16>
    %cst = arith.constant dense<0.000000e+00> : vector<98x8xf32>
    %4 = tpu.matmul %1, %3, %cst {dimension_numbers = #tpu.dot_dimension_numbers<[1], [0], [0], [1], [0, 0, 1, 1], [], []>} : vector<98x72xbf16>, vector<72x8xbf16>, vector<98x8xf32> -> vector<98x8xf32>
    %cst_5 = arith.constant dense<0.000000e+00> : vector<8xf32>
    %5 = vector.multi_reduction <add>, %4, %cst_5 [0] : vector<98x8xf32> to vector<8xf32>
    %6 = vector.shape_cast %5 : vector<8xf32> to vector<1x8xf32>
    %cst_6 = arith.constant 0.0102040814 : f32
    %7 = vector.broadcast %cst_6 : f32 to vector<1x8xf32>
    %8 = arith.mulf %6, %7 : vector<1x8xf32>
    %9 = vector.broadcast %8 : vector<1x8xf32> to vector<98x8xf32>
    %10 = arith.subf %4, %9 : vector<98x8xf32>
    %11 = arith.mulf %10, %10 : vector<98x8xf32>
    %cst_7 = arith.constant dense<0.000000e+00> : vector<8xf32>
    %12 = vector.multi_reduction <add>, %11, %cst_7 [0] : vector<98x8xf32> to vector<8xf32>
    %13 = vector.shape_cast %12 : vector<8xf32> to vector<1x8xf32>
    %cst_8 = arith.constant 0.0102040814 : f32
    %14 = vector.broadcast %cst_8 : f32 to vector<1x8xf32>
    %15 = arith.mulf %13, %14 : vector<1x8xf32>
    %c0_9 = arith.constant 0 : index
    %c0_10 = arith.constant 0 : index
    %c0_11 = arith.constant 0 : index
    %16 = vector.load %arg3[%c0_9, %c0_10, %c0_11] : memref<15x1x8xf32, #tpu.memory_space<vmem>>, vector<1x1x8xf32>
    %17 = vector.shape_cast %16 : vector<1x1x8xf32> to vector<1x8xf32>
    %cst_12 = arith.constant 9.99999974E-6 : f32
    %18 = vector.broadcast %cst_12 : f32 to vector<1x8xf32>
    %19 = arith.addf %15, %18 : vector<1x8xf32>
    %20 = math.rsqrt %19 : vector<1x8xf32>
    %21 = arith.mulf %17, %20 : vector<1x8xf32>
    %22 = vector.broadcast %21 : vector<1x8xf32> to vector<98x8xf32>
    %23 = arith.mulf %10, %22 : vector<98x8xf32>
    %c0_13 = arith.constant 0 : index
    %c0_14 = arith.constant 0 : index
    %c0_15 = arith.constant 0 : index
    %24 = vector.load %arg4[%c0_13, %c0_14, %c0_15] : memref<15x1x8xf32, #tpu.memory_space<vmem>>, vector<1x1x8xf32>
    %25 = vector.shape_cast %24 : vector<1x1x8xf32> to vector<1x8xf32>
    %26 = vector.broadcast %25 : vector<1x8xf32> to vector<98x8xf32>
    %27 = arith.addf %23, %26 : vector<98x8xf32>
    %cst_16 = arith.constant 0.000000e+00 : f32
    %28 = vector.broadcast %cst_16 : f32 to vector<98x8xf32>
    %29 = arith.maximumf %27, %28 : vector<98x8xf32>
    %c1 = arith.constant 1 : index
    %c0_17 = arith.constant 0 : index
    %c0_18 = arith.constant 0 : index
    %30 = vector.load %arg1[%c1, %c0_17, %c0_18] : memref<15x98x72xbf16, #tpu.memory_space<vmem>>, vector<1x98x72xbf16>
    %31 = vector.shape_cast %30 : vector<1x98x72xbf16> to vector<98x72xbf16>
    %c1_19 = arith.constant 1 : index
    %c0_20 = arith.constant 0 : index
    %c0_21 = arith.constant 0 : index
    %32 = vector.load %arg2[%c1_19, %c0_20, %c0_21] : memref<15x72x8xbf16, #tpu.memory_space<vmem>>, vector<1x72x8xbf16>
    %33 = vector.shape_cast %32 : vector<1x72x8xbf16> to vector<72x8xbf16>
    %cst_22 = arith.constant dense<0.000000e+00> : vector<98x8xf32>
    %34 = tpu.matmul %31, %33, %cst_22 {dimension_numbers = #tpu.dot_dimension_numbers<[1], [0], [0], [1], [0, 0, 1, 1], [], []>} : vector<98x72xbf16>, vector<72x8xbf16>, vector<98x8xf32> -> vector<98x8xf32>
    %cst_23 = arith.constant dense<0.000000e+00> : vector<8xf32>
    %35 = vector.multi_reduction <add>, %34, %cst_23 [0] : vector<98x8xf32> to vector<8xf32>
    %36 = vector.shape_cast %35 : vector<8xf32> to vector<1x8xf32>
    %cst_24 = arith.constant 0.0102040814 : f32
    %37 = vector.broadcast %cst_24 : f32 to vector<1x8xf32>
    %38 = arith.mulf %36, %37 : vector<1x8xf32>
    %39 = vector.broadcast %38 : vector<1x8xf32> to vector<98x8xf32>
    %40 = arith.subf %34, %39 : vector<98x8xf32>
    %41 = arith.mulf %40, %40 : vector<98x8xf32>
    %cst_25 = arith.constant dense<0.000000e+00> : vector<8xf32>
    %42 = vector.multi_reduction <add>, %41, %cst_25 [0] : vector<98x8xf32> to vector<8xf32>
    %43 = vector.shape_cast %42 : vector<8xf32> to vector<1x8xf32>
    %cst_26 = arith.constant 0.0102040814 : f32
    %44 = vector.broadcast %cst_26 : f32 to vector<1x8xf32>
    %45 = arith.mulf %43, %44 : vector<1x8xf32>
    %c1_27 = arith.constant 1 : index
    %c0_28 = arith.constant 0 : index
    %c0_29 = arith.constant 0 : index
    %46 = vector.load %arg3[%c1_27, %c0_28, %c0_29] : memref<15x1x8xf32, #tpu.memory_space<vmem>>, vector<1x1x8xf32>
    %47 = vector.shape_cast %46 : vector<1x1x8xf32> to vector<1x8xf32>
    %cst_30 = arith.constant 9.99999974E-6 : f32
    %48 = vector.broadcast %cst_30 : f32 to vector<1x8xf32>
    %49 = arith.addf %45, %48 : vector<1x8xf32>
    %50 = math.rsqrt %49 : vector<1x8xf32>
    %51 = arith.mulf %47, %50 : vector<1x8xf32>
    %52 = vector.broadcast %51 : vector<1x8xf32> to vector<98x8xf32>
    %53 = arith.mulf %40, %52 : vector<98x8xf32>
    %c1_31 = arith.constant 1 : index
    %c0_32 = arith.constant 0 : index
    %c0_33 = arith.constant 0 : index
    %54 = vector.load %arg4[%c1_31, %c0_32, %c0_33] : memref<15x1x8xf32, #tpu.memory_space<vmem>>, vector<1x1x8xf32>
    %55 = vector.shape_cast %54 : vector<1x1x8xf32> to vector<1x8xf32>
    %56 = vector.broadcast %55 : vector<1x8xf32> to vector<98x8xf32>
    %57 = arith.addf %53, %56 : vector<98x8xf32>
    %cst_34 = arith.constant 0.000000e+00 : f32
    %58 = vector.broadcast %cst_34 : f32 to vector<98x8xf32>
    %59 = arith.maximumf %57, %58 : vector<98x8xf32>
    %c2 = arith.constant 2 : index
    %c0_35 = arith.constant 0 : index
    %c0_36 = arith.constant 0 : index
    %60 = vector.load %arg1[%c2, %c0_35, %c0_36] : memref<15x98x72xbf16, #tpu.memory_space<vmem>>, vector<1x98x72xbf16>
    %61 = vector.shape_cast %60 : vector<1x98x72xbf16> to vector<98x72xbf16>
    %c2_37 = arith.constant 2 : index
    %c0_38 = arith.constant 0 : index
    %c0_39 = arith.constant 0 : index
    %62 = vector.load %arg2[%c2_37, %c0_38, %c0_39] : memref<15x72x8xbf16, #tpu.memory_space<vmem>>, vector<1x72x8xbf16>
    %63 = vector.shape_cast %62 : vector<1x72x8xbf16> to vector<72x8xbf16>
    %cst_40 = arith.constant dense<0.000000e+00> : vector<98x8xf32>
    %64 = tpu.matmul %61, %63, %cst_40 {dimension_numbers = #tpu.dot_dimension_numbers<[1], [0], [0], [1], [0, 0, 1, 1], [], []>} : vector<98x72xbf16>, vector<72x8xbf16>, vector<98x8xf32> -> vector<98x8xf32>
    %cst_41 = arith.constant dense<0.000000e+00> : vector<8xf32>
    %65 = vector.multi_reduction <add>, %64, %cst_41 [0] : vector<98x8xf32> to vector<8xf32>
    %66 = vector.shape_cast %65 : vector<8xf32> to vector<1x8xf32>
    %cst_42 = arith.constant 0.0102040814 : f32
    %67 = vector.broadcast %cst_42 : f32 to vector<1x8xf32>
    %68 = arith.mulf %66, %67 : vector<1x8xf32>
    %69 = vector.broadcast %68 : vector<1x8xf32> to vector<98x8xf32>
    %70 = arith.subf %64, %69 : vector<98x8xf32>
    %71 = arith.mulf %70, %70 : vector<98x8xf32>
    %cst_43 = arith.constant dense<0.000000e+00> : vector<8xf32>
    %72 = vector.multi_reduction <add>, %71, %cst_43 [0] : vector<98x8xf32> to vector<8xf32>
    %73 = vector.shape_cast %72 : vector<8xf32> to vector<1x8xf32>
    %cst_44 = arith.constant 0.0102040814 : f32
    %74 = vector.broadcast %cst_44 : f32 to vector<1x8xf32>
    %75 = arith.mulf %73, %74 : vector<1x8xf32>
    %c2_45 = arith.constant 2 : index
    %c0_46 = arith.constant 0 : index
    %c0_47 = arith.constant 0 : index
    %76 = vector.load %arg3[%c2_45, %c0_46, %c0_47] : memref<15x1x8xf32, #tpu.memory_space<vmem>>, vector<1x1x8xf32>
    %77 = vector.shape_cast %76 : vector<1x1x8xf32> to vector<1x8xf32>
    %cst_48 = arith.constant 9.99999974E-6 : f32
    %78 = vector.broadcast %cst_48 : f32 to vector<1x8xf32>
    %79 = arith.addf %75, %78 : vector<1x8xf32>
    %80 = math.rsqrt %79 : vector<1x8xf32>
    %81 = arith.mulf %77, %80 : vector<1x8xf32>
    %82 = vector.broadcast %81 : vector<1x8xf32> to vector<98x8xf32>
    %83 = arith.mulf %70, %82 : vector<98x8xf32>
    %c2_49 = arith.constant 2 : index
    %c0_50 = arith.constant 0 : index
    %c0_51 = arith.constant 0 : index
    %84 = vector.load %arg4[%c2_49, %c0_50, %c0_51] : memref<15x1x8xf32, #tpu.memory_space<vmem>>, vector<1x1x8xf32>
    %85 = vector.shape_cast %84 : vector<1x1x8xf32> to vector<1x8xf32>
    %86 = vector.broadcast %85 : vector<1x8xf32> to vector<98x8xf32>
    %87 = arith.addf %83, %86 : vector<98x8xf32>
    %cst_52 = arith.constant 0.000000e+00 : f32
    %88 = vector.broadcast %cst_52 : f32 to vector<98x8xf32>
    %89 = arith.maximumf %87, %88 : vector<98x8xf32>
    %c3 = arith.constant 3 : index
    %c0_53 = arith.constant 0 : index
    %c0_54 = arith.constant 0 : index
    %90 = vector.load %arg1[%c3, %c0_53, %c0_54] : memref<15x98x72xbf16, #tpu.memory_space<vmem>>, vector<1x98x72xbf16>
    %91 = vector.shape_cast %90 : vector<1x98x72xbf16> to vector<98x72xbf16>
    %c3_55 = arith.constant 3 : index
    %c0_56 = arith.constant 0 : index
    %c0_57 = arith.constant 0 : index
    %92 = vector.load %arg2[%c3_55, %c0_56, %c0_57] : memref<15x72x8xbf16, #tpu.memory_space<vmem>>, vector<1x72x8xbf16>
    %93 = vector.shape_cast %92 : vector<1x72x8xbf16> to vector<72x8xbf16>
    %cst_58 = arith.constant dense<0.000000e+00> : vector<98x8xf32>
    %94 = tpu.matmul %91, %93, %cst_58 {dimension_numbers = #tpu.dot_dimension_numbers<[1], [0], [0], [1], [0, 0, 1, 1], [], []>} : vector<98x72xbf16>, vector<72x8xbf16>, vector<98x8xf32> -> vector<98x8xf32>
    %cst_59 = arith.constant dense<0.000000e+00> : vector<8xf32>
    %95 = vector.multi_reduction <add>, %94, %cst_59 [0] : vector<98x8xf32> to vector<8xf32>
    %96 = vector.shape_cast %95 : vector<8xf32> to vector<1x8xf32>
    %cst_60 = arith.constant 0.0102040814 : f32
    %97 = vector.broadcast %cst_60 : f32 to vector<1x8xf32>
    %98 = arith.mulf %96, %97 : vector<1x8xf32>
    %99 = vector.broadcast %98 : vector<1x8xf32> to vector<98x8xf32>
    %100 = arith.subf %94, %99 : vector<98x8xf32>
    %101 = arith.mulf %100, %100 : vector<98x8xf32>
    %cst_61 = arith.constant dense<0.000000e+00> : vector<8xf32>
    %102 = vector.multi_reduction <add>, %101, %cst_61 [0] : vector<98x8xf32> to vector<8xf32>
    %103 = vector.shape_cast %102 : vector<8xf32> to vector<1x8xf32>
    %cst_62 = arith.constant 0.0102040814 : f32
    %104 = vector.broadcast %cst_62 : f32 to vector<1x8xf32>
    %105 = arith.mulf %103, %104 : vector<1x8xf32>
    %c3_63 = arith.constant 3 : index
    %c0_64 = arith.constant 0 : index
    %c0_65 = arith.constant 0 : index
    %106 = vector.load %arg3[%c3_63, %c0_64, %c0_65] : memref<15x1x8xf32, #tpu.memory_space<vmem>>, vector<1x1x8xf32>
    %107 = vector.shape_cast %106 : vector<1x1x8xf32> to vector<1x8xf32>
    %cst_66 = arith.constant 9.99999974E-6 : f32
    %108 = vector.broadcast %cst_66 : f32 to vector<1x8xf32>
    %109 = arith.addf %105, %108 : vector<1x8xf32>
    %110 = math.rsqrt %109 : vector<1x8xf32>
    %111 = arith.mulf %107, %110 : vector<1x8xf32>
    %112 = vector.broadcast %111 : vector<1x8xf32> to vector<98x8xf32>
    %113 = arith.mulf %100, %112 : vector<98x8xf32>
    %c3_67 = arith.constant 3 : index
    %c0_68 = arith.constant 0 : index
    %c0_69 = arith.constant 0 : index
    %114 = vector.load %arg4[%c3_67, %c0_68, %c0_69] : memref<15x1x8xf32, #tpu.memory_space<vmem>>, vector<1x1x8xf32>
    %115 = vector.shape_cast %114 : vector<1x1x8xf32> to vector<1x8xf32>
    %116 = vector.broadcast %115 : vector<1x8xf32> to vector<98x8xf32>
    %117 = arith.addf %113, %116 : vector<98x8xf32>
    %cst_70 = arith.constant 0.000000e+00 : f32
    %118 = vector.broadcast %cst_70 : f32 to vector<98x8xf32>
    %119 = arith.maximumf %117, %118 : vector<98x8xf32>
    %c4 = arith.constant 4 : index
    %c0_71 = arith.constant 0 : index
    %c0_72 = arith.constant 0 : index
    %120 = vector.load %arg1[%c4, %c0_71, %c0_72] : memref<15x98x72xbf16, #tpu.memory_space<vmem>>, vector<1x98x72xbf16>
    %121 = vector.shape_cast %120 : vector<1x98x72xbf16> to vector<98x72xbf16>
    %c4_73 = arith.constant 4 : index
    %c0_74 = arith.constant 0 : index
    %c0_75 = arith.constant 0 : index
    %122 = vector.load %arg2[%c4_73, %c0_74, %c0_75] : memref<15x72x8xbf16, #tpu.memory_space<vmem>>, vector<1x72x8xbf16>
    %123 = vector.shape_cast %122 : vector<1x72x8xbf16> to vector<72x8xbf16>
    %cst_76 = arith.constant dense<0.000000e+00> : vector<98x8xf32>
    %124 = tpu.matmul %121, %123, %cst_76 {dimension_numbers = #tpu.dot_dimension_numbers<[1], [0], [0], [1], [0, 0, 1, 1], [], []>} : vector<98x72xbf16>, vector<72x8xbf16>, vector<98x8xf32> -> vector<98x8xf32>
    %cst_77 = arith.constant dense<0.000000e+00> : vector<8xf32>
    %125 = vector.multi_reduction <add>, %124, %cst_77 [0] : vector<98x8xf32> to vector<8xf32>
    %126 = vector.shape_cast %125 : vector<8xf32> to vector<1x8xf32>
    %cst_78 = arith.constant 0.0102040814 : f32
    %127 = vector.broadcast %cst_78 : f32 to vector<1x8xf32>
    %128 = arith.mulf %126, %127 : vector<1x8xf32>
    %129 = vector.broadcast %128 : vector<1x8xf32> to vector<98x8xf32>
    %130 = arith.subf %124, %129 : vector<98x8xf32>
    %131 = arith.mulf %130, %130 : vector<98x8xf32>
    %cst_79 = arith.constant dense<0.000000e+00> : vector<8xf32>
    %132 = vector.multi_reduction <add>, %131, %cst_79 [0] : vector<98x8xf32> to vector<8xf32>
    %133 = vector.shape_cast %132 : vector<8xf32> to vector<1x8xf32>
    %cst_80 = arith.constant 0.0102040814 : f32
    %134 = vector.broadcast %cst_80 : f32 to vector<1x8xf32>
    %135 = arith.mulf %133, %134 : vector<1x8xf32>
    %c4_81 = arith.constant 4 : index
    %c0_82 = arith.constant 0 : index
    %c0_83 = arith.constant 0 : index
    %136 = vector.load %arg3[%c4_81, %c0_82, %c0_83] : memref<15x1x8xf32, #tpu.memory_space<vmem>>, vector<1x1x8xf32>
    %137 = vector.shape_cast %136 : vector<1x1x8xf32> to vector<1x8xf32>
    %cst_84 = arith.constant 9.99999974E-6 : f32
    %138 = vector.broadcast %cst_84 : f32 to vector<1x8xf32>
    %139 = arith.addf %135, %138 : vector<1x8xf32>
    %140 = math.rsqrt %139 : vector<1x8xf32>
    %141 = arith.mulf %137, %140 : vector<1x8xf32>
    %142 = vector.broadcast %141 : vector<1x8xf32> to vector<98x8xf32>
    %143 = arith.mulf %130, %142 : vector<98x8xf32>
    %c4_85 = arith.constant 4 : index
    %c0_86 = arith.constant 0 : index
    %c0_87 = arith.constant 0 : index
    %144 = vector.load %arg4[%c4_85, %c0_86, %c0_87] : memref<15x1x8xf32, #tpu.memory_space<vmem>>, vector<1x1x8xf32>
    %145 = vector.shape_cast %144 : vector<1x1x8xf32> to vector<1x8xf32>
    %146 = vector.broadcast %145 : vector<1x8xf32> to vector<98x8xf32>
    %147 = arith.addf %143, %146 : vector<98x8xf32>
    %cst_88 = arith.constant 0.000000e+00 : f32
    %148 = vector.broadcast %cst_88 : f32 to vector<98x8xf32>
    %149 = arith.maximumf %147, %148 : vector<98x8xf32>
    %c5 = arith.constant 5 : index
    %c0_89 = arith.constant 0 : index
    %c0_90 = arith.constant 0 : index
    %150 = vector.load %arg1[%c5, %c0_89, %c0_90] : memref<15x98x72xbf16, #tpu.memory_space<vmem>>, vector<1x98x72xbf16>
    %151 = vector.shape_cast %150 : vector<1x98x72xbf16> to vector<98x72xbf16>
    %c5_91 = arith.constant 5 : index
    %c0_92 = arith.constant 0 : index
    %c0_93 = arith.constant 0 : index
    %152 = vector.load %arg2[%c5_91, %c0_92, %c0_93] : memref<15x72x8xbf16, #tpu.memory_space<vmem>>, vector<1x72x8xbf16>
    %153 = vector.shape_cast %152 : vector<1x72x8xbf16> to vector<72x8xbf16>
    %cst_94 = arith.constant dense<0.000000e+00> : vector<98x8xf32>
    %154 = tpu.matmul %151, %153, %cst_94 {dimension_numbers = #tpu.dot_dimension_numbers<[1], [0], [0], [1], [0, 0, 1, 1], [], []>} : vector<98x72xbf16>, vector<72x8xbf16>, vector<98x8xf32> -> vector<98x8xf32>
    %cst_95 = arith.constant dense<0.000000e+00> : vector<8xf32>
    %155 = vector.multi_reduction <add>, %154, %cst_95 [0] : vector<98x8xf32> to vector<8xf32>
    %156 = vector.shape_cast %155 : vector<8xf32> to vector<1x8xf32>
    %cst_96 = arith.constant 0.0102040814 : f32
    %157 = vector.broadcast %cst_96 : f32 to vector<1x8xf32>
    %158 = arith.mulf %156, %157 : vector<1x8xf32>
    %159 = vector.broadcast %158 : vector<1x8xf32> to vector<98x8xf32>
    %160 = arith.subf %154, %159 : vector<98x8xf32>
    %161 = arith.mulf %160, %160 : vector<98x8xf32>
    %cst_97 = arith.constant dense<0.000000e+00> : vector<8xf32>
    %162 = vector.multi_reduction <add>, %161, %cst_97 [0] : vector<98x8xf32> to vector<8xf32>
    %163 = vector.shape_cast %162 : vector<8xf32> to vector<1x8xf32>
    %cst_98 = arith.constant 0.0102040814 : f32
    %164 = vector.broadcast %cst_98 : f32 to vector<1x8xf32>
    %165 = arith.mulf %163, %164 : vector<1x8xf32>
    %c5_99 = arith.constant 5 : index
    %c0_100 = arith.constant 0 : index
    %c0_101 = arith.constant 0 : index
    %166 = vector.load %arg3[%c5_99, %c0_100, %c0_101] : memref<15x1x8xf32, #tpu.memory_space<vmem>>, vector<1x1x8xf32>
    %167 = vector.shape_cast %166 : vector<1x1x8xf32> to vector<1x8xf32>
    %cst_102 = arith.constant 9.99999974E-6 : f32
    %168 = vector.broadcast %cst_102 : f32 to vector<1x8xf32>
    %169 = arith.addf %165, %168 : vector<1x8xf32>
    %170 = math.rsqrt %169 : vector<1x8xf32>
    %171 = arith.mulf %167, %170 : vector<1x8xf32>
    %172 = vector.broadcast %171 : vector<1x8xf32> to vector<98x8xf32>
    %173 = arith.mulf %160, %172 : vector<98x8xf32>
    %c5_103 = arith.constant 5 : index
    %c0_104 = arith.constant 0 : index
    %c0_105 = arith.constant 0 : index
    %174 = vector.load %arg4[%c5_103, %c0_104, %c0_105] : memref<15x1x8xf32, #tpu.memory_space<vmem>>, vector<1x1x8xf32>
    %175 = vector.shape_cast %174 : vector<1x1x8xf32> to vector<1x8xf32>
    %176 = vector.broadcast %175 : vector<1x8xf32> to vector<98x8xf32>
    %177 = arith.addf %173, %176 : vector<98x8xf32>
    %cst_106 = arith.constant 0.000000e+00 : f32
    %178 = vector.broadcast %cst_106 : f32 to vector<98x8xf32>
    %179 = arith.maximumf %177, %178 : vector<98x8xf32>
    %c6 = arith.constant 6 : index
    %c0_107 = arith.constant 0 : index
    %c0_108 = arith.constant 0 : index
    %180 = vector.load %arg1[%c6, %c0_107, %c0_108] : memref<15x98x72xbf16, #tpu.memory_space<vmem>>, vector<1x98x72xbf16>
    %181 = vector.shape_cast %180 : vector<1x98x72xbf16> to vector<98x72xbf16>
    %c6_109 = arith.constant 6 : index
    %c0_110 = arith.constant 0 : index
    %c0_111 = arith.constant 0 : index
    %182 = vector.load %arg2[%c6_109, %c0_110, %c0_111] : memref<15x72x8xbf16, #tpu.memory_space<vmem>>, vector<1x72x8xbf16>
    %183 = vector.shape_cast %182 : vector<1x72x8xbf16> to vector<72x8xbf16>
    %cst_112 = arith.constant dense<0.000000e+00> : vector<98x8xf32>
    %184 = tpu.matmul %181, %183, %cst_112 {dimension_numbers = #tpu.dot_dimension_numbers<[1], [0], [0], [1], [0, 0, 1, 1], [], []>} : vector<98x72xbf16>, vector<72x8xbf16>, vector<98x8xf32> -> vector<98x8xf32>
    %cst_113 = arith.constant dense<0.000000e+00> : vector<8xf32>
    %185 = vector.multi_reduction <add>, %184, %cst_113 [0] : vector<98x8xf32> to vector<8xf32>
    %186 = vector.shape_cast %185 : vector<8xf32> to vector<1x8xf32>
    %cst_114 = arith.constant 0.0102040814 : f32
    %187 = vector.broadcast %cst_114 : f32 to vector<1x8xf32>
    %188 = arith.mulf %186, %187 : vector<1x8xf32>
    %189 = vector.broadcast %188 : vector<1x8xf32> to vector<98x8xf32>
    %190 = arith.subf %184, %189 : vector<98x8xf32>
    %191 = arith.mulf %190, %190 : vector<98x8xf32>
    %cst_115 = arith.constant dense<0.000000e+00> : vector<8xf32>
    %192 = vector.multi_reduction <add>, %191, %cst_115 [0] : vector<98x8xf32> to vector<8xf32>
    %193 = vector.shape_cast %192 : vector<8xf32> to vector<1x8xf32>
    %cst_116 = arith.constant 0.0102040814 : f32
    %194 = vector.broadcast %cst_116 : f32 to vector<1x8xf32>
    %195 = arith.mulf %193, %194 : vector<1x8xf32>
    %c6_117 = arith.constant 6 : index
    %c0_118 = arith.constant 0 : index
    %c0_119 = arith.constant 0 : index
    %196 = vector.load %arg3[%c6_117, %c0_118, %c0_119] : memref<15x1x8xf32, #tpu.memory_space<vmem>>, vector<1x1x8xf32>
    %197 = vector.shape_cast %196 : vector<1x1x8xf32> to vector<1x8xf32>
    %cst_120 = arith.constant 9.99999974E-6 : f32
    %198 = vector.broadcast %cst_120 : f32 to vector<1x8xf32>
    %199 = arith.addf %195, %198 : vector<1x8xf32>
    %200 = math.rsqrt %199 : vector<1x8xf32>
    %201 = arith.mulf %197, %200 : vector<1x8xf32>
    %202 = vector.broadcast %201 : vector<1x8xf32> to vector<98x8xf32>
    %203 = arith.mulf %190, %202 : vector<98x8xf32>
    %c6_121 = arith.constant 6 : index
    %c0_122 = arith.constant 0 : index
    %c0_123 = arith.constant 0 : index
    %204 = vector.load %arg4[%c6_121, %c0_122, %c0_123] : memref<15x1x8xf32, #tpu.memory_space<vmem>>, vector<1x1x8xf32>
    %205 = vector.shape_cast %204 : vector<1x1x8xf32> to vector<1x8xf32>
    %206 = vector.broadcast %205 : vector<1x8xf32> to vector<98x8xf32>
    %207 = arith.addf %203, %206 : vector<98x8xf32>
    %cst_124 = arith.constant 0.000000e+00 : f32
    %208 = vector.broadcast %cst_124 : f32 to vector<98x8xf32>
    %209 = arith.maximumf %207, %208 : vector<98x8xf32>
    %c7 = arith.constant 7 : index
    %c0_125 = arith.constant 0 : index
    %c0_126 = arith.constant 0 : index
    %210 = vector.load %arg1[%c7, %c0_125, %c0_126] : memref<15x98x72xbf16, #tpu.memory_space<vmem>>, vector<1x98x72xbf16>
    %211 = vector.shape_cast %210 : vector<1x98x72xbf16> to vector<98x72xbf16>
    %c7_127 = arith.constant 7 : index
    %c0_128 = arith.constant 0 : index
    %c0_129 = arith.constant 0 : index
    %212 = vector.load %arg2[%c7_127, %c0_128, %c0_129] : memref<15x72x8xbf16, #tpu.memory_space<vmem>>, vector<1x72x8xbf16>
    %213 = vector.shape_cast %212 : vector<1x72x8xbf16> to vector<72x8xbf16>
    %cst_130 = arith.constant dense<0.000000e+00> : vector<98x8xf32>
    %214 = tpu.matmul %211, %213, %cst_130 {dimension_numbers = #tpu.dot_dimension_numbers<[1], [0], [0], [1], [0, 0, 1, 1], [], []>} : vector<98x72xbf16>, vector<72x8xbf16>, vector<98x8xf32> -> vector<98x8xf32>
    %cst_131 = arith.constant dense<0.000000e+00> : vector<8xf32>
    %215 = vector.multi_reduction <add>, %214, %cst_131 [0] : vector<98x8xf32> to vector<8xf32>
    %216 = vector.shape_cast %215 : vector<8xf32> to vector<1x8xf32>
    %cst_132 = arith.constant 0.0102040814 : f32
    %217 = vector.broadcast %cst_132 : f32 to vector<1x8xf32>
    %218 = arith.mulf %216, %217 : vector<1x8xf32>
    %219 = vector.broadcast %218 : vector<1x8xf32> to vector<98x8xf32>
    %220 = arith.subf %214, %219 : vector<98x8xf32>
    %221 = arith.mulf %220, %220 : vector<98x8xf32>
    %cst_133 = arith.constant dense<0.000000e+00> : vector<8xf32>
    %222 = vector.multi_reduction <add>, %221, %cst_133 [0] : vector<98x8xf32> to vector<8xf32>
    %223 = vector.shape_cast %222 : vector<8xf32> to vector<1x8xf32>
    %cst_134 = arith.constant 0.0102040814 : f32
    %224 = vector.broadcast %cst_134 : f32 to vector<1x8xf32>
    %225 = arith.mulf %223, %224 : vector<1x8xf32>
    %c7_135 = arith.constant 7 : index
    %c0_136 = arith.constant 0 : index
    %c0_137 = arith.constant 0 : index
    %226 = vector.load %arg3[%c7_135, %c0_136, %c0_137] : memref<15x1x8xf32, #tpu.memory_space<vmem>>, vector<1x1x8xf32>
    %227 = vector.shape_cast %226 : vector<1x1x8xf32> to vector<1x8xf32>
    %cst_138 = arith.constant 9.99999974E-6 : f32
    %228 = vector.broadcast %cst_138 : f32 to vector<1x8xf32>
    %229 = arith.addf %225, %228 : vector<1x8xf32>
    %230 = math.rsqrt %229 : vector<1x8xf32>
    %231 = arith.mulf %227, %230 : vector<1x8xf32>
    %232 = vector.broadcast %231 : vector<1x8xf32> to vector<98x8xf32>
    %233 = arith.mulf %220, %232 : vector<98x8xf32>
    %c7_139 = arith.constant 7 : index
    %c0_140 = arith.constant 0 : index
    %c0_141 = arith.constant 0 : index
    %234 = vector.load %arg4[%c7_139, %c0_140, %c0_141] : memref<15x1x8xf32, #tpu.memory_space<vmem>>, vector<1x1x8xf32>
    %235 = vector.shape_cast %234 : vector<1x1x8xf32> to vector<1x8xf32>
    %236 = vector.broadcast %235 : vector<1x8xf32> to vector<98x8xf32>
    %237 = arith.addf %233, %236 : vector<98x8xf32>
    %cst_142 = arith.constant 0.000000e+00 : f32
    %238 = vector.broadcast %cst_142 : f32 to vector<98x8xf32>
    %239 = arith.maximumf %237, %238 : vector<98x8xf32>
    %c8 = arith.constant 8 : index
    %c0_143 = arith.constant 0 : index
    %c0_144 = arith.constant 0 : index
    %240 = vector.load %arg1[%c8, %c0_143, %c0_144] : memref<15x98x72xbf16, #tpu.memory_space<vmem>>, vector<1x98x72xbf16>
    %241 = vector.shape_cast %240 : vector<1x98x72xbf16> to vector<98x72xbf16>
    %c8_145 = arith.constant 8 : index
    %c0_146 = arith.constant 0 : index
    %c0_147 = arith.constant 0 : index
    %242 = vector.load %arg2[%c8_145, %c0_146, %c0_147] : memref<15x72x8xbf16, #tpu.memory_space<vmem>>, vector<1x72x8xbf16>
    %243 = vector.shape_cast %242 : vector<1x72x8xbf16> to vector<72x8xbf16>
    %cst_148 = arith.constant dense<0.000000e+00> : vector<98x8xf32>
    %244 = tpu.matmul %241, %243, %cst_148 {dimension_numbers = #tpu.dot_dimension_numbers<[1], [0], [0], [1], [0, 0, 1, 1], [], []>} : vector<98x72xbf16>, vector<72x8xbf16>, vector<98x8xf32> -> vector<98x8xf32>
    %cst_149 = arith.constant dense<0.000000e+00> : vector<8xf32>
    %245 = vector.multi_reduction <add>, %244, %cst_149 [0] : vector<98x8xf32> to vector<8xf32>
    %246 = vector.shape_cast %245 : vector<8xf32> to vector<1x8xf32>
    %cst_150 = arith.constant 0.0102040814 : f32
    %247 = vector.broadcast %cst_150 : f32 to vector<1x8xf32>
    %248 = arith.mulf %246, %247 : vector<1x8xf32>
    %249 = vector.broadcast %248 : vector<1x8xf32> to vector<98x8xf32>
    %250 = arith.subf %244, %249 : vector<98x8xf32>
    %251 = arith.mulf %250, %250 : vector<98x8xf32>
    %cst_151 = arith.constant dense<0.000000e+00> : vector<8xf32>
    %252 = vector.multi_reduction <add>, %251, %cst_151 [0] : vector<98x8xf32> to vector<8xf32>
    %253 = vector.shape_cast %252 : vector<8xf32> to vector<1x8xf32>
    %cst_152 = arith.constant 0.0102040814 : f32
    %254 = vector.broadcast %cst_152 : f32 to vector<1x8xf32>
    %255 = arith.mulf %253, %254 : vector<1x8xf32>
    %c8_153 = arith.constant 8 : index
    %c0_154 = arith.constant 0 : index
    %c0_155 = arith.constant 0 : index
    %256 = vector.load %arg3[%c8_153, %c0_154, %c0_155] : memref<15x1x8xf32, #tpu.memory_space<vmem>>, vector<1x1x8xf32>
    %257 = vector.shape_cast %256 : vector<1x1x8xf32> to vector<1x8xf32>
    %cst_156 = arith.constant 9.99999974E-6 : f32
    %258 = vector.broadcast %cst_156 : f32 to vector<1x8xf32>
    %259 = arith.addf %255, %258 : vector<1x8xf32>
    %260 = math.rsqrt %259 : vector<1x8xf32>
    %261 = arith.mulf %257, %260 : vector<1x8xf32>
    %262 = vector.broadcast %261 : vector<1x8xf32> to vector<98x8xf32>
    %263 = arith.mulf %250, %262 : vector<98x8xf32>
    %c8_157 = arith.constant 8 : index
    %c0_158 = arith.constant 0 : index
    %c0_159 = arith.constant 0 : index
    %264 = vector.load %arg4[%c8_157, %c0_158, %c0_159] : memref<15x1x8xf32, #tpu.memory_space<vmem>>, vector<1x1x8xf32>
    %265 = vector.shape_cast %264 : vector<1x1x8xf32> to vector<1x8xf32>
    %266 = vector.broadcast %265 : vector<1x8xf32> to vector<98x8xf32>
    %267 = arith.addf %263, %266 : vector<98x8xf32>
    %cst_160 = arith.constant 0.000000e+00 : f32
    %268 = vector.broadcast %cst_160 : f32 to vector<98x8xf32>
    %269 = arith.maximumf %267, %268 : vector<98x8xf32>
    %c9 = arith.constant 9 : index
    %c0_161 = arith.constant 0 : index
    %c0_162 = arith.constant 0 : index
    %270 = vector.load %arg1[%c9, %c0_161, %c0_162] : memref<15x98x72xbf16, #tpu.memory_space<vmem>>, vector<1x98x72xbf16>
    %271 = vector.shape_cast %270 : vector<1x98x72xbf16> to vector<98x72xbf16>
    %c9_163 = arith.constant 9 : index
    %c0_164 = arith.constant 0 : index
    %c0_165 = arith.constant 0 : index
    %272 = vector.load %arg2[%c9_163, %c0_164, %c0_165] : memref<15x72x8xbf16, #tpu.memory_space<vmem>>, vector<1x72x8xbf16>
    %273 = vector.shape_cast %272 : vector<1x72x8xbf16> to vector<72x8xbf16>
    %cst_166 = arith.constant dense<0.000000e+00> : vector<98x8xf32>
    %274 = tpu.matmul %271, %273, %cst_166 {dimension_numbers = #tpu.dot_dimension_numbers<[1], [0], [0], [1], [0, 0, 1, 1], [], []>} : vector<98x72xbf16>, vector<72x8xbf16>, vector<98x8xf32> -> vector<98x8xf32>
    %cst_167 = arith.constant dense<0.000000e+00> : vector<8xf32>
    %275 = vector.multi_reduction <add>, %274, %cst_167 [0] : vector<98x8xf32> to vector<8xf32>
    %276 = vector.shape_cast %275 : vector<8xf32> to vector<1x8xf32>
    %cst_168 = arith.constant 0.0102040814 : f32
    %277 = vector.broadcast %cst_168 : f32 to vector<1x8xf32>
    %278 = arith.mulf %276, %277 : vector<1x8xf32>
    %279 = vector.broadcast %278 : vector<1x8xf32> to vector<98x8xf32>
    %280 = arith.subf %274, %279 : vector<98x8xf32>
    %281 = arith.mulf %280, %280 : vector<98x8xf32>
    %cst_169 = arith.constant dense<0.000000e+00> : vector<8xf32>
    %282 = vector.multi_reduction <add>, %281, %cst_169 [0] : vector<98x8xf32> to vector<8xf32>
    %283 = vector.shape_cast %282 : vector<8xf32> to vector<1x8xf32>
    %cst_170 = arith.constant 0.0102040814 : f32
    %284 = vector.broadcast %cst_170 : f32 to vector<1x8xf32>
    %285 = arith.mulf %283, %284 : vector<1x8xf32>
    %c9_171 = arith.constant 9 : index
    %c0_172 = arith.constant 0 : index
    %c0_173 = arith.constant 0 : index
    %286 = vector.load %arg3[%c9_171, %c0_172, %c0_173] : memref<15x1x8xf32, #tpu.memory_space<vmem>>, vector<1x1x8xf32>
    %287 = vector.shape_cast %286 : vector<1x1x8xf32> to vector<1x8xf32>
    %cst_174 = arith.constant 9.99999974E-6 : f32
    %288 = vector.broadcast %cst_174 : f32 to vector<1x8xf32>
    %289 = arith.addf %285, %288 : vector<1x8xf32>
    %290 = math.rsqrt %289 : vector<1x8xf32>
    %291 = arith.mulf %287, %290 : vector<1x8xf32>
    %292 = vector.broadcast %291 : vector<1x8xf32> to vector<98x8xf32>
    %293 = arith.mulf %280, %292 : vector<98x8xf32>
    %c9_175 = arith.constant 9 : index
    %c0_176 = arith.constant 0 : index
    %c0_177 = arith.constant 0 : index
    %294 = vector.load %arg4[%c9_175, %c0_176, %c0_177] : memref<15x1x8xf32, #tpu.memory_space<vmem>>, vector<1x1x8xf32>
    %295 = vector.shape_cast %294 : vector<1x1x8xf32> to vector<1x8xf32>
    %296 = vector.broadcast %295 : vector<1x8xf32> to vector<98x8xf32>
    %297 = arith.addf %293, %296 : vector<98x8xf32>
    %cst_178 = arith.constant 0.000000e+00 : f32
    %298 = vector.broadcast %cst_178 : f32 to vector<98x8xf32>
    %299 = arith.maximumf %297, %298 : vector<98x8xf32>
    %c10 = arith.constant 10 : index
    %c0_179 = arith.constant 0 : index
    %c0_180 = arith.constant 0 : index
    %300 = vector.load %arg1[%c10, %c0_179, %c0_180] : memref<15x98x72xbf16, #tpu.memory_space<vmem>>, vector<1x98x72xbf16>
    %301 = vector.shape_cast %300 : vector<1x98x72xbf16> to vector<98x72xbf16>
    %c10_181 = arith.constant 10 : index
    %c0_182 = arith.constant 0 : index
    %c0_183 = arith.constant 0 : index
    %302 = vector.load %arg2[%c10_181, %c0_182, %c0_183] : memref<15x72x8xbf16, #tpu.memory_space<vmem>>, vector<1x72x8xbf16>
    %303 = vector.shape_cast %302 : vector<1x72x8xbf16> to vector<72x8xbf16>
    %cst_184 = arith.constant dense<0.000000e+00> : vector<98x8xf32>
    %304 = tpu.matmul %301, %303, %cst_184 {dimension_numbers = #tpu.dot_dimension_numbers<[1], [0], [0], [1], [0, 0, 1, 1], [], []>} : vector<98x72xbf16>, vector<72x8xbf16>, vector<98x8xf32> -> vector<98x8xf32>
    %cst_185 = arith.constant dense<0.000000e+00> : vector<8xf32>
    %305 = vector.multi_reduction <add>, %304, %cst_185 [0] : vector<98x8xf32> to vector<8xf32>
    %306 = vector.shape_cast %305 : vector<8xf32> to vector<1x8xf32>
    %cst_186 = arith.constant 0.0102040814 : f32
    %307 = vector.broadcast %cst_186 : f32 to vector<1x8xf32>
    %308 = arith.mulf %306, %307 : vector<1x8xf32>
    %309 = vector.broadcast %308 : vector<1x8xf32> to vector<98x8xf32>
    %310 = arith.subf %304, %309 : vector<98x8xf32>
    %311 = arith.mulf %310, %310 : vector<98x8xf32>
    %cst_187 = arith.constant dense<0.000000e+00> : vector<8xf32>
    %312 = vector.multi_reduction <add>, %311, %cst_187 [0] : vector<98x8xf32> to vector<8xf32>
    %313 = vector.shape_cast %312 : vector<8xf32> to vector<1x8xf32>
    %cst_188 = arith.constant 0.0102040814 : f32
    %314 = vector.broadcast %cst_188 : f32 to vector<1x8xf32>
    %315 = arith.mulf %313, %314 : vector<1x8xf32>
    %c10_189 = arith.constant 10 : index
    %c0_190 = arith.constant 0 : index
    %c0_191 = arith.constant 0 : index
    %316 = vector.load %arg3[%c10_189, %c0_190, %c0_191] : memref<15x1x8xf32, #tpu.memory_space<vmem>>, vector<1x1x8xf32>
    %317 = vector.shape_cast %316 : vector<1x1x8xf32> to vector<1x8xf32>
    %cst_192 = arith.constant 9.99999974E-6 : f32
    %318 = vector.broadcast %cst_192 : f32 to vector<1x8xf32>
    %319 = arith.addf %315, %318 : vector<1x8xf32>
    %320 = math.rsqrt %319 : vector<1x8xf32>
    %321 = arith.mulf %317, %320 : vector<1x8xf32>
    %322 = vector.broadcast %321 : vector<1x8xf32> to vector<98x8xf32>
    %323 = arith.mulf %310, %322 : vector<98x8xf32>
    %c10_193 = arith.constant 10 : index
    %c0_194 = arith.constant 0 : index
    %c0_195 = arith.constant 0 : index
    %324 = vector.load %arg4[%c10_193, %c0_194, %c0_195] : memref<15x1x8xf32, #tpu.memory_space<vmem>>, vector<1x1x8xf32>
    %325 = vector.shape_cast %324 : vector<1x1x8xf32> to vector<1x8xf32>
    %326 = vector.broadcast %325 : vector<1x8xf32> to vector<98x8xf32>
    %327 = arith.addf %323, %326 : vector<98x8xf32>
    %cst_196 = arith.constant 0.000000e+00 : f32
    %328 = vector.broadcast %cst_196 : f32 to vector<98x8xf32>
    %329 = arith.maximumf %327, %328 : vector<98x8xf32>
    %c11 = arith.constant 11 : index
    %c0_197 = arith.constant 0 : index
    %c0_198 = arith.constant 0 : index
    %330 = vector.load %arg1[%c11, %c0_197, %c0_198] : memref<15x98x72xbf16, #tpu.memory_space<vmem>>, vector<1x98x72xbf16>
    %331 = vector.shape_cast %330 : vector<1x98x72xbf16> to vector<98x72xbf16>
    %c11_199 = arith.constant 11 : index
    %c0_200 = arith.constant 0 : index
    %c0_201 = arith.constant 0 : index
    %332 = vector.load %arg2[%c11_199, %c0_200, %c0_201] : memref<15x72x8xbf16, #tpu.memory_space<vmem>>, vector<1x72x8xbf16>
    %333 = vector.shape_cast %332 : vector<1x72x8xbf16> to vector<72x8xbf16>
    %cst_202 = arith.constant dense<0.000000e+00> : vector<98x8xf32>
    %334 = tpu.matmul %331, %333, %cst_202 {dimension_numbers = #tpu.dot_dimension_numbers<[1], [0], [0], [1], [0, 0, 1, 1], [], []>} : vector<98x72xbf16>, vector<72x8xbf16>, vector<98x8xf32> -> vector<98x8xf32>
    %cst_203 = arith.constant dense<0.000000e+00> : vector<8xf32>
    %335 = vector.multi_reduction <add>, %334, %cst_203 [0] : vector<98x8xf32> to vector<8xf32>
    %336 = vector.shape_cast %335 : vector<8xf32> to vector<1x8xf32>
    %cst_204 = arith.constant 0.0102040814 : f32
    %337 = vector.broadcast %cst_204 : f32 to vector<1x8xf32>
    %338 = arith.mulf %336, %337 : vector<1x8xf32>
    %339 = vector.broadcast %338 : vector<1x8xf32> to vector<98x8xf32>
    %340 = arith.subf %334, %339 : vector<98x8xf32>
    %341 = arith.mulf %340, %340 : vector<98x8xf32>
    %cst_205 = arith.constant dense<0.000000e+00> : vector<8xf32>
    %342 = vector.multi_reduction <add>, %341, %cst_205 [0] : vector<98x8xf32> to vector<8xf32>
    %343 = vector.shape_cast %342 : vector<8xf32> to vector<1x8xf32>
    %cst_206 = arith.constant 0.0102040814 : f32
    %344 = vector.broadcast %cst_206 : f32 to vector<1x8xf32>
    %345 = arith.mulf %343, %344 : vector<1x8xf32>
    %c11_207 = arith.constant 11 : index
    %c0_208 = arith.constant 0 : index
    %c0_209 = arith.constant 0 : index
    %346 = vector.load %arg3[%c11_207, %c0_208, %c0_209] : memref<15x1x8xf32, #tpu.memory_space<vmem>>, vector<1x1x8xf32>
    %347 = vector.shape_cast %346 : vector<1x1x8xf32> to vector<1x8xf32>
    %cst_210 = arith.constant 9.99999974E-6 : f32
    %348 = vector.broadcast %cst_210 : f32 to vector<1x8xf32>
    %349 = arith.addf %345, %348 : vector<1x8xf32>
    %350 = math.rsqrt %349 : vector<1x8xf32>
    %351 = arith.mulf %347, %350 : vector<1x8xf32>
    %352 = vector.broadcast %351 : vector<1x8xf32> to vector<98x8xf32>
    %353 = arith.mulf %340, %352 : vector<98x8xf32>
    %c11_211 = arith.constant 11 : index
    %c0_212 = arith.constant 0 : index
    %c0_213 = arith.constant 0 : index
    %354 = vector.load %arg4[%c11_211, %c0_212, %c0_213] : memref<15x1x8xf32, #tpu.memory_space<vmem>>, vector<1x1x8xf32>
    %355 = vector.shape_cast %354 : vector<1x1x8xf32> to vector<1x8xf32>
    %356 = vector.broadcast %355 : vector<1x8xf32> to vector<98x8xf32>
    %357 = arith.addf %353, %356 : vector<98x8xf32>
    %cst_214 = arith.constant 0.000000e+00 : f32
    %358 = vector.broadcast %cst_214 : f32 to vector<98x8xf32>
    %359 = arith.maximumf %357, %358 : vector<98x8xf32>
    %c12 = arith.constant 12 : index
    %c0_215 = arith.constant 0 : index
    %c0_216 = arith.constant 0 : index
    %360 = vector.load %arg1[%c12, %c0_215, %c0_216] : memref<15x98x72xbf16, #tpu.memory_space<vmem>>, vector<1x98x72xbf16>
    %361 = vector.shape_cast %360 : vector<1x98x72xbf16> to vector<98x72xbf16>
    %c12_217 = arith.constant 12 : index
    %c0_218 = arith.constant 0 : index
    %c0_219 = arith.constant 0 : index
    %362 = vector.load %arg2[%c12_217, %c0_218, %c0_219] : memref<15x72x8xbf16, #tpu.memory_space<vmem>>, vector<1x72x8xbf16>
    %363 = vector.shape_cast %362 : vector<1x72x8xbf16> to vector<72x8xbf16>
    %cst_220 = arith.constant dense<0.000000e+00> : vector<98x8xf32>
    %364 = tpu.matmul %361, %363, %cst_220 {dimension_numbers = #tpu.dot_dimension_numbers<[1], [0], [0], [1], [0, 0, 1, 1], [], []>} : vector<98x72xbf16>, vector<72x8xbf16>, vector<98x8xf32> -> vector<98x8xf32>
    %cst_221 = arith.constant dense<0.000000e+00> : vector<8xf32>
    %365 = vector.multi_reduction <add>, %364, %cst_221 [0] : vector<98x8xf32> to vector<8xf32>
    %366 = vector.shape_cast %365 : vector<8xf32> to vector<1x8xf32>
    %cst_222 = arith.constant 0.0102040814 : f32
    %367 = vector.broadcast %cst_222 : f32 to vector<1x8xf32>
    %368 = arith.mulf %366, %367 : vector<1x8xf32>
    %369 = vector.broadcast %368 : vector<1x8xf32> to vector<98x8xf32>
    %370 = arith.subf %364, %369 : vector<98x8xf32>
    %371 = arith.mulf %370, %370 : vector<98x8xf32>
    %cst_223 = arith.constant dense<0.000000e+00> : vector<8xf32>
    %372 = vector.multi_reduction <add>, %371, %cst_223 [0] : vector<98x8xf32> to vector<8xf32>
    %373 = vector.shape_cast %372 : vector<8xf32> to vector<1x8xf32>
    %cst_224 = arith.constant 0.0102040814 : f32
    %374 = vector.broadcast %cst_224 : f32 to vector<1x8xf32>
    %375 = arith.mulf %373, %374 : vector<1x8xf32>
    %c12_225 = arith.constant 12 : index
    %c0_226 = arith.constant 0 : index
    %c0_227 = arith.constant 0 : index
    %376 = vector.load %arg3[%c12_225, %c0_226, %c0_227] : memref<15x1x8xf32, #tpu.memory_space<vmem>>, vector<1x1x8xf32>
    %377 = vector.shape_cast %376 : vector<1x1x8xf32> to vector<1x8xf32>
    %cst_228 = arith.constant 9.99999974E-6 : f32
    %378 = vector.broadcast %cst_228 : f32 to vector<1x8xf32>
    %379 = arith.addf %375, %378 : vector<1x8xf32>
    %380 = math.rsqrt %379 : vector<1x8xf32>
    %381 = arith.mulf %377, %380 : vector<1x8xf32>
    %382 = vector.broadcast %381 : vector<1x8xf32> to vector<98x8xf32>
    %383 = arith.mulf %370, %382 : vector<98x8xf32>
    %c12_229 = arith.constant 12 : index
    %c0_230 = arith.constant 0 : index
    %c0_231 = arith.constant 0 : index
    %384 = vector.load %arg4[%c12_229, %c0_230, %c0_231] : memref<15x1x8xf32, #tpu.memory_space<vmem>>, vector<1x1x8xf32>
    %385 = vector.shape_cast %384 : vector<1x1x8xf32> to vector<1x8xf32>
    %386 = vector.broadcast %385 : vector<1x8xf32> to vector<98x8xf32>
    %387 = arith.addf %383, %386 : vector<98x8xf32>
    %cst_232 = arith.constant 0.000000e+00 : f32
    %388 = vector.broadcast %cst_232 : f32 to vector<98x8xf32>
    %389 = arith.maximumf %387, %388 : vector<98x8xf32>
    %c13 = arith.constant 13 : index
    %c0_233 = arith.constant 0 : index
    %c0_234 = arith.constant 0 : index
    %390 = vector.load %arg1[%c13, %c0_233, %c0_234] : memref<15x98x72xbf16, #tpu.memory_space<vmem>>, vector<1x98x72xbf16>
    %391 = vector.shape_cast %390 : vector<1x98x72xbf16> to vector<98x72xbf16>
    %c13_235 = arith.constant 13 : index
    %c0_236 = arith.constant 0 : index
    %c0_237 = arith.constant 0 : index
    %392 = vector.load %arg2[%c13_235, %c0_236, %c0_237] : memref<15x72x8xbf16, #tpu.memory_space<vmem>>, vector<1x72x8xbf16>
    %393 = vector.shape_cast %392 : vector<1x72x8xbf16> to vector<72x8xbf16>
    %cst_238 = arith.constant dense<0.000000e+00> : vector<98x8xf32>
    %394 = tpu.matmul %391, %393, %cst_238 {dimension_numbers = #tpu.dot_dimension_numbers<[1], [0], [0], [1], [0, 0, 1, 1], [], []>} : vector<98x72xbf16>, vector<72x8xbf16>, vector<98x8xf32> -> vector<98x8xf32>
    %cst_239 = arith.constant dense<0.000000e+00> : vector<8xf32>
    %395 = vector.multi_reduction <add>, %394, %cst_239 [0] : vector<98x8xf32> to vector<8xf32>
    %396 = vector.shape_cast %395 : vector<8xf32> to vector<1x8xf32>
    %cst_240 = arith.constant 0.0102040814 : f32
    %397 = vector.broadcast %cst_240 : f32 to vector<1x8xf32>
    %398 = arith.mulf %396, %397 : vector<1x8xf32>
    %399 = vector.broadcast %398 : vector<1x8xf32> to vector<98x8xf32>
    %400 = arith.subf %394, %399 : vector<98x8xf32>
    %401 = arith.mulf %400, %400 : vector<98x8xf32>
    %cst_241 = arith.constant dense<0.000000e+00> : vector<8xf32>
    %402 = vector.multi_reduction <add>, %401, %cst_241 [0] : vector<98x8xf32> to vector<8xf32>
    %403 = vector.shape_cast %402 : vector<8xf32> to vector<1x8xf32>
    %cst_242 = arith.constant 0.0102040814 : f32
    %404 = vector.broadcast %cst_242 : f32 to vector<1x8xf32>
    %405 = arith.mulf %403, %404 : vector<1x8xf32>
    %c13_243 = arith.constant 13 : index
    %c0_244 = arith.constant 0 : index
    %c0_245 = arith.constant 0 : index
    %406 = vector.load %arg3[%c13_243, %c0_244, %c0_245] : memref<15x1x8xf32, #tpu.memory_space<vmem>>, vector<1x1x8xf32>
    %407 = vector.shape_cast %406 : vector<1x1x8xf32> to vector<1x8xf32>
    %cst_246 = arith.constant 9.99999974E-6 : f32
    %408 = vector.broadcast %cst_246 : f32 to vector<1x8xf32>
    %409 = arith.addf %405, %408 : vector<1x8xf32>
    %410 = math.rsqrt %409 : vector<1x8xf32>
    %411 = arith.mulf %407, %410 : vector<1x8xf32>
    %412 = vector.broadcast %411 : vector<1x8xf32> to vector<98x8xf32>
    %413 = arith.mulf %400, %412 : vector<98x8xf32>
    %c13_247 = arith.constant 13 : index
    %c0_248 = arith.constant 0 : index
    %c0_249 = arith.constant 0 : index
    %414 = vector.load %arg4[%c13_247, %c0_248, %c0_249] : memref<15x1x8xf32, #tpu.memory_space<vmem>>, vector<1x1x8xf32>
    %415 = vector.shape_cast %414 : vector<1x1x8xf32> to vector<1x8xf32>
    %416 = vector.broadcast %415 : vector<1x8xf32> to vector<98x8xf32>
    %417 = arith.addf %413, %416 : vector<98x8xf32>
    %cst_250 = arith.constant 0.000000e+00 : f32
    %418 = vector.broadcast %cst_250 : f32 to vector<98x8xf32>
    %419 = arith.maximumf %417, %418 : vector<98x8xf32>
    %c14 = arith.constant 14 : index
    %c0_251 = arith.constant 0 : index
    %c0_252 = arith.constant 0 : index
    %420 = vector.load %arg1[%c14, %c0_251, %c0_252] : memref<15x98x72xbf16, #tpu.memory_space<vmem>>, vector<1x98x72xbf16>
    %421 = vector.shape_cast %420 : vector<1x98x72xbf16> to vector<98x72xbf16>
    %c14_253 = arith.constant 14 : index
    %c0_254 = arith.constant 0 : index
    %c0_255 = arith.constant 0 : index
    %422 = vector.load %arg2[%c14_253, %c0_254, %c0_255] : memref<15x72x8xbf16, #tpu.memory_space<vmem>>, vector<1x72x8xbf16>
    %423 = vector.shape_cast %422 : vector<1x72x8xbf16> to vector<72x8xbf16>
    %cst_256 = arith.constant dense<0.000000e+00> : vector<98x8xf32>
    %424 = tpu.matmul %421, %423, %cst_256 {dimension_numbers = #tpu.dot_dimension_numbers<[1], [0], [0], [1], [0, 0, 1, 1], [], []>} : vector<98x72xbf16>, vector<72x8xbf16>, vector<98x8xf32> -> vector<98x8xf32>
    %cst_257 = arith.constant dense<0.000000e+00> : vector<8xf32>
    %425 = vector.multi_reduction <add>, %424, %cst_257 [0] : vector<98x8xf32> to vector<8xf32>
    %426 = vector.shape_cast %425 : vector<8xf32> to vector<1x8xf32>
    %cst_258 = arith.constant 0.0102040814 : f32
    %427 = vector.broadcast %cst_258 : f32 to vector<1x8xf32>
    %428 = arith.mulf %426, %427 : vector<1x8xf32>
    %429 = vector.broadcast %428 : vector<1x8xf32> to vector<98x8xf32>
    %430 = arith.subf %424, %429 : vector<98x8xf32>
    %431 = arith.mulf %430, %430 : vector<98x8xf32>
    %cst_259 = arith.constant dense<0.000000e+00> : vector<8xf32>
    %432 = vector.multi_reduction <add>, %431, %cst_259 [0] : vector<98x8xf32> to vector<8xf32>
    %433 = vector.shape_cast %432 : vector<8xf32> to vector<1x8xf32>
    %cst_260 = arith.constant 0.0102040814 : f32
    %434 = vector.broadcast %cst_260 : f32 to vector<1x8xf32>
    %435 = arith.mulf %433, %434 : vector<1x8xf32>
    %c14_261 = arith.constant 14 : index
    %c0_262 = arith.constant 0 : index
    %c0_263 = arith.constant 0 : index
    %436 = vector.load %arg3[%c14_261, %c0_262, %c0_263] : memref<15x1x8xf32, #tpu.memory_space<vmem>>, vector<1x1x8xf32>
    %437 = vector.shape_cast %436 : vector<1x1x8xf32> to vector<1x8xf32>
    %cst_264 = arith.constant 9.99999974E-6 : f32
    %438 = vector.broadcast %cst_264 : f32 to vector<1x8xf32>
    %439 = arith.addf %435, %438 : vector<1x8xf32>
    %440 = math.rsqrt %439 : vector<1x8xf32>
    %441 = arith.mulf %437, %440 : vector<1x8xf32>
    %442 = vector.broadcast %441 : vector<1x8xf32> to vector<98x8xf32>
    %443 = arith.mulf %430, %442 : vector<98x8xf32>
    %c14_265 = arith.constant 14 : index
    %c0_266 = arith.constant 0 : index
    %c0_267 = arith.constant 0 : index
    %444 = vector.load %arg4[%c14_265, %c0_266, %c0_267] : memref<15x1x8xf32, #tpu.memory_space<vmem>>, vector<1x1x8xf32>
    %445 = vector.shape_cast %444 : vector<1x1x8xf32> to vector<1x8xf32>
    %446 = vector.broadcast %445 : vector<1x8xf32> to vector<98x8xf32>
    %447 = arith.addf %443, %446 : vector<98x8xf32>
    %cst_268 = arith.constant 0.000000e+00 : f32
    %448 = vector.broadcast %cst_268 : f32 to vector<98x8xf32>
    %449 = arith.maximumf %447, %448 : vector<98x8xf32>
    %450 = tpu.concatenate %29, %59, %89, %119, %149, %179, %209, %239, %269, %299, %329, %359, %389, %419, %449 in 1 : vector<98x8xf32>, vector<98x8xf32>, vector<98x8xf32>, vector<98x8xf32>, vector<98x8xf32>, vector<98x8xf32>, vector<98x8xf32>, vector<98x8xf32>, vector<98x8xf32>, vector<98x8xf32>, vector<98x8xf32>, vector<98x8xf32>, vector<98x8xf32>, vector<98x8xf32>, vector<98x8xf32> -> vector<98x120xf32>
    %c0_269 = arith.constant 0 : index
    %c0_270 = arith.constant 0 : index
    %c0_271 = arith.constant 0 : index
    %451 = vector.load %arg5[%c0_269, %c0_270, %c0_271] : memref<1x98x120xf32, #tpu.memory_space<vmem>>, vector<1x98x120xf32>
    %452 = vector.shape_cast %451 : vector<1x98x120xf32> to vector<98x120xf32>
    %453 = vector.shape_cast %450 : vector<98x120xf32> to vector<1x98x120xf32>
    tpu.vector_store %arg5[%c0_269, %c0_270, %c0_271], %453 {strides = array<i32>} : memref<1x98x120xf32, #tpu.memory_space<vmem>>, vector<1x98x120xf32>,
    return
  }
  func.func @transform_0(%arg0: i32) -> (i32, i32, i32) {
    %c0_i32 = arith.constant 0 : i32
    %c0_i32_0 = arith.constant 0 : i32
    %c0_i32_1 = arith.constant 0 : i32
    return %arg0, %c0_i32, %c0_i32_0 : i32, i32, i32
  }
  func.func @transform_1(%arg0: i32) -> (i32, i32, i32) {
    %c0_i32 = arith.constant 0 : i32
    %c0_i32_0 = arith.constant 0 : i32
    %c0_i32_1 = arith.constant 0 : i32
    return %arg0, %c0_i32, %c0_i32_0 : i32, i32, i32
  }
  func.func @transform_2(%arg0: i32) -> (i32, i32, i32) {
    %c0_i32 = arith.constant 0 : i32
    %c0_i32_0 = arith.constant 0 : i32
    %c0_i32_1 = arith.constant 0 : i32
    return %arg0, %c0_i32, %c0_i32_0 : i32, i32, i32
  }
  func.func @transform_3(%arg0: i32) -> (i32, i32, i32) {
    %c0_i32 = arith.constant 0 : i32
    %c0_i32_0 = arith.constant 0 : i32
    %c0_i32_1 = arith.constant 0 : i32
    return %arg0, %c0_i32, %c0_i32_0 : i32, i32, i32
  }
  func.func @transform_4(%arg0: i32) -> (i32, i32, i32) {
    %c0_i32 = arith.constant 0 : i32
    %c0_i32_0 = arith.constant 0 : i32
    %c0_i32_1 = arith.constant 0 : i32
    return %arg0, %c0_i32, %c0_i32_0 : i32, i32, i32
  }
}

</mosaic_0001>

<bundles_post_ra>
// kernel: tpu_custom_call.1
= control target key start
LH: loop header
LB: loop body
LE: loop exit
PB: predicated region body
PF: predicated region fallthrough
CT: control target
= control target key end

     0   :  { %vm122_vm0 = vcmask 1043456   ;;  %vm100_vm1 = vcmask 588800   ;;  %vm169_vm2 = vcmask 64512   ;;  %vm193_vm3 = vcmask 58368   ;;  %s6754_s17 = smov 8   ;;  %s6755_s29 = smov 16   ;;  %s11708_s1 = inlined_call_operand.vmem [shape: bf16[15,72,8], index: 1, kind: input, shape index: {}]   ;;  %s11709_s0 = inlined_call_operand.vmem [shape: bf16[15,98,72], index: 0, kind: input, shape index: {}]   ;;  %s11710_s3 = inlined_call_operand.vmem [shape: f32[15,1,8], index: 3, kind: input, shape index: {}]   ;;  %s11711_s2 = inlined_call_operand.vmem [shape: f32[15,1,8], index: 2, kind: input, shape index: {}]   ;;  %s11712_s4 = inlined_call_operand.vmem [shape: f32[1,98,120], index: 4, kind: output, shape index: {}]  }
   0x1   :  { %v39_v0 = vld [vmem:[%s11708_s1 + $0x20] sm:$0xf]  ;;  %v5557_v1 = vld [vmem:[%s11708_s1 + $0x44] sm:$0xf]  ;;  %v5628_v2 = vld [vmem:[%s11708_s1 + $0x68] sm:$0xf] }
   0x2   :  { %v90_v3 = vunpack.c.l.b16 %v39_v0  ;;  %v394_v4 = vunpack.c.l.b16 %v5557_v1  ;;  %v696_v5 = vunpack.c.l.b16 %v5628_v2  ;;  %v6539_v12 = vld [vmem:[%s11708_s1 + $0x18] sm:$0xff]  ;;  %v6817_v14 = vld [vmem:[%s11708_s1 + $0x60] sm:$0xff]  ;;  %v6538_v15 = vld [vmem:[%s11708_s1 + $0x10] sm:$0xff]  ;;  %s6756_s7 = smov 32   ;;  %s6758_s11 = smov 40  }
   0x3   :  { %v6549_v13 = vld [vmem:[%s11708_s1 + $0x3c] sm:$0xff]  ;;  %v5699_v16 = vld [vmem:[%s11708_s1 + $0x8c] sm:$0xf]  ;;  %v6548_v17 = vld [vmem:[%s11708_s1 + $0x34] sm:$0xff]  ;;  %s6759_s16 = smov 48   ;;  %s6760_s20 = smov 64  }
   0x4   :  { %v95_v6 = vpack.c.b16 %v90_v3, %v90_v3  ;;  %v399_v7 = vpack.c.b16 %v394_v4, %v394_v4  ;;  %v701_v8 = vpack.c.b16 %v696_v5, %v696_v5  ;;  %v6558_v18 = vld [vmem:[%s11708_s1 + $0x58] sm:$0xff]  ;;  %v998_v19 = vunpack.c.l.b16 %v5699_v16  ;;  %v6537_v20 = vld [vmem:[%s11708_s1 + $0x8] sm:$0xff]  ;;  %v6557_v22 = vld [vmem:[%s11708_s1 + $0x50] sm:$0xff]  ;;  %s6761_s25 = smov 56   ;;  %s6762_s30 = smov 72  }
   0x5   :  { %v6547_v21 = vld [vmem:[%s11708_s1 + $0x2c] sm:$0xff]  ;;  %v6536_v24 = vld [vmem:[%s11708_s1] sm:$0xff]  ;;  %v5841_v33 = vld [vmem:[%s11708_s1 + $0xd4] sm:$0xf]  ;;  %s6763_s9 = smov 80  }
   0x6   :  { %v124_v9 = vsel %vm122_vm0, %v95_v6, 0  ;;  %v426_v10 = vsel %vm122_vm0, %v399_v7, 0  ;;  %v6805_v11 = vsel %vm122_vm0, %v701_v8, 0  ;;  %v1003_v23 = vpack.c.b16 %v998_v19, %v998_v19  ;;  %v6546_v25 = vld [vmem:[%s11708_s1 + $0x24] sm:$0xff]  ;;  %v6532_v28 = vld [vmem:[%s11709_s0 + $0x10] sm:$0xff]  ;;  %v6541_v30 = vld [vmem:[%s11709_s0 + $0x3c] sm:$0xff] }
   0x7   :  { %129 = vmatpush.bf16.msra.mxu0 %v124_v9  ;;  %6680 = vmatpush.bf16.msra.mxu3 %v124_v9  ;;  %v6556_v26 = vld [vmem:[%s11708_s1 + $0x48] sm:$0xff]  ;;  %v6530_v27 = vld [vmem:[%s11709_s0] sm:$0xff]  ;;  %v6551_v31 = vld [vmem:[%s11709_s0 + $0x70] sm:$0xff]  ;;  %v1602_v34 = vunpack.c.l.b16 %v5841_v33 }
   0x8   :  { %6685 = vmatpush.bf16.msra.mxu1 %v426_v10  ;;  %6690 = vmatpush.bf16.msra.mxu2 %v6805_v11  ;;  %v1030_v29 = vsel %vm122_vm0, %v1003_v23, 0  ;;  %v6569_v32 = vld [vmem:[%s11708_s1 + $0x84] sm:$0xff]  ;;  %v6568_v36 = vld [vmem:[%s11708_s1 + $0x7c] sm:$0xff]  ;;  %v6589_v42 = vld [vmem:[%s11708_s1 + $0xcc] sm:$0xff] }
   0x9   :  { %v1607_v35 = vpack.c.b16 %v1602_v34, %v1602_v34  ;;  %v6531_v38 = vld [vmem:[%s11709_s0 + $0x8] sm:$0xff]  ;;  %v6533_v39 = vld [vmem:[%s11709_s0 + $0x18] sm:$0xff]  ;;  %v5770_v44 = vld [vmem:[%s11708_s1 + $0xb0] sm:$0xf] }
   0xa   :  { %v6542_v40 = vld [vmem:[%s11709_s0 + $0x44] sm:$0xff]  ;;  %v6552_v41 = vld [vmem:[%s11709_s0 + $0x78] sm:$0xff]  ;;  %v1300_v45 = vunpack.c.l.b16 %v5770_v44  ;;  %v6543_v49 = vld [vmem:[%s11709_s0 + $0x4c] sm:$0xff] }
   0xb   :  { %130 = vmatpush.bf16.msra.mxu0 %v6539_v12  ;;  %6681 = vmatpush.bf16.msra.mxu3 %v6539_v12  ;;  %v1634_v37 = vsel %vm122_vm0, %v1607_v35, 0  ;;  %v6567_v43 = vld [vmem:[%s11708_s1 + $0x74] sm:$0xff]  ;;  %v6534_v46 = vld [vmem:[%s11709_s0 + $0x20] sm:$0xff]  ;;  %v6566_v54 = vld [vmem:[%s11708_s1 + $0x6c] sm:$0xff] }
   0xc   :  { %6686 = vmatpush.bf16.msra.mxu1 %v6549_v13  ;;  %6691 = vmatpush.bf16.msra.mxu2 %v6817_v14  ;;  %v6540_v47 = vld [vmem:[%s11709_s0 + $0x34] sm:$0xff]  ;;  %v1305_v48 = vpack.c.b16 %v1300_v45, %v1300_v45  ;;  %v6553_v50 = vld [vmem:[%s11709_s0 + $0x80] sm:$0xff]  ;;  %v6579_v56 = vld [vmem:[%s11708_s1 + $0xa8] sm:$0xff] }
   0xd   :  { %v5912_v52 = vld [vmem:[%s11708_s1 + $0xf8] sm:$0xf]  ;;  %v6588_v53 = vld [vmem:[%s11708_s1 + $0xc4] sm:$0xff]  ;;  %v6576_v1 = vld [vmem:[%s11708_s1 + $0x90] sm:$0xff] }
   0xe   :  { %v1332_v51 = vsel %vm122_vm0, %v1305_v48, 0  ;;  %v1904_v55 = vunpack.c.l.b16 %v5912_v52  ;;  %v6578_v59 = vld [vmem:[%s11708_s1 + $0xa0] sm:$0xff]  ;;  %v6577_v60 = vld [vmem:[%s11708_s1 + $0x98] sm:$0xff]  ;;  %v6535_v61 = vld [vmem:[%s11709_s0 + $0x28] sm:$0xff] }
   0xf   :  { %131 = vmatpush.bf16.msra.mxu0 %v6538_v15  ;;  %6682 = vmatpush.bf16.msra.mxu3 %v6538_v15  ;;  %v6550_v62 = vld [vmem:[%s11709_s0 + $0x68] sm:$0xff]  ;;  %v6544_v63 = vld [vmem:[%s11709_s0 + $0x54] sm:$0xff]  ;;  %v6054_v3 = vld [vmem:[%s11708_s1 + $0x140] sm:$0xf] }
  0x10   :  { %6687 = vmatpush.bf16.msra.mxu1 %v6548_v17  ;;  %6692 = vmatpush.bf16.msra.mxu2 %v6558_v18  ;;  %v1909_v57 = vpack.c.b16 %v1904_v55, %v1904_v55  ;;  %v6554_v0 = vld [vmem:[%s11709_s0 + $0x88] sm:$0xff]  ;;  %v6599_v2 = vld [vmem:[%s11708_s1 + $0xf0] sm:$0xff]  ;;  %v6587_v4 = vld [vmem:[%s11708_s1 + $0xbc] sm:$0xff]  ;;  %v2508_v6 = vunpack.c.l.b16 %v6054_v3 }
  0x11   :  { %v6598_v5 = vld [vmem:[%s11708_s1 + $0xe8] sm:$0xff]  ;;  %v6586_v7 = vld [vmem:[%s11708_s1 + $0xb4] sm:$0xff]  ;;  %v30_v9 = vld [vmem:[%s11709_s0 + $0x30] sm:$0x1] }
  0x12   :  { %v1936_v58 = vsel %vm122_vm0, %v1909_v57, 0  ;;  %v2513_v8 = vpack.c.b16 %v2508_v6, %v2508_v6  ;;  %v65_v12 = vunpack.c.l.b16 %v30_v9  ;;  %v6570_v15 = vld [vmem:[%s11709_s0 + $0xd0] sm:$0xff]  ;;  %v6545_v16 = vld [vmem:[%s11709_s0 + $0x5c] sm:$0xff]  ;;  %v5548_v19 = vld [vmem:[%s11709_s0 + $0x64] sm:$0x1] }
  0x13   :  { %132 = vmatpush.bf16.msra.mxu0 %v6537_v20  ;;  %6683 = vmatpush.bf16.msra.mxu3 %v6537_v20  ;;  %v5619_v20 = vld [vmem:[%s11709_s0 + $0x98] sm:$0x1]  ;;  %v6560_v23 = vld [vmem:[%s11709_s0 + $0x9c] sm:$0xff]  ;;  %v6580_v33 = vld [vmem:[%s11709_s0 + $0x104] sm:$0xff] }
  0x14   :  { %6688 = vmatpush.bf16.msra.mxu1 %v6547_v21  ;;  %6693 = vmatpush.bf16.msra.mxu2 %v6557_v22  ;;  %v6590_v34 = vld [vmem:[%s11709_s0 + $0x138] sm:$0xff]  ;;  %v6618_v35 = vld [vmem:[%s11708_s1 + $0x130] sm:$0xff]  ;;  %v6592_v45 = vld [vmem:[%s11709_s0 + $0x148] sm:$0xff] }
  0x15   :  { %v6582_v44 = vld [vmem:[%s11709_s0 + $0x114] sm:$0xff]  ;;  %v6608_v48 = vld [vmem:[%s11708_s1 + $0x10c] sm:$0xff] }
  0x17   :  { %133 = vmatpush.bf16.msra.mxu0 %v6536_v24  ;;  %6684 = vmatpush.bf16.msra.mxu3 %v6536_v24  ;;  %v6571_v24 = vld [vmem:[%s11709_s0 + $0xd8] sm:$0xff] }
  0x18   :  { %6689 = vmatpush.bf16.msra.mxu1 %v6546_v25  ;;  %6694 = vmatpush.bf16.msra.mxu2 %v6556_v26 }
  0x1a   :  { %5529 = vmatmul.msk.bf16.vlgmr.msra.gmra.mxu0 %vm100_vm1, %v6530_v27  ;;  %5531 = vmatmul.msk.bf16.vlgmr.msra.gmra.mxu3 %vm100_vm1, %v6532_v28  ;;  %v5983_v27 = vld [vmem:[%s11708_s1 + $0x11c] sm:$0xf] }
  0x1b   :  { %431 = vmatpush.bf16.msrb.mxu0 %v426_v10  ;;  %1035 = vmatpush.bf16.msrb.mxu3 %v1030_v29  ;;  %v2540_v10 = vsel %vm122_vm0, %v2513_v8, 0  ;;  %v2206_v28 = vunpack.c.l.b16 %v5983_v27  ;;  %v6565_v27 = vld [vmem:[%s11709_s0 + $0xc4] sm:$0xff] }
  0x1c   :  { %5599 = vmatmul.msk.bf16.vlgmr.msra.gmra.mxu1 %vm100_vm1, %v6541_v30  ;;  %5670 = vmatmul.msk.bf16.vlgmr.msra.gmra.mxu2 %vm100_vm1, %v6551_v31  ;;  %v6561_v31 = vld [vmem:[%s11709_s0 + $0xa4] sm:$0xff] }
  0x1d   :  { %1639 = vmatpush.bf16.msrb.mxu1 %v1634_v37  ;;  %1941 = vmatpush.bf16.msrb.mxu2 %v1936_v58  ;;  %v2211_v29 = vpack.c.b16 %v2206_v28, %v2206_v28  ;;  %v6562_v37 = vld [vmem:[%s11709_s0 + $0xac] sm:$0xff] }
  0x1f   :  { %432 = vmatpush.bf16.msrb.mxu0 %v6549_v13  ;;  %1036 = vmatpush.bf16.msrb.mxu3 %v6569_v32  ;;  %v6596_v13 = vld [vmem:[%s11708_s1 + $0xd8] sm:$0xff]  ;;  %v2238_v30 = vsel %vm122_vm0, %v2211_v29, 0  ;;  %v6572_v32 = vld [vmem:[%s11709_s0 + $0xe0] sm:$0xff] }
  0x20   :  { %v6606_v29 = vld [vmem:[%s11708_s1 + $0xfc] sm:$0xff] }
  0x21   :  { %1640 = vmatpush.bf16.msrb.mxu1 %v6589_v42  ;;  %1942 = vmatpush.bf16.msrb.mxu2 %v6599_v2  ;;  %v6574_v42 = vld [vmem:[%s11709_s0 + $0xf0] sm:$0xff] }
  0x23   :  { %433 = vmatpush.bf16.msrb.mxu0 %v6548_v17  ;;  %1037 = vmatpush.bf16.msrb.mxu3 %v6568_v36  ;;  %v6555_v17 = vld [vmem:[%s11709_s0 + $0x90] sm:$0xff] }
  0x24   :  { %v6609_v36 = vld [vmem:[%s11708_s1 + $0x114] sm:$0xff] }
  0x25   :  { %1641 = vmatpush.bf16.msrb.mxu1 %v6588_v53  ;;  %1943 = vmatpush.bf16.msrb.mxu2 %v6598_v5 }
  0x27   :  { %434 = vmatpush.bf16.msrb.mxu0 %v6547_v21  ;;  %1038 = vmatpush.bf16.msrb.mxu3 %v6567_v43  ;;  %v369_v21 = vunpack.c.l.b16 %v5548_v19 }
  0x29   :  { %1642 = vmatpush.bf16.msrb.mxu1 %v6587_v4 }
  0x2a   :  { %5530 = vmatmul.msk.bf16.gmra.mxu0 %vm100_vm1, %v6531_v38  ;;  %5532 = vmatmul.msk.bf16.gmra.mxu3 %vm100_vm1, %v6533_v39  ;;  %v6573_v38 = vld [vmem:[%s11709_s0 + $0xe8] sm:$0xff] }
  0x2b   :  { %435 = vmatpush.bf16.msrb.mxu0 %v6546_v25  ;;  %1039 = vmatpush.bf16.msrb.mxu3 %v6566_v54  ;;  %v376_v25 = vpack.c.b16 %v369_v21, %v369_v21  ;;  %v6581_v39 = vld [vmem:[%s11709_s0 + $0x10c] sm:$0xff] }
  0x2c   :  { %5600 = vmatmul.msk.bf16.gmra.mxu1 %vm100_vm1, %v6542_v40  ;;  %5671 = vmatmul.msk.bf16.gmra.mxu2 %vm100_vm1, %v6552_v41  ;;  %v6591_v40 = vld [vmem:[%s11709_s0 + $0x140] sm:$0xff]  ;;  %v6563_v41 = vld [vmem:[%s11709_s0 + $0xb4] sm:$0xff] }
  0x2d   :  { %1643 = vmatpush.bf16.msrb.mxu1 %v6586_v7 }
  0x2f   :  { %733 = vmatpush.bf16.msra.mxu0 %v6805_v11  ;;  %v6597_v11 = vld [vmem:[%s11708_s1 + $0xe0] sm:$0xff]  ;;  %2243 = vmatpush.bf16.msra.mxu3 %v2238_v30 }
  0x30   :  { %1944 = vmatpush.bf16.msrb.mxu2 %v6597_v11 }
  0x33   :  { %734 = vmatpush.bf16.msra.mxu0 %v6817_v14  ;;  %v72_v14 = vpack.c.b16 %v65_v12, %v65_v12  ;;  %2244 = vmatpush.bf16.msra.mxu3 %v6609_v36 }
  0x34   :  { %1945 = vmatpush.bf16.msrb.mxu2 %v6596_v13 }
  0x37   :  { %735 = vmatpush.bf16.msra.mxu0 %v6558_v18  ;;  %v6619_v18 = vld [vmem:[%s11708_s1 + $0x138] sm:$0xff]  ;;  %2245 = vmatpush.bf16.msra.mxu3 %v6608_v48 }
  0x3a   :  { %5533 = vmatmul.msk.bf16.gmra.mxu3 %vm100_vm1, %v6534_v46  ;;  %5598 = vmatmul.msk.bf16.vlgmr.msrb.gmra.mxu0 %vm100_vm1, %v6540_v47  ;;  %v6617_v47 = vld [vmem:[%s11708_s1 + $0x128] sm:$0xff] }
  0x3b   :  { %736 = vmatpush.bf16.msra.mxu0 %v6557_v22  ;;  %v671_v22 = vunpack.c.l.b16 %v5619_v20 }
  0x3c   :  { %5601 = vmatmul.msk.bf16.gmra.mxu1 %vm100_vm1, %v6543_v49  ;;  %5672 = vmatmul.msk.bf16.gmra.mxu2 %vm100_vm1, %v6553_v50  ;;  %v6125_v49 = vld [vmem:[%s11708_s1 + $0x164] sm:$0xf] }
  0x3d   :  { %v2810_v50 = vunpack.c.l.b16 %v6125_v49 }
  0x3f   :  { %737 = vmatpush.bf16.msra.mxu0 %v6556_v26  ;;  %v678_v26 = vpack.c.b16 %v671_v22, %v671_v22  ;;  %v2815_v53 = vpack.c.b16 %v2810_v50, %v2810_v50  ;;  %v6628_v50 = vld [vmem:[%s11708_s1 + $0x154] sm:$0xff] }
  0x43   :  { %1337 = vmatpush.bf16.msrb.mxu0 %v1332_v51 }
  0x47   :  { %1338 = vmatpush.bf16.msrb.mxu0 %v6579_v56  ;;  %v2842_v56 = vsel %vm122_vm0, %v2815_v53, 0  ;;  %v6638_v53 = vld [vmem:[%s11708_s1 + $0x178] sm:$0xff] }
  0x48   :  { %2847 = vmatpush.bf16.msra.mxu1 %v2842_v56 }
  0x4a   :  { %5534 = vmatmul.msk.bf16.gmra.mxu3 %vm100_vm1, %v6535_v61  ;;  %5669 = vmatmul.msk.bf16.vlgmr.msra.gmra.mxu0 %vm100_vm1, %v6550_v62  ;;  %v6616_v61 = vld [vmem:[%s11708_s1 + $0x120] sm:$0xff] }
  0x4b   :  { %1339 = vmatpush.bf16.msrb.mxu0 %v6578_v59  ;;  %v6564_v59 = vld [vmem:[%s11709_s0 + $0xbc] sm:$0xff] }
  0x4c   :  { %5602 = vmatmul.msk.bf16.gmra.mxu1 %vm100_vm1, %v6544_v63  ;;  %5673 = vmatmul.msk.bf16.gmra.mxu2 %vm100_vm1, %v6554_v0  ;;  %v6583_v63 = vld [vmem:[%s11709_s0 + $0x11c] sm:$0xff]  ;;  %v6593_v0 = vld [vmem:[%s11709_s0 + $0x150] sm:$0xff] }
  0x4f   :  { %1340 = vmatpush.bf16.msrb.mxu0 %v6577_v60  ;;  %v6575_v60 = vld [vmem:[%s11709_s0 + $0xf8] sm:$0xff] }
  0x53   :  { %1341 = vmatpush.bf16.msrb.mxu0 %v6576_v1 }
  0x57   :  { %2545 = vmatpush.bf16.msra.mxu0 %v2540_v10  ;;  %v5761_v10 = vld [vmem:[%s11709_s0 + $0x100] sm:$0x1] }
  0x5a   :  { %5535 = vmatmul.msk.bf16.gmra.mxu3 %vm100_vm1, %v72_v14  ;;  %5811 = vmatmul.msk.bf16.vlgmr.msrb.gmra.mxu0 %vm100_vm1, %v6570_v15  ;;  %v1275_v15 = vunpack.c.l.b16 %v5761_v10  ;;  %v6627_v10 = vld [vmem:[%s11708_s1 + $0x14c] sm:$0xff] }
  0x5b   :  { %2546 = vmatpush.bf16.msra.mxu0 %v6619_v18 }
  0x5c   :  { %5603 = vmatmul.msk.bf16.gmra.mxu1 %vm100_vm1, %v6545_v16  ;;  %5674 = vmatmul.msk.bf16.gmra.mxu2 %vm100_vm1, %v6555_v17  ;;  %v6607_v16 = vld [vmem:[%s11708_s1 + $0x104] sm:$0xff]  ;;  %v1282_v28 = vpack.c.b16 %v1275_v15, %v1275_v15 }
  0x5d   :  { %v6196_v17 = vld [vmem:[%s11708_s1 + $0x188] sm:$0xf]  ;;  %2246 = vmatpush.bf16.msra.mxu3 %v6607_v16 }
  0x5e   :  { %v3112_v19 = vunpack.c.l.b16 %v6196_v17 }
  0x5f   :  { %2547 = vmatpush.bf16.msra.mxu0 %v6618_v35 }
  0x61   :  { %2247 = vmatpush.bf16.msra.mxu3 %v6606_v29 }
  0x63   :  { %2548 = vmatpush.bf16.msra.mxu0 %v6617_v47 }
  0x67   :  { %2549 = vmatpush.bf16.msra.mxu0 %v6616_v61 }
  0x6a   :  { %5740 = vmatmul.msk.bf16.vlgmr.msrb.gmra.mxu3 %vm100_vm1, %v6560_v23  ;;  %5812 = vmatmul.msk.bf16.gmra.mxu0 %vm100_vm1, %v6571_v24  ;;  %v3117_v24 = vpack.c.b16 %v3112_v19, %v3112_v19 }
  0x6c   :  { %5604 = vmatmul.msk.bf16.gmra.mxu1 %vm100_vm1, %v376_v25  ;;  %5675 = vmatmul.msk.bf16.gmra.mxu2 %vm100_vm1, %v678_v26  ;;  %v3144_v35 = vsel %vm122_vm0, %v3117_v24, 0 }
  0x6d   :  { %3149 = vmatpush.bf16.msra.mxu2 %v3144_v35 }
  0x7a   :  { %5741 = vmatmul.msk.bf16.gmra.mxu3 %vm100_vm1, %v6561_v31  ;;  %5813 = vmatmul.msk.bf16.gmra.mxu0 %vm100_vm1, %v6572_v32  ;;  %v6584_v32 = vld [vmem:[%s11709_s0 + $0x124] sm:$0xff] }
  0x7c   :  { %5882 = vmatmul.msk.bf16.vlgmr.msrb.gmra.mxu1 %vm100_vm1, %v6580_v33  ;;  %5953 = vmatmul.msk.bf16.vlgmr.msrb.gmra.mxu2 %vm100_vm1, %v6590_v34  ;;  %v6594_v33 = vld [vmem:[%s11709_s0 + $0x158] sm:$0xff] }
  0x7d   :  { %v6629_v34 = vld [vmem:[%s11708_s1 + $0x15c] sm:$0xff] }
  0x7e   :  { %2848 = vmatpush.bf16.msra.mxu1 %v6629_v34 }
  0x82   :  { %2849 = vmatpush.bf16.msra.mxu1 %v6628_v50 }
  0x86   :  { %2850 = vmatpush.bf16.msra.mxu1 %v6627_v10 }
  0x8a   :  { %5742 = vmatmul.msk.bf16.gmra.mxu3 %vm100_vm1, %v6562_v37  ;;  %5814 = vmatmul.msk.bf16.gmra.mxu0 %vm100_vm1, %v6573_v38  ;;  %v6639_v38 = vld [vmem:[%s11708_s1 + $0x180] sm:$0xff] }
  0x8b   :  { %3150 = vmatpush.bf16.msra.mxu2 %v6639_v38 }
  0x8c   :  { %5883 = vmatmul.msk.bf16.gmra.mxu1 %vm100_vm1, %v6581_v39  ;;  %5954 = vmatmul.msk.bf16.gmra.mxu2 %vm100_vm1, %v6591_v40 }
  0x8f   :  { %3151 = vmatpush.bf16.msra.mxu2 %v6638_v53  ;;  %v6611_v53 = vld [vmem:[%s11709_s0 + $0x1a8] sm:$0xff] }
  0x97   :  { %v7064_v43 = vpop.f32.mrf.mxu0 }
  0x98   :  { %v170_v3 = vsel %vm169_vm2, %v7064_v43, 0.0 }
  0x99   :  { %v7072_v46 = vpop.f32.mrf.mxu1 }
  0x9a   :  { %5743 = vmatmul.msk.bf16.gmra.mxu3 %vm100_vm1, %v6563_v41  ;;  %5815 = vmatmul.msk.bf16.gmra.mxu0 %vm100_vm1, %v6574_v42 }
  0x9c   :  { %5884 = vmatmul.msk.bf16.gmra.mxu1 %vm100_vm1, %v6582_v44  ;;  %5955 = vmatmul.msk.bf16.gmra.mxu2 %vm100_vm1, %v6592_v45  ;;  %v5690_v45 = vld [vmem:[%s11709_s0 + $0xcc] sm:$0x1] }
  0x9d   :  { %v7087_v51 = vpop.f32.mrf.mxu3  ;;  %v973_v48 = vunpack.c.l.b16 %v5690_v45 }
  0x9e   :  { %v177_v14 = vsel %vm169_vm2, %v7087_v51, 0.0 }
  0x9f   :  { %v7089_v52 = vpop.f32.mrf.mxu2  ;;  %v7091_v54 = vpop.f32.mrf.mxu0 }
  0xa0   :  { %v171_v2 = vsel %vm169_vm2, %v7091_v54, 0.0 }
  0xa1   :  { %v7093_v55 = vpop.f32.mrf.mxu1  ;;  %v172_v5 = vadd.f32 %v171_v2, %v170_v3  ;;  %v6585_v2 = vld [vmem:[%s11709_s0 + $0x12c] sm:$0xff]  ;;  %v6610_v3 = vld [vmem:[%s11709_s0 + $0x1a0] sm:$0xff] }
  0xa2   :  { %v476_v16 = vsel %vm169_vm2, %v7093_v55, 0.0 }
  0xa5   :  { %v7096_v57 = vpop.f32.mrf.mxu3 }
  0xa6   :  { %v179_v20 = vsel %vm169_vm2, %v7096_v57, 0.0 }
  0xa7   :  { %v7098_v58 = vpop.f32.mrf.mxu2  ;;  %v7109_v62 = vpop.f32.mrf.mxu0 }
  0xa8   :  { %v173_v4 = vsel %vm169_vm2, %v7109_v62, 0.0 }
  0xa9   :  { %v7117_v1 = vpop.f32.mrf.mxu1  ;;  %v174_v8 = vadd.f32 %v173_v4, %v172_v5 }
  0xaa   :  { %5744 = vmatmul.msk.bf16.gmra.mxu3 %vm100_vm1, %v6564_v59  ;;  %5816 = vmatmul.msk.bf16.gmra.mxu0 %vm100_vm1, %v6575_v60  ;;  %v478_v29 = vsel %vm169_vm2, %v7117_v1, 0.0 }
  0xac   :  { %5885 = vmatmul.msk.bf16.gmra.mxu1 %vm100_vm1, %v6583_v63  ;;  %5956 = vmatmul.msk.bf16.gmra.mxu2 %vm100_vm1, %v6593_v0  ;;  %v980_v0 = vpack.c.b16 %v973_v48, %v973_v48 }
  0xad   :  { %v7129_v6 = vpop.f32.mrf.mxu3 }
  0xae   :  { %v181_v21 = vsel %vm169_vm2, %v7129_v6, 0.0 }
  0xaf   :  { %v7131_v7 = vpop.f32.mrf.mxu2  ;;  %v7133_v9 = vpop.f32.mrf.mxu0 }
  0xb0   :  { %v175_v11 = vsel %vm169_vm2, %v7133_v9, 0.0 }
  0xb1   :  { %v7140_v12 = vpop.f32.mrf.mxu1  ;;  %v176_v13 = vadd.f32 %v175_v11, %v174_v8  ;;  %v6595_v8 = vld [vmem:[%s11709_s0 + $0x160] sm:$0xff]  ;;  %v6637_v11 = vld [vmem:[%s11708_s1 + $0x170] sm:$0xff] }
  0xb2   :  { %3152 = vmatpush.bf16.msra.mxu2 %v6637_v11  ;;  %v480_v38 = vsel %vm169_vm2, %v7140_v12, 0.0 }
  0xb3   :  { %v178_v18 = vadd.f32 %v177_v14, %v176_v13  ;;  %v474_v14 = vsel %vm169_vm2, %v7072_v46, 0.0 }
  0xb5   :  { %v7154_v22 = vpop.f32.mrf.mxu3  ;;  %v180_v23 = vadd.f32 %v179_v20, %v178_v18 }
  0xb6   :  { %v183_v25 = vsel %vm169_vm2, %v7154_v22, 0.0 }
  0xb7   :  { %v7158_v26 = vpop.f32.mrf.mxu2  ;;  %v182_v30 = vadd.f32 %v181_v21, %v180_v23  ;;  %v7166_v31 = vpop.f32.mrf.mxu0 }
  0xb8   :  { %v471_v56 = vsel %vm169_vm2, %v7166_v31, 0.0 }
  0xb9   :  { %v7178_v36 = vpop.f32.mrf.mxu1  ;;  %v184_v37 = vadd.f32 %v183_v25, %v182_v30 }
  0xba   :  { %5745 = vmatmul.msk.bf16.gmra.mxu3 %vm100_vm1, %v6565_v27  ;;  %5817 = vmatmul.msk.bf16.gmra.mxu0 %vm100_vm1, %v1282_v28  ;;  %v5832_v27 = vld [vmem:[%s11709_s0 + $0x134] sm:$0x1]  ;;  %v5903_v28 = vld [vmem:[%s11709_s0 + $0x168] sm:$0x1]  ;;  %v482_v10 = vsel %vm169_vm2, %v7178_v36, 0.0 }
  0xbb   :  { %v1577_v34 = vunpack.c.l.b16 %v5832_v27  ;;  %v1879_v35 = vunpack.c.l.b16 %v5903_v28 }
  0xbc   :  { %5886 = vmatmul.msk.bf16.gmra.mxu1 %vm100_vm1, %v6584_v32  ;;  %5957 = vmatmul.msk.bf16.gmra.mxu2 %vm100_vm1, %v6594_v33 }
  0xbd   :  { %v7187_v39 = vpop.f32.mrf.mxu3 }
  0xbe   :  { %v185_v40 = vsel %vm169_vm2, %v7187_v39, 0.0 }
  0xbf   :  { %v7191_v41 = vpop.f32.mrf.mxu2  ;;  %v186_v42 = vadd.f32 %v185_v40, %v184_v37  ;;  %v7193_v44 = vpop.f32.mrf.mxu0  ;;  %v776_v37 = vsel %vm169_vm2, %v7089_v52, 0.0 }
  0xc0   :  { %v472_v49 = vsel %vm169_vm2, %v7193_v44, 0.0 }
  0xc1   :  { %v7198_v47 = vpop.f32.mrf.mxu1  ;;  %v473_v60 = vadd.f32 %v472_v49, %v471_v56  ;;  %v6626_v56 = vld [vmem:[%s11708_s1 + $0x144] sm:$0xff] }
  0xc2   :  { %2851 = vmatpush.bf16.msra.mxu1 %v6626_v56 }
  0xc3   :  { %v475_v15 = vadd.f32 %v474_v14, %v473_v60  ;;  %v6636_v60 = vld [vmem:[%s11708_s1 + $0x168] sm:$0xff] }
  0xc4   :  { %3153 = vmatpush.bf16.msra.mxu2 %v6636_v60 }
  0xc5   :  { %v7210_v59 = vpop.f32.mrf.mxu3  ;;  %v477_v18 = vadd.f32 %v476_v16, %v475_v15  ;;  %v780_v15 = vsel %vm169_vm2, %v7131_v7, 0.0  ;;  %v484_v16 = vsel %vm169_vm2, %v7198_v47, 0.0 }
  0xc6   :  { %v187_v61 = vsel %vm169_vm2, %v7210_v59, 0.0 }
  0xc7   :  { %v7214_v63 = vpop.f32.mrf.mxu2  ;;  %v188_v4 = vadd.f32 %v187_v61, %v186_v42  ;;  %v7222_v5 = vpop.f32.mrf.mxu0  ;;  %v479_v32 = vadd.f32 %v478_v29, %v477_v18  ;;  %v6600_v42 = vld [vmem:[%s11709_s0 + $0x16c] sm:$0xff] }
  0xc8   :  { %v773_v30 = vsel %vm169_vm2, %v7222_v5, 0.0 }
  0xc9   :  { %v7233_v13 = vpop.f32.mrf.mxu1  ;;  %v481_v45 = vadd.f32 %v480_v38, %v479_v32  ;;  %v784_v38 = vsel %vm169_vm2, %v7191_v41, 0.0 }
  0xca   :  { %5746 = vmatmul.msk.bf16.gmra.mxu3 %vm100_vm1, %v980_v0  ;;  %6095 = vmatmul.msk.bf16.vlgmr.msra.gmra.mxu0 %vm100_vm1, %v6610_v3  ;;  %v1886_v3 = vpack.c.b16 %v1879_v35, %v1879_v35  ;;  %v486_v28 = vsel %vm169_vm2, %v7233_v13, 0.0 }
  0xcb   :  { %v483_v11 = vadd.f32 %v482_v10, %v481_v45 }
  0xcc   :  { %5887 = vmatmul.msk.bf16.gmra.mxu1 %vm100_vm1, %v6585_v2  ;;  %5958 = vmatmul.msk.bf16.gmra.mxu2 %vm100_vm1, %v6595_v8  ;;  %v1584_v2 = vpack.c.b16 %v1577_v34, %v1577_v34  ;;  %v778_v8 = vsel %vm169_vm2, %v7098_v58, 0.0 }
  0xcd   :  { %v7243_v17 = vpop.f32.mrf.mxu3 }
  0xce   :  { %v189_v19 = vsel %vm169_vm2, %v7243_v17, 0.0 }
  0xcf   :  { %v7247_v20 = vpop.f32.mrf.mxu2  ;;  %v190_v21 = vadd.f32 %v189_v19, %v188_v4  ;;  %v7249_v23 = vpop.f32.mrf.mxu0  ;;  %v485_v19 = vadd.f32 %v484_v16, %v483_v11  ;;  %v6630_v16 = vld [vmem:[%s11709_s0 + $0x208] sm:$0xff] }
  0xd0   :  { %v774_v25 = vsel %vm169_vm2, %v7249_v23, 0.0 }
  0xd1   :  { %v7251_v24 = vpop.f32.mrf.mxu1  ;;  %v775_v33 = vadd.f32 %v774_v25, %v773_v30  ;;  %v487_v35 = vadd.f32 %v486_v28, %v485_v19 }
  0xd3   :  { %v777_v48 = vadd.f32 %v776_v37, %v775_v33  ;;  %v782_v33 = vsel %vm169_vm2, %v7158_v26, 0.0 }
  0xd5   :  { %v7269_v40 = vpop.f32.mrf.mxu3  ;;  %v779_v14 = vadd.f32 %v778_v8, %v777_v48  ;;  %v786_v8 = vsel %vm169_vm2, %v7214_v63, 0.0 }
  0xd6   :  { %v191_v49 = vsel %vm169_vm2, %v7269_v40, 0.0 }
  0xd7   :  { %v7276_v50 = vpop.f32.mrf.mxu2  ;;  %v192_v61 = vadd.f32 %v191_v49, %v190_v21  ;;  %v7287_v0 = vpop.f32.mrf.mxu0  ;;  %v781_v21 = vadd.f32 %v780_v15, %v779_v14  ;;  %v6620_v15 = vld [vmem:[%s11709_s0 + $0x1d4] sm:$0xff] }
  0xd8   :  { %11956 = vst [vmem:[#allocation2_spill] sm:$0xff] %v7287_v0 }
  0xd9   :  { %v7289_v4 = vpop.f32.mrf.mxu1  ;;  %v783_v37 = vadd.f32 %v782_v33, %v781_v21 }
  0xda   :  { %6024 = vmatmul.msk.bf16.vlgmr.msra.gmra.mxu3 %vm100_vm1, %v6600_v42  ;;  %6096 = vmatmul.msk.bf16.gmra.mxu0 %vm100_vm1, %v6611_v53  ;;  %v488_v42 = vsel %vm169_vm2, %v7251_v24, 0.0  ;;  %v490_v48 = vsel %vm169_vm2, %v7289_v4, 0.0 }
  0xdb   :  { %v489_v56 = vadd.f32 %v488_v42, %v487_v35  ;;  %v785_v60 = vadd.f32 %v784_v38, %v783_v37 }
  0xdc   :  { %5888 = vmatmul.msk.bf16.gmra.mxu1 %vm100_vm1, %v1584_v2  ;;  %5959 = vmatmul.msk.bf16.gmra.mxu2 %vm100_vm1, %v1886_v3  ;;  %v6601_v2 = vld [vmem:[%s11709_s0 + $0x174] sm:$0xff] }
  0xdd   :  { %v165_v18 = vpop.f32.mrf.mxu3  ;;  %v6612_v3 = vld [vmem:[%s11709_s0 + $0x1b0] sm:$0xff]  ;;  %v491_v19 = vadd.f32 %v490_v48, %v489_v56 }
  0xde   :  { %v194_v25 = vsel %vm193_vm3, %v165_v18, 0.0 }
  0xdf   :  { %v7304_v27 = vpop.f32.mrf.mxu2  ;;  %v195_v29 = vadd.f32 %v194_v25, %v192_v61  ;;  %v7308_v30 = vpop.f32.mrf.mxu0 }
  0xe0   :  { %11957 = vst [vmem:[#allocation3_spill] sm:$0xff] %v7308_v30 }
  0xe1   :  { %v7310_v32 = vpop.f32.mrf.mxu1  ;;  %v196_v34 = vrot.slane %v195_v29, 4 }
  0xe2   :  { %v492_v11 = vsel %vm169_vm2, %v7310_v32, 0.0 }
  0xe3   :  { %v197_v45 = vadd.f32 %v196_v34, %v195_v29  ;;  %v787_v29 = vadd.f32 %v786_v8, %v785_v60  ;;  %v493_v33 = vadd.f32 %v492_v11, %v491_v19  ;;  %v788_v34 = vsel %vm169_vm2, %v7247_v20, 0.0 }
  0xe5   :  { %v198_v49 = vrot.slane %v197_v45, 2  ;;  %v167_v53 = vpop.f32.mrf.mxu3 }
  0xe7   :  { %v7320_v61 = vpop.f32.mrf.mxu2  ;;  %v199_v10 = vadd.f32 %v198_v49, %v197_v45  ;;  %v7332_v14 = vpop.f32.mrf.mxu0  ;;  %v789_v45 = vadd.f32 %v788_v34, %v787_v29  ;;  %v790_v49 = vsel %vm169_vm2, %v7276_v50, 0.0  ;;  %v6621_v29 = vld [vmem:[%s11709_s0 + $0x1dc] sm:$0xff] }
  0xe8   :  { %11958 = vst [vmem:[#allocation4_spill] sm:$0xff] %v7332_v14 }
  0xe9   :  { %v7340_v21 = vpop.f32.mrf.mxu1  ;;  %v200_v25 = vrot.slane %v199_v10, 1 }
  0xea   :  { %v494_v28 = vsel %vm193_vm3, %v7340_v21, 0.0  ;;  %6025 = vmatmul.msk.bf16.gmra.mxu3 %vm100_vm1, %v6601_v2  ;;  %6097 = vmatmul.msk.bf16.gmra.mxu0 %vm100_vm1, %v6612_v3 }
  0xeb   :  { %v201_v35 = vadd.f32 %v200_v25, %v199_v10  ;;  %v495_v37 = vadd.f32 %v494_v28, %v493_v33  ;;  %v6631_v33 = vld [vmem:[%s11709_s0 + $0x210] sm:$0xff] }
  0xec   :  { %6166 = vmatmul.msk.bf16.vlgmr.msra.gmra.mxu1 %vm100_vm1, %v6620_v15  ;;  %6237 = vmatmul.msk.bf16.vlgmr.msra.gmra.mxu2 %vm100_vm1, %v6630_v16  ;;  %v794_v16 = vsel %vm169_vm2, %v7320_v61, 0.0 }
  0xed   :  { %v7350_v38 = vmul.f32 0.010204081, %v201_v35  ;;  %v7352_v42 = vpop.f32.mrf.mxu3  ;;  %v496_v2 = vrot.slane %v495_v37, 4 }
  0xef   :  { %v7354_v48 = vpop.f32.mrf.mxu2  ;;  %v7360_v53 = vsub.f32 %v7133_v9, %v7350_v38  ;;  %v7362_v56 = vpop.f32.mrf.mxu0  ;;  %v7366_v60 = vsub.f32 %v7154_v22, %v7350_v38  ;;  %v7370_v8 = vsub.f32 %v7187_v39, %v7350_v38  ;;  %v7374_v10 = vsub.f32 %v7210_v59, %v7350_v38 }
  0xf0   :  { %11960 = vst [vmem:[#allocation6_spill] sm:$0xff] %v7362_v56  ;;  %v7378_v9 = vsub.f32 %v7243_v17, %v7350_v38  ;;  %v7382_v11 = vsub.f32 %v7269_v40, %v7350_v38  ;;  %v791_v22 = vadd.f32 %v790_v49, %v789_v45  ;;  %v7385_v15 = vsub.f32 %v165_v18, %v7350_v38  ;;  %v6602_v40 = vld [vmem:[%s11709_s0 + $0x17c] sm:$0xff] }
  0xf1   :  { %11959 = vst [vmem:[#allocation5_spill] sm:$0xff] %v7360_v53  ;;  %v469_v3 = vpop.f32.mrf.mxu1  ;;  %v792_v39 = vsel %vm169_vm2, %v7304_v27, 0.0  ;;  %v497_v59 = vadd.f32 %v496_v2, %v495_v37  ;;  %v6613_v18 = vld [vmem:[%s11709_s0 + $0x1b8] sm:$0xff]  ;;  %v796_v45 = vsel %vm193_vm3, %v7354_v48, 0.0 }
  0xf2   :  { %11961 = vst [vmem:[#allocation7_spill] sm:$0xff] %v7366_v60  ;;  %v793_v25 = vadd.f32 %v792_v39, %v791_v22 }
  0xf3   :  { %11962 = vst [vmem:[#allocation8_spill] sm:$0xff] %v7370_v8  ;;  %v498_v37 = vrot.slane %v497_v59, 2 }
  0xf4   :  { %11963 = vst [vmem:[#allocation9_spill] sm:$0xff] %v7374_v10  ;;  %v795_v34 = vadd.f32 %v794_v16, %v793_v25 }
  0xf5   :  { %11964 = vst [vmem:[#allocation10_spill] sm:$0xff] %v7378_v9  ;;  %v7391_v19 = vpop.f32.mrf.mxu3  ;;  %v499_v2 = vadd.f32 %v498_v37, %v497_v59  ;;  %v1378_v59 = vsel %vm169_vm2, %v7308_v30, 0.0  ;;  %v6622_v9 = vld [vmem:[%s11709_s0 + $0x1e4] sm:$0xff] }
  0xf6   :  { %11965 = vst [vmem:[#allocation11_spill] sm:$0xff] %v7382_v11  ;;  %v797_v49 = vadd.f32 %v796_v45, %v795_v34  ;;  %v1380_v45 = vsel %vm169_vm2, %v7332_v14, 0.0 }
  0xf7   :  { %11966 = vst [vmem:[#allocation12_spill] sm:$0xff] %v7385_v15  ;;  %v771_v17 = vpop.f32.mrf.mxu2  ;;  %v7399_v28 = vpop.f32.mrf.mxu0  ;;  %v500_v3 = vrot.slane %v499_v2, 1 }
  0xf8   :  { %11967 = vst [vmem:[#allocation13_spill] sm:$0xff] %v7391_v19  ;;  %v798_v22 = vrot.slane %v797_v49, 4 }
  0xf9   :  { %v7407_v35 = vpop.f32.mrf.mxu1  ;;  %v501_v25 = vadd.f32 %v500_v3, %v499_v2 }
  0xfa   :  { %11968 = vst [vmem:[#allocation14_spill] sm:$0xff] %v7407_v35  ;;  %6026 = vmatmul.msk.bf16.gmra.mxu3 %vm100_vm1, %v6602_v40  ;;  %6098 = vmatmul.msk.bf16.gmra.mxu0 %vm100_vm1, %v6613_v18  ;;  %v799_v40 = vadd.f32 %v798_v22, %v797_v49  ;;  %v1382_v22 = vsel %vm169_vm2, %v7362_v56, 0.0 }
  0xfb   :  { %v7423_v34 = vmul.f32 0.010204081, %v501_v25 }
  0xfc   :  { %6167 = vmatmul.msk.bf16.gmra.mxu1 %vm100_vm1, %v6621_v29  ;;  %6238 = vmatmul.msk.bf16.gmra.mxu2 %vm100_vm1, %v6631_v33  ;;  %v1377_v33 = vsel %vm169_vm2, %v7287_v0, 0.0  ;;  %v800_v2 = vrot.slane %v799_v40, 2 }
  0xfd   :  { %v7415_v39 = vpop.f32.mrf.mxu3  ;;  %v7429_v18 = vsub.f32 %v7166_v31, %v7423_v34  ;;  %v7433_v29 = vsub.f32 %v7193_v44, %v7423_v34  ;;  %v7439_v37 = vsub.f32 %v7072_v46, %v7423_v34  ;;  %v1379_v49 = vadd.f32 %v1378_v59, %v1377_v33  ;;  %v6603_v46 = vld [vmem:[%s11709_s0 + $0x184] sm:$0xff] }
  0xfe   :  { %11969 = vst [vmem:[#allocation15_spill] sm:$0xff] %v7415_v39  ;;  %v7447_v31 = vsub.f32 %v7093_v55, %v7423_v34  ;;  %v6614_v59 = vld [vmem:[%s11709_s0 + $0x1c0] sm:$0xff]  ;;  %v7473_v56 = vsub.f32 %v7117_v1, %v7423_v34  ;;  %v7485_v10 = vsub.f32 %v7140_v12, %v7423_v34  ;;  %v7497_v12 = vsub.f32 %v7178_v36, %v7423_v34 }
  0xff   :  { %v7417_v16 = vpop.f32.mrf.mxu2  ;;  %v7419_v17 = vpop.f32.mrf.mxu0  ;;  %11972 = vst [vmem:[#allocation18_spill] sm:$0xff] %v7429_v18  ;;  %v516_v44 = vmul.f32 %v7429_v18, %v7429_v18  ;;  %v517_v55 = vmul.f32 %v7433_v29, %v7433_v29  ;;  %v1381_v33 = vadd.f32 %v1380_v45, %v1379_v49  ;;  %v6632_v18 = vld [vmem:[%s11709_s0 + $0x218] sm:$0xff]  ;;  %v518_v14 = vmul.f32 %v7439_v37, %v7439_v37 }
 0x100   :  { %11970 = vst [vmem:[#allocation16_spill] sm:$0xff] %v7417_v16  ;;  %v1384_v45 = vsel %vm169_vm2, %v7399_v28, 0.0  ;;  %v1386_v0 = vsel %vm169_vm2, %v7419_v17, 0.0  ;;  %v519_v1 = vmul.f32 %v7447_v31, %v7447_v31 }
 0x101   :  { %v7421_v15 = vpop.f32.mrf.mxu1  ;;  %11973 = vst [vmem:[#allocation19_spill] sm:$0xff] %v7433_v29  ;;  %v801_v29 = vadd.f32 %v800_v2, %v799_v40  ;;  %v1383_v30 = vadd.f32 %v1382_v22, %v1381_v33  ;;  %v529_v8 = vsel %vm169_vm2, %v516_v44, 0.0  ;;  %v520_v22 = vmul.f32 %v7473_v56, %v7473_v56 }
 0x102   :  { %11971 = vst [vmem:[#allocation17_spill] sm:$0xff] %v7421_v15  ;;  %v532_v44 = vsel %vm169_vm2, %v518_v14, 0.0 }
 0x103   :  { %11974 = vst [vmem:[#allocation20_spill] sm:$0xff] %v7439_v37  ;;  %v530_v37 = vsel %vm169_vm2, %v517_v55, 0.0  ;;  %v1385_v2 = vadd.f32 %v1384_v45, %v1383_v30  ;;  %v7506_v30 = vsub.f32 %v7198_v47, %v7423_v34  ;;  %v802_v36 = vrot.slane %v801_v29, 1 }
 0x104   :  { %11975 = vst [vmem:[#allocation21_spill] sm:$0xff] %v7447_v31  ;;  %v531_v40 = vadd.f32 %v530_v37, %v529_v8  ;;  %v521_v8 = vmul.f32 %v7485_v10, %v7485_v10  ;;  %v7515_v37 = vsub.f32 %v7233_v13, %v7423_v34  ;;  %v522_v47 = vmul.f32 %v7497_v12, %v7497_v12 }
 0x105   :  { %v7443_v3 = vpop.f32.mrf.mxu3  ;;  %11978 = vst [vmem:[#allocation24_spill] sm:$0xff] %v7497_v12  ;;  %v1387_v33 = vadd.f32 %v1386_v0, %v1385_v2  ;;  %v536_v45 = vsel %vm169_vm2, %v520_v22, 0.0 }
 0x106   :  { %v533_v55 = vadd.f32 %v532_v44, %v531_v40  ;;  %v803_v40 = vadd.f32 %v802_v36, %v801_v29  ;;  %v7528_v44 = vsub.f32 %v7251_v24, %v7423_v34  ;;  %v538_v31 = vsel %vm169_vm2, %v521_v8, 0.0 }
 0x107   :  { %v7453_v25 = vpop.f32.mrf.mxu2  ;;  %v7463_v11 = vpop.f32.mrf.mxu0  ;;  %v524_v24 = vmul.f32 %v7515_v37, %v7515_v37  ;;  %v540_v36 = vsel %vm169_vm2, %v522_v47, 0.0 }
 0x108   :  { %11976 = vst [vmem:[#allocation22_spill] sm:$0xff] %v7453_v25  ;;  %v1388_v0 = vsel %vm169_vm2, %v7463_v11, 0.0  ;;  %v7535_v12 = vmul.f32 0.010204081, %v803_v40  ;;  %v525_v47 = vmul.f32 %v7528_v44, %v7528_v44 }
 0x109   :  { %v7479_v49 = vpop.f32.mrf.mxu1  ;;  %11981 = vst [vmem:[#allocation27_spill] sm:$0xff] %v7528_v44 }
 0x10a   :  { %11977 = vst [vmem:[#allocation23_spill] sm:$0xff] %v7479_v49  ;;  %6027 = vmatmul.msk.bf16.gmra.mxu3 %vm100_vm1, %v6603_v46  ;;  %6099 = vmatmul.msk.bf16.gmra.mxu0 %vm100_vm1, %v6614_v59  ;;  %v7552_v8 = vsub.f32 %v7249_v23, %v7535_v12  ;;  %v6604_v23 = vld [vmem:[%s11709_s0 + $0x18c] sm:$0xff]  ;;  %v7608_v44 = vsub.f32 %v7098_v58, %v7535_v12 }
 0x10c   :  { %6168 = vmatmul.msk.bf16.gmra.mxu1 %vm100_vm1, %v6622_v9  ;;  %6239 = vmatmul.msk.bf16.gmra.mxu2 %vm100_vm1, %v6632_v18  ;;  %v534_v9 = vsel %vm169_vm2, %v519_v1, 0.0  ;;  %v1389_v1 = vadd.f32 %v1388_v0, %v1387_v33  ;;  %v7541_v33 = vsub.f32 %v7289_v4, %v7423_v34  ;;  %11984 = vst [vmem:[#allocation30_spill] sm:$0xff] %v7552_v8 }
 0x10d   :  { %v7502_v46 = vpop.f32.mrf.mxu3  ;;  %v535_v14 = vadd.f32 %v534_v9, %v533_v55  ;;  %v523_v9 = vmul.f32 %v7506_v30, %v7506_v30  ;;  %v7558_v4 = vsub.f32 %v7310_v32, %v7423_v34  ;;  %v6615_v32 = vld [vmem:[%s11709_s0 + $0x1c8] sm:$0xff]  ;;  %11992 = vst [vmem:[#allocation38_spill] sm:$0xff] %v7608_v44 }
 0x10e   :  { %11982 = vst [vmem:[#allocation28_spill] sm:$0xff] %v7541_v33 }
 0x10f   :  { %v7511_v18 = vpop.f32.mrf.mxu2  ;;  %v7519_v59 = vpop.f32.mrf.mxu0  ;;  %v537_v13 = vadd.f32 %v536_v45, %v535_v14  ;;  %v7548_v14 = vsub.f32 %v7222_v5, %v7535_v12  ;;  %11985 = vst [vmem:[#allocation31_spill] sm:$0xff] %v7558_v4  ;;  %v542_v5 = vsel %vm169_vm2, %v523_v9, 0.0  ;;  %v6623_v9 = vld [vmem:[%s11709_s0 + $0x1ec] sm:$0xff] }
 0x110   :  { %11979 = vst [vmem:[#allocation25_spill] sm:$0xff] %v7511_v18  ;;  %v1390_v55 = vsel %vm169_vm2, %v7519_v59, 0.0 }
 0x111   :  { %v7524_v2 = vpop.f32.mrf.mxu1  ;;  %v7537_v22 = vadd.f32 %v1390_v55, %v1389_v1  ;;  %v539_v29 = vadd.f32 %v538_v31, %v537_v13  ;;  %11983 = vst [vmem:[#allocation29_spill] sm:$0xff] %v7548_v14  ;;  %v7562_v31 = vsub.f32 %v7340_v21, %v7423_v34  ;;  %v7577_v21 = vsub.f32 %v7089_v52, %v7535_v12 }
 0x112   :  { %11980 = vst [vmem:[#allocation26_spill] sm:$0xff] %v7524_v2  ;;  %v7581_v34 = vsub.f32 %v7304_v27, %v7535_v12  ;;  %v7585_v13 = vsub.f32 %v7320_v61, %v7535_v12  ;;  %v544_v52 = vsel %vm169_vm2, %v524_v24, 0.0  ;;  %v818_v27 = vmul.f32 %v7548_v14, %v7548_v14 }
 0x113   :  { %v541_v0 = vadd.f32 %v540_v36, %v539_v29  ;;  %11986 = vst [vmem:[#allocation32_spill] sm:$0xff] %v7562_v31  ;;  %v526_v29 = vmul.f32 %v7541_v33, %v7541_v33  ;;  %v7597_v36 = vsub.f32 %v7354_v48, %v7535_v12  ;;  %v819_v24 = vmul.f32 %v7552_v8, %v7552_v8 }
 0x114   :  { %11988 = vst [vmem:[#allocation34_spill] sm:$0xff] %v7577_v21  ;;  %v527_v48 = vmul.f32 %v7558_v4, %v7558_v4  ;;  %v546_v33 = vsel %vm169_vm2, %v525_v47, 0.0  ;;  %v820_v58 = vmul.f32 %v7577_v21, %v7577_v21  ;;  %v831_v47 = vsel %vm169_vm2, %v818_v27, 0.0 }
 0x115   :  { %v7554_v45 = vpop.f32.mrf.mxu3  ;;  %v543_v1 = vadd.f32 %v542_v5, %v541_v0  ;;  %11989 = vst [vmem:[#allocation35_spill] sm:$0xff] %v7581_v34  ;;  %v6633_v0 = vld [vmem:[%s11709_s0 + $0x220] sm:$0xff]  ;;  %v548_v8 = vsel %vm169_vm2, %v526_v29, 0.0 }
 0x116   :  { %11990 = vst [vmem:[#allocation36_spill] sm:$0xff] %v7585_v13 }
 0x117   :  { %v7567_v40 = vpop.f32.mrf.mxu2  ;;  %v7587_v55 = vpop.f32.mrf.mxu0  ;;  %11991 = vst [vmem:[#allocation37_spill] sm:$0xff] %v7597_v36  ;;  %v545_v5 = vadd.f32 %v544_v52, %v543_v1  ;;  %v7619_v1 = vsub.f32 %v7131_v7, %v7535_v12  ;;  %v528_v52 = vmul.f32 %v7562_v31, %v7562_v31  ;;  %v821_v7 = vmul.f32 %v7608_v44, %v7608_v44 }
 0x118   :  { %11987 = vst [vmem:[#allocation33_spill] sm:$0xff] %v7567_v40 }
 0x119   :  { %v7601_v61 = vpop.f32.mrf.mxu1  ;;  %v547_v14 = vadd.f32 %v546_v33, %v545_v5  ;;  %11993 = vst [vmem:[#allocation39_spill] sm:$0xff] %v7619_v1  ;;  %v7631_v33 = vsub.f32 %v7158_v26, %v7535_v12  ;;  %v550_v5 = vsel %vm169_vm2, %v527_v48, 0.0  ;;  %v822_v26 = vmul.f32 %v7619_v1, %v7619_v1 }
 0x11a   :  { %6028 = vmatmul.msk.bf16.gmra.mxu3 %vm100_vm1, %v6604_v23  ;;  %6100 = vmatmul.msk.bf16.gmra.mxu0 %vm100_vm1, %v6615_v32  ;;  %v832_v32 = vsel %vm169_vm2, %v819_v24, 0.0  ;;  %v552_v48 = vsel %vm193_vm3, %v528_v52, 0.0  ;;  %v1075_v1 = vsel %vm169_vm2, %v7352_v42, 0.0 }
 0x11b   :  { %v549_v23 = vadd.f32 %v548_v8, %v547_v14  ;;  %11994 = vst [vmem:[#allocation40_spill] sm:$0xff] %v7631_v33  ;;  %v833_v21 = vadd.f32 %v832_v32, %v831_v47  ;;  %v7643_v14 = vsub.f32 %v7191_v41, %v7535_v12  ;;  %v834_v8 = vsel %vm169_vm2, %v820_v58, 0.0 }
 0x11c   :  { %6169 = vmatmul.msk.bf16.gmra.mxu1 %vm100_vm1, %v6623_v9  ;;  %6240 = vmatmul.msk.bf16.gmra.mxu2 %vm100_vm1, %v6633_v0  ;;  %v6338_v0 = vld [vmem:[%s11708_s1 + $0x1d0] sm:$0xf]  ;;  %v7658_v41 = vsub.f32 %v7214_v63, %v7535_v12  ;;  %v836_v58 = vsel %vm169_vm2, %v821_v7, 0.0  ;;  %v838_v63 = vsel %vm169_vm2, %v822_v26, 0.0 }
 0x11d   :  { %v7636_v9 = vpop.f32.mrf.mxu3  ;;  %v551_v27 = vadd.f32 %v550_v5, %v549_v23  ;;  %11996 = vst [vmem:[#allocation42_spill] sm:$0xff] %v7643_v14  ;;  %v835_v47 = vadd.f32 %v834_v8, %v833_v21  ;;  %v823_v5 = vmul.f32 %v7631_v33, %v7631_v33  ;;  %v3716_v31 = vunpack.c.l.b16 %v6338_v0 }
 0x11e   :  { %11998 = vst [vmem:[#allocation44_spill] sm:$0xff] %v7658_v41  ;;  %v7667_v21 = vsub.f32 %v7247_v20, %v7535_v12  ;;  %v824_v52 = vmul.f32 %v7643_v14, %v7643_v14  ;;  %v1076_v8 = vsel %vm169_vm2, %v7391_v19, 0.0  ;;  %v7678_v0 = vsub.f32 %v7276_v50, %v7535_v12 }
 0x11f   :  { %v7639_v29 = vpop.f32.mrf.mxu2  ;;  %v7651_v24 = vpop.f32.mrf.mxu0  ;;  %v553_v23 = vadd.f32 %v552_v48, %v551_v27  ;;  %v837_v44 = vadd.f32 %v836_v58, %v835_v47  ;;  %v3721_v7 = vpack.c.b16 %v3716_v31, %v3716_v31  ;;  %v1392_v48 = vsel %vm169_vm2, %v7587_v55, 0.0 }
 0x120   :  { %11995 = vst [vmem:[#allocation41_spill] sm:$0xff] %v7639_v29  ;;  %v825_v20 = vmul.f32 %v7658_v41, %v7658_v41  ;;  %v840_v58 = vsel %vm169_vm2, %v823_v5, 0.0  ;;  %v1393_v31 = vadd.f32 %v1392_v48, %v7537_v22  ;;  %v826_v12 = vmul.f32 %v7667_v21, %v7667_v21  ;;  %v6659_v5 = vld [vmem:[%s11708_s1 + $0x1c8] sm:$0xff]  ;;  %v6624_v22 = vld [vmem:[%s11709_s0 + $0x1f4] sm:$0xff] }
 0x121   :  { %v7654_v32 = vpop.f32.mrf.mxu1  ;;  %v554_v4 = vrot.slane %v553_v23, 4  ;;  %11999 = vst [vmem:[#allocation45_spill] sm:$0xff] %v7667_v21  ;;  %v839_v27 = vadd.f32 %v838_v63, %v837_v44  ;;  %v3748_v26 = vsel %vm122_vm0, %v3721_v7, 0  ;;  %v1077_v48 = vadd.f32 %v1076_v8, %v1075_v1  ;;  %v6045_v1 = vld [vmem:[%s11709_s0 + $0x1d0] sm:$0x1] }
 0x122   :  { %11997 = vst [vmem:[#allocation43_spill] sm:$0xff] %v7654_v32  ;;  %3753 = vmatpush.bf16.msrb.mxu0 %v3748_v26  ;;  %v1394_v21 = vsel %vm169_vm2, %v7651_v24, 0.0  ;;  %v6634_v26 = vld [vmem:[%s11709_s0 + $0x228] sm:$0xff]  ;;  %v827_v41 = vmul.f32 %v7678_v0, %v7678_v0  ;;  %v844_v19 = vsel %vm169_vm2, %v825_v20, 0.0  ;;  %v828_v8 = vmul.f32 %v7581_v34, %v7581_v34 }
 0x123   :  { %v555_v47 = vadd.f32 %v554_v4, %v553_v23  ;;  %12000 = vst [vmem:[#allocation46_spill] sm:$0xff] %v7678_v0  ;;  %v841_v44 = vadd.f32 %v840_v58, %v839_v27  ;;  %v6605_v4 = vld [vmem:[%s11709_s0 + $0x194] sm:$0xff]  ;;  %v842_v23 = vsel %vm169_vm2, %v824_v52, 0.0  ;;  %v1078_v58 = vsel %vm169_vm2, %v7415_v39, 0.0 }
 0x124   :  { %v1079_v20 = vadd.f32 %v1078_v58, %v1077_v48  ;;  %v2483_v0 = vunpack.c.l.b16 %v6045_v1  ;;  %v1082_v48 = vsel %vm169_vm2, %v7502_v46, 0.0 }
 0x125   :  { %v7683_v33 = vpop.f32.mrf.mxu3  ;;  %v556_v50 = vrot.slane %v555_v47, 2  ;;  %v843_v7 = vadd.f32 %v842_v23, %v841_v44  ;;  %v1395_v44 = vadd.f32 %v1394_v21, %v1393_v31  ;;  %v846_v21 = vsel %vm169_vm2, %v826_v12, 0.0  ;;  %v6658_v31 = vld [vmem:[%s11708_s1 + $0x1c0] sm:$0xff] }
 0x126   :  { %12001 = vst [vmem:[#allocation47_spill] sm:$0xff] %v7683_v33  ;;  %3754 = vmatpush.bf16.msrb.mxu0 %v6659_v5  ;;  %v829_v12 = vmul.f32 %v7585_v13, %v7585_v13  ;;  %v848_v5 = vsel %vm169_vm2, %v827_v41, 0.0  ;;  %v1680_v41 = vsel %vm169_vm2, %v7421_v15, 0.0 }
 0x127   :  { %v7687_v63 = vpop.f32.mrf.mxu2  ;;  %v7698_v27 = vpop.f32.mrf.mxu0  ;;  %v557_v14 = vadd.f32 %v556_v50, %v555_v47  ;;  %v845_v23 = vadd.f32 %v844_v19, %v843_v7  ;;  %v7725_v47 = vsub.f32 %v7064_v43, %v7350_v38  ;;  %v1080_v7 = vsel %vm169_vm2, %v7443_v3, 0.0 }
 0x128   :  { %12002 = vst [vmem:[#allocation48_spill] sm:$0xff] %v7687_v63  ;;  %v1396_v39 = vsel %vm169_vm2, %v7698_v27, 0.0 }
 0x129   :  { %v7707_v52 = vpop.f32.mrf.mxu1  ;;  %12003 = vst [vmem:[#allocation49_spill] sm:$0xff] %v7725_v47  ;;  %v558_v50 = vrot.slane %v557_v14, 1  ;;  %v847_v19 = vadd.f32 %v846_v21, %v845_v23  ;;  %v850_v23 = vsel %vm169_vm2, %v828_v8, 0.0  ;;  %v6267_v21 = vld [vmem:[%s11708_s1 + $0x1ac] sm:$0xf] }
 0x12a   :  { %6029 = vmatmul.msk.bf16.gmra.mxu3 %vm100_vm1, %v6605_v4  ;;  %v1397_v4 = vadd.f32 %v1396_v39, %v1395_v44  ;;  %v1679_v39 = vsel %vm169_vm2, %v7407_v35, 0.0  ;;  %v2490_v44 = vpack.c.b16 %v2483_v0, %v2483_v0  ;;  %3755 = vmatpush.bf16.msrb.mxu0 %v6658_v31  ;;  %v6657_v0 = vld [vmem:[%s11708_s1 + $0x1b8] sm:$0xff]  ;;  %v7772_v31 = vsub.f32 %v7087_v51, %v7350_v38 }
 0x12b   :  { %v559_v43 = vadd.f32 %v558_v50, %v557_v14  ;;  %v1081_v50 = vadd.f32 %v1080_v7, %v1079_v20  ;;  %v3414_v7 = vunpack.c.l.b16 %v6267_v21  ;;  %v1681_v15 = vadd.f32 %v1680_v41, %v1679_v39 }
 0x12c   :  { %6170 = vmatmul.msk.bf16.gmra.mxu1 %vm100_vm1, %v6624_v22  ;;  %6241 = vmatmul.msk.bf16.gmra.mxu2 %vm100_vm1, %v6634_v26  ;;  %v849_v22 = vadd.f32 %v848_v5, %v847_v19  ;;  %v830_v26 = vmul.f32 %v7597_v36, %v7597_v36  ;;  %v7761_v19 = vsub.f32 %v7091_v54, %v7350_v38  ;;  %v852_v36 = vsel %vm169_vm2, %v829_v12, 0.0  ;;  %v5974_v12 = vld [vmem:[%s11709_s0 + $0x19c] sm:$0x1] }
 0x12d   :  { %v7740_v58 = vpop.f32.mrf.mxu3  ;;  %v560_v14 = vmul.f32 0.010204081, %v559_v43  ;;  %v7765_v43 = vsub.f32 %v7109_v62, %v7350_v38  ;;  %6101 = vmatmul.msk.bf16.gmra.mxu0 %vm100_vm1, %v2490_v44  ;;  %12008 = vst [vmem:[#allocation54_spill] sm:$0xff] %v7772_v31  ;;  %v1083_v54 = vadd.f32 %v1082_v48, %v1081_v50  ;;  %v3419_v35 = vpack.c.b16 %v3414_v7, %v3414_v7 }
 0x12e   :  { %12005 = vst [vmem:[#allocation51_spill] sm:$0xff] %v7761_v19  ;;  %v851_v20 = vadd.f32 %v850_v23, %v849_v22  ;;  %v1084_v62 = vsel %vm169_vm2, %v7554_v45, 0.0  ;;  %v854_v22 = vsel %vm193_vm3, %v830_v26, 0.0  ;;  %v1682_v23 = vsel %vm169_vm2, %v7479_v49, 0.0  ;;  %3756 = vmatpush.bf16.msrb.mxu0 %v6657_v0 }
 0x12f   :  { %v7745_v1 = vpop.f32.mrf.mxu2  ;;  %v7754_v8 = vpop.f32.mrf.mxu0  ;;  %12006 = vst [vmem:[#allocation52_spill] sm:$0xff] %v7765_v43  ;;  %v7774_v13 = vadd.f32 1e-05, %v560_v14  ;;  %v1086_v51 = vsel %vm169_vm2, %v7636_v9, 0.0  ;;  %v3446_v39 = vsel %vm122_vm0, %v3419_v35, 0  ;;  %v2181_v14 = vunpack.c.l.b16 %v5974_v12 }
 0x130   :  { %12004 = vst [vmem:[#allocation50_spill] sm:$0xff] %v7745_v1  ;;  %v853_v34 = vadd.f32 %v852_v36, %v851_v20  ;;  %v6656_v36 = vld [vmem:[%s11708_s1 + $0x1b0] sm:$0xff]  ;;  %v1398_v44 = vsel %vm169_vm2, %v7754_v8, 0.0  ;;  %v7796_v26 = vsub.f32 %v7096_v57, %v7350_v38  ;;  %v7800_v41 = vsub.f32 %v7129_v6, %v7350_v38  ;;  %3451 = vmatpush.bf16.msrb.mxu3 %v3446_v39 }
 0x131   :  { %v7768_v5 = vpop.f32.mrf.mxu1  ;;  %6724 = vrsqrt.f32 %v7774_v13  ;;  %v7804_v50 = vmul.f32 %v7725_v47, %v7725_v47  ;;  %v1683_v0 = vadd.f32 %v1682_v23, %v1681_v15  ;;  %v1088_v20 = vsel %vm169_vm2, %v7683_v33, 0.0  ;;  %v6625_v23 = vld [vmem:[%s11709_s0 + $0x1fc] sm:$0xff] }
 0x132   :  { %12007 = vst [vmem:[#allocation53_spill] sm:$0xff] %v7768_v5  ;;  %v855_v48 = vadd.f32 %v854_v22, %v853_v34  ;;  %v1085_v34 = vadd.f32 %v1084_v62, %v1083_v54  ;;  %v2188_v57 = vpack.c.b16 %v2181_v14, %v2181_v14  ;;  %v7814_v6 = vmul.f32 %v7761_v19, %v7761_v19  ;;  %v6649_v54 = vld [vmem:[%s11708_s1 + $0x1a4] sm:$0xff] }
 0x133   :  { %12009 = vst [vmem:[#allocation55_spill] sm:$0xff] %v7796_v26  ;;  %v1684_v38 = vsel %vm169_vm2, %v7524_v2, 0.0  ;;  %v1399_v62 = vadd.f32 %v1398_v44, %v1397_v4  ;;  %3757 = vmatpush.bf16.msrb.mxu0 %v6656_v36  ;;  %v7828_v12 = vmul.f32 %v7765_v43, %v7765_v43  ;;  %v6635_v4 = vld [vmem:[%s11709_s0 + $0x230] sm:$0xff]  ;;  %v7843_v44 = vmul.f32 %v7360_v53, %v7360_v53 }
 0x134   :  { %12010 = vst [vmem:[#allocation56_spill] sm:$0xff] %v7800_v41  ;;  %v856_v35 = vrot.slane %v855_v48, 4  ;;  %v1087_v22 = vadd.f32 %v1086_v51, %v1085_v34  ;;  %v1090_v51 = vsel %vm169_vm2, %v7740_v58, 0.0  ;;  %3452 = vmatpush.bf16.msrb.mxu3 %v6649_v54  ;;  %v7851_v47 = vmul.f32 %v7796_v26, %v7796_v26  ;;  %v6648_v54 = vld [vmem:[%s11708_s1 + $0x19c] sm:$0xff] }
 0x135   :  { %v7806_v21 = vpop.f32.mrf.mxu3  ;;  %v1685_v49 = vadd.f32 %v1684_v38, %v1683_v0  ;;  %v1686_v53 = vsel %vm169_vm2, %v7601_v61, 0.0  ;;  %v1981_v0 = vsel %vm169_vm2, %v7417_v16, 0.0  ;;  %v6650_v38 = vld [vmem:[%s11709_s0 + $0x270] sm:$0xff]  ;;  %v1986_v16 = vsel %vm169_vm2, %v7567_v40, 0.0 }
 0x136   :  { %v857_v39 = vadd.f32 %v856_v35, %v855_v48  ;;  %v7847_v48 = vmul.f32 %v7772_v31, %v7772_v31  ;;  %v1089_v35 = vadd.f32 %v1088_v20, %v1087_v22  ;;  %v1092_v20 = vsel %vm169_vm2, %v7806_v21, 0.0 }
 0x137   :  { %v7810_v7 = vpop.f32.mrf.mxu2  ;;  %v7821_v15 = vpop.f32.mrf.mxu0  ;;  %v1687_v26 = vadd.f32 %v1686_v53, %v1685_v49  ;;  %v6647_v53 = vld [vmem:[%s11708_s1 + $0x194] sm:$0xff]  ;;  %vm570_vm5 = vweird.f32 %v7774_v13 }
 0x138   :  { %v1400_v14 = vsel %vm193_vm3, %v7821_v15, 0.0  ;;  %v7839_v36 = vpop.eup %6724  ;;  %v858_v2 = vrot.slane %v857_v39, 2  ;;  %v1091_v33 = vadd.f32 %v1090_v51, %v1089_v35  ;;  %3453 = vmatpush.bf16.msrb.mxu3 %v6648_v54  ;;  %v7905_v54 = vmul.f32 %v7366_v60, %v7366_v60 }
 0x139   :  { %v7834_v34 = vpop.f32.mrf.mxu1  ;;  %v1401_v19 = vadd.f32 %v1400_v14, %v1399_v62  ;;  %v565_v43 = vmul.f32 %v7839_v36, %v7774_v13  ;;  %vm571_vm4 = vweird.f32 %v7839_v36 }
 0x13a   :  { %12011 = vst [vmem:[#allocation57_spill] sm:$0xff] %v7834_v34  ;;  %6030 = vmatmul.msk.bf16.gmra.mxu3 %vm100_vm1, %v2188_v57  ;;  %v859_v14 = vadd.f32 %v858_v2, %v857_v39  ;;  %v1982_v57 = vsel %vm169_vm2, %v7453_v25, 0.0  ;;  %v1984_v2 = vsel %vm169_vm2, %v7511_v18, 0.0  ;;  %v1093_v31 = vadd.f32 %v1092_v20, %v1091_v33  ;;  %vm7941_vm6 = vmor %vm570_vm5, %vm571_vm4 }
 0x13b   :  { %v1402_v22 = vrot.slane %v1401_v19, 4  ;;  %v566_v62 = vmul.f32 %v7839_v36, %v565_v43  ;;  %v1983_v51 = vadd.f32 %v1982_v57, %v1981_v0  ;;  %v1688_v43 = vsel %vm169_vm2, %v7654_v32, 0.0  ;;  %v6409_v32 = vld [vmem:[%s11708_s1 + $0x1f4] sm:$0xf] }
 0x13c   :  { %6171 = vmatmul.msk.bf16.gmra.mxu1 %vm100_vm1, %v6625_v23  ;;  %6242 = vmatmul.msk.bf16.gmra.mxu2 %vm100_vm1, %v6635_v4  ;;  %v7875_v23 = vmul.f32 %v7800_v41, %v7800_v41  ;;  %v860_v4 = vrot.slane %v859_v14, 1 }
 0x13d   :  { %v7881_v39 = vpop.f32.mrf.mxu3  ;;  %v567_v35 = vmul.f32 0.5, %v566_v62  ;;  %v1985_v25 = vadd.f32 %v1984_v2, %v1983_v51  ;;  %v1403_v41 = vadd.f32 %v1402_v22, %v1401_v19  ;;  %6379 = vmatmul.msk.bf16.vlgmr.msrb.gmra.mxu0 %vm100_vm1, %v6650_v38  ;;  %v4018_v22 = vunpack.c.l.b16 %v6409_v32  ;;  %3454 = vmatpush.bf16.msrb.mxu3 %v6647_v53  ;;  %v6116_v53 = vld [vmem:[%s11709_s0 + $0x204] sm:$0x1] }
 0x13e   :  { %v1094_v0 = vsel %vm169_vm2, %v7881_v39, 0.0  ;;  %v861_v33 = vadd.f32 %v860_v4, %v859_v14  ;;  %v1690_v62 = vsel %vm169_vm2, %v7707_v52, 0.0  ;;  %v1689_v38 = vadd.f32 %v1688_v43, %v1687_v26 }
 0x13f   :  { %v7887_v57 = vpop.f32.mrf.mxu2  ;;  %v1375_v18 = vpop.f32.mrf.mxu0  ;;  %v568_v49 = vsub.f32 1.5, %v567_v35  ;;  %v7896_v20 = vadd.f32 %v1094_v0, %v1093_v31  ;;  %v1404_v51 = vrot.slane %v1403_v41, 2  ;;  %v4023_v2 = vpack.c.b16 %v4018_v22, %v4018_v22  ;;  %v6646_v0 = vld [vmem:[%s11708_s1 + $0x18c] sm:$0xff] }
 0x140   :  { %v6480_v18 = vld [vmem:[%s11708_s1 + $0x218] sm:$0xf]  ;;  %v862_v31 = vmul.f32 0.010204081, %v861_v33  ;;  %v1987_v32 = vadd.f32 %v1986_v16, %v1985_v25  ;;  %v1988_v35 = vsel %vm169_vm2, %v7639_v29, 0.0  ;;  %v2785_v16 = vunpack.c.l.b16 %v6116_v53  ;;  %v12019_v29 = vld [vmem:[#allocation3_spill] sm:$0xff] }
 0x141   :  { %v7898_v19 = vpop.f32.mrf.mxu1  ;;  %v4320_v14 = vunpack.c.l.b16 %v6480_v18  ;;  %v1405_v4 = vadd.f32 %v1404_v51, %v1403_v41  ;;  %v569_v18 = vmul.f32 %v7839_v36, %v568_v49  ;;  %v4050_v26 = vsel %vm122_vm0, %v4023_v2, 0  ;;  %3455 = vmatpush.bf16.msrb.mxu3 %v6646_v0  ;;  %v6187_v49 = vld [vmem:[%s11709_s0 + $0x238] sm:$0x1] }
 0x142   :  { %12012 = vst [vmem:[#allocation58_spill] sm:$0xff] %v7898_v19  ;;  %v7919_v40 = vadd.f32 1e-05, %v862_v31  ;;  %v229_v25 = vsel %vm169_vm2, %v7804_v50, 0.0  ;;  %v1692_v41 = vsel %vm169_vm2, %v7768_v5, 0.0  ;;  %4055 = vmatpush.bf16.msrb.mxu1 %v4050_v26  ;;  %v230_v51 = vsel %vm169_vm2, %v7814_v6, 0.0 }
 0x143   :  { %v4325_v60 = vpack.c.b16 %v4320_v14, %v4320_v14  ;;  %v1406_v43 = vrot.slane %v1405_v4, 1  ;;  %v1691_v50 = vadd.f32 %v1690_v62, %v1689_v38  ;;  %v6640_v14 = vld [vmem:[%s11709_s0 + $0x23c] sm:$0xff]  ;;  %v1989_v31 = vadd.f32 %v1988_v35, %v1987_v32  ;;  %v6669_v35 = vld [vmem:[%s11708_s1 + $0x1ec] sm:$0xff] }
 0x144   :  { %6726 = vrsqrt.f32 %v7919_v40  ;;  %v1694_v6 = vsel %vm169_vm2, %v7834_v34, 0.0  ;;  %v2792_v13 = vpack.c.b16 %v2785_v16, %v2785_v16  ;;  %v5605_v62 = vld [vmem:[%s11711_s2 + $0x1] sm:$0x1]  ;;  %v573_v38 = vsel %vm7941_vm6, %v7839_v36, %v569_v18 }
 0x145   :  { %v7926_v33 = vpop.f32.mrf.mxu3  ;;  %v4352_v22 = vsel %vm122_vm0, %v4325_v60, 0  ;;  %v1407_v2 = vadd.f32 %v1406_v43, %v1405_v4  ;;  %v1990_v0 = vsel %vm169_vm2, %v7687_v63, 0.0  ;;  %v1693_v53 = vadd.f32 %v1692_v41, %v1691_v50  ;;  %v12015_v4 = vld [vmem:[#allocation8_spill] sm:$0xff]  ;;  %v12016_v43 = vld [vmem:[#allocation9_spill] sm:$0xff] }
 0x146   :  { %4357 = vmatpush.bf16.msrb.mxu2 %v4352_v22  ;;  %v3087_v32 = vunpack.c.l.b16 %v6187_v49  ;;  %v7962_v16 = vmul.f32 %v12015_v4, %v12015_v4  ;;  %v7966_v22 = vmul.f32 %v12016_v43, %v12016_v43  ;;  %v231_v36 = vadd.f32 %v230_v51, %v229_v25  ;;  %v6679_v41 = vld [vmem:[%s11708_s1 + $0x210] sm:$0xff]  ;;  %4056 = vmatpush.bf16.msrb.mxu1 %v6669_v35  ;;  %v12027_v35 = vld [vmem:[#allocation6_spill] sm:$0xff] }
 0x147   :  { %v7968_v18 = vmul.f32 0.010204081, %v1407_v2  ;;  %v7970_v60 = vpop.f32.mrf.mxu2  ;;  %v232_v49 = vsel %vm169_vm2, %v7828_v12, 0.0  ;;  %v1992_v50 = vsel %vm169_vm2, %v7745_v1, 0.0  ;;  %v1695_v4 = vadd.f32 %v1694_v6, %v1693_v53  ;;  %v12017_v2 = vld [vmem:[#allocation2_spill] sm:$0xff]  ;;  %v12021_v6 = vld [vmem:[#allocation4_spill] sm:$0xff] }
 0x148   :  { %v3094_v63 = vpack.c.b16 %v3087_v32, %v3087_v32  ;;  %v574_v25 = vmul.f32 %v5605_v62, %v573_v38  ;;  %v1991_v51 = vadd.f32 %v1990_v0, %v1989_v31  ;;  %v6668_v62 = vld [vmem:[%s11708_s1 + $0x1e4] sm:$0xff]  ;;  %vm872_vm7 = vweird.f32 %v7919_v40 }
 0x149   :  { %v7955_v26 = vpop.f32.mrf.mxu1  ;;  %v7982_v43 = vsub.f32 %v12017_v2, %v7968_v18  ;;  %v7986_v34 = vsub.f32 %v12019_v29, %v7968_v18  ;;  %v7993_v53 = vsub.f32 %v12021_v6, %v7968_v18  ;;  %v8001_v31 = vsub.f32 %v7519_v59, %v7968_v18  ;;  %v6678_v32 = vld [vmem:[%s11708_s1 + $0x208] sm:$0xff] }
 0x14a   :  { %6308 = vmatmul.msk.bf16.vlgmr.msrb.gmra.mxu3 %vm100_vm1, %v6640_v14  ;;  %v7989_v12 = vpop.eup %6726  ;;  %v7997_v14 = vsub.f32 %v7463_v11, %v7968_v18  ;;  %v1696_v29 = vsel %vm169_vm2, %v7898_v19, 0.0  ;;  %v8016_v59 = vsub.f32 %v7587_v55, %v7968_v18  ;;  %v8020_v38 = vsub.f32 %v7651_v24, %v7968_v18  ;;  %4358 = vmatpush.bf16.msrb.mxu2 %v6679_v41 }
 0x14b   :  { %12018 = vst [vmem:[#allocation2_spill] sm:$0xff] %v7982_v43  ;;  %v867_v11 = vmul.f32 %v7989_v12, %v7919_v40  ;;  %v8031_v2 = vsub.f32 %v12027_v35, %v7968_v18  ;;  %v8035_v55 = vsub.f32 %v7698_v27, %v7968_v18  ;;  %v8039_v24 = vsub.f32 %v7821_v15, %v7968_v18 }
 0x14c   :  { %12020 = vst [vmem:[#allocation3_spill] sm:$0xff] %v7986_v34  ;;  %6172 = vmatmul.msk.bf16.gmra.mxu1 %vm100_vm1, %v2792_v13  ;;  %6243 = vmatmul.msk.bf16.gmra.mxu2 %vm100_vm1, %v3094_v63  ;;  %v6651_v13 = vld [vmem:[%s11709_s0 + $0x278] sm:$0xff]  ;;  %v1096_v63 = vsel %vm169_vm2, %v7926_v33, 0.0  ;;  %v1422_v41 = vmul.f32 %v7982_v43, %v7982_v43  ;;  %v8043_v6 = vperm.slane %v574_v25, 0  ;;  %v1993_v19 = vadd.f32 %v1992_v50, %v1991_v51 }
 0x14d   :  { %12022 = vst [vmem:[#allocation4_spill] sm:$0xff] %v7993_v53  ;;  %v8024_v0 = vpop.f32.mrf.mxu3  ;;  %4057 = vmatpush.bf16.msrb.mxu1 %v6668_v62  ;;  %v868_v1 = vmul.f32 %v7989_v12, %v867_v11  ;;  %v1423_v35 = vmul.f32 %v7986_v34, %v7986_v34  ;;  %v8050_v27 = vsel %vm169_vm2, %v7843_v44, 0.0  ;;  %v1994_v15 = vsel %vm169_vm2, %v7810_v7, 0.0  ;;  %6380 = vmatmul.msk.bf16.gmra.mxu0 %vm100_vm1, %v6651_v13 }
 0x14e   :  { %12023 = vst [vmem:[#allocation59_spill] sm:$0xff] %v7997_v14  ;;  %v8056_v5 = vsub.f32 %v7399_v28, %v7968_v18  ;;  %v1424_v25 = vmul.f32 %v7993_v53, %v7993_v53  ;;  %v8061_v50 = vadd.f32 %v232_v49, %v231_v36  ;;  %v8065_v62 = vsub.f32 %v7419_v17, %v7968_v18  ;;  %v12032_v49 = vld [vmem:[#allocation20_spill] sm:$0xff] }
 0x14f   :  { %12024 = vst [vmem:[#allocation60_spill] sm:$0xff] %v8001_v31  ;;  %v869_v51 = vmul.f32 0.5, %v868_v1  ;;  %v8067_v44 = vadd.f32 %v1696_v29, %v1695_v4  ;;  %4359 = vmatpush.bf16.msrb.mxu2 %v6678_v32  ;;  %v1425_v11 = vmul.f32 %v8031_v2, %v8031_v2  ;;  %v1435_v28 = vsel %vm169_vm2, %v1422_v41, 0.0  ;;  %v8081_v4 = vld [vmem:[%s11710_s3 + $0x1] ss:$0 sm:$0xff]  ;;  %v8085_v32 = vpop.f32.mrf.mxu2 }
 0x150   :  { %12025 = vst [vmem:[#allocation61_spill] sm:$0xff] %v8016_v59  ;;  %v1436_v43 = vsel %vm169_vm2, %v1423_v35, 0.0  ;;  %v1097_v34 = vadd.f32 %v1096_v63, %v7896_v20  ;;  %v1995_v36 = vadd.f32 %v1994_v15, %v1993_v19  ;;  %v582_v17 = vmul.f32 %v8043_v6, %v7473_v56  ;;  %v12033_v19 = vld [vmem:[#allocation18_spill] sm:$0xff] }
 0x151   :  { %12026 = vst [vmem:[#allocation62_spill] sm:$0xff] %v8020_v38  ;;  %v8074_v13 = vpop.f32.mrf.mxu1  ;;  %v1437_v1 = vadd.f32 %v1436_v43, %v1435_v28  ;;  %v580_v29 = vmul.f32 %v8043_v6, %v12032_v49  ;;  %v1426_v20 = vmul.f32 %v8056_v5, %v8056_v5  ;;  %v1438_v63 = vsel %vm169_vm2, %v1424_v25, 0.0 }
 0x152   :  { %12028 = vst [vmem:[#allocation6_spill] sm:$0xff] %v8031_v2  ;;  %v578_v43 = vmul.f32 %v8043_v6, %v12033_v19  ;;  %v8094_v56 = vsel %vm169_vm2, %v7955_v26, 0.0  ;;  %v870_v41 = vsub.f32 1.5, %v869_v51  ;;  %vm873_vm8 = vweird.f32 %v7989_v12  ;;  %v6667_v2 = vld [vmem:[%s11708_s1 + $0x1dc] sm:$0xff] }
 0x153   :  { %12029 = vst [vmem:[#allocation63_spill] sm:$0xff] %v8035_v55  ;;  %v1427_v35 = vmul.f32 %v8065_v62, %v8065_v62  ;;  %v1439_v15 = vadd.f32 %v1438_v63, %v1437_v1  ;;  %v8102_v25 = vsub.f32 %v7754_v8, %v7968_v18  ;;  %v1428_v49 = vmul.f32 %v7997_v14, %v7997_v14  ;;  %v6677_v1 = vld [vmem:[%s11708_s1 + $0x200] sm:$0xff]  ;;  %vm8176_vm9 = vmor %vm872_vm7, %vm873_vm8 }
 0x154   :  { %12030 = vst [vmem:[#allocation64_spill] sm:$0xff] %v8056_v5  ;;  %v1429_v19 = vmul.f32 %v8001_v31, %v8001_v31  ;;  %v1440_v51 = vsel %vm169_vm2, %v1425_v11, 0.0  ;;  %v1430_v8 = vmul.f32 %v8016_v59, %v8016_v59  ;;  %v1431_v18 = vmul.f32 %v8020_v38, %v8020_v38  ;;  %4058 = vmatpush.bf16.msrb.mxu1 %v6667_v2  ;;  %v6666_v2 = vld [vmem:[%s11708_s1 + $0x1d4] sm:$0xff] }
 0x155   :  { %12031 = vst [vmem:[#allocation65_spill] sm:$0xff] %v8065_v62  ;;  %v1073_v28 = vpop.f32.mrf.mxu3  ;;  %v1441_v63 = vadd.f32 %v1440_v51, %v1439_v15  ;;  %v8122_v11 = vmul.f32 %v8035_v55, %v8035_v55  ;;  %v1442_v14 = vsel %vm169_vm2, %v1426_v20, 0.0  ;;  %v598_v31 = vadd.f32 %v8081_v4, %v580_v29  ;;  %4360 = vmatpush.bf16.msrb.mxu2 %v6677_v1  ;;  %v6676_v29 = vld [vmem:[%s11708_s1 + $0x1f8] sm:$0xff] }
 0x156   :  { %12034 = vst [vmem:[#allocation20_spill] sm:$0xff] %v8102_v25  ;;  %v600_v28 = vadd.f32 %v8081_v4, %v582_v17  ;;  %v596_v5 = vadd.f32 %v8081_v4, %v578_v43  ;;  %v8128_v59 = vmul.f32 %v7989_v12, %v870_v41  ;;  %v1444_v15 = vsel %vm169_vm2, %v1427_v35, 0.0  ;;  %v12035_v43 = vld [vmem:[#allocation21_spill] sm:$0xff] }
 0x157   :  { %v1443_v62 = vadd.f32 %v1442_v14, %v1441_v63  ;;  %v1996_v17 = vsel %vm169_vm2, %v7887_v57, 0.0  ;;  %v611_v38 = vmax.f32 %v598_v31, 0.0  ;;  %v583_v20 = vmul.f32 %v8043_v6, %v7485_v10  ;;  %v12036_v31 = vld [vmem:[#allocation19_spill] sm:$0xff] }
 0x158   :  { %v613_v51 = vmax.f32 %v600_v28, 0.0  ;;  %v609_v55 = vmax.f32 %v596_v5, 0.0  ;;  %v581_v41 = vmul.f32 %v8043_v6, %v12035_v43  ;;  %v579_v5 = vmul.f32 %v8043_v6, %v12036_v31  ;;  %4059 = vmatpush.bf16.msrb.mxu1 %v6666_v2  ;;  %v6670_v2 = vld [vmem:[%s11709_s0 + $0x2d8] sm:$0xff] }
 0x159   :  { %v1445_v14 = vadd.f32 %v1444_v15, %v1443_v62  ;;  %v1098_v10 = vsel %vm193_vm3, %v8024_v0, 0.0  ;;  %v1433_v35 = vmul.f32 %v8102_v25, %v8102_v25  ;;  %v8152_v1 = vmul.f32 %v8039_v24, %v8039_v24  ;;  %4565 = vrot.lane.b32.xlu1 %v611_v38, %s6754_s17  ;;  %v8157_v28 = vpop.f32.mrf.mxu1  ;;  %v8161_v25 = vpop.f32.mrf.mxu2  ;;  %v6652_v38 = vld [vmem:[%s11709_s0 + $0x280] sm:$0xff]  ;;  %4361 = vmatpush.bf16.msrb.mxu2 %v6676_v29 }
 0x15a   :  { %4569 = vrot.lane.b32.xlu2 %v613_v51, %s6754_s17  ;;  %v1446_v62 = vsel %vm169_vm2, %v1428_v49, 0.0  ;;  %4561 = vrot.lane.b32.xlu0 %v609_v55, %s6754_s17  ;;  %v1099_v63 = vadd.f32 %v1098_v10, %v1097_v34  ;;  %v1448_v51 = vsel %vm169_vm2, %v1429_v19, 0.0  ;;  %v1997_v43 = vadd.f32 %v1996_v17, %v1995_v36  ;;  %v6641_v49 = vld [vmem:[%s11709_s0 + $0x244] sm:$0xff] }
 0x15b   :  { %v1447_v15 = vadd.f32 %v1446_v62, %v1445_v14  ;;  %v601_v31 = vadd.f32 %v8081_v4, %v583_v20  ;;  %v6660_v34 = vld [vmem:[%s11709_s0 + $0x2a4] sm:$0xff]  ;;  %v1998_v36 = vsel %vm169_vm2, %v7970_v60, 0.0  ;;  %v599_v19 = vadd.f32 %v8081_v4, %v581_v41  ;;  %6309 = vmatmul.msk.bf16.gmra.mxu3 %vm100_vm1, %v6641_v49 }
 0x15c   :  { %v597_v17 = vadd.f32 %v8081_v4, %v579_v5  ;;  %v1100_v20 = vrot.slane %v1099_v63, 4  ;;  %v875_v40 = vsel %vm8176_vm9, %v7989_v12, %v8128_v59  ;;  %v1450_v10 = vsel %vm169_vm2, %v1430_v8, 0.0  ;;  %6450 = vmatmul.msk.bf16.vlgmr.msrb.gmra.mxu1 %vm100_vm1, %v6660_v34  ;;  %6521 = vmatmul.msk.bf16.vlgmr.msrb.gmra.mxu2 %vm100_vm1, %v6670_v2 }
 0x15d   :  { %v1449_v14 = vadd.f32 %v1448_v51, %v1447_v15  ;;  %v1700_v62 = vsel %vm169_vm2, %v8074_v13, 0.0  ;;  %v1452_v41 = vsel %vm169_vm2, %v1431_v18, 0.0  ;;  %v1699_v29 = vadd.f32 %v8094_v56, %v8067_v44  ;;  %6381 = vmatmul.msk.bf16.gmra.mxu0 %vm100_vm1, %v6652_v38 }
 0x15e   :  { %v1101_v5 = vadd.f32 %v1100_v20, %v1099_v63  ;;  %v586_v53 = vmul.f32 %v8043_v6, %v7515_v37  ;;  %v1999_v59 = vadd.f32 %v1998_v36, %v1997_v43  ;;  %v614_v8 = vmax.f32 %v601_v31, 0.0  ;;  %v12039_v63 = vld [vmem:[#allocation24_spill] sm:$0xff] }
 0x15f   :  { %v1451_v12 = vadd.f32 %v1450_v10, %v1449_v14  ;;  %v585_v15 = vmul.f32 %v8043_v6, %v7506_v30  ;;  %v612_v18 = vmax.f32 %v599_v19, 0.0  ;;  %v610_v51 = vmax.f32 %v597_v17, 0.0  ;;  %v5676_v30 = vld [vmem:[%s11711_s2 + $0x2] sm:$0x1] }
 0x160   :  { %v1102_v49 = vrot.slane %v1101_v5, 2  ;;  %v1701_v44 = vadd.f32 %v1700_v62, %v1699_v29  ;;  %v2000_v37 = vsel %vm169_vm2, %v8085_v32, 0.0  ;;  %v584_v38 = vmul.f32 %v8043_v6, %v12039_v63 }
 0x161   :  { %v1453_v56 = vadd.f32 %v1452_v41, %v1451_v12  ;;  %v1702_v43 = vsel %vm193_vm3, %v8157_v28, 0.0  ;;  %v1454_v31 = vsel %vm169_vm2, %v8122_v11, 0.0  ;;  %4567 = vrot.lane.b32.xlu1 %v612_v18, %s6754_s17  ;;  %v604_v55 = vadd.f32 %v8081_v4, %v586_v53  ;;  %v1677_v19 = vpop.f32.mrf.mxu1  ;;  %v8231_v12 = vpop.f32.mrf.mxu2 }
 0x162   :  { %4571 = vrot.lane.b32.xlu2 %v614_v8, %s6754_s17  ;;  %4563 = vrot.lane.b32.xlu0 %v610_v51, %s6754_s17  ;;  %v1103_v34 = vadd.f32 %v1102_v49, %v1101_v5  ;;  %v1703_v36 = vadd.f32 %v1702_v43, %v1701_v44  ;;  %v236_v17 = vsel %vm169_vm2, %v7847_v48, 0.0  ;;  %v603_v2 = vadd.f32 %v8081_v4, %v585_v15  ;;  %v12040_v51 = vld [vmem:[#allocation31_spill] sm:$0xff] }
 0x163   :  { %v1455_v20 = vadd.f32 %v1454_v31, %v1453_v56  ;;  %v2002_v14 = vsel %vm169_vm2, %v8161_v25, 0.0  ;;  %v235_v11 = vadd.f32 %v8050_v27, %v8061_v50  ;;  %v1456_v10 = vsel %vm169_vm2, %v1433_v35, 0.0  ;;  %v12041_v35 = vld [vmem:[#allocation28_spill] sm:$0xff]  ;;  %v12042_v56 = vld [vmem:[#allocation27_spill] sm:$0xff] }
 0x164   :  { %v1104_v62 = vrot.slane %v1103_v34, 1  ;;  %v2001_v41 = vadd.f32 %v2000_v37, %v1999_v59  ;;  %v876_v29 = vmul.f32 %v5676_v30, %v875_v40  ;;  %v1458_v5 = vsel %vm193_vm3, %v8152_v1, 0.0 }
 0x165   :  { %v1457_v53 = vadd.f32 %v1456_v10, %v1455_v20  ;;  %v602_v48 = vadd.f32 %v8081_v4, %v584_v38  ;;  %v617_v15 = vmax.f32 %v604_v55, 0.0  ;;  %v589_v49 = vmul.f32 %v8043_v6, %v12040_v51  ;;  %v12043_v20 = vld [vmem:[#allocation13_spill] sm:$0xff] }
 0x166   :  { %v1105_v8 = vadd.f32 %v1104_v62, %v1103_v34  ;;  %v2003_v18 = vadd.f32 %v2002_v14, %v2001_v41  ;;  %v616_v50 = vmax.f32 %v603_v2, 0.0  ;;  %v588_v59 = vmul.f32 %v8043_v6, %v12041_v35 }
 0x167   :  { %v1459_v27 = vadd.f32 %v1458_v5, %v1457_v53  ;;  %v2004_v40 = vsel %vm193_vm3, %v8231_v12, 0.0  ;;  %v1704_v1 = vrot.slane %v1703_v36, 4  ;;  %v587_v37 = vmul.f32 %v8043_v6, %v12042_v56 }
 0x168   :  { %v8239_v44 = vmul.f32 0.010204081, %v1105_v8  ;;  %v8243_v63 = vadd.f32 %v2004_v40, %v2003_v18  ;;  %v238_v38 = vsel %vm169_vm2, %v7851_v47, 0.0  ;;  %v240_v43 = vsel %vm169_vm2, %v7875_v23, 0.0  ;;  %v12045_v23 = vld [vmem:[#allocation15_spill] sm:$0xff]  ;;  %v12050_v18 = vld [vmem:[#allocation30_spill] sm:$0xff] }
 0x169   :  { %v1460_v30 = vrot.slane %v1459_v27, 4  ;;  %v615_v31 = vmax.f32 %v602_v48, 0.0  ;;  %v237_v34 = vadd.f32 %v236_v17, %v235_v11  ;;  %v8250_v55 = vperm.slane %v876_v29, 0  ;;  %4575 = vrot.lane.b32.xlu1 %v616_v50, %s6754_s17  ;;  %v1979_v48 = vpop.f32.mrf.mxu2 }
 0x16a   :  { %4577 = vrot.lane.b32.xlu2 %v617_v15, %s6754_s17  ;;  %v8254_v19 = vsub.f32 %v7352_v42, %v8239_v44  ;;  %v8258_v2 = vsub.f32 %v12043_v20, %v8239_v44  ;;  %v8263_v14 = vsub.f32 %v12045_v23, %v8239_v44  ;;  %v607_v17 = vadd.f32 %v8081_v4, %v589_v49  ;;  %v12049_v15 = vld [vmem:[#allocation32_spill] sm:$0xff] }
 0x16b   :  { %v1461_v47 = vadd.f32 %v1460_v30, %v1459_v27  ;;  %4573 = vrot.lane.b32.xlu0 %v615_v31, %s6754_s17  ;;  %v606_v11 = vadd.f32 %v8081_v4, %v588_v59  ;;  %v8270_v42 = vsub.f32 %v7740_v58, %v8239_v44  ;;  %v8274_v10 = vsub.f32 %v7881_v39, %v8239_v44  ;;  %v12053_v31 = vld [vmem:[#allocation29_spill] sm:$0xff] }
 0x16c   :  { %12044 = vst [vmem:[#allocation18_spill] sm:$0xff] %v8258_v2  ;;  %v1705_v62 = vadd.f32 %v1704_v1, %v1703_v36  ;;  %v605_v41 = vadd.f32 %v8081_v4, %v587_v37  ;;  %v8279_v53 = vsub.f32 %v7443_v3, %v8239_v44  ;;  %v8283_v5 = vsub.f32 %v8024_v0, %v8239_v44  ;;  %v8296_v3 = vld [vmem:[%s11710_s3 + $0x2] ss:$0 sm:$0xff] }
 0x16d   :  { %12046 = vst [vmem:[#allocation21_spill] sm:$0xff] %v8270_v42  ;;  %v1462_v29 = vrot.slane %v1461_v47, 2  ;;  %v1120_v58 = vmul.f32 %v8254_v19, %v8254_v19  ;;  %v239_v8 = vadd.f32 %v238_v38, %v237_v34  ;;  %v590_v39 = vmul.f32 %v8043_v6, %v12049_v15 }
 0x16e   :  { %12047 = vst [vmem:[#allocation19_spill] sm:$0xff] %v8274_v10  ;;  %v1121_v36 = vmul.f32 %v8258_v2, %v8258_v2  ;;  %v881_v51 = vmul.f32 %v8250_v55, %v12050_v18  ;;  %v8300_v49 = vsub.f32 %v7502_v46, %v8239_v44  ;;  %v1122_v27 = vmul.f32 %v8263_v14, %v8263_v14 }
 0x16f   :  { %12048 = vst [vmem:[#allocation24_spill] sm:$0xff] %v8279_v53  ;;  %v1463_v0 = vadd.f32 %v1462_v29, %v1461_v47  ;;  %v620_v6 = vmax.f32 %v607_v17, 0.0  ;;  %v8306_v50 = vsub.f32 %v7554_v45, %v8239_v44  ;;  %v1706_v35 = vrot.slane %v1705_v62, 2 }
 0x170   :  { %12051 = vst [vmem:[#allocation31_spill] sm:$0xff] %v8300_v49  ;;  %v619_v59 = vmax.f32 %v606_v11, 0.0  ;;  %v618_v40 = vmax.f32 %v605_v41, 0.0  ;;  %v1123_v56 = vmul.f32 %v8279_v53, %v8279_v53  ;;  %v1133_v37 = vsel %vm169_vm2, %v1120_v58, 0.0  ;;  %v8327_v11 = vpop.f32.mrf.mxu0  ;;  %v12055_v41 = vld [vmem:[#allocation47_spill] sm:$0xff] }
 0x171   :  { %12052 = vst [vmem:[#allocation28_spill] sm:$0xff] %v8306_v50  ;;  %v1464_v1 = vrot.slane %v1463_v0, 1  ;;  %v1134_v46 = vsel %vm169_vm2, %v1121_v36, 0.0  ;;  %v241_v38 = vadd.f32 %v240_v43, %v239_v8  ;;  %v899_v45 = vadd.f32 %v8296_v3, %v881_v51 }
 0x172   :  { %4583 = vrot.lane.b32.xlu2 %v620_v6, %s6754_s17  ;;  %v1135_v30 = vadd.f32 %v1134_v46, %v1133_v37  ;;  %4581 = vrot.lane.b32.xlu1 %v619_v59, %s6754_s17  ;;  %v880_v34 = vmul.f32 %v8250_v55, %v12053_v31  ;;  %v8319_v47 = vsub.f32 %v7636_v9, %v8239_v44  ;;  %v1136_v17 = vsel %vm169_vm2, %v1122_v27, 0.0  ;;  %v12058_v46 = vld [vmem:[#allocation10_spill] sm:$0xff] }
 0x173   :  { %v1465_v20 = vadd.f32 %v1464_v1, %v1463_v0  ;;  %v1124_v23 = vmul.f32 %v8300_v49, %v8300_v49  ;;  %4579 = vrot.lane.b32.xlu0 %v618_v40, %s6754_s17  ;;  %v242_v43 = vsel %vm169_vm2, %v7905_v54, 0.0  ;;  %v8331_v29 = vsub.f32 %v12055_v41, %v8239_v44  ;;  %v12142_v49 = vld [vmem:[#allocation8_spill] sm:$0xff] }
 0x174   :  { %12054 = vst [vmem:[#allocation27_spill] sm:$0xff] %v8319_v47  ;;  %v1137_v58 = vadd.f32 %v1136_v17, %v1135_v30  ;;  %v608_v9 = vadd.f32 %v8081_v4, %v590_v39  ;;  %v1125_v8 = vmul.f32 %v8306_v50, %v8306_v50  ;;  %v1138_v15 = vsel %vm169_vm2, %v1123_v56, 0.0 }
 0x175   :  { %12056 = vst [vmem:[#allocation13_spill] sm:$0xff] %v8331_v29  ;;  %v1466_v48 = vmul.f32 0.010204081, %v1465_v20  ;;  %v1707_v36 = vadd.f32 %v1706_v35, %v1705_v62  ;;  %v243_v18 = vadd.f32 %v242_v43, %v241_v38  ;;  %v912_v0 = vmax.f32 %v899_v45, 0.0  ;;  %v12059_v45 = vld [vmem:[#allocation39_spill] sm:$0xff] }
 0x176   :  { %v1139_v51 = vadd.f32 %v1138_v15, %v1137_v58  ;;  %v898_v54 = vadd.f32 %v8296_v3, %v880_v34  ;;  %v1126_v6 = vmul.f32 %v8319_v47, %v8319_v47  ;;  %v1140_v59 = vsel %vm169_vm2, %v1124_v23, 0.0  ;;  %v12060_v43 = vld [vmem:[#allocation11_spill] sm:$0xff]  ;;  %v12062_v15 = vld [vmem:[#allocation14_spill] sm:$0xff] }
 0x177   :  { %v8338_v27 = vadd.f32 1e-05, %v1466_v48  ;;  %v1708_v4 = vrot.slane %v1707_v36, 1  ;;  %v8345_v39 = vsub.f32 %v7806_v21, %v8239_v44  ;;  %v1127_v62 = vmul.f32 %v8331_v29, %v8331_v29 }
 0x178   :  { %v1141_v35 = vadd.f32 %v1140_v59, %v1139_v51  ;;  %v911_v40 = vmax.f32 %v898_v54, 0.0  ;;  %v1142_v1 = vsel %vm169_vm2, %v1125_v8, 0.0  ;;  %v621_v37 = vmax.f32 %v608_v9, 0.0  ;;  %v12064_v51 = vld [vmem:[#allocation17_spill] sm:$0xff]  ;;  %v12066_v54 = vld [vmem:[#allocation12_spill] sm:$0xff] }
 0x179   :  { %12057 = vst [vmem:[#allocation15_spill] sm:$0xff] %v8345_v39  ;;  %6728 = vrsqrt.f32 %v8338_v27  ;;  %v1709_v56 = vadd.f32 %v1708_v4, %v1707_v36  ;;  %v226_v38 = vmul.f32 %v12058_v46, %v12058_v46  ;;  %v244_v21 = vsel %vm169_vm2, %v7962_v16, 0.0 }
 0x17a   :  { %4615 = vrot.lane.b32.xlu2 %v912_v0, %s6755_s29  ;;  %v1143_v30 = vadd.f32 %v1142_v1, %v1141_v35  ;;  %4613 = vrot.lane.b32.xlu1 %v911_v40, %s6755_s29  ;;  %v884_v31 = vmul.f32 %v8250_v55, %v12059_v45  ;;  %v1128_v34 = vmul.f32 %v8270_v42, %v8270_v42  ;;  %v1144_v20 = vsel %vm169_vm2, %v1126_v6, 0.0  ;;  %v8389_v6 = vpop.f32.mrf.mxu0  ;;  %v12141_v42 = vld [vmem:[#allocation62_spill] sm:$0xff] }
 0x17b   :  { %v8362_v23 = vmul.f32 0.010204081, %v1709_v56  ;;  %v2006_v17 = vrot.slane %v8243_v63, 4  ;;  %4585 = vrot.lane.b32.xlu0 %v621_v37, %s6754_s17  ;;  %v8368_v16 = vmul.f32 %v12060_v43, %v12060_v43  ;;  %v245_v41 = vadd.f32 %v244_v21, %v243_v18  ;;  %v6653_v56 = vld [vmem:[%s11709_s0 + $0x288] sm:$0xff] }
 0x17c   :  { %v8372_v58 = vsub.f32 %v7926_v33, %v8239_v44  ;;  %v1145_v9 = vadd.f32 %v1144_v20, %v1143_v30  ;;  %v1129_v48 = vmul.f32 %v8345_v39, %v8345_v39  ;;  %v1146_v8 = vsel %vm169_vm2, %v1127_v62, 0.0  ;;  %v6661_v37 = vld [vmem:[%s11709_s0 + $0x2ac] sm:$0xff]  ;;  %6382 = vmatmul.msk.bf16.gmra.mxu0 %vm100_vm1, %v6653_v56  ;;  %v12071_v56 = vld [vmem:[#allocation38_spill] sm:$0xff] }
 0x17d   :  { %v8379_v36 = vsub.f32 %v12062_v15, %v8362_v23  ;;  %v8383_v0 = vsub.f32 %v12064_v51, %v8362_v23  ;;  %v228_v18 = vmul.f32 %v12066_v54, %v12066_v54  ;;  %v246_v33 = vsel %vm169_vm2, %v7966_v22, 0.0  ;;  %v6642_v22 = vld [vmem:[%s11709_s0 + $0x24c] sm:$0xff]  ;;  %6451 = vmatmul.msk.bf16.gmra.mxu1 %vm100_vm1, %v6661_v37 }
 0x17e   :  { %12061 = vst [vmem:[#allocation32_spill] sm:$0xff] %v8372_v58  ;;  %v1147_v44 = vadd.f32 %v1146_v8, %v1145_v9  ;;  %v902_v59 = vadd.f32 %v8296_v3, %v884_v31  ;;  %v1130_v62 = vmul.f32 %v8274_v10, %v8274_v10  ;;  %v1148_v35 = vsel %vm169_vm2, %v1128_v34, 0.0  ;;  %6310 = vmatmul.msk.bf16.gmra.mxu3 %vm100_vm1, %v6642_v22  ;;  %v12069_v51 = vld [vmem:[#allocation23_spill] sm:$0xff] }
 0x17f   :  { %12063 = vst [vmem:[#allocation30_spill] sm:$0xff] %v8379_v36  ;;  %v6729_v4 = vpop.eup %6728  ;;  %v8397_v40 = vsub.f32 %v7955_v26, %v8362_v23  ;;  %v2007_v1 = vadd.f32 %v2006_v17, %v8243_v63  ;;  %v247_v21 = vadd.f32 %v246_v33, %v245_v41  ;;  %v1131_v26 = vmul.f32 %v8372_v58, %v8372_v58  ;;  %v6671_v63 = vld [vmem:[%s11709_s0 + $0x2e0] sm:$0xff]  ;;  %v12130_v10 = vld [vmem:[#allocation59_spill] sm:$0xff] }
 0x180   :  { %12065 = vst [vmem:[#allocation29_spill] sm:$0xff] %v8383_v0  ;;  %v1471_v30 = vmul.f32 %v6729_v4, %v8338_v27  ;;  %v1149_v45 = vadd.f32 %v1148_v35, %v1147_v44  ;;  %v1150_v31 = vsel %vm169_vm2, %v1129_v48, 0.0  ;;  %v8418_v34 = vsub.f32 %v8157_v28, %v8362_v23  ;;  %6522 = vmatmul.msk.bf16.gmra.mxu2 %vm100_vm1, %v6671_v63  ;;  %v12073_v63 = vld [vmem:[#allocation26_spill] sm:$0xff]  ;;  %v12140_v39 = vld [vmem:[#allocation63_spill] sm:$0xff] }
 0x181   :  { %12067 = vst [vmem:[#allocation47_spill] sm:$0xff] %v8397_v40  ;;  %v1724_v20 = vmul.f32 %v8379_v36, %v8379_v36  ;;  %v1725_v17 = vmul.f32 %v8383_v0, %v8383_v0  ;;  %v1132_v9 = vmul.f32 %v8283_v5, %v8283_v5  ;;  %v915_v48 = vmax.f32 %v902_v59, 0.0 }
 0x182   :  { %12068 = vst [vmem:[#allocation10_spill] sm:$0xff] %v8418_v34  ;;  %v1472_v41 = vmul.f32 %v6729_v4, %v1471_v30  ;;  %v1151_v8 = vadd.f32 %v1150_v31, %v1149_v45  ;;  %v248_v15 = vsel %vm169_vm2, %v226_v38, 0.0  ;;  %v1152_v28 = vsel %vm169_vm2, %v1130_v62, 0.0  ;;  %v12072_v31 = vld [vmem:[#allocation34_spill] sm:$0xff] }
 0x183   :  { %v8432_v33 = vsub.f32 %v12069_v51, %v8362_v23  ;;  %v2008_v44 = vrot.slane %v2007_v1, 2  ;;  %v249_v35 = vadd.f32 %v248_v15, %v247_v21  ;;  %4621 = vrot.lane.b32.xlu2 %v915_v48, %s6755_s29  ;;  %v883_v59 = vmul.f32 %v8250_v55, %v12071_v56 }
 0x184   :  { %v1473_v22 = vmul.f32 0.5, %v1472_v41  ;;  %v1153_v30 = vadd.f32 %v1152_v28, %v1151_v8  ;;  %v1154_v38 = vsel %vm169_vm2, %v1131_v26, 0.0  ;;  %v1737_v62 = vsel %vm169_vm2, %v1724_v20, 0.0 }
 0x185   :  { %12070 = vst [vmem:[#allocation39_spill] sm:$0xff] %v8432_v33  ;;  %v1738_v45 = vsel %vm169_vm2, %v1725_v17, 0.0  ;;  %v882_v51 = vmul.f32 %v8250_v55, %v12072_v31  ;;  %vm1477_vm10 = vweird.f32 %v6729_v4  ;;  %v1156_v41 = vsel %vm193_vm3, %v1132_v9, 0.0  ;;  %v5818_v17 = vld [vmem:[%s11711_s2 + $0x4] sm:$0x1] }
 0x186   :  { %v1474_v37 = vsub.f32 1.5, %v1473_v22  ;;  %v1155_v21 = vadd.f32 %v1154_v38, %v1153_v30  ;;  %vm1476_vm11 = vweird.f32 %v8338_v27  ;;  %v8448_v8 = vsub.f32 %v12073_v63, %v8362_v23  ;;  %v8455_v22 = vpop.f32.mrf.mxu0  ;;  %v12077_v63 = vld [vmem:[#allocation42_spill] sm:$0xff] }
 0x187   :  { %v1726_v26 = vmul.f32 %v8432_v33, %v8432_v33  ;;  %v2009_v20 = vadd.f32 %v2008_v44, %v2007_v1  ;;  %v1739_v28 = vadd.f32 %v1738_v45, %v1737_v62  ;;  %v901_v9 = vadd.f32 %v8296_v3, %v883_v59  ;;  %vm1478_vm12 = vmor %vm1476_vm11, %vm1477_vm10  ;;  %v12075_v44 = vld [vmem:[#allocation44_spill] sm:$0xff] }
 0x188   :  { %12074 = vst [vmem:[#allocation11_spill] sm:$0xff] %v8448_v8  ;;  %v1475_v48 = vmul.f32 %v6729_v4, %v1474_v37  ;;  %v1157_v15 = vadd.f32 %v1156_v41, %v1155_v21  ;;  %v250_v27 = vsel %vm169_vm2, %v8368_v16, 0.0  ;;  %v252_v30 = vsel %vm193_vm3, %v228_v18, 0.0 }
 0x189   :  { %v900_v1 = vadd.f32 %v8296_v3, %v882_v51  ;;  %v887_v56 = vmul.f32 %v8250_v55, %v12075_v44  ;;  %v251_v38 = vadd.f32 %v250_v27, %v249_v35  ;;  %v8467_v62 = vsub.f32 %v7601_v61, %v8362_v23 }
 0x18a   :  { %v1479_v31 = vsel %vm1478_vm12, %v6729_v4, %v1475_v48  ;;  %v1158_v37 = vrot.slane %v1157_v15, 4  ;;  %v1727_v16 = vmul.f32 %v8448_v8, %v8448_v8  ;;  %v1740_v18 = vsel %vm169_vm2, %v1726_v26, 0.0 }
 0x18b   :  { %12076 = vst [vmem:[#allocation14_spill] sm:$0xff] %v8467_v62  ;;  %v1480_v59 = vmul.f32 %v5818_v17, %v1479_v31  ;;  %v2010_v45 = vrot.slane %v2009_v20, 1  ;;  %v1741_v41 = vadd.f32 %v1740_v18, %v1739_v28  ;;  %v914_v51 = vmax.f32 %v901_v9, 0.0  ;;  %v12078_v31 = vld [vmem:[#allocation43_spill] sm:$0xff] }
 0x18c   :  { %v1159_v21 = vadd.f32 %v1158_v37, %v1157_v15  ;;  %v886_v44 = vmul.f32 %v8250_v55, %v12077_v63  ;;  %v913_v48 = vmax.f32 %v900_v1, 0.0  ;;  %v905_v61 = vadd.f32 %v8296_v3, %v887_v56 }
 0x18d   :  { %v8474_v35 = vperm.slane %v1480_v59, 0  ;;  %v2011_v4 = vadd.f32 %v2010_v45, %v2009_v20  ;;  %v253_v27 = vadd.f32 %v252_v30, %v251_v38  ;;  %v8479_v8 = vsub.f32 %v12078_v31, %v8362_v23  ;;  %4619 = vrot.lane.b32.xlu1 %v914_v51, %s6755_s29  ;;  %v12080_v38 = vld [vmem:[#allocation16_spill] sm:$0xff]  ;;  %v12082_v59 = vld [vmem:[#allocation22_spill] sm:$0xff] }
 0x18e   :  { %v1160_v17 = vrot.slane %v1159_v21, 2  ;;  %v1728_v26 = vmul.f32 %v8467_v62, %v8467_v62  ;;  %v1742_v20 = vsel %vm169_vm2, %v1727_v16, 0.0  ;;  %4617 = vrot.lane.b32.xlu0 %v913_v48, %s6755_s29  ;;  %v918_v9 = vmax.f32 %v905_v61, 0.0  ;;  %v8502_v45 = vpop.f32.mrf.mxu0  ;;  %v12086_v61 = vld [vmem:[#allocation25_spill] sm:$0xff] }
 0x18f   :  { %12079 = vst [vmem:[#allocation17_spill] sm:$0xff] %v8479_v8  ;;  %v8486_v15 = vmul.f32 %v8474_v35, %v8039_v24  ;;  %v8489_v28 = vmul.f32 0.010204081, %v2011_v4  ;;  %v1743_v1 = vadd.f32 %v1742_v20, %v1741_v41  ;;  %v904_v56 = vadd.f32 %v8296_v3, %v886_v44 }
 0x190   :  { %v1161_v30 = vadd.f32 %v1160_v17, %v1159_v21  ;;  %4627 = vrot.lane.b32.xlu2 %v918_v9, %s6755_s29  ;;  %v254_v24 = vrot.slane %v253_v27, 4  ;;  %v8506_v21 = vsub.f32 %v7707_v52, %v8362_v23  ;;  %v1729_v41 = vmul.f32 %v8479_v8, %v8479_v8 }
 0x191   :  { %v8495_v37 = vsub.f32 %v12080_v38, %v8489_v28  ;;  %v8499_v18 = vsub.f32 %v12082_v59, %v8489_v28  ;;  %v1744_v51 = vsel %vm169_vm2, %v1728_v26, 0.0  ;;  %v8513_v4 = vsub.f32 %v8085_v32, %v8489_v28  ;;  %v12089_v32 = vld [vmem:[#allocation53_spill] sm:$0xff] }
 0x192   :  { %v1162_v16 = vrot.slane %v1161_v30, 1  ;;  %12084 = vst [vmem:[#allocation38_spill] sm:$0xff] %v8506_v21  ;;  %v1745_v44 = vadd.f32 %v1744_v51, %v1743_v1  ;;  %v917_v48 = vmax.f32 %v904_v56, 0.0  ;;  %v8517_v17 = vsub.f32 %v12086_v61, %v8489_v28  ;;  %v12091_v56 = vld [vmem:[#allocation40_spill] sm:$0xff] }
 0x193   :  { %12081 = vst [vmem:[#allocation12_spill] sm:$0xff] %v8495_v37  ;;  %v8521_v52 = vsub.f32 %v8231_v12, %v8489_v28  ;;  %v2026_v31 = vmul.f32 %v8495_v37, %v8495_v37  ;;  %v2027_v26 = vmul.f32 %v8499_v18, %v8499_v18  ;;  %v255_v20 = vadd.f32 %v254_v24, %v253_v27  ;;  %v12092_v27 = vld [vmem:[#allocation33_spill] sm:$0xff] }
 0x194   :  { %12083 = vst [vmem:[#allocation23_spill] sm:$0xff] %v8499_v18  ;;  %v1163_v63 = vadd.f32 %v1162_v16, %v1161_v30  ;;  %v8530_v30 = vsub.f32 %v12089_v32, %v8362_v23  ;;  %v1730_v1 = vmul.f32 %v8506_v21, %v8506_v21  ;;  %v1746_v12 = vsel %vm169_vm2, %v1729_v41, 0.0  ;;  %v12094_v41 = vld [vmem:[#allocation57_spill] sm:$0xff] }
 0x195   :  { %12085 = vst [vmem:[#allocation34_spill] sm:$0xff] %v8513_v4  ;;  %4625 = vrot.lane.b32.xlu1 %v917_v48, %s6755_s29  ;;  %v885_v38 = vmul.f32 %v8250_v55, %v12091_v56  ;;  %v1747_v16 = vadd.f32 %v1746_v12, %v1745_v44  ;;  %v8541_v24 = vsub.f32 %v12092_v27, %v8489_v28  ;;  %v2040_v48 = vsel %vm169_vm2, %v2027_v26, 0.0  ;;  %v12096_v27 = vld [vmem:[#allocation35_spill] sm:$0xff]  ;;  %v12097_v26 = vld [vmem:[#allocation41_spill] sm:$0xff] }
 0x196   :  { %12087 = vst [vmem:[#allocation26_spill] sm:$0xff] %v8517_v17  ;;  %v1164_v9 = vmul.f32 0.010204081, %v1163_v63  ;;  %v2028_v51 = vmul.f32 %v8517_v17, %v8517_v17  ;;  %v2039_v63 = vsel %vm169_vm2, %v2026_v31, 0.0  ;;  %v256_v61 = vrot.slane %v255_v20, 2  ;;  %v8562_v37 = vpop.f32.mrf.mxu0 }
 0x197   :  { %12088 = vst [vmem:[#allocation44_spill] sm:$0xff] %v8521_v52  ;;  %v8550_v32 = vsub.f32 %v12094_v41, %v8362_v23  ;;  %v1731_v44 = vmul.f32 %v8530_v30, %v8530_v30  ;;  %v1748_v12 = vsel %vm169_vm2, %v1730_v1, 0.0  ;;  %v903_v56 = vadd.f32 %v8296_v3, %v885_v38  ;;  %v12099_v1 = vld [vmem:[#allocation58_spill] sm:$0xff] }
 0x198   :  { %12090 = vst [vmem:[#allocation42_spill] sm:$0xff] %v8530_v30  ;;  %v8537_v59 = vadd.f32 1e-05, %v1164_v9  ;;  %v2041_v9 = vadd.f32 %v2040_v48, %v2039_v63  ;;  %v890_v31 = vmul.f32 %v8250_v55, %v12096_v27  ;;  %v1749_v18 = vadd.f32 %v1748_v12, %v1747_v16 }
 0x199   :  { %12093 = vst [vmem:[#allocation43_spill] sm:$0xff] %v8541_v24  ;;  %v8560_v17 = vsub.f32 %v12097_v26, %v8489_v28  ;;  %v2029_v63 = vmul.f32 %v8541_v24, %v8541_v24  ;;  %v2042_v48 = vsel %vm169_vm2, %v2028_v51, 0.0  ;;  %v257_v41 = vadd.f32 %v256_v61, %v255_v20  ;;  %v12101_v24 = vld [vmem:[#allocation48_spill] sm:$0xff]  ;;  %v12103_v51 = vld [vmem:[#allocation46_spill] sm:$0xff] }
 0x19a   :  { %6730 = vrsqrt.f32 %v8537_v59  ;;  %12095 = vst [vmem:[#allocation16_spill] sm:$0xff] %v8550_v32  ;;  %v8569_v30 = vsub.f32 %v12099_v1, %v8362_v23  ;;  %v2043_v38 = vadd.f32 %v2042_v48, %v2041_v9  ;;  %v1732_v16 = vmul.f32 %v8550_v32, %v8550_v32 }
 0x19b   :  { %12098 = vst [vmem:[#allocation22_spill] sm:$0xff] %v8560_v17  ;;  %v1750_v12 = vsel %vm169_vm2, %v1731_v44, 0.0  ;;  %v916_v27 = vmax.f32 %v903_v56, 0.0  ;;  %v908_v26 = vadd.f32 %v8296_v3, %v890_v31  ;;  %v8577_v62 = vsub.f32 %v12101_v24, %v8489_v28  ;;  %v12104_v56 = vld [vmem:[#allocation45_spill] sm:$0xff] }
 0x19c   :  { %12100 = vst [vmem:[#allocation25_spill] sm:$0xff] %v8569_v30  ;;  %v1751_v21 = vadd.f32 %v1750_v12, %v1749_v18  ;;  %v2030_v20 = vmul.f32 %v8560_v17, %v8560_v17  ;;  %v889_v61 = vmul.f32 %v8250_v55, %v12103_v51  ;;  %v2044_v48 = vsel %vm169_vm2, %v2029_v63, 0.0  ;;  %v8590_v12 = vpop.f32.mrf.mxu3 }
 0x19d   :  { %12102 = vst [vmem:[#allocation53_spill] sm:$0xff] %v8577_v62  ;;  %4623 = vrot.lane.b32.xlu0 %v916_v27, %s6755_s29  ;;  %v921_v44 = vmax.f32 %v908_v26, 0.0  ;;  %v888_v18 = vmul.f32 %v8250_v55, %v12104_v56  ;;  %v258_v31 = vrot.slane %v257_v41, 1  ;;  %v1733_v24 = vmul.f32 %v8569_v30, %v8569_v30  ;;  %v12106_v27 = vld [vmem:[#allocation37_spill] sm:$0xff]  ;;  %v12107_v30 = vld [vmem:[#allocation50_spill] sm:$0xff] }
 0x19e   :  { %v2045_v1 = vadd.f32 %v2044_v48, %v2043_v38  ;;  %12105 = vst [vmem:[#allocation40_spill] sm:$0xff] %v8590_v12  ;;  %v907_v17 = vadd.f32 %v8296_v3, %v889_v61  ;;  %v1752_v32 = vsel %vm169_vm2, %v1732_v16, 0.0  ;;  %v892_v26 = vmul.f32 %v8250_v55, %v12106_v27 }
 0x19f   :  { %4633 = vrot.lane.b32.xlu2 %v921_v44, %s6755_s29  ;;  %v906_v63 = vadd.f32 %v8296_v3, %v888_v18  ;;  %v1753_v56 = vadd.f32 %v1752_v32, %v1751_v21  ;;  %v8600_v38 = vsub.f32 %v12107_v30, %v8489_v28  ;;  %v2031_v61 = vmul.f32 %v8577_v62, %v8577_v62  ;;  %v8610_v21 = vpop.f32.mrf.mxu0  ;;  %v12110_v32 = vld [vmem:[#allocation36_spill] sm:$0xff] }
 0x1a0   :  { %v6731_v8 = vpop.eup %6730  ;;  %v920_v0 = vmax.f32 %v907_v17, 0.0  ;;  %v259_v16 = vadd.f32 %v258_v31, %v257_v41  ;;  %v8607_v48 = vsub.f32 %v8074_v13, %v8362_v23  ;;  %v1754_v44 = vsel %vm169_vm2, %v1733_v24, 0.0 }
 0x1a1   :  { %v1169_v9 = vmul.f32 %v6731_v8, %v8537_v59  ;;  %12108 = vst [vmem:[#allocation33_spill] sm:$0xff] %v8600_v38  ;;  %vm1175_vm13 = vweird.f32 %v6731_v8  ;;  %v919_v30 = vmax.f32 %v906_v63, 0.0  ;;  %v1734_v41 = vmul.f32 %v8397_v40, %v8397_v40 }
 0x1a2   :  { %12109 = vst [vmem:[#allocation57_spill] sm:$0xff] %v8607_v48  ;;  %4631 = vrot.lane.b32.xlu1 %v920_v0, %s6755_s29  ;;  %v8619_v13 = vsub.f32 %v7810_v7, %v8489_v28  ;;  %v910_v23 = vadd.f32 %v8296_v3, %v892_v26  ;;  %v5747_v0 = vld [vmem:[%s11711_s2 + $0x3] sm:$0x1]  ;;  %vm1174_vm14 = vweird.f32 %v8537_v59  ;;  %v2048_v31 = vsel %vm169_vm2, %v2031_v61, 0.0 }
 0x1a3   :  { %v1170_v51 = vmul.f32 %v6731_v8, %v1169_v9  ;;  %v2046_v9 = vsel %vm169_vm2, %v2030_v20, 0.0  ;;  %v1755_v20 = vadd.f32 %v1754_v44, %v1753_v56  ;;  %vm1176_vm15 = vmor %vm1174_vm14, %vm1175_vm13  ;;  %v260_v7 = vmul.f32 0.010204081, %v259_v16 }
 0x1a4   :  { %v2047_v18 = vadd.f32 %v2046_v9, %v2045_v1  ;;  %12111 = vst [vmem:[#allocation35_spill] sm:$0xff] %v8619_v13  ;;  %v1735_v26 = vmul.f32 %v8607_v48, %v8607_v48  ;;  %v1756_v56 = vsel %vm169_vm2, %v1734_v41, 0.0  ;;  %v8634_v59 = vpop.f32.mrf.mxu3  ;;  %v923_v9 = vmax.f32 %v910_v23, 0.0 }
 0x1a5   :  { %v1171_v33 = vmul.f32 0.5, %v1170_v51  ;;  %v891_v51 = vmul.f32 %v8250_v55, %v12110_v32  ;;  %v2032_v55 = vmul.f32 %v8600_v38, %v8600_v38  ;;  %4629 = vrot.lane.b32.xlu0 %v919_v30, %s6755_s29  ;;  %12112 = vst [vmem:[#allocation41_spill] sm:$0xff] %v8634_v59  ;;  %v1757_v44 = vadd.f32 %v1756_v56, %v1755_v20 }
 0x1a6   :  { %v2049_v24 = vadd.f32 %v2048_v31, %v2047_v18  ;;  %v8638_v61 = vsub.f32 %v7887_v57, %v8489_v28  ;;  %v2033_v16 = vmul.f32 %v8619_v13, %v8619_v13  ;;  %v8648_v30 = vadd.f32 1e-05, %v260_v7  ;;  %v6654_v7 = vld [vmem:[%s11709_s0 + $0x290] sm:$0xff] }
 0x1a7   :  { %v1172_v17 = vsub.f32 1.5, %v1171_v33  ;;  %v909_v63 = vadd.f32 %v8296_v3, %v891_v51  ;;  %v2585_v32 = vsel %vm169_vm2, %v8327_v11, 0.0  ;;  %v2586_v57 = vsel %vm169_vm2, %v8389_v6, 0.0  ;;  %6383 = vmatmul.msk.bf16.gmra.mxu0 %vm100_vm1, %v6654_v7 }
 0x1a8   :  { %12113 = vst [vmem:[#allocation58_spill] sm:$0xff] %v8638_v61  ;;  %v1736_v20 = vmul.f32 %v8418_v34, %v8418_v34  ;;  %v1758_v23 = vsel %vm169_vm2, %v1735_v26, 0.0  ;;  %v2034_v31 = vmul.f32 %v8638_v61, %v8638_v61  ;;  %6732 = vrsqrt.f32 %v8648_v30  ;;  %v12122_v61 = vld [vmem:[#allocation2_spill] sm:$0xff] }
 0x1a9   :  { %v1173_v33 = vmul.f32 %v6731_v8, %v1172_v17  ;;  %v8645_v17 = vpop.f32.mrf.mxu1  ;;  %v922_v51 = vmax.f32 %v909_v63, 0.0  ;;  %v2588_v26 = vsel %vm169_vm2, %v8455_v22, 0.0  ;;  %v2592_v7 = vsel %vm169_vm2, %v8562_v37, 0.0 }
 0x1aa   :  { %12114 = vst [vmem:[#allocation48_spill] sm:$0xff] %v8645_v17  ;;  %4637 = vrot.lane.b32.xlu1 %v923_v9, %s6755_s29  ;;  %v1760_v56 = vsel %vm193_vm3, %v1736_v20, 0.0  ;;  %v8702_v20 = vsub.f32 %v8161_v25, %v8489_v28  ;;  %v2594_v25 = vsel %vm169_vm2, %v8610_v21, 0.0  ;;  %v1484_v38 = vmul.f32 %v8474_v35, %v12122_v61 }
 0x1ab   :  { %v1177_v1 = vsel %vm1176_vm15, %v6731_v8, %v1173_v33  ;;  %v2050_v8 = vsel %vm169_vm2, %v2032_v55, 0.0  ;;  %v1759_v33 = vadd.f32 %v1758_v23, %v1757_v44  ;;  %v8665_v55 = vsub.f32 %v7970_v60, %v8489_v28  ;;  %v8720_v28 = vld [vmem:[%s11710_s3 + $0x4] ss:$0 sm:$0xff] }
 0x1ac   :  { %v1178_v27 = vmul.f32 %v5747_v0, %v1177_v1  ;;  %v2051_v18 = vadd.f32 %v2050_v8, %v2049_v24  ;;  %v8661_v0 = vpop.f32.mrf.mxu0  ;;  %v2052_v24 = vsel %vm169_vm2, %v2033_v16, 0.0  ;;  %v6662_v1 = vld [vmem:[%s11709_s0 + $0x2b4] sm:$0xff]  ;;  %v2587_v60 = vadd.f32 %v2586_v57, %v2585_v32  ;;  %v8694_v32 = vpop.f32.mrf.mxu3  ;;  %12119 = vst [vmem:[#allocation36_spill] sm:$0xff] %v8702_v20 }
 0x1ad   :  { %12116 = vst [vmem:[#allocation45_spill] sm:$0xff] %v8665_v55  ;;  %4635 = vrot.lane.b32.xlu0 %v922_v51, %s6755_s29  ;;  %6452 = vmatmul.msk.bf16.gmra.mxu1 %vm100_vm1, %v6662_v1  ;;  %v1761_v9 = vadd.f32 %v1760_v56, %v1759_v33  ;;  %v2035_v44 = vmul.f32 %v8665_v55, %v8665_v55  ;;  %v2054_v16 = vsel %vm169_vm2, %v2034_v31, 0.0  ;;  %v8696_v57 = vpop.f32.mrf.mxu2  ;;  %v2590_v51 = vsel %vm169_vm2, %v8502_v45, 0.0  ;;  %v12121_v55 = vld [vmem:[#allocation3_spill] sm:$0xff]  ;;  %s6757_s29 = smov 24  }
 0x1ae   :  { %v8643_v3 = vperm.slane %v1178_v27, 0  ;;  %v2053_v63 = vadd.f32 %v2052_v24, %v2051_v18  ;;  %v6672_v27 = vld [vmem:[%s11709_s0 + $0x2e8] sm:$0xff]  ;;  %v2589_v8 = vadd.f32 %v2588_v26, %v2587_v60  ;;  %12117 = vst [vmem:[#allocation37_spill] sm:$0xff] %v8694_v32  ;;  %v8706_v33 = vpop.eup %6732  ;;  %v2036_v31 = vmul.f32 %v8513_v4, %v8513_v4 }
 0x1af   :  { %6523 = vmatmul.msk.bf16.gmra.mxu2 %vm100_vm1, %v6672_v27  ;;  %12118 = vst [vmem:[#allocation50_spill] sm:$0xff] %v8696_v57  ;;  %v1762_v24 = vrot.slane %v1761_v9, 4  ;;  %v264_v27 = vmul.f32 %v8706_v33, %v8648_v30  ;;  %v2037_v26 = vmul.f32 %v8702_v20, %v8702_v20  ;;  %v1485_v13 = vmul.f32 %v8474_v35, %v12121_v55 }
 0x1b0   :  { %v8656_v41 = vmul.f32 %v8643_v3, %v8283_v5  ;;  %v6643_v5 = vld [vmem:[%s11709_s0 + $0x254] sm:$0xff]  ;;  %v2055_v18 = vadd.f32 %v2054_v16, %v2053_v63  ;;  %v2591_v63 = vadd.f32 %v2590_v51, %v2589_v8  ;;  %v2058_v16 = vsel %vm169_vm2, %v2036_v31, 0.0 }
 0x1b1   :  { %6311 = vmatmul.msk.bf16.gmra.mxu3 %vm100_vm1, %v6643_v5  ;;  %v8704_v23 = vpop.f32.mrf.mxu1  ;;  %v2056_v5 = vsel %vm169_vm2, %v2035_v44, 0.0  ;;  %v1763_v44 = vadd.f32 %v1762_v24, %v1761_v9  ;;  %v2596_v8 = vsel %vm169_vm2, %v8661_v0, 0.0  ;;  %v6644_v9 = vld [vmem:[%s11709_s0 + $0x25c] sm:$0xff]  ;;  %v2060_v20 = vsel %vm169_vm2, %v2037_v26, 0.0 }
 0x1b2   :  { %12115 = vst [vmem:[#allocation46_spill] sm:$0xff] %v8656_v41  ;;  %v2057_v60 = vadd.f32 %v2056_v5, %v2055_v18  ;;  %v2593_v56 = vadd.f32 %v2592_v7, %v2591_v63  ;;  %v12120_v18 = vld [vmem:[#allocation4_spill] sm:$0xff]  ;;  %v6655_v24 = vld [vmem:[%s11709_s0 + $0x298] sm:$0xff]  ;;  %vm270_vm0 = vweird.f32 %v8706_v33  ;;  %v1490_v58 = vmul.f32 %v8474_v35, %v12130_v10 }
 0x1b3   :  { %v1486_v51 = vmul.f32 %v8474_v35, %v12120_v18  ;;  %v1502_v18 = vadd.f32 %v8720_v28, %v1484_v38  ;;  %vm269_vm4 = vweird.f32 %v8648_v30  ;;  %v6674_v30 = vld [vmem:[%s11709_s0 + $0x2f8] sm:$0xff]  ;;  %v1494_v29 = vmul.f32 %v8474_v35, %v12140_v39 }
 0x1b4   :  { %v8713_v1 = vpop.f32.mrf.mxu0  ;;  %v2059_v5 = vadd.f32 %v2058_v16, %v2057_v60  ;;  %v2595_v4 = vadd.f32 %v2594_v25, %v2593_v56  ;;  %v265_v60 = vmul.f32 %v8706_v33, %v264_v27  ;;  %v8745_v63 = vpop.f32.mrf.mxu3  ;;  %v6663_v25 = vld [vmem:[%s11709_s0 + $0x2bc] sm:$0xff]  ;;  %v6673_v56 = vld [vmem:[%s11709_s0 + $0x2f0] sm:$0xff]  ;;  %v1503_v16 = vadd.f32 %v8720_v28, %v1485_v13  ;;  %vm271_vm5 = vmor %vm269_vm4, %vm270_vm0 }
 0x1b5   :  { %v2598_v7 = vsel %vm169_vm2, %v8713_v1, 0.0  ;;  %v1504_v31 = vadd.f32 %v8720_v28, %v1486_v51  ;;  %v8747_v55 = vpop.f32.mrf.mxu2  ;;  %v1764_v51 = vrot.slane %v1763_v44, 2  ;;  %v2038_v27 = vmul.f32 %v8521_v52, %v8521_v52  ;;  %v12124_v13 = vld [vmem:[#allocation65_spill] sm:$0xff] }
 0x1b6   :  { %12123 = vst [vmem:[#allocation4_spill] sm:$0xff] %v8747_v55  ;;  %v2597_v61 = vadd.f32 %v2596_v8, %v2595_v4  ;;  %v2061_v8 = vadd.f32 %v2060_v20, %v2059_v5  ;;  %v1516_v38 = vmax.f32 %v1503_v16, 0.0  ;;  %v1489_v52 = vmul.f32 %v8474_v35, %v12124_v13  ;;  %v12128_v13 = vld [vmem:[#allocation61_spill] sm:$0xff] }
 0x1b7   :  { %v1517_v4 = vmax.f32 %v1504_v31, 0.0  ;;  %6384 = vmatmul.msk.bf16.gmra.mxu0 %vm100_vm1, %v6655_v24  ;;  %v266_v36 = vmul.f32 0.5, %v265_v60  ;;  %v1515_v20 = vmax.f32 %v1502_v18, 0.0  ;;  %v1765_v5 = vadd.f32 %v1764_v51, %v1763_v44  ;;  %v12126_v31 = vld [vmem:[#allocation6_spill] sm:$0xff] }
 0x1b8   :  { %v2599_v40 = vadd.f32 %v2598_v7, %v2597_v61  ;;  %v2062_v7 = vsel %vm193_vm3, %v2038_v27, 0.0  ;;  %4719 = vrot.lane.b32.xlu1 %v1516_v38, %s6756_s7  ;;  %v1487_v60 = vmul.f32 %v8474_v35, %v12126_v31  ;;  %v1507_v44 = vadd.f32 %v8720_v28, %v1489_v52 }
 0x1b9   :  { %v8762_v48 = vpop.f32.mrf.mxu1  ;;  %4721 = vrot.lane.b32.xlu2 %v1517_v4, %s6756_s7  ;;  %4717 = vrot.lane.b32.xlu0 %v1515_v20, %s6756_s7  ;;  %v1766_v16 = vrot.slane %v1765_v5, 1  ;;  %v1492_v52 = vmul.f32 %v8474_v35, %v12128_v13  ;;  %v1493_v47 = vmul.f32 %v8474_v35, %v12141_v42  ;;  %vm5289_vm12 = vcmask 130048  }
 0x1bc   :  { %v8760_v62 = vpop.f32.mrf.mxu0  ;;  %v8788_v27 = vpop.f32.mrf.mxu3 }
 0x1bd   :  { %v2600_v41 = vsel %vm169_vm2, %v8760_v62, 0.0  ;;  %6453 = vmatmul.msk.bf16.gmra.mxu1 %vm100_vm1, %v6663_v25  ;;  %v267_v25 = vsub.f32 1.5, %v266_v36  ;;  %v8790_v4 = vpop.f32.mrf.mxu2 }
 0x1be   :  { %v2601_v26 = vadd.f32 %v2600_v41, %v2599_v40  ;;  %v2063_v40 = vadd.f32 %v2062_v7, %v2061_v8  ;;  %v6329_v41 = vld [vmem:[%s11709_s0 + $0x2a0] sm:$0x1]  ;;  %12127 = vst [vmem:[#allocation3_spill] sm:$0xff] %v8790_v4  ;;  %v1520_v7 = vmax.f32 %v1507_v44, 0.0  ;;  %v6645_v44 = vld [vmem:[%s11709_s0 + $0x264] sm:$0xff] }
 0x1bf   :  { %6524 = vmatmul.msk.bf16.gmra.mxu2 %vm100_vm1, %v6673_v56  ;;  %v1505_v56 = vadd.f32 %v8720_v28, %v1487_v60  ;;  %v3691_v38 = vunpack.c.l.b16 %v6329_v41  ;;  %v268_v31 = vmul.f32 %v8706_v33, %v267_v25  ;;  %v1767_v41 = vadd.f32 %v1766_v16, %v1765_v5  ;;  %v261_v5 = vld [vmem:[%s11711_s2] sm:$0x1] }
 0x1c0   :  { %v2064_v51 = vrot.slane %v2063_v40, 4  ;;  %v1510_v25 = vadd.f32 %v8720_v28, %v1492_v52 }
 0x1c1   :  { %6312 = vmatmul.msk.bf16.gmra.mxu3 %vm100_vm1, %v6644_v9  ;;  %v12125_v9 = vld [vmem:[#allocation64_spill] sm:$0xff]  ;;  %v8800_v60 = vpop.f32.mrf.mxu1  ;;  %v1518_v34 = vmax.f32 %v1505_v56, 0.0  ;;  %4727 = vrot.lane.b32.xlu2 %v1520_v7, %s6756_s7  ;;  %v272_v56 = vsel %vm271_vm5, %v8706_v33, %v268_v31  ;;  %v1768_v16 = vmul.f32 0.010204081, %v1767_v41 }
 0x1c2   :  { %v1488_v24 = vmul.f32 %v8474_v35, %v12125_v9  ;;  %v12129_v9 = vld [vmem:[#allocation60_spill] sm:$0xff]  ;;  %v1523_v33 = vmax.f32 %v1510_v25, 0.0 }
 0x1c3   :  { %4723 = vrot.lane.b32.xlu0 %v1518_v34, %s6756_s7  ;;  %v6664_v34 = vld [vmem:[%s11709_s0 + $0x2c4] sm:$0xff] }
 0x1c4   :  { %v1506_v61 = vadd.f32 %v8720_v28, %v1488_v24  ;;  %v8786_v18 = vpop.f32.mrf.mxu0  ;;  %v1491_v24 = vmul.f32 %v8474_v35, %v12129_v9  ;;  %v8828_v52 = vpop.f32.mrf.mxu3 }
 0x1c5   :  { %v2602_v8 = vsel %vm169_vm2, %v8786_v18, 0.0  ;;  %v8830_v7 = vpop.f32.mrf.mxu2 }
 0x1c6   :  { %v2603_v20 = vadd.f32 %v2602_v8, %v2601_v26  ;;  %v1519_v36 = vmax.f32 %v1506_v61, 0.0  ;;  %v2065_v26 = vadd.f32 %v2064_v51, %v2063_v40  ;;  %v3698_v61 = vpack.c.b16 %v3691_v38, %v3691_v38  ;;  %12131 = vst [vmem:[#allocation2_spill] sm:$0xff] %v8830_v7 }
 0x1c7   :  { %v1509_v10 = vadd.f32 %v8720_v28, %v1491_v24  ;;  %v1508_v40 = vadd.f32 %v8720_v28, %v1490_v58  ;;  %v273_v8 = vmul.f32 %v272_v56, %v261_v5  ;;  %v2284_v5 = vsel %vm169_vm2, %v8634_v59, 0.0  ;;  %v12133_v56 = vld [vmem:[#allocation54_spill] sm:$0xff] }
 0x1c8   :  { %4725 = vrot.lane.b32.xlu1 %v1519_v36, %s6756_s7  ;;  %v2066_v38 = vrot.slane %v2065_v26, 2  ;;  %6385 = vmatmul.msk.bf16.gmra.mxu0 %vm100_vm1, %v3698_v61  ;;  %v8834_v36 = vadd.f32 1e-05, %v1768_v16  ;;  %v8851_v61 = vld [vmem:[%s11710_s3] ss:$0 sm:$0xff] }
 0x1c9   :  { %v1522_v13 = vmax.f32 %v1509_v10, 0.0  ;;  %v1521_v58 = vmax.f32 %v1508_v40, 0.0  ;;  %4733 = vrot.lane.b32.xlu2 %v1523_v33, %s6756_s7  ;;  %v8838_v9 = vpop.f32.mrf.mxu1  ;;  %v8841_v24 = vperm.slane %v273_v8, 0  ;;  %v2283_v10 = vsel %vm169_vm2, %v8590_v12, 0.0 }
 0x1ca   :  { %12132 = vst [vmem:[#allocation65_spill] sm:$0xff] %v8838_v9  ;;  %v2067_v31 = vadd.f32 %v2066_v38, %v2065_v26  ;;  %6734 = vrsqrt.f32 %v8834_v36  ;;  %vm1778_vm6 = vweird.f32 %v8834_v36 }
 0x1cb   :  { %4729 = vrot.lane.b32.xlu0 %v1521_v58, %s6756_s7  ;;  %v2285_v58 = vadd.f32 %v2284_v5, %v2283_v10  ;;  %v288_v10 = vmul.f32 %v8841_v24, %v12060_v43  ;;  %v2286_v43 = vsel %vm169_vm2, %v8694_v32, 0.0 }
 0x1cc   :  { %v8824_v51 = vpop.f32.mrf.mxu0  ;;  %v2068_v25 = vrot.slane %v2067_v31, 1  ;;  %v8863_v40 = vpop.f32.mrf.mxu3 }
 0x1cd   :  { %6454 = vmatmul.msk.bf16.gmra.mxu1 %vm100_vm1, %v6664_v34  ;;  %v2604_v26 = vsel %vm169_vm2, %v8824_v51, 0.0  ;;  %v281_v34 = vmul.f32 %v8841_v24, %v12133_v56  ;;  %12135 = vst [vmem:[#allocation64_spill] sm:$0xff] %v8863_v40  ;;  %v8865_v16 = vpop.f32.mrf.mxu2  ;;  %v12139_v56 = vld [vmem:[#allocation20_spill] sm:$0xff]  ;;  %v12144_v40 = vld [vmem:[#allocation49_spill] sm:$0xff] }
 0x1ce   :  { %12136 = vst [vmem:[#allocation6_spill] sm:$0xff] %v8865_v16  ;;  %v2605_v59 = vadd.f32 %v2604_v26, %v2603_v20  ;;  %v285_v16 = vmul.f32 %v8841_v24, %v12142_v49  ;;  %v277_v50 = vmul.f32 %v8841_v24, %v12144_v40 }
 0x1cf   :  { %6525 = vmatmul.msk.bf16.gmra.mxu2 %vm100_vm1, %v6674_v30  ;;  %v12134_v30 = vld [vmem:[#allocation55_spill] sm:$0xff] }
 0x1d0   :  { %4731 = vrot.lane.b32.xlu1 %v1522_v13, %s6756_s7  ;;  %v8869_v38 = vpop.eup %6734  ;;  %v2069_v13 = vadd.f32 %v2068_v25, %v2067_v31 }
 0x1d1   :  { %6313 = vmatmul.msk.bf16.gmra.mxu3 %vm100_vm1, %v6645_v44  ;;  %v289_v44 = vmul.f32 %v8841_v24, %v12066_v54  ;;  %v282_v54 = vmul.f32 %v8841_v24, %v12134_v30  ;;  %v8874_v12 = vpop.f32.mrf.mxu1  ;;  %v1495_v30 = vmul.f32 %v8474_v35, %v12139_v56  ;;  %v1773_v39 = vmul.f32 %v8869_v38, %v8834_v36  ;;  %v12143_v35 = vld [vmem:[#allocation52_spill] sm:$0xff] }
 0x1d2   :  { %12138 = vst [vmem:[#allocation60_spill] sm:$0xff] %v8874_v12  ;;  %v279_v5 = vmul.f32 %v8841_v24, %v12143_v35  ;;  %v8906_v56 = vadd.f32 %v8851_v61, %v285_v16  ;;  %v12145_v35 = vld [vmem:[#allocation5_spill] sm:$0xff]  ;;  %v12147_v16 = vld [vmem:[#allocation51_spill] sm:$0xff]  ;;  %vm1779_vm7 = vweird.f32 %v8869_v38  ;;  %v2292_v36 = vsel %vm169_vm2, %v8828_v52, 0.0 }
 0x1d3   :  { %v8872_v33 = vadd.f32 %v8851_v61, %v289_v44  ;;  %v8885_v44 = vadd.f32 %v8851_v61, %v281_v34  ;;  %v8888_v20 = vadd.f32 %v8851_v61, %v282_v54  ;;  %v1513_v49 = vadd.f32 %v8720_v28, %v1495_v30  ;;  %vm9048_vm8 = vmor %vm1778_vm6, %vm1779_vm7 }
 0x1d4   :  { %v8844_v41 = vpop.f32.mrf.mxu0  ;;  %v1512_v34 = vadd.f32 %v8720_v28, %v1494_v29  ;;  %v1511_v54 = vadd.f32 %v8720_v28, %v1493_v47  ;;  %v8915_v47 = vadd.f32 %v8851_v61, %v288_v10  ;;  %v1774_v40 = vmul.f32 %v8869_v38, %v1773_v39  ;;  %v12149_v39 = vld [vmem:[#allocation7_spill] sm:$0xff] }
 0x1d5   :  { %v2606_v8 = vsel %vm169_vm2, %v8844_v41, 0.0  ;;  %12137 = vst [vmem:[#allocation61_spill] sm:$0xff] %v8872_v33  ;;  %v8929_v10 = vpop.f32.mrf.mxu2  ;;  %vm5303_vm6 = vcmask 195584  }
 0x1d6   :  { %v2607_v31 = vadd.f32 %v2606_v8, %v2605_v59  ;;  %v2070_v59 = vmul.f32 0.010204081, %v2069_v13  ;;  %v1526_v8 = vmax.f32 %v1513_v49, 0.0  ;;  %v1525_v53 = vmax.f32 %v1512_v34, 0.0  ;;  %12148 = vst [vmem:[#allocation54_spill] sm:$0xff] %v8929_v10 }
 0x1d7   :  { %v1524_v2 = vmax.f32 %v1511_v54, 0.0  ;;  %v280_v13 = vmul.f32 %v8841_v24, %v12145_v35  ;;  %v2287_v34 = vadd.f32 %v2286_v43, %v2285_v58  ;;  %v12150_v43 = vld [vmem:[#allocation56_spill] sm:$0xff]  ;;  %v2887_v35 = vsel %vm169_vm2, %v8645_v17, 0.0  ;;  %v12152_v17 = vld [vmem:[#allocation9_spill] sm:$0xff] }
 0x1d8   :  { %4739 = vrot.lane.b32.xlu2 %v1526_v8, %s6756_s7  ;;  %v8923_v49 = vadd.f32 1e-05, %v2070_v59  ;;  %4737 = vrot.lane.b32.xlu1 %v1525_v53, %s6756_s7  ;;  %v8927_v8 = vpop.f32.mrf.mxu3  ;;  %v284_v59 = vmul.f32 %v8841_v24, %v12149_v39  ;;  %v1514_v53 = vadd.f32 %v8720_v28, %v8486_v15  ;;  %v1775_v29 = vmul.f32 0.5, %v1774_v40 }
 0x1d9   :  { %4735 = vrot.lane.b32.xlu0 %v1524_v2, %s6756_s7  ;;  %v8941_v2 = vadd.f32 %v8851_v61, %v280_v13  ;;  %v2888_v15 = vsel %vm169_vm2, %v8704_v23, 0.0  ;;  %v286_v39 = vmul.f32 %v8841_v24, %v12152_v17  ;;  %v3190_v17 = vsel %vm169_vm2, %v8747_v55, 0.0 }
 0x1da   :  { %6736 = vrsqrt.f32 %v8923_v49  ;;  %v1527_v32 = vmax.f32 %v1514_v53, 0.0  ;;  %v1776_v13 = vsub.f32 1.5, %v1775_v29  ;;  %vm2080_vm10 = vweird.f32 %v8923_v49 }
 0x1dc   :  { %v8890_v25 = vpop.f32.mrf.mxu0 }
 0x1dd   :  { %v2608_v42 = vsel %vm193_vm3, %v8890_v25, 0.0 }
 0x1de   :  { %v2609_v26 = vadd.f32 %v2608_v42, %v2607_v31  ;;  %v8918_v31 = vadd.f32 %v8851_v61, %v279_v5  ;;  %v278_v42 = vmul.f32 %v8841_v24, %v12147_v16  ;;  %v8934_v16 = vadd.f32 %v8851_v61, %v277_v50  ;;  %v8947_v5 = vpop.f32.mrf.mxu1 }
 0x1df   :  { %12151 = vst [vmem:[#allocation55_spill] sm:$0xff] %v8947_v5  ;;  %v287_v50 = vmul.f32 %v8841_v24, %v12058_v46 }
 0x1e0   :  { %v2610_v30 = vrot.slane %v2609_v26, 4  ;;  %12146 = vst [vmem:[#allocation59_spill] sm:$0xff] %v8918_v31  ;;  %v8988_v29 = vpop.eup %6736 }
 0x1e1   :  { %4741 = vrot.lane.b32.xlu0 %v1527_v32, %s6756_s7  ;;  %v8982_v40 = vadd.f32 %v8851_v61, %v287_v50  ;;  %v3192_v50 = vsel %vm169_vm2, %v8790_v4, 0.0  ;;  %v3194_v4 = vsel %vm169_vm2, %v8830_v7, 0.0  ;;  %vm2081_vm9 = vweird.f32 %v8988_v29 }
 0x1e2   :  { %v2611_v54 = vadd.f32 %v2610_v30, %v2609_v26  ;;  %v283_v30 = vmul.f32 %v8841_v24, %v12150_v43  ;;  %v8959_v43 = vadd.f32 %v8851_v61, %v284_v59  ;;  %v2889_v59 = vadd.f32 %v2888_v15, %v2887_v35  ;;  %vm9193_vm11 = vmor %vm2080_vm10, %vm2081_vm9 }
 0x1e3   :  { %v2890_v24 = vsel %vm169_vm2, %v8762_v48, 0.0  ;;  %12153 = vst [vmem:[#allocation20_spill] sm:$0xff] %v8982_v40  ;;  %v8985_v35 = vadd.f32 %v8851_v61, %v286_v39  ;;  %v8998_v39 = vpop.f32.mrf.mxu2  ;;  %v1777_v15 = vmul.f32 %v8869_v38, %v1776_v13  ;;  %v12201_v40 = vld [vmem:[#allocation38_spill] sm:$0xff]  ;;  %vm5317_vm10 = vcmask 261120  }
 0x1e4   :  { %v2612_v58 = vrot.slane %v2611_v54, 2  ;;  %v2583_v26 = vpop.f32.mrf.mxu0  ;;  %v8967_v31 = vadd.f32 %v8851_v61, %v283_v30  ;;  %v2891_v32 = vadd.f32 %v2890_v24, %v2889_v59  ;;  %v2290_v30 = vsel %vm169_vm2, %v8788_v27, 0.0 }
 0x1e5   :  { %v8952_v26 = vadd.f32 %v8851_v61, %v278_v42  ;;  %12154 = vst [vmem:[#allocation63_spill] sm:$0xff] %v8985_v35  ;;  %v8996_v61 = vpop.f32.mrf.mxu3  ;;  %v2075_v59 = vmul.f32 %v8988_v29, %v8923_v49 }
 0x1e6   :  { %v2613_v28 = vadd.f32 %v2612_v58, %v2611_v54  ;;  %v3189_v54 = vsel %vm169_vm2, %v8696_v57, 0.0  ;;  %v2288_v58 = vsel %vm169_vm2, %v8745_v63, 0.0 }
 0x1e7   :  { %v2289_v46 = vadd.f32 %v2288_v58, %v2287_v34  ;;  %v2892_v58 = vsel %vm169_vm2, %v8800_v60, 0.0 }
 0x1e8   :  { %v2614_v42 = vrot.slane %v2613_v28, 1 }
 0x1ea   :  { %v2615_v53 = vadd.f32 %v2614_v42, %v2613_v28  ;;  %v3191_v42 = vadd.f32 %v3190_v17, %v3189_v54  ;;  %v9014_v17 = vpop.f32.mrf.mxu1 }
 0x1eb   :  { %12158 = vst [vmem:[#allocation49_spill] sm:$0xff] %v9014_v17 }
 0x1ec   :  { %v2616_v55 = vmul.f32 0.010204081, %v2615_v53 }
 0x1ee   :  { %v9002_v33 = vsub.f32 %v8327_v11, %v2616_v55  ;;  %v9005_v34 = vsub.f32 %v8389_v6, %v2616_v55  ;;  %v9008_v54 = vsub.f32 %v8455_v22, %v2616_v55  ;;  %v9017_v24 = vsub.f32 %v8502_v45, %v2616_v55 }
 0x1ef   :  { %v9020_v11 = vsub.f32 %v8713_v1, %v2616_v55  ;;  %v9023_v6 = vsub.f32 %v8760_v62, %v2616_v55  ;;  %v9026_v22 = vsub.f32 %v8786_v18, %v2616_v55  ;;  %v9029_v13 = vsub.f32 %v8824_v51, %v2616_v55 }
 0x1f0   :  { %12155 = vst [vmem:[#allocation62_spill] sm:$0xff] %v9002_v33  ;;  %v9032_v53 = vsub.f32 %v8844_v41, %v2616_v55  ;;  %v9035_v28 = vsub.f32 %v8562_v37, %v2616_v55  ;;  %v9038_v45 = vsub.f32 %v8890_v25, %v2616_v55  ;;  %v2630_v1 = vmul.f32 %v9002_v33, %v9002_v33  ;;  %v5889_v33 = vld [vmem:[%s11711_s2 + $0x5] sm:$0x1] }
 0x1f1   :  { %12156 = vst [vmem:[#allocation8_spill] sm:$0xff] %v9005_v34  ;;  %v2631_v62 = vmul.f32 %v9005_v34, %v9005_v34  ;;  %v2291_v51 = vadd.f32 %v2290_v30, %v2289_v46  ;;  %v3193_v37 = vadd.f32 %v3192_v50, %v3191_v42  ;;  %v2893_v41 = vadd.f32 %v2892_v58, %v2891_v32  ;;  %v9069_v42 = vpop.permute.xlu2 %4569 }
 0x1f2   :  { %12157 = vst [vmem:[#allocation52_spill] sm:$0xff] %v9008_v54  ;;  %v2632_v25 = vmul.f32 %v9008_v54, %v9008_v54  ;;  %v1781_v34 = vsel %vm9048_vm8, %v8869_v38, %v1777_v15  ;;  %v9065_v46 = vsub.f32 %v8610_v21, %v2616_v55  ;;  %v2894_v30 = vsel %vm169_vm2, %v8838_v9, 0.0  ;;  %v6258_v54 = vld [vmem:[%s11709_s0 + $0x26c] sm:$0x1]  ;;  %v12176_v9 = vld [vmem:[#allocation6_spill] sm:$0xff] }
 0x1f3   :  { %12159 = vst [vmem:[#allocation5_spill] sm:$0xff] %v9017_v24  ;;  %v2633_v32 = vmul.f32 %v9017_v24, %v9017_v24  ;;  %v2643_v50 = vsel %vm169_vm2, %v2630_v1, 0.0  ;;  %v2644_v38 = vsel %vm169_vm2, %v2631_v62, 0.0  ;;  %v2076_v15 = vmul.f32 %v8988_v29, %v2075_v59  ;;  %v9090_v59 = vld [vmem:[%s11710_s3 + $0x3] ss:$0 sm:$0xff]  ;;  %v9094_v62 = vpop.f32.mrf.mxu3 }
 0x1f4   :  { %12160 = vst [vmem:[#allocation51_spill] sm:$0xff] %v9020_v11  ;;  %v9077_v58 = vsub.f32 %v8661_v0, %v2616_v55  ;;  %v2634_v21 = vmul.f32 %v9035_v28, %v9035_v28  ;;  %v2645_v18 = vadd.f32 %v2644_v38, %v2643_v50  ;;  %v9084_v7 = vmul.f32 %v5889_v33, %v1781_v34  ;;  %v9096_v50 = vpop.f32.mrf.mxu2 }
 0x1f5   :  { %12161 = vst [vmem:[#allocation7_spill] sm:$0xff] %v9023_v6  ;;  %v2293_v24 = vadd.f32 %v2292_v36, %v2291_v51  ;;  %v3195_v57 = vadd.f32 %v3194_v4, %v3193_v37  ;;  %v2646_v1 = vsel %vm169_vm2, %v2632_v25, 0.0  ;;  %v2895_v0 = vadd.f32 %v2894_v30, %v2893_v41  ;;  %v6665_v4 = vld [vmem:[%s11709_s0 + $0x2cc] sm:$0xff]  ;;  %v6675_v51 = vld [vmem:[%s11709_s0 + $0x300] sm:$0xff] }
 0x1f6   :  { %12162 = vst [vmem:[#allocation56_spill] sm:$0xff] %v9026_v22  ;;  %v2896_v55 = vsel %vm169_vm2, %v8874_v12, 0.0  ;;  %v2635_v33 = vmul.f32 %v9065_v46, %v9065_v46  ;;  %v2647_v34 = vadd.f32 %v2646_v1, %v2645_v18  ;;  %v2648_v37 = vsel %vm169_vm2, %v2633_v32, 0.0  ;;  %6455 = vmatmul.msk.bf16.gmra.mxu1 %vm100_vm1, %v6665_v4  ;;  %6526 = vmatmul.msk.bf16.gmra.mxu2 %vm100_vm1, %v6675_v51  ;;  %v12175_v12 = vld [vmem:[#allocation64_spill] sm:$0xff] }
 0x1f7   :  { %12163 = vst [vmem:[#allocation9_spill] sm:$0xff] %v9029_v13  ;;  %v3389_v41 = vunpack.c.l.b16 %v6258_v54  ;;  %v1182_v25 = vmul.f32 %v8643_v3, %v8254_v19  ;;  %v1184_v36 = vmul.f32 %v8643_v3, %v8263_v14  ;;  %v2077_v30 = vmul.f32 0.5, %v2076_v15 }
 0x1f8   :  { %12164 = vst [vmem:[#allocation66_spill] sm:$0xff] %v9032_v53  ;;  %v2636_v38 = vmul.f32 %v9077_v58, %v9077_v58  ;;  %v2649_v18 = vadd.f32 %v2648_v37, %v2647_v34  ;;  %v2650_v1 = vsel %vm169_vm2, %v2634_v21, 0.0  ;;  %v2637_v15 = vmul.f32 %v9020_v11, %v9020_v11  ;;  %v12173_v37 = vld [vmem:[#allocation24_spill] sm:$0xff] }
 0x1f9   :  { %12165 = vst [vmem:[#allocation67_spill] sm:$0xff] %v9035_v28  ;;  %v9114_v28 = vpop.f32.mrf.mxu1  ;;  %v3396_v54 = vpack.c.b16 %v3389_v41, %v3389_v41  ;;  %v1200_v32 = vadd.f32 %v9090_v59, %v1182_v25  ;;  %v1202_v19 = vadd.f32 %v9090_v59, %v1184_v36  ;;  %v2652_v21 = vsel %vm169_vm2, %v2635_v33, 0.0  ;;  %v12174_v41 = vld [vmem:[#allocation28_spill] sm:$0xff]  ;;  %v9137_v11 = vpop.permute.xlu2 %4571 }
 0x1fa   :  { %12166 = vst [vmem:[#allocation68_spill] sm:$0xff] %v9038_v45  ;;  %v2651_v34 = vadd.f32 %v2650_v1, %v2649_v18  ;;  %v1187_v25 = vmul.f32 %v8643_v3, %v12174_v41  ;;  %v3196_v18 = vsel %vm169_vm2, %v12176_v9, 0.0  ;;  %v2897_v1 = vadd.f32 %v2896_v55, %v2895_v0  ;;  %v12177_v55 = vld [vmem:[#allocation31_spill] sm:$0xff] }
 0x1fb   :  { %12169 = vst [vmem:[#allocation69_spill] sm:$0xff] %v9065_v46  ;;  %v12172_v46 = vld [vmem:[#allocation18_spill] sm:$0xff]  ;;  %6314 = vmatmul.msk.bf16.gmra.mxu3 %vm100_vm1, %v3396_v54  ;;  %v1213_v4 = vmax.f32 %v1200_v32, 0.0  ;;  %v1215_v51 = vmax.f32 %v1202_v19, 0.0  ;;  %v2638_v54 = vmul.f32 %v9023_v6, %v9023_v6  ;;  %v2654_v32 = vsel %vm169_vm2, %v2636_v38, 0.0  ;;  %v9153_v9 = vpop.f32.mrf.mxu3 }
 0x1fc   :  { %12170 = vst [vmem:[#allocation70_spill] sm:$0xff] %v9077_v58  ;;  %v1183_v14 = vmul.f32 %v8643_v3, %v12172_v46  ;;  %v1185_v58 = vmul.f32 %v8643_v3, %v12173_v37  ;;  %v2294_v46 = vsel %vm169_vm2, %v12175_v12, 0.0  ;;  %v2653_v33 = vadd.f32 %v2652_v21, %v2651_v34 }
 0x1fd   :  { %12171 = vst [vmem:[#allocation71_spill] sm:$0xff] %v9114_v28  ;;  %v2898_v37 = vsel %vm169_vm2, %v8947_v5, 0.0  ;;  %4665 = vrot.lane.b32.xlu2 %v1213_v4, %s6757_s29  ;;  %4669 = vrot.lane.b32.xlu1 %v1215_v51, %s6757_s29  ;;  %v1186_v34 = vmul.f32 %v8643_v3, %v12177_v55  ;;  %v2639_v21 = vmul.f32 %v9026_v22, %v9026_v22  ;;  %v2656_v41 = vsel %vm169_vm2, %v2637_v15, 0.0 }
 0x1fe   :  { %v1201_v36 = vadd.f32 %v9090_v59, %v1183_v14  ;;  %v2078_v14 = vsub.f32 1.5, %v2077_v30  ;;  %v2655_v0 = vadd.f32 %v2654_v32, %v2653_v33  ;;  %v1203_v38 = vadd.f32 %v9090_v59, %v1185_v58  ;;  %v9155_v33 = vpop.f32.mrf.mxu2 }
 0x1ff   :  { %v1205_v6 = vadd.f32 %v9090_v59, %v1187_v25  ;;  %v2295_v4 = vadd.f32 %v2294_v46, %v2293_v24  ;;  %v3197_v51 = vadd.f32 %v3196_v18, %v3195_v57  ;;  %v2899_v30 = vadd.f32 %v2898_v37, %v2897_v1  ;;  %12178 = vst [vmem:[#allocation18_spill] sm:$0xff] %v9155_v33  ;;  %v12180_v18 = vld [vmem:[#allocation27_spill] sm:$0xff] }
 0x200   :  { %v1214_v19 = vmax.f32 %v1201_v36, 0.0  ;;  %v2657_v36 = vadd.f32 %v2656_v41, %v2655_v0  ;;  %v2900_v32 = vsel %vm169_vm2, %v9014_v17, 0.0  ;;  %v2640_v15 = vmul.f32 %v9029_v13, %v9029_v13  ;;  %v12181_v41 = vld [vmem:[#allocation21_spill] sm:$0xff] }
 0x201   :  { %v2658_v58 = vsel %vm169_vm2, %v2638_v54, 0.0  ;;  %v1204_v25 = vadd.f32 %v9090_v59, %v1186_v34  ;;  %v2641_v57 = vmul.f32 %v9032_v53, %v9032_v53  ;;  %v9166_v46 = vpop.f32.mrf.mxu1  ;;  %v1188_v1 = vmul.f32 %v8643_v3, %v12180_v18  ;;  %v12186_v53 = vld [vmem:[#allocation32_spill] sm:$0xff] }
 0x202   :  { %4667 = vrot.lane.b32.xlu0 %v1214_v19, %s6757_s29  ;;  %v2079_v19 = vmul.f32 %v8988_v29, %v2078_v14  ;;  %v2659_v24 = vadd.f32 %v2658_v58, %v2657_v36  ;;  %12179 = vst [vmem:[#allocation24_spill] sm:$0xff] %v9166_v46  ;;  %v2660_v37 = vsel %vm169_vm2, %v2639_v21, 0.0  ;;  %v1216_v0 = vmax.f32 %v1203_v38, 0.0 }
 0x203   :  { %v1218_v55 = vmax.f32 %v1205_v6, 0.0  ;;  %v1190_v54 = vmul.f32 %v8643_v3, %v12181_v41  ;;  %v2296_v34 = vsel %vm169_vm2, %v8927_v8, 0.0  ;;  %v3198_v14 = vsel %vm169_vm2, %v8929_v10, 0.0 }
 0x204   :  { %v2901_v13 = vadd.f32 %v2900_v32, %v2899_v30  ;;  %v2661_v36 = vadd.f32 %v2660_v37, %v2659_v24  ;;  %v2642_v58 = vmul.f32 %v9038_v45, %v9038_v45  ;;  %v2662_v18 = vsel %vm169_vm2, %v2640_v15, 0.0  ;;  %v12182_v30 = vld [vmem:[#allocation13_spill] sm:$0xff]  ;;  %v9230_v15 = vpop.permute.xlu0 %4561 }
 0x205   :  { %v2902_v21 = vsel %vm169_vm2, %v9114_v28, 0.0  ;;  %4671 = vrot.lane.b32.xlu2 %v1216_v0, %s6757_s29  ;;  %4675 = vrot.lane.b32.xlu1 %v1218_v55, %s6757_s29  ;;  %v1217_v6 = vmax.f32 %v1204_v25, 0.0  ;;  %v1206_v41 = vadd.f32 %v9090_v59, %v1188_v1  ;;  %v1189_v32 = vmul.f32 %v8643_v3, %v12182_v30  ;;  %v9198_v0 = vpop.permute.xlu2 %4577 }
 0x206   :  { %v2663_v38 = vadd.f32 %v2662_v18, %v2661_v36  ;;  %v9189_v24 = vperm.slane %v9084_v7, 0  ;;  %v2297_v37 = vadd.f32 %v2296_v34, %v2295_v4  ;;  %v2664_v25 = vsel %vm169_vm2, %v2641_v57, 0.0  ;;  %v9205_v18 = vpop.permute.xlu1 %4565  ;;  %v5960_v4 = vld [vmem:[%s11711_s2 + $0x6] sm:$0x1] }
 0x207   :  { %v1208_v49 = vadd.f32 %v9090_v59, %v1190_v54  ;;  %v2083_v7 = vsel %vm9193_vm11, %v8988_v29, %v2079_v19  ;;  %v3199_v1 = vadd.f32 %v3198_v14, %v3197_v51  ;;  %v2903_v36 = vadd.f32 %v2902_v21, %v2901_v13  ;;  %v9217_v19 = vpop.f32.mrf.mxu3  ;;  %v9219_v13 = vpop.f32.mrf.mxu2  ;;  %v6400_v14 = vld [vmem:[%s11709_s0 + $0x2d4] sm:$0x1]  ;;  %v6471_v21 = vld [vmem:[%s11709_s0 + $0x308] sm:$0x1] }
 0x208   :  { %v2665_v55 = vadd.f32 %v2664_v25, %v2663_v38  ;;  %v2298_v57 = vsel %vm169_vm2, %v8996_v61, 0.0  ;;  %v2300_v54 = vsel %vm169_vm2, %v9094_v62, 0.0  ;;  %v2666_v34 = vsel %vm193_vm3, %v2642_v58, 0.0  ;;  %v12185_v38 = vld [vmem:[#allocation15_spill] sm:$0xff] }
 0x209   :  { %v2904_v29 = vsel %vm169_vm2, %v9166_v46, 0.0  ;;  %v1191_v58 = vmul.f32 %v8643_v3, %v12185_v38  ;;  %v1207_v30 = vadd.f32 %v9090_v59, %v1189_v32  ;;  %v3993_v25 = vunpack.c.l.b16 %v6400_v14  ;;  %v9234_v5 = vpop.f32.mrf.mxu1 }
 0x20a   :  { %4673 = vrot.lane.b32.xlu0 %v1217_v6, %s6757_s29  ;;  %v2667_v51 = vadd.f32 %v2666_v34, %v2665_v55  ;;  %v1219_v6 = vmax.f32 %v1206_v41, 0.0  ;;  %v4295_v55 = vunpack.c.l.b16 %v6471_v21  ;;  %v1221_v34 = vmax.f32 %v1208_v49, 0.0  ;;  %v9236_v41 = vpop.f32.mrf.mxu0  ;;  %v12188_v49 = vld [vmem:[#allocation19_spill] sm:$0xff] }
 0x20b   :  { %v1193_v22 = vmul.f32 %v8643_v3, %v12186_v53  ;;  %v2084_v45 = vmul.f32 %v5960_v4, %v2083_v7  ;;  %v2299_v10 = vadd.f32 %v2298_v57, %v2297_v37  ;;  %v2905_v17 = vadd.f32 %v2904_v29, %v2903_v36  ;;  %12187 = vst [vmem:[#allocation28_spill] sm:$0xff] %v9236_v41 }
 0x20c   :  { %v2668_v28 = vrot.slane %v2667_v51, 4  ;;  %v2302_v38 = vsel %vm169_vm2, %v9153_v9, 0.0  ;;  %v4000_v32 = vpack.c.b16 %v3993_v25, %v3993_v25  ;;  %v4302_v46 = vpack.c.b16 %v4295_v55, %v4295_v55  ;;  %v12198_v55 = vld [vmem:[#allocation29_spill] sm:$0xff] }
 0x20d   :  { %4677 = vrot.lane.b32.xlu2 %v1219_v6, %s6757_s29  ;;  %4681 = vrot.lane.b32.xlu1 %v1221_v34, %s6757_s29  ;;  %v1192_v53 = vmul.f32 %v8643_v3, %v12188_v49  ;;  %v3200_v37 = vsel %vm169_vm2, %v8998_v39, 0.0  ;;  %v2301_v7 = vadd.f32 %v2300_v54, %v2299_v10  ;;  %v1220_v4 = vmax.f32 %v1207_v30, 0.0  ;;  %v12189_v54 = vld [vmem:[#allocation10_spill] sm:$0xff]  ;;  %v4584_v25 = vpop.permute.xlu2 %4583 }
 0x20e   :  { %v2669_v36 = vadd.f32 %v2668_v28, %v2667_v51  ;;  %v2304_v57 = vsel %vm169_vm2, %v9217_v19, 0.0  ;;  %v2906_v29 = vsel %vm169_vm2, %v9234_v5, 0.0  ;;  %6456 = vmatmul.msk.bf16.gmra.mxu1 %vm100_vm1, %v4000_v32  ;;  %6527 = vmatmul.msk.bf16.gmra.mxu2 %vm100_vm1, %v4302_v46  ;;  %v1209_v14 = vadd.f32 %v9090_v59, %v1191_v58 }
 0x20f   :  { %v1211_v3 = vadd.f32 %v9090_v59, %v1193_v22  ;;  %v9254_v21 = vperm.slane %v2084_v45, 0  ;;  %v2303_v10 = vadd.f32 %v2302_v38, %v2301_v7  ;;  %v2907_v28 = vadd.f32 %v2906_v29, %v2905_v17  ;;  %v9271_v38 = vpop.permute.xlu1 %4567  ;;  %v9273_v32 = vpop.f32.mrf.mxu3  ;;  %v12192_v7 = vld [vmem:[#allocation44_spill] sm:$0xff] }
 0x210   :  { %v2670_v6 = vrot.slane %v2669_v36, 2  ;;  %v9259_v51 = vmul.f32 %v9189_v24, %v12189_v54  ;;  %v3201_v30 = vadd.f32 %v3200_v37, %v3199_v1  ;;  %v1210_v46 = vadd.f32 %v9090_v59, %v1192_v53  ;;  %v12191_v37 = vld [vmem:[#allocation30_spill] sm:$0xff] }
 0x211   :  { %v12190_v22 = vmax.f32 %v8885_v44, 0.0  ;;  %v3202_v17 = vsel %vm169_vm2, %v9096_v50, 0.0  ;;  %v2305_v34 = vadd.f32 %v2304_v57, %v2303_v10  ;;  %v2306_v1 = vsel %vm193_vm3, %v9273_v32, 0.0  ;;  %v9296_v10 = vpop.permute.xlu0 %4563  ;;  %v9298_v54 = vpop.f32.mrf.mxu1 }
 0x212   :  { %4679 = vrot.lane.b32.xlu0 %v1220_v4, %s6757_s29  ;;  %v2671_v58 = vadd.f32 %v2670_v6, %v2669_v36  ;;  %v1222_v49 = vmax.f32 %v1209_v14, 0.0  ;;  %v1224_v53 = vmax.f32 %v1211_v3, 0.0  ;;  %v1786_v44 = vmul.f32 %v9189_v24, %v12191_v37  ;;  %v9294_v3 = vpop.f32.mrf.mxu2 }
 0x213   :  { %v9267_v45 = vsel %vm169_vm2, %v12190_v22, %v9069_v42  ;;  %v9282_v42 = vld [vmem:[%s11710_s3 + $0x5] ss:$0 sm:$0xff]  ;;  %v9286_v36 = vmul.f32 %v9254_v21, %v12192_v7  ;;  %v12193_v4 = vmax.f32 %v8888_v20, 0.0  ;;  %v2307_v14 = vadd.f32 %v2306_v1, %v2305_v34  ;;  %v12196_v7 = vld [vmem:[#allocation39_spill] sm:$0xff]  ;;  %v9310_v1 = vpop.f32.mrf.mxu0 }
 0x214   :  { %v2672_v29 = vrot.slane %v2671_v58, 1  ;;  %v3203_v6 = vadd.f32 %v3202_v17, %v3201_v30  ;;  %v12195_v22 = vld [vmem:[#allocation46_spill] sm:$0xff]  ;;  %v1223_v20 = vmax.f32 %v1210_v46, 0.0  ;;  %v3204_v34 = vsel %vm169_vm2, %v9155_v33, 0.0  ;;  %12197 = vst [vmem:[#allocation31_spill] sm:$0xff] %v9310_v1  ;;  %v12199_v46 = vld [vmem:[#allocation11_spill] sm:$0xff] }
 0x215   :  { %v9292_v57 = vsel %vm169_vm2, %v12193_v4, %v9137_v11  ;;  %4683 = vrot.lane.b32.xlu2 %v1222_v49, %s6757_s29  ;;  %4687 = vrot.lane.b32.xlu1 %v1224_v53, %s6757_s29  ;;  %v1212_v37 = vadd.f32 %v9090_v59, %v12195_v22  ;;  %v1788_v11 = vmul.f32 %v9189_v24, %v12196_v7  ;;  %v2308_v30 = vrot.slane %v2307_v14, 4 }
 0x216   :  { %12194 = vst [vmem:[#allocation64_spill] sm:$0xff] %v9292_v57  ;;  %v2673_v4 = vadd.f32 %v2672_v29, %v2671_v58  ;;  %v2908_v17 = vsel %vm169_vm2, %v9298_v54, 0.0  ;;  %v1804_v53 = vadd.f32 %v9282_v42, %v1786_v44  ;;  %v1787_v59 = vmul.f32 %v9189_v24, %v12198_v55  ;;  %v12200_v29 = vld [vmem:[#allocation14_spill] sm:$0xff] }
 0x217   :  { %v2909_v49 = vadd.f32 %v2908_v17, %v2907_v28  ;;  %v1789_v22 = vmul.f32 %v9189_v24, %v12199_v46  ;;  %v2309_v58 = vadd.f32 %v2308_v30, %v2307_v14  ;;  %v1790_v57 = vmul.f32 %v9189_v24, %v12200_v29 }
 0x218   :  { %v2674_v7 = vmul.f32 0.010204081, %v2673_v4  ;;  %v1792_v33 = vmul.f32 %v9189_v24, %v12201_v40  ;;  %v12202_v28 = vmax.f32 %v8906_v56, 0.0  ;;  %v3205_v55 = vadd.f32 %v3204_v34, %v3203_v6  ;;  %v2281_v6 = vpop.f32.mrf.mxu3 }
 0x219   :  { %v12204_v17 = vmax.f32 %v8915_v47, 0.0  ;;  %v1225_v14 = vmax.f32 %v1212_v37, 0.0  ;;  %v3206_v40 = vsel %vm169_vm2, %v9219_v13, 0.0  ;;  %v2310_v56 = vrot.slane %v2309_v58, 2 }
 0x21a   :  { %4685 = vrot.lane.b32.xlu0 %v1223_v20, %s6757_s29  ;;  %v9326_v44 = vsel %vm169_vm2, %v12202_v28, %v9198_v0  ;;  %v12206_v20 = vld [vmem:[#allocation59_spill] sm:$0xff]  ;;  %v1806_v0 = vadd.f32 %v9282_v42, %v1788_v11  ;;  %v9342_v29 = vadd.f32 1e-05, %v2674_v7  ;;  %v1817_v47 = vmax.f32 %v1804_v53, 0.0  ;;  %v9352_v28 = vpop.permute.xlu2 %4615  ;;  %v12213_v7 = vld [vmem:[#allocation42_spill] sm:$0xff] }
 0x21b   :  { %12203 = vst [vmem:[#allocation27_spill] sm:$0xff] %v9326_v44  ;;  %v9331_v4 = vsel %vm169_vm2, %v12204_v17, %v4584_v25  ;;  %v12207_v30 = vmax.f32 %v12206_v20, 0.0  ;;  %v1805_v25 = vadd.f32 %v9282_v42, %v1787_v59  ;;  %v1807_v37 = vadd.f32 %v9282_v42, %v1789_v22  ;;  %v9354_v20 = vpop.permute.xlu1 %4575  ;;  %v9384_v44 = vpop.f32.mrf.mxu0 }
 0x21c   :  { %12205 = vst [vmem:[#allocation21_spill] sm:$0xff] %v9331_v4  ;;  %v12209_v34 = vmax.f32 %v8934_v16, 0.0  ;;  %v2311_v17 = vadd.f32 %v2310_v56, %v2309_v58  ;;  %v9357_v11 = vadd.f32 %v9282_v42, %v1790_v57  ;;  %v9360_v53 = vadd.f32 %v9282_v42, %v1792_v33  ;;  %v12212_v16 = vld [vmem:[#allocation17_spill] sm:$0xff]  ;;  %v9369_v57 = vpop.f32.mrf.mxu2 }
 0x21d   :  { %v9337_v46 = vsel %vm169_vm2, %v12207_v30, %v9205_v18  ;;  %12211 = vst [vmem:[#allocation32_spill] sm:$0xff] %v9352_v28  ;;  %v3207_v59 = vadd.f32 %v3206_v40, %v3205_v55  ;;  %4689 = vrot.lane.b32.xlu2 %v1225_v14, %s6757_s29  ;;  %4769 = vrot.lane.b32.xlu1 %v1817_v47, %s6758_s11  ;;  %v1819_v56 = vmax.f32 %v1806_v0, 0.0  ;;  %v12214_v33 = vld [vmem:[#allocation25_spill] sm:$0xff]  ;;  %v12215_v40 = vld [vmem:[#allocation16_spill] sm:$0xff]  ;;  %6738 = vrsqrt.f32 %v9342_v29  ;;  %v9376_v14 = vpop.permute.xlu0 %4573  ;;  %v9382_v0 = vpop.f32.mrf.mxu1 }
 0x21e   :  { %12208 = vst [vmem:[#allocation13_spill] sm:$0xff] %v9337_v46  ;;  %v9350_v18 = vsel %vm169_vm2, %v12209_v34, %v9230_v15  ;;  %v1791_v15 = vmul.f32 %v9189_v24, %v12212_v16  ;;  %v1793_v58 = vmul.f32 %v9189_v24, %v12213_v7  ;;  %v2312_v30 = vrot.slane %v2311_v17, 1  ;;  %v12216_v16 = vld [vmem:[#allocation47_spill] sm:$0xff] }
 0x21f   :  { %12210 = vst [vmem:[#allocation15_spill] sm:$0xff] %v9350_v18  ;;  %v1795_v55 = vmul.f32 %v9189_v24, %v12214_v33  ;;  %v1794_v6 = vmul.f32 %v9189_v24, %v12215_v40  ;;  %v1818_v47 = vmax.f32 %v1805_v25, 0.0  ;;  %v1820_v34 = vmax.f32 %v1807_v37, 0.0 }
 0x220   :  { %v1796_v22 = vmul.f32 %v9189_v24, %v12216_v16  ;;  %v2313_v7 = vadd.f32 %v2312_v30, %v2311_v17  ;;  %v3208_v4 = vsel %vm169_vm2, %v9294_v3, 0.0  ;;  %v2910_v25 = vsel %vm193_vm3, %v9382_v0, 0.0 }
 0x221   :  { %v9389_v28 = vadd.f32 %v3208_v4, %v3207_v59  ;;  %v1809_v37 = vadd.f32 %v9282_v42, %v1791_v15  ;;  %v9395_v17 = vadd.f32 %v9282_v42, %v1793_v58  ;;  %v9399_v16 = vadd.f32 %v2910_v25, %v2909_v49 }
 0x222   :  { %4773 = vrot.lane.b32.xlu0 %v1819_v56, %s6758_s11  ;;  %v9397_v30 = vmul.f32 0.010204081, %v2313_v7  ;;  %v9402_v56 = vadd.f32 %v9282_v42, %v1795_v55  ;;  %v9405_v33 = vadd.f32 %v9282_v42, %v1794_v6  ;;  %v9409_v4 = vsel %vm169_vm2, %v9236_v41, 0.0  ;;  %v12221_v7 = vld [vmem:[#allocation40_spill] sm:$0xff] }
 0x223   :  { %v12217_v59 = vmax.f32 %v8941_v2, 0.0  ;;  %v9418_v58 = vadd.f32 %v9282_v42, %v1796_v22  ;;  %v9422_v49 = vadd.f32 %v9282_v42, %v9259_v51  ;;  %v12219_v55 = vmax.f32 %v8952_v26, 0.0  ;;  %v12223_v2 = vld [vmem:[#allocation41_spill] sm:$0xff]  ;;  %v9440_v40 = vpop.eup %6738 }
 0x224   :  { %v9432_v25 = vsub.f32 %v12221_v7, %v9397_v30  ;;  %v12225_v22 = vld [vmem:[#allocation57_spill] sm:$0xff]  ;;  %v1822_v26 = vmax.f32 %v1809_v37, 0.0  ;;  %v9452_v7 = vld [vmem:[%s11710_s3 + $0x6] ss:$0 sm:$0xff]  ;;  %v12231_v37 = vld [vmem:[#allocation23_spill] sm:$0xff]  ;;  %v9465_v46 = vsub.f32 %v8745_v63, %v9397_v30  ;;  %v9469_v35 = vpop.f32.mrf.mxu2  ;;  %v9486_v18 = vsub.f32 %v8788_v27, %v9397_v30 }
 0x225   :  { %v9415_v15 = vsel %vm169_vm2, %v12217_v59, %v9271_v38  ;;  %v9428_v6 = vsel %vm169_vm2, %v12219_v55, %v9296_v10  ;;  %v9436_v38 = vsub.f32 %v12223_v2, %v9397_v30  ;;  %v1797_v59 = vmul.f32 %v9189_v24, %v12225_v22  ;;  %v12226_v51 = vld [vmem:[#allocation37_spill] sm:$0xff]  ;;  %4771 = vrot.lane.b32.xlu2 %v1818_v47, %s6758_s11  ;;  %v12228_v10 = vld [vmem:[#allocation12_spill] sm:$0xff]  ;;  %v4622_v2 = vpop.permute.xlu2 %4621  ;;  %v9454_v24 = vpop.permute.xlu1 %4581 }
 0x226   :  { %12218 = vst [vmem:[#allocation19_spill] sm:$0xff] %v9415_v15  ;;  %v9444_v41 = vsub.f32 %v12226_v51, %v9397_v30  ;;  %v2088_v55 = vmul.f32 %v9254_v21, %v12228_v10  ;;  %4775 = vrot.lane.b32.xlu1 %v1820_v34, %s6758_s11  ;;  %v2089_v10 = vmul.f32 %v9254_v21, %v12231_v37  ;;  %v9471_v34 = vpop.f32.mrf.mxu3  ;;  %v1825_v22 = vmax.f32 %v9405_v33, 0.0  ;;  %v9490_v51 = vpop.permute.xlu0 %4579 }
 0x227   :  { %12220 = vst [vmem:[#allocation10_spill] sm:$0xff] %v9428_v6  ;;  %v12230_v6 = vld [vmem:[#allocation26_spill] sm:$0xff]  ;;  %v2328_v15 = vmul.f32 %v9432_v25, %v9432_v25  ;;  %v2329_v37 = vmul.f32 %v9436_v38, %v9436_v38  ;;  %vm2684_vm13 = vweird.f32 %v9342_v29  ;;  %vm2685_vm14 = vweird.f32 %v9440_v40 }
 0x228   :  { %12222 = vst [vmem:[#allocation30_spill] sm:$0xff] %v9432_v25  ;;  %v2090_v47 = vmul.f32 %v9254_v21, %v12230_v6  ;;  %v2679_v6 = vmul.f32 %v9440_v40, %v9342_v29  ;;  %v9482_v25 = vadd.f32 %v9282_v42, %v1797_v59  ;;  %v2330_v33 = vmul.f32 %v9444_v41, %v9444_v41  ;;  %vm9653_vm15 = vmor %vm2684_vm13, %vm2685_vm14  ;;  %v6102_v29 = vld [vmem:[%s11711_s2 + $0x8] sm:$0x1] }
 0x229   :  { %12224 = vst [vmem:[#allocation44_spill] sm:$0xff] %v9436_v38  ;;  %v9501_v42 = vsel %vm5289_vm12, %v9267_v45, %v4622_v2  ;;  %v9507_v59 = vadd.f32 %v9452_v7, %v2089_v10  ;;  %v12238_v38 = vld [vmem:[#allocation53_spill] sm:$0xff]  ;;  %v2342_v45 = vsel %vm169_vm2, %v2329_v37, 0.0  ;;  %v12240_v10 = vmax.f32 %v8959_v43, 0.0 }
 0x22a   :  { %12227 = vst [vmem:[#allocation46_spill] sm:$0xff] %v9444_v41  ;;  %4779 = vrot.lane.b32.xlu0 %v1822_v26, %s6758_s11  ;;  %v12236_v26 = vld [vmem:[#allocation43_spill] sm:$0xff]  ;;  %v9504_v27 = vadd.f32 %v9452_v7, %v2090_v47  ;;  %v2093_v41 = vmul.f32 %v9254_v21, %v12238_v38  ;;  %v2680_v2 = vmul.f32 %v9440_v40, %v2679_v6  ;;  %v2344_v37 = vsel %vm169_vm2, %v2330_v33, 0.0 }
 0x22b   :  { %12229 = vst [vmem:[#allocation39_spill] sm:$0xff] %v9454_v24  ;;  %v2885_v24 = vpop.f32.mrf.mxu1  ;;  %v2091_v63 = vmul.f32 %v9254_v21, %v12236_v26  ;;  %v2331_v26 = vmul.f32 %v9465_v46, %v9465_v46  ;;  %v9548_v33 = vsub.f32 %v8927_v8, %v9397_v30  ;;  %v9564_v8 = vsub.f32 %v8996_v61, %v9397_v30 }
 0x22c   :  { %12232 = vst [vmem:[#allocation29_spill] sm:$0xff] %v9465_v46  ;;  %v9495_v24 = vadd.f32 %v9452_v7, %v2088_v55  ;;  %v9513_v55 = vsub.f32 %v8828_v52, %v9397_v30  ;;  %v9529_v52 = vsub.f32 %v12175_v12, %v9397_v30  ;;  %v9578_v61 = vadd.f32 %v9452_v7, %v2093_v41 }
 0x22d   :  { %12233 = vst [vmem:[#allocation11_spill] sm:$0xff] %v9471_v34  ;;  %v9492_v34 = vpop.f32.mrf.mxu0  ;;  %v9557_v43 = vpop.permute.xlu1 %4613  ;;  %v9582_v38 = vsub.f32 %v9094_v62, %v9397_v30  ;;  %v9595_v62 = vsub.f32 %v9153_v9, %v9397_v30  ;;  %v12267_v46 = vmax.f32 %v9418_v58, 0.0  ;;  %vm5331_vm11 = vcmask 326656  }
 0x22e   :  { %12234 = vst [vmem:[#allocation14_spill] sm:$0xff] %v9486_v18  ;;  %v9559_v12 = vpop.f32.mrf.mxu3 }
 0x22f   :  { %12235 = vst [vmem:[#allocation38_spill] sm:$0xff] %v9490_v51  ;;  %v2341_v51 = vsel %vm169_vm2, %v2328_v15, 0.0  ;;  %v2332_v15 = vmul.f32 %v9486_v18, %v9486_v18  ;;  %v9587_v18 = vpop.permute.xlu0 %4585 }
 0x230   :  { %12237 = vst [vmem:[#allocation59_spill] sm:$0xff] %v9501_v42  ;;  %v2343_v47 = vadd.f32 %v2342_v45, %v2341_v51  ;;  %v9524_v42 = vsel %vm169_vm2, %v12240_v10, %v9354_v20  ;;  %v12242_v51 = vmax.f32 %v9357_v11, 0.0  ;;  %v12243_v20 = vmax.f32 %v9360_v53, 0.0 }
 0x231   :  { %12239 = vst [vmem:[#allocation17_spill] sm:$0xff] %v9513_v55  ;;  %v9544_v10 = vadd.f32 %v9452_v7, %v2091_v63  ;;  %v2333_v11 = vmul.f32 %v9513_v55, %v9513_v55  ;;  %v3210_v53 = vsel %vm169_vm2, %v9369_v57, 0.0  ;;  %v2912_v63 = vrot.slane %v9399_v16, 4  ;;  %v12249_v55 = vld [vmem:[#allocation22_spill] sm:$0xff] }
 0x232   :  { %12241 = vst [vmem:[#allocation42_spill] sm:$0xff] %v9529_v52  ;;  %4777 = vrot.lane.b32.xlu2 %v12242_v51, %s6758_s11  ;;  %v2345_v6 = vadd.f32 %v2344_v37, %v2343_v47  ;;  %4781 = vrot.lane.b32.xlu1 %v12243_v20, %s6758_s11  ;;  %v2346_v47 = vsel %vm169_vm2, %v2331_v26, 0.0  ;;  %v3187_v37 = vpop.f32.mrf.mxu2  ;;  %v2681_v51 = vmul.f32 0.5, %v2680_v2  ;;  %v3211_v45 = vadd.f32 %v3210_v53, %v9389_v28 }
 0x233   :  { %12244 = vst [vmem:[#allocation25_spill] sm:$0xff] %v9548_v33  ;;  %4785 = vrot.lane.b32.xlu0 %v1825_v22, %s6758_s11  ;;  %v2334_v26 = vmul.f32 %v9529_v52, %v9529_v52  ;;  %v2348_v2 = vsel %vm169_vm2, %v2332_v15, 0.0  ;;  %v3212_v28 = vsel %vm193_vm3, %v9469_v35, 0.0  ;;  %v2913_v22 = vadd.f32 %v2912_v63, %v9399_v16  ;;  %v9591_v63 = vpop.permute.xlu2 %4627 }
 0x234   :  { %v2347_v20 = vadd.f32 %v2346_v47, %v2345_v6  ;;  %12245 = vst [vmem:[#allocation16_spill] sm:$0xff] %v9559_v12  ;;  %v9573_v47 = vpop.f32.mrf.mxu1  ;;  %v3213_v37 = vadd.f32 %v3212_v28, %v3211_v45  ;;  %v2335_v15 = vmul.f32 %v9548_v33, %v9548_v33  ;;  %v2350_v52 = vsel %vm169_vm2, %v2333_v11, 0.0 }
 0x235   :  { %12246 = vst [vmem:[#allocation47_spill] sm:$0xff] %v9564_v8  ;;  %v9571_v6 = vpop.f32.mrf.mxu0  ;;  %v2914_v45 = vrot.slane %v2913_v22, 2  ;;  %v2336_v28 = vmul.f32 %v9564_v8, %v9564_v8  ;;  %v2352_v11 = vsel %vm169_vm2, %v2334_v26, 0.0  ;;  %v12251_v33 = vmax.f32 %v8967_v31, 0.0  ;;  %v12255_v8 = vld [vmem:[#allocation33_spill] sm:$0xff] }
 0x236   :  { %12247 = vst [vmem:[#allocation40_spill] sm:$0xff] %v9573_v47  ;;  %v2349_v53 = vadd.f32 %v2348_v2, %v2347_v20  ;;  %v2092_v20 = vmul.f32 %v9254_v21, %v12249_v55  ;;  %v2682_v2 = vsub.f32 1.5, %v2681_v51  ;;  %v3214_v41 = vrot.slane %v3213_v37, 4 }
 0x237   :  { %12248 = vst [vmem:[#allocation41_spill] sm:$0xff] %v9582_v38  ;;  %v9604_v55 = vsel %vm169_vm2, %v12251_v33, %v9376_v14  ;;  %v2915_v9 = vadd.f32 %v2914_v45, %v2913_v22  ;;  %v2094_v26 = vmul.f32 %v9254_v21, %v12255_v8  ;;  %v9617_v31 = vsub.f32 %v9217_v19, %v9397_v30 }
 0x238   :  { %v2351_v16 = vadd.f32 %v2350_v52, %v2349_v53  ;;  %12250 = vst [vmem:[#allocation57_spill] sm:$0xff] %v9595_v62  ;;  %v12253_v52 = vmax.f32 %v9395_v17, 0.0  ;;  %v12254_v53 = vmax.f32 %v9402_v56, 0.0  ;;  %v9621_v14 = vsub.f32 %v9273_v32, %v9397_v30 }
 0x239   :  { %12252 = vst [vmem:[#allocation37_spill] sm:$0xff] %v9604_v55  ;;  %v2337_v17 = vmul.f32 %v9582_v38, %v9582_v38  ;;  %v2354_v33 = vsel %vm169_vm2, %v2335_v15, 0.0  ;;  %v2683_v56 = vmul.f32 %v9440_v40, %v2682_v2  ;;  %v2916_v45 = vrot.slane %v2915_v9, 1 }
 0x23a   :  { %4783 = vrot.lane.b32.xlu2 %v12253_v52, %s6758_s11  ;;  %v2353_v51 = vadd.f32 %v2352_v11, %v2351_v16  ;;  %4787 = vrot.lane.b32.xlu1 %v12254_v53, %s6758_s11  ;;  %12256 = vst [vmem:[#allocation12_spill] sm:$0xff] %v9617_v31  ;;  %v9626_v22 = vpop.f32.mrf.mxu2  ;;  %v3215_v8 = vadd.f32 %v3214_v41, %v3213_v37  ;;  %v9629_v11 = vpop.f32.mrf.mxu3  ;;  %v12259_v19 = vmax.f32 %v9482_v25, 0.0  ;;  %v2356_v30 = vsel %vm169_vm2, %v2336_v28, 0.0  ;;  %v12263_v25 = vld [vmem:[#allocation35_spill] sm:$0xff] }
 0x23b   :  { %12257 = vst [vmem:[#allocation26_spill] sm:$0xff] %v9626_v22  ;;  %v2338_v32 = vmul.f32 %v9595_v62, %v9595_v62  ;;  %v2917_v53 = vadd.f32 %v2916_v45, %v2915_v9  ;;  %v2339_v2 = vmul.f32 %v9617_v31, %v9617_v31  ;;  %v2340_v9 = vmul.f32 %v9621_v14, %v9621_v14  ;;  %v12266_v45 = vld [vmem:[#allocation45_spill] sm:$0xff] }
 0x23c   :  { %v2355_v16 = vadd.f32 %v2354_v33, %v2353_v51  ;;  %12258 = vst [vmem:[#allocation23_spill] sm:$0xff] %v9629_v11  ;;  %4791 = vrot.lane.b32.xlu0 %v12259_v19, %s6758_s11  ;;  %v9639_v15 = vpop.f32.mrf.mxu1  ;;  %v12262_v51 = vld [vmem:[#allocation58_spill] sm:$0xff]  ;;  %v9645_v33 = vadd.f32 %v9452_v7, %v2092_v20  ;;  %v2095_v19 = vmul.f32 %v9254_v21, %v12263_v25  ;;  %v2358_v20 = vsel %vm169_vm2, %v2337_v17, 0.0  ;;  %v9675_v17 = vpop.permute.xlu0 %4617 }
 0x23d   :  { %v9637_v52 = vpop.f32.mrf.mxu0  ;;  %12261 = vst [vmem:[#allocation53_spill] sm:$0xff] %v9639_v15  ;;  %v2096_v37 = vmul.f32 %v9254_v21, %v12262_v51  ;;  %v2687_v51 = vsel %vm9653_vm15, %v9440_v40, %v2683_v56  ;;  %v9672_v62 = vmul.f32 0.010204081, %v2917_v53  ;;  %v3216_v31 = vrot.slane %v3215_v8, 2  ;;  %v12268_v56 = vld [vmem:[#allocation48_spill] sm:$0xff]  ;;  %v9695_v53 = vpop.permute.xlu2 %4633 }
 0x23e   :  { %12260 = vst [vmem:[#allocation43_spill] sm:$0xff] %v9637_v52  ;;  %v2357_v41 = vadd.f32 %v2356_v30, %v2355_v16  ;;  %v9662_v16 = vpop.permute.xlu1 %4619  ;;  %v2097_v30 = vmul.f32 %v9254_v21, %v12266_v45  ;;  %v2360_v38 = vsel %vm169_vm2, %v2338_v32, 0.0  ;;  %v9682_v15 = vadd.f32 %v9452_v7, %v2094_v26 }
 0x23f   :  { %v9685_v28 = vadd.f32 %v9452_v7, %v2096_v37  ;;  %v9693_v32 = vsub.f32 %v8704_v23, %v9672_v62  ;;  %v2123_v58 = vmax.f32 %v9645_v33, 0.0  ;;  %v2688_v26 = vmul.f32 %v6102_v29, %v2687_v51 }
 0x240   :  { %v2359_v25 = vadd.f32 %v2358_v20, %v2357_v41  ;;  %v9689_v41 = vsub.f32 %v12268_v56, %v9672_v62  ;;  %v2362_v37 = vsel %vm169_vm2, %v2339_v2, 0.0  ;;  %v9710_v56 = vsub.f32 %v8762_v48, %v9672_v62 }
 0x241   :  { %12270 = vst [vmem:[#allocation33_spill] sm:$0xff] %v9693_v32  ;;  %v3217_v45 = vadd.f32 %v3216_v31, %v3215_v8  ;;  %v12275_v33 = vmax.f32 %v9507_v59, 0.0  ;;  %v9718_v2 = vadd.f32 %v9452_v7, %v2097_v30  ;;  %v9730_v48 = vsub.f32 %v9234_v5, %v9672_v62 }
 0x242   :  { %4789 = vrot.lane.b32.xlu2 %v12267_v46, %s6758_s11  ;;  %v2361_v40 = vadd.f32 %v2360_v38, %v2359_v25  ;;  %12269 = vst [vmem:[#allocation22_spill] sm:$0xff] %v9689_v41  ;;  %v12271_v46 = vmax.f32 %v9422_v49, 0.0  ;;  %v2364_v38 = vsel %vm193_vm3, %v2340_v9, 0.0  ;;  %v9703_v20 = vpop.f32.mrf.mxu2  ;;  %v9706_v25 = vadd.f32 %v9452_v7, %v2095_v19  ;;  %v9712_v49 = vpop.f32.mrf.mxu3  ;;  %v12277_v9 = vld [vmem:[#allocation24_spill] sm:$0xff] }
 0x243   :  { %12272 = vst [vmem:[#allocation58_spill] sm:$0xff] %v9703_v20  ;;  %v9722_v19 = vsub.f32 %v8800_v60, %v9672_v62  ;;  %v9726_v29 = vsub.f32 %v12277_v9, %v9672_v62  ;;  %v9734_v31 = vsub.f32 %v9298_v54, %v9672_v62  ;;  %v9742_v60 = vsub.f32 %v9382_v0, %v9672_v62  ;;  %v12284_v0 = vld [vmem:[#allocation65_spill] sm:$0xff] }
 0x244   :  { %4793 = vrot.lane.b32.xlu1 %v12271_v46, %s6758_s11  ;;  %v2363_v23 = vadd.f32 %v2362_v37, %v2361_v40  ;;  %12273 = vst [vmem:[#allocation35_spill] sm:$0xff] %v9710_v56  ;;  %4823 = vrot.lane.b32.xlu0 %v12275_v33, %s6759_s16  ;;  %v9738_v8 = vpop.f32.mrf.mxu1  ;;  %v2932_v51 = vmul.f32 %v9689_v41, %v9689_v41  ;;  %v12283_v37 = vld [vmem:[#allocation36_spill] sm:$0xff]  ;;  %v3218_v54 = vrot.slane %v3217_v45, 1  ;;  %v12289_v46 = vld [vmem:[#allocation34_spill] sm:$0xff]  ;;  %v12291_v55 = vmax.f32 %v9504_v27, 0.0  ;;  %v12296_v27 = vld [vmem:[#allocation49_spill] sm:$0xff] }
 0x245   :  { %12274 = vst [vmem:[#allocation45_spill] sm:$0xff] %v9712_v49  ;;  %v9736_v59 = vpop.f32.mrf.mxu0  ;;  %v2933_v5 = vmul.f32 %v9693_v32, %v9693_v32  ;;  %v2099_v33 = vmul.f32 %v9254_v21, %v12283_v37  ;;  %v9757_v9 = vsub.f32 %v12284_v0, %v9672_v62  ;;  %v2934_v41 = vmul.f32 %v9710_v56, %v9710_v56  ;;  %v12286_v32 = vld [vmem:[#allocation60_spill] sm:$0xff]  ;;  %v9777_v47 = vpop.permute.xlu2 %4721  ;;  %s6764_s11 = smov 96  }
 0x246   :  { %12276 = vst [vmem:[#allocation48_spill] sm:$0xff] %v9722_v19  ;;  %v2365_v30 = vadd.f32 %v2364_v38, %v2363_v23  ;;  %v9753_v38 = vperm.slane %v2688_v26, 0  ;;  %v9763_v40 = vsub.f32 %v12286_v32, %v9672_v62  ;;  %v12288_v37 = vmax.f32 %v9495_v24, 0.0  ;;  %v12292_v24 = vld [vmem:[#allocation55_spill] sm:$0xff] }
 0x247   :  { %12278 = vst [vmem:[#allocation24_spill] sm:$0xff] %v9726_v29  ;;  %v2098_v0 = vmul.f32 %v9254_v21, %v12289_v46  ;;  %v2935_v56 = vmul.f32 %v9722_v19, %v9722_v19  ;;  %v2945_v22 = vsel %vm169_vm2, %v2932_v51, 0.0  ;;  %v2946_v32 = vsel %vm169_vm2, %v2933_v5, 0.0  ;;  %v9786_v21 = vpop.permute.xlu0 %4623 }
 0x248   :  { %12279 = vst [vmem:[#allocation72_spill] sm:$0xff] %v9730_v48  ;;  %v2366_v23 = vrot.slane %v2365_v30, 4  ;;  %v2947_v26 = vadd.f32 %v2946_v32, %v2945_v22  ;;  %v9791_v46 = vadd.f32 %v9452_v7, %v2099_v33  ;;  %v9795_v51 = vadd.f32 %v9452_v7, %v9286_v36  ;;  %v12299_v36 = vld [vmem:[#allocation71_spill] sm:$0xff] }
 0x249   :  { %12280 = vst [vmem:[#allocation73_spill] sm:$0xff] %v9734_v31  ;;  %v2948_v22 = vsel %vm169_vm2, %v2934_v41, 0.0  ;;  %v3794_v33 = vsel %vm169_vm2, %v9310_v1, 0.0  ;;  %vm5345_vm15 = vcmask 392192  }
 0x24a   :  { %12281 = vst [vmem:[#allocation74_spill] sm:$0xff] %v9736_v59  ;;  %4821 = vrot.lane.b32.xlu2 %v12288_v37, %s6759_s16  ;;  %v2367_v20 = vadd.f32 %v2366_v23, %v2365_v30  ;;  %v9784_v37 = vsub.f32 %v12292_v24, %v9672_v62  ;;  %v9788_v30 = vpop.f32.mrf.mxu2  ;;  %v2936_v23 = vmul.f32 %v9757_v9, %v9757_v9  ;;  %v9804_v32 = vpop.f32.mrf.mxu3 }
 0x24b   :  { %12282 = vst [vmem:[#allocation75_spill] sm:$0xff] %v9738_v8  ;;  %v9765_v8 = vpop.permute.xlu1 %4625  ;;  %v9811_v24 = vsub.f32 %v12299_v36, %v9672_v62  ;;  %v2949_v19 = vadd.f32 %v2948_v22, %v2947_v26  ;;  %v2941_v22 = vmul.f32 %v9726_v29, %v9726_v29 }
 0x24c   :  { %12285 = vst [vmem:[#allocation36_spill] sm:$0xff] %v9757_v9  ;;  %4825 = vrot.lane.b32.xlu1 %v12291_v55, %s6759_s16  ;;  %v2368_v5 = vrot.slane %v2367_v20, 2  ;;  %v9799_v55 = vsub.f32 %v12296_v27, %v9672_v62  ;;  %4829 = vrot.lane.b32.xlu0 %v2123_v58, %s6759_s16  ;;  %v9815_v27 = vpop.f32.mrf.mxu1  ;;  %v9818_v9 = vadd.f32 %v9452_v7, %v2098_v0  ;;  %v2950_v58 = vsel %vm169_vm2, %v2935_v56, 0.0 }
 0x24d   :  { %12287 = vst [vmem:[#allocation65_spill] sm:$0xff] %v9763_v40  ;;  %v2938_v1 = vmul.f32 %v9784_v37, %v9784_v37  ;;  %v2951_v62 = vadd.f32 %v2950_v58, %v2949_v19  ;;  %v12303_v19 = vmax.f32 %v9544_v10, 0.0  ;;  %v2942_v10 = vmul.f32 %v9730_v48, %v9730_v48 }
 0x24e   :  { %12290 = vst [vmem:[#allocation60_spill] sm:$0xff] %v9777_v47  ;;  %v9813_v47 = vpop.f32.mrf.mxu0  ;;  %v2369_v41 = vadd.f32 %v2368_v5, %v2367_v20  ;;  %v2939_v7 = vmul.f32 %v9799_v55, %v9799_v55  ;;  %v2952_v20 = vsel %vm169_vm2, %v2936_v23, 0.0  ;;  %v3795_v5 = vadd.f32 %v3794_v33, %v9409_v4  ;;  %v9846_v4 = vpop.permute.xlu2 %4727 }
 0x24f   :  { %12293 = vst [vmem:[#allocation34_spill] sm:$0xff] %v9784_v37  ;;  %v2953_v56 = vadd.f32 %v2952_v20, %v2951_v62  ;;  %v12307_v33 = vmax.f32 %v9578_v61, 0.0  ;;  %v12308_v62 = vld [vmem:[#allocation4_spill] sm:$0xff]  ;;  %v12310_v61 = vld [vmem:[#allocation3_spill] sm:$0xff] }
 0x250   :  { %12294 = vst [vmem:[#allocation55_spill] sm:$0xff] %v9786_v21  ;;  %v2937_v21 = vmul.f32 %v9763_v40, %v9763_v40  ;;  %v2370_v36 = vrot.slane %v2369_v41, 1 }
 0x251   :  { %12295 = vst [vmem:[#allocation76_spill] sm:$0xff] %v9788_v30  ;;  %v3219_v30 = vadd.f32 %v3218_v54, %v3217_v45  ;;  %v2940_v45 = vmul.f32 %v9811_v24, %v9811_v24  ;;  %v2129_v54 = vmax.f32 %v9818_v9, 0.0 }
 0x252   :  { %12297 = vst [vmem:[#allocation49_spill] sm:$0xff] %v9799_v55  ;;  %4827 = vrot.lane.b32.xlu2 %v12303_v19, %s6759_s16  ;;  %v2371_v58 = vadd.f32 %v2370_v36, %v2369_v41  ;;  %v2954_v23 = vsel %vm169_vm2, %v2937_v21, 0.0  ;;  %v2956_v41 = vsel %vm169_vm2, %v2938_v1, 0.0  ;;  %v2958_v19 = vsel %vm169_vm2, %v2939_v7, 0.0  ;;  %v9867_v48 = vpop.f32.mrf.mxu3 }
 0x253   :  { %12298 = vst [vmem:[#allocation77_spill] sm:$0xff] %v9804_v32  ;;  %v9830_v0 = vmul.f32 0.010204081, %v3219_v30  ;;  %v12304_v30 = vld [vmem:[#allocation50_spill] sm:$0xff]  ;;  %v2955_v9 = vadd.f32 %v2954_v23, %v2953_v56  ;;  %v9858_v21 = vpop.permute.xlu1 %4631  ;;  %v9869_v56 = vpop.f32.mrf.mxu2  ;;  %v12314_v1 = vmax.f32 %v9706_v25, 0.0 }
 0x254   :  { %12300 = vst [vmem:[#allocation71_spill] sm:$0xff] %v9811_v24  ;;  %4831 = vrot.lane.b32.xlu1 %v12307_v33, %s6759_s16  ;;  %v2372_v20 = vmul.f32 0.010204081, %v2371_v58  ;;  %v12319_v25 = vld [vmem:[#allocation2_spill] sm:$0xff] }
 0x255   :  { %12301 = vst [vmem:[#allocation78_spill] sm:$0xff] %v9813_v47  ;;  %v9844_v26 = vsub.f32 %v12304_v30, %v9830_v0  ;;  %v9856_v36 = vsub.f32 %v12308_v62, %v9830_v0  ;;  %v3796_v30 = vsel %vm169_vm2, %v9384_v44, 0.0  ;;  %v9865_v33 = vsub.f32 %v12310_v61, %v9830_v0  ;;  %4835 = vrot.lane.b32.xlu0 %v12314_v1, %s6759_s16  ;;  %v9886_v61 = vpop.permute.xlu0 %4629  ;;  %v12323_v24 = vld [vmem:[#allocation6_spill] sm:$0xff] }
 0x256   :  { %12302 = vst [vmem:[#allocation79_spill] sm:$0xff] %v9815_v27  ;;  %v2957_v23 = vadd.f32 %v2956_v41, %v2955_v9  ;;  %v9876_v58 = vsub.f32 %v9219_v13, %v9830_v0  ;;  %v9880_v7 = vsub.f32 %v9294_v3, %v9830_v0  ;;  %v9884_v62 = vsub.f32 %v9369_v57, %v9830_v0  ;;  %v9888_v29 = vpop.f32.mrf.mxu0  ;;  %v9902_v41 = vpop.f32.mrf.mxu1 }
 0x257   :  { %12305 = vst [vmem:[#allocation50_spill] sm:$0xff] %v9844_v26  ;;  %v9890_v55 = vadd.f32 1e-05, %v2372_v20  ;;  %v9894_v9 = vsub.f32 %v12319_v25, %v9830_v0  ;;  %v9898_v13 = vsub.f32 %v9469_v35, %v9830_v0  ;;  %v3234_v3 = vmul.f32 %v9844_v26, %v9844_v26 }
 0x258   :  { %12306 = vst [vmem:[#allocation80_spill] sm:$0xff] %v9846_v4  ;;  %v2959_v57 = vadd.f32 %v2958_v19, %v2957_v23  ;;  %v3797_v1 = vadd.f32 %v3796_v30, %v3795_v5  ;;  %v9906_v37 = vsub.f32 %v12323_v24, %v9830_v0  ;;  %v3235_v20 = vmul.f32 %v9856_v36, %v9856_v36  ;;  %v12325_v24 = vld [vmem:[#allocation54_spill] sm:$0xff] }
 0x259   :  { %12309 = vst [vmem:[#allocation4_spill] sm:$0xff] %v9856_v36  ;;  %6740 = vrsqrt.f32 %v9890_v55  ;;  %v2943_v35 = vmul.f32 %v9734_v31, %v9734_v31  ;;  %v2960_v25 = vsel %vm169_vm2, %v2940_v45, 0.0  ;;  %v3798_v26 = vsel %vm169_vm2, %v9492_v34, 0.0 }
 0x25a   :  { %12311 = vst [vmem:[#allocation3_spill] sm:$0xff] %v9865_v33  ;;  %v2944_v5 = vmul.f32 %v9742_v60, %v9742_v60  ;;  %v2961_v19 = vadd.f32 %v2960_v25, %v2959_v57  ;;  %v9920_v30 = vsub.f32 %v12325_v24, %v9830_v0  ;;  %v3236_v23 = vmul.f32 %v9865_v33, %v9865_v33  ;;  %v9935_v24 = vpop.permute.xlu2 %4733 }
 0x25b   :  { %12312 = vst [vmem:[#allocation81_spill] sm:$0xff] %v9867_v48  ;;  %v12327_v36 = vmax.f32 %v9682_v15, 0.0  ;;  %v2962_v45 = vsel %vm169_vm2, %v2941_v22, 0.0  ;;  %v9930_v31 = vsub.f32 %v8998_v39, %v9830_v0  ;;  %v3237_v57 = vmul.f32 %v9894_v9, %v9894_v9 }
 0x25c   :  { %12313 = vst [vmem:[#allocation82_spill] sm:$0xff] %v9869_v56  ;;  %v3247_v25 = vsel %vm169_vm2, %v3234_v3, 0.0  ;;  %v12330_v33 = vmax.f32 %v9685_v28, 0.0  ;;  %v2963_v40 = vadd.f32 %v2962_v45, %v2961_v19  ;;  %v3238_v15 = vmul.f32 %v9906_v37, %v9906_v37  ;;  %v9965_v45 = vpop.f32.mrf.mxu2 }
 0x25d   :  { %12315 = vst [vmem:[#allocation83_spill] sm:$0xff] %v9876_v58  ;;  %4833 = vrot.lane.b32.xlu2 %v12327_v36, %s6759_s16  ;;  %v3248_v22 = vsel %vm169_vm2, %v3235_v20, 0.0  ;;  %v3799_v36 = vadd.f32 %v3798_v26, %v3797_v1  ;;  %v2964_v39 = vsel %vm169_vm2, %v2942_v10, 0.0  ;;  %v2966_v4 = vsel %vm169_vm2, %v2943_v35, 0.0  ;;  %4841 = vrot.lane.b32.xlu0 %v2129_v54, %s6759_s16  ;;  %v9952_v20 = vpop.f32.mrf.mxu3 }
 0x25e   :  { %12316 = vst [vmem:[#allocation84_spill] sm:$0xff] %v9880_v7  ;;  %4837 = vrot.lane.b32.xlu1 %v12330_v33, %s6759_s16  ;;  %v3800_v3 = vsel %vm169_vm2, %v9571_v6, 0.0  ;;  %v2968_v28 = vsel %vm193_vm3, %v2944_v5, 0.0  ;;  %v3239_v33 = vmul.f32 %v9920_v30, %v9920_v30  ;;  %v3250_v19 = vsel %vm169_vm2, %v3236_v23, 0.0  ;;  %v9954_v26 = vpop.f32.mrf.mxu0  ;;  %v9963_v5 = vpop.permute.xlu1 %4637 }
 0x25f   :  { %12317 = vst [vmem:[#allocation85_spill] sm:$0xff] %v9884_v62  ;;  %v9956_v10 = vpop.eup %6740  ;;  %v3240_v1 = vmul.f32 %v9930_v31, %v9930_v31  ;;  %v3252_v54 = vsel %vm169_vm2, %v3237_v57, 0.0  ;;  %vm2382_vm0 = vweird.f32 %v9890_v55 }
 0x260   :  { %12318 = vst [vmem:[#allocation86_spill] sm:$0xff] %v9888_v29  ;;  %v2377_v23 = vmul.f32 %v9956_v10, %v9890_v55  ;;  %vm2383_vm4 = vweird.f32 %v9956_v10  ;;  %v12349_v55 = vmax.f32 %v9795_v51, 0.0 }
 0x261   :  { %12320 = vst [vmem:[#allocation2_spill] sm:$0xff] %v9894_v9  ;;  %v3249_v9 = vadd.f32 %v3248_v22, %v3247_v25  ;;  %v3254_v22 = vsel %vm169_vm2, %v3238_v15, 0.0  ;;  %vm2384_vm5 = vmor %vm2382_vm0, %vm2383_vm4 }
 0x262   :  { %12321 = vst [vmem:[#allocation87_spill] sm:$0xff] %v9898_v13 }
 0x263   :  { %12322 = vst [vmem:[#allocation88_spill] sm:$0xff] %v9902_v41  ;;  %v3251_v35 = vadd.f32 %v3250_v19, %v3249_v9  ;;  %v9975_v9 = vsub.f32 %v9096_v50, %v9830_v0  ;;  %v3804_v19 = vsel %vm169_vm2, %v9736_v59, 0.0  ;;  %v12345_v59 = vld [vmem:[#allocation5_spill] sm:$0xff] }
 0x264   :  { %12324 = vst [vmem:[#allocation6_spill] sm:$0xff] %v9906_v37  ;;  %v2378_v37 = vmul.f32 %v9956_v10, %v2377_v23 }
 0x265   :  { %12326 = vst [vmem:[#allocation54_spill] sm:$0xff] %v9920_v30  ;;  %v9970_v30 = vpop.permute.xlu0 %4635  ;;  %v3253_v57 = vadd.f32 %v3252_v54, %v3251_v35  ;;  %v3806_v35 = vsel %vm169_vm2, %v9813_v47, 0.0  ;;  %v9990_v54 = vpop.permute.xlu2 %4739  ;;  %v3241_v51 = vmul.f32 %v9975_v9, %v9975_v9 }
 0x266   :  { %12328 = vst [vmem:[#allocation89_spill] sm:$0xff] %v9930_v31  ;;  %v9979_v31 = vpop.f32.mrf.mxu1 }
 0x267   :  { %12329 = vst [vmem:[#allocation90_spill] sm:$0xff] %v9935_v24  ;;  %v2965_v24 = vadd.f32 %v2964_v39, %v2963_v40  ;;  %v3802_v40 = vsel %vm169_vm2, %v9637_v52, 0.0  ;;  %v3801_v39 = vadd.f32 %v3800_v3, %v3799_v36  ;;  %v12336_v36 = vmax.f32 %v9718_v2, 0.0 }
 0x268   :  { %12331 = vst [vmem:[#allocation91_spill] sm:$0xff] %v9952_v20  ;;  %v3255_v50 = vadd.f32 %v3254_v22, %v3253_v57  ;;  %v3258_v3 = vsel %vm169_vm2, %v3240_v1, 0.0  ;;  %v10000_v22 = vld [vmem:[%s11710_s3 + $0x8] ss:$0 sm:$0xff]  ;;  %v3810_v57 = vsel %vm169_vm2, %v9954_v26, 0.0 }
 0x269   :  { %12332 = vst [vmem:[#allocation92_spill] sm:$0xff] %v9954_v26  ;;  %v2967_v25 = vadd.f32 %v2966_v4, %v2965_v24  ;;  %v3256_v24 = vsel %vm169_vm2, %v3239_v33, 0.0  ;;  %v3803_v15 = vadd.f32 %v3802_v40, %v3801_v39  ;;  %4839 = vrot.lane.b32.xlu2 %v12336_v36, %s6759_s16  ;;  %v2379_v33 = vmul.f32 0.5, %v2378_v37 }
 0x26a   :  { %12333 = vst [vmem:[#allocation93_spill] sm:$0xff] %v9965_v45  ;;  %v3257_v1 = vadd.f32 %v3256_v24, %v3255_v50  ;;  %v3808_v39 = vsel %vm169_vm2, %v9888_v29, 0.0  ;;  %v3492_v24 = vsel %vm169_vm2, %v9559_v12, 0.0  ;;  %v10015_v50 = vpop.permute.xlu1 %4719  ;;  %v12344_v29 = vld [vmem:[#allocation8_spill] sm:$0xff]  ;;  %v10027_v12 = vpop.f32.mrf.mxu3 }
 0x26b   :  { %12334 = vst [vmem:[#allocation94_spill] sm:$0xff] %v9975_v9  ;;  %v2969_v4 = vadd.f32 %v2968_v28, %v2967_v25  ;;  %v12338_v28 = vmax.f32 %v9791_v46, 0.0  ;;  %v3805_v23 = vadd.f32 %v3804_v19, %v3803_v15  ;;  %v12339_v25 = vld [vmem:[#allocation62_spill] sm:$0xff]  ;;  %v12340_v46 = vld [vmem:[#allocation52_spill] sm:$0xff]  ;;  %v2380_v36 = vsub.f32 1.5, %v2379_v33 }
 0x26c   :  { %12335 = vst [vmem:[#allocation95_spill] sm:$0xff] %v9979_v31  ;;  %v2692_v2 = vmul.f32 %v9753_v38, %v12339_v25  ;;  %v2694_v37 = vmul.f32 %v9753_v38, %v12340_v46  ;;  %v2693_v26 = vmul.f32 %v9753_v38, %v12344_v29  ;;  %v2695_v33 = vmul.f32 %v9753_v38, %v12345_v59  ;;  %v10035_v59 = vpop.f32.mrf.mxu2 }
 0x26d   :  { %12337 = vst [vmem:[#allocation96_spill] sm:$0xff] %v9990_v54  ;;  %4843 = vrot.lane.b32.xlu1 %v12338_v28, %s6759_s16  ;;  %v2970_v40 = vrot.slane %v2969_v4, 4  ;;  %v3807_v15 = vadd.f32 %v3806_v35, %v3805_v23  ;;  %v10008_v28 = vpop.f32.mrf.mxu0  ;;  %v12342_v54 = vld [vmem:[#allocation11_spill] sm:$0xff]  ;;  %v2381_v35 = vmul.f32 %v9956_v10, %v2380_v36  ;;  %v10025_v46 = vpop.permute.xlu0 %4717  ;;  %v3494_v29 = vsel %vm169_vm2, %v9629_v11, 0.0 }
 0x26e   :  { %12341 = vst [vmem:[#allocation62_spill] sm:$0xff] %v10008_v28  ;;  %v2710_v25 = vadd.f32 %v10000_v22, %v2692_v2  ;;  %v3491_v47 = vsel %vm169_vm2, %v12342_v54, 0.0  ;;  %v3812_v36 = vsel %vm169_vm2, %v10008_v28, 0.0  ;;  %v12350_v11 = vld [vmem:[#allocation15_spill] sm:$0xff]  ;;  %v3496_v28 = vsel %vm169_vm2, %v9712_v49, 0.0 }
 0x26f   :  { %v2971_v19 = vadd.f32 %v2970_v40, %v2969_v4  ;;  %12343 = vst [vmem:[#allocation52_spill] sm:$0xff] %v10015_v50  ;;  %v6031_v4 = vld [vmem:[%s11711_s2 + $0x7] sm:$0x1]  ;;  %v3493_v23 = vadd.f32 %v3492_v24, %v3491_v47  ;;  %v3809_v2 = vadd.f32 %v3808_v39, %v3807_v15  ;;  %v2712_v47 = vadd.f32 %v10000_v22, %v2694_v37  ;;  %v4666_v37 = vpop.permute.xlu2 %4665 }
 0x270   :  { %12346 = vst [vmem:[#allocation8_spill] sm:$0xff] %v10025_v46  ;;  %v2723_v54 = vmax.f32 %v2710_v25, 0.0  ;;  %v2385_v39 = vsel %vm2384_vm5, %v9956_v10, %v2381_v35  ;;  %v5290_v52 = vsel %vm5289_vm12, %v12350_v11, %v9557_v43  ;;  %v10049_v25 = vpop.f32.mrf.mxu1  ;;  %v12353_v43 = vld [vmem:[#allocation18_spill] sm:$0xff]  ;;  %v3259_v35 = vadd.f32 %v3258_v3, %v3257_v1 }
 0x271   :  { %v2972_v40 = vrot.slane %v2971_v19, 2  ;;  %12347 = vst [vmem:[#allocation5_spill] sm:$0xff] %v10027_v12  ;;  %v3495_v24 = vadd.f32 %v3494_v29, %v3493_v23  ;;  %v3811_v46 = vadd.f32 %v3810_v57, %v3809_v2  ;;  %4845 = vrot.lane.b32.xlu2 %v12349_v55, %s6759_s16  ;;  %v2386_v50 = vmul.f32 %v6031_v4, %v2385_v39  ;;  %s6765_s16 = smov 88  }
 0x272   :  { %12348 = vst [vmem:[#allocation97_spill] sm:$0xff] %v10035_v59  ;;  %v10061_v11 = vsub.f32 %v12353_v43, %v9830_v0  ;;  %v2713_v39 = vadd.f32 %v10000_v22, %v2695_v33  ;;  %v3498_v0 = vsel %vm169_vm2, %v9804_v32, 0.0  ;;  %v3260_v1 = vsel %vm169_vm2, %v3241_v51, 0.0 }
 0x273   :  { %v2973_v15 = vadd.f32 %v2972_v40, %v2971_v19  ;;  %12351 = vst [vmem:[#allocation15_spill] sm:$0xff] %v10049_v25  ;;  %v3813_v57 = vadd.f32 %v3812_v36, %v3811_v46  ;;  %v10055_v19 = vsel %vm5303_vm6, %v5290_v52, %v4666_v37  ;;  %v10057_v4 = vperm.slane %v2386_v50, 0  ;;  %v12357_v36 = vld [vmem:[#allocation69_spill] sm:$0xff]  ;;  %v10094_v37 = vpop.f32.mrf.mxu3 }
 0x274   :  { %12352 = vst [vmem:[#allocation98_spill] sm:$0xff] %v10055_v19  ;;  %v2725_v40 = vmax.f32 %v2712_v47, 0.0  ;;  %v3497_v2 = vadd.f32 %v3496_v28, %v3495_v24  ;;  %v10074_v50 = vsel %vm5289_vm12, %v9524_v42, %v9591_v63  ;;  %v3242_v33 = vmul.f32 %v10061_v11, %v10061_v11  ;;  %v10086_v42 = vpop.permute.xlu1 %4725 }
 0x275   :  { %4925 = vrot.lane.b32.xlu1 %v2723_v54, %s6760_s20  ;;  %v2974_v10 = vrot.slane %v2973_v15, 1  ;;  %12354 = vst [vmem:[#allocation18_spill] sm:$0xff] %v10061_v11  ;;  %v10063_v29 = vpop.f32.mrf.mxu0  ;;  %v2711_v54 = vadd.f32 %v10000_v22, %v2693_v26  ;;  %v10069_v52 = vmul.f32 %v10057_v4, %v9621_v14  ;;  %v3261_v46 = vadd.f32 %v3260_v1, %v3259_v35  ;;  %v10092_v55 = vpop.permute.xlu0 %4723  ;;  %v12361_v35 = vld [vmem:[#allocation39_spill] sm:$0xff] }
 0x276   :  { %12356 = vst [vmem:[#allocation100_spill] sm:$0xff] %v10074_v50  ;;  %v3814_v3 = vsel %vm169_vm2, %v10063_v29, 0.0  ;;  %4929 = vrot.lane.b32.xlu0 %v2725_v40, %s6760_s20  ;;  %v2726_v63 = vmax.f32 %v2713_v39, 0.0  ;;  %v2697_v47 = vmul.f32 %v9753_v38, %v12357_v36  ;;  %v3499_v24 = vadd.f32 %v3498_v0, %v3497_v2  ;;  %v12362_v40 = vld [vmem:[#allocation20_spill] sm:$0xff]  ;;  %v12364_v39 = vld [vmem:[#allocation38_spill] sm:$0xff]  ;;  %v10113_v1 = vpop.f32.mrf.mxu2 }
 0x277   :  { %v2975_v23 = vadd.f32 %v2974_v10, %v2973_v15  ;;  %12355 = vst [vmem:[#allocation99_spill] sm:$0xff] %v10069_v52  ;;  %v10082_v28 = vadd.f32 %v3814_v3, %v3813_v57  ;;  %v2724_v14 = vmax.f32 %v2711_v54, 0.0  ;;  %v12359_v10 = vld [vmem:[#allocation67_spill] sm:$0xff]  ;;  %v12360_v57 = vld [vmem:[#allocation70_spill] sm:$0xff]  ;;  %v12368_v36 = vld [vmem:[#allocation68_spill] sm:$0xff] }
 0x278   :  { %12358 = vst [vmem:[#allocation69_spill] sm:$0xff] %v10092_v55  ;;  %v2696_v51 = vmul.f32 %v9753_v38, %v12359_v10  ;;  %v2698_v43 = vmul.f32 %v9753_v38, %v12360_v57  ;;  %v12365_v3 = vld [vmem:[#allocation63_spill] sm:$0xff]  ;;  %v10119_v10 = vmul.f32 %v9753_v38, %v12368_v36  ;;  %v3243_v57 = vmul.f32 %v9876_v58, %v9876_v58  ;;  %v12387_v55 = vld [vmem:[#allocation76_spill] sm:$0xff] }
 0x279   :  { %v2976_v26 = vmul.f32 0.010204081, %v2975_v23  ;;  %4927 = vrot.lane.b32.xlu2 %v2724_v14, %s6760_s20  ;;  %v12363_v23 = vmax.f32 %v12362_v40, 0.0  ;;  %v12366_v2 = vmax.f32 %v12365_v3, 0.0  ;;  %12367 = vst [vmem:[#allocation67_spill] sm:$0xff] %v10113_v1  ;;  %v2715_v14 = vadd.f32 %v10000_v22, %v2697_v47  ;;  %v12370_v3 = vld [vmem:[#allocation7_spill] sm:$0xff] }
 0x27a   :  { %v3262_v40 = vsel %vm169_vm2, %v3242_v33, 0.0  ;;  %v2700_v47 = vmul.f32 %v9753_v38, %v12370_v3  ;;  %v3502_v3 = vsel %vm169_vm2, %v9952_v20, 0.0 }
 0x27b   :  { %v10090_v15 = vadd.f32 1e-05, %v2976_v26  ;;  %v5286_v54 = vsel %vm169_vm2, %v12363_v23, %v12361_v35  ;;  %v10109_v0 = vsel %vm169_vm2, %v12366_v2, %v12364_v39  ;;  %v3500_v26 = vsel %vm169_vm2, %v9867_v48, 0.0  ;;  %v10126_v23 = vpop.f32.mrf.mxu1 }
 0x27c   :  { %v2714_v35 = vadd.f32 %v10000_v22, %v2696_v51  ;;  %12369 = vst [vmem:[#allocation70_spill] sm:$0xff] %v10126_v23  ;;  %v2728_v39 = vmax.f32 %v2715_v14, 0.0  ;;  %v3244_v2 = vmul.f32 %v9880_v7, %v9880_v7  ;;  %v3263_v36 = vadd.f32 %v3262_v40, %v3261_v46  ;;  %v12372_v51 = vld [vmem:[#allocation61_spill] sm:$0xff]  ;;  %v12375_v46 = vld [vmem:[#allocation51_spill] sm:$0xff]  ;;  %v12383_v7 = vld [vmem:[#allocation58_spill] sm:$0xff] }
 0x27d   :  { %4931 = vrot.lane.b32.xlu1 %v2726_v63, %s6760_s20  ;;  %6742 = vrsqrt.f32 %v10090_v15  ;;  %v2716_v63 = vadd.f32 %v10000_v22, %v2698_v43  ;;  %v10135_v11 = vsel %vm5289_vm12, %v5286_v54, %v9695_v53  ;;  %v3501_v58 = vadd.f32 %v3500_v26, %v3499_v24  ;;  %v12374_v43 = vld [vmem:[#allocation19_spill] sm:$0xff]  ;;  %v12376_v54 = vld [vmem:[#allocation13_spill] sm:$0xff]  ;;  %v10195_v48 = vpop.permute.xlu0 %4729 }
 0x27e   :  { %12371 = vst [vmem:[#allocation39_spill] sm:$0xff] %v10135_v11  ;;  %v12373_v33 = vmax.f32 %v12372_v51, 0.0  ;;  %v5293_v14 = vsel %vm5289_vm12, %v12374_v43, %v9662_v16  ;;  %4935 = vrot.lane.b32.xlu0 %v2728_v39, %s6760_s20  ;;  %v2699_v53 = vmul.f32 %v9753_v38, %v12375_v46  ;;  %v10153_v24 = vmul.f32 %v9884_v62, %v9884_v62  ;;  %v12377_v26 = vld [vmem:[#allocation37_spill] sm:$0xff]  ;;  %v10200_v49 = vpop.f32.mrf.mxu2  ;;  %v10204_v11 = vpop.f32.mrf.mxu0 }
 0x27f   :  { %v10163_v16 = vsel %vm5289_vm12, %v12377_v26, %v9765_v8  ;;  %v2727_v40 = vmax.f32 %v2714_v35, 0.0  ;;  %v10167_v39 = vmul.f32 %v9898_v13, %v9898_v13  ;;  %v3264_v51 = vsel %vm169_vm2, %v3243_v57, 0.0  ;;  %v12378_v26 = vld [vmem:[#allocation40_spill] sm:$0xff]  ;;  %v10181_v13 = vpop.permute.xlu1 %4731  ;;  %12385 = vst [vmem:[#allocation38_spill] sm:$0xff] %v10195_v48 }
 0x280   :  { %v10141_v9 = vsel %vm169_vm2, %v12373_v33, %v9587_v18  ;;  %v10158_v18 = vsel %vm5289_vm12, %v12376_v54, %v9675_v17  ;;  %v2729_v33 = vmax.f32 %v2716_v63, 0.0  ;;  %v2718_v43 = vadd.f32 %v10000_v22, %v2700_v47  ;;  %v4672_v63 = vpop.permute.xlu2 %4671  ;;  %12379 = vst [vmem:[#allocation20_spill] sm:$0xff] %v10181_v13  ;;  %v12389_v13 = vld [vmem:[#allocation9_spill] sm:$0xff] }
 0x281   :  { %v3265_v62 = vadd.f32 %v3264_v51, %v3263_v36  ;;  %v3266_v17 = vsel %vm169_vm2, %v3244_v2, 0.0  ;;  %v3503_v54 = vadd.f32 %v3502_v3, %v3501_v58  ;;  %v3504_v8 = vsel %vm169_vm2, %v10027_v12, 0.0  ;;  %4933 = vrot.lane.b32.xlu2 %v2727_v40, %s6760_s20  ;;  %v12380_v2 = vld [vmem:[#allocation56_spill] sm:$0xff]  ;;  %v12381_v36 = vld [vmem:[#allocation26_spill] sm:$0xff]  ;;  %v12382_v40 = vld [vmem:[#allocation53_spill] sm:$0xff]  ;;  %12386 = vst [vmem:[#allocation63_spill] sm:$0xff] %v10200_v49 }
 0x282   :  { %v4095_v57 = vsel %vm169_vm2, %v12378_v26, 0.0  ;;  %v2717_v47 = vadd.f32 %v10000_v22, %v2699_v53  ;;  %v2701_v58 = vmul.f32 %v9753_v38, %v12380_v2  ;;  %v4397_v3 = vsel %vm169_vm2, %v12381_v36, 0.0  ;;  %v12384_v26 = vld [vmem:[#allocation75_spill] sm:$0xff] }
 0x283   :  { %v10171_v46 = vpop.eup %6742  ;;  %v4096_v51 = vsel %vm169_vm2, %v12382_v40, 0.0  ;;  %v4398_v12 = vsel %vm169_vm2, %v12383_v7, 0.0  ;;  %v4098_v20 = vsel %vm169_vm2, %v12384_v26, 0.0  ;;  %v2731_v36 = vmax.f32 %v2718_v43, 0.0  ;;  %v12388_v7 = vld [vmem:[#allocation66_spill] sm:$0xff] }
 0x284   :  { %v2981_v35 = vmul.f32 %v10171_v46, %v10090_v15  ;;  %v4097_v32 = vadd.f32 %v4096_v51, %v4095_v57  ;;  %v4399_v2 = vadd.f32 %v4398_v12, %v4397_v3  ;;  %v4400_v40 = vsel %vm169_vm2, %v12387_v55, 0.0  ;;  %v10212_v57 = vpop.f32.mrf.mxu1  ;;  %v12426_v55 = vld [vmem:[#allocation62_spill] sm:$0xff] }
 0x285   :  { %4937 = vrot.lane.b32.xlu1 %v2729_v33, %s6760_s20  ;;  %v10197_v33 = vpop.f32.mrf.mxu3  ;;  %v3505_v52 = vadd.f32 %v3504_v8, %v3503_v54  ;;  %v2703_v26 = vmul.f32 %v9753_v38, %v12388_v7  ;;  %v2702_v48 = vmul.f32 %v9753_v38, %v12389_v13  ;;  %v3506_v12 = vsel %vm169_vm2, %v10094_v37, 0.0 }
 0x286   :  { %v2982_v53 = vmul.f32 %v10171_v46, %v2981_v35  ;;  %v4099_v50 = vadd.f32 %v4098_v20, %v4097_v32  ;;  %v4401_v35 = vadd.f32 %v4400_v40, %v4399_v2  ;;  %4941 = vrot.lane.b32.xlu0 %v2731_v36, %s6760_s20  ;;  %v4100_v43 = vsel %vm169_vm2, %v9815_v27, 0.0 }
 0x287   :  { %v4402_v54 = vsel %vm169_vm2, %v9869_v56, 0.0  ;;  %v2730_v7 = vmax.f32 %v2717_v47, 0.0  ;;  %v2719_v8 = vadd.f32 %v10000_v22, %v2701_v58  ;;  %vm2986_vm7 = vweird.f32 %v10090_v15  ;;  %v6173_v47 = vld [vmem:[%s11711_s2 + $0x9] sm:$0x1] }
 0x288   :  { %v2983_v19 = vmul.f32 0.5, %v2982_v53  ;;  %vm2987_vm8 = vweird.f32 %v10171_v46  ;;  %v3267_v32 = vadd.f32 %v3266_v17, %v3265_v62  ;;  %v3507_v13 = vadd.f32 %v3506_v12, %v3505_v52  ;;  %v4678_v17 = vpop.permute.xlu2 %4677  ;;  %v10247_v53 = vpop.permute.xlu0 %4735 }
 0x289   :  { %v10223_v20 = vsel %vm5303_vm6, %v5293_v14, %v4672_v63  ;;  %4939 = vrot.lane.b32.xlu2 %v2730_v7, %s6760_s20  ;;  %v2721_v36 = vadd.f32 %v10000_v22, %v2703_v26  ;;  %v2720_v3 = vadd.f32 %v10000_v22, %v2702_v48  ;;  %v4101_v15 = vadd.f32 %v4100_v43, %v4099_v50  ;;  %vm2988_vm9 = vmor %vm2986_vm7, %vm2987_vm8  ;;  %v10240_v26 = vpop.permute.xlu1 %4737  ;;  %v10258_v7 = vpop.f32.mrf.mxu2 }
 0x28a   :  { %v2984_v38 = vsub.f32 1.5, %v2983_v19  ;;  %v4403_v58 = vadd.f32 %v4402_v54, %v4401_v35  ;;  %v3508_v62 = vsel %vm169_vm2, %v10197_v33, 0.0  ;;  %v4102_v52 = vsel %vm169_vm2, %v9902_v41, 0.0  ;;  %12390 = vst [vmem:[#allocation68_spill] sm:$0xff] %v10258_v7 }
 0x28b   :  { %v4404_v14 = vsel %vm169_vm2, %v9965_v45, 0.0  ;;  %v3816_v48 = vsel %vm193_vm3, %v10204_v11, 0.0  ;;  %v2732_v63 = vmax.f32 %v2719_v8, 0.0  ;;  %v4104_v40 = vsel %vm169_vm2, %v9979_v31, 0.0  ;;  %v3791_v8 = vpop.f32.mrf.mxu0 }
 0x28c   :  { %v2985_v19 = vmul.f32 %v10171_v46, %v2984_v38  ;;  %v4406_v51 = vsel %vm169_vm2, %v10035_v59, 0.0  ;;  %v2722_v35 = vadd.f32 %v10000_v22, %v10119_v10  ;;  %v3509_v43 = vadd.f32 %v3508_v62, %v3507_v13  ;;  %v10263_v45 = vpop.f32.mrf.mxu1 }
 0x28d   :  { %v10249_v2 = vpop.f32.mrf.mxu3  ;;  %v3817_v54 = vadd.f32 %v3816_v48, %v10082_v28  ;;  %4943 = vrot.lane.b32.xlu1 %v2732_v63, %s6760_s20  ;;  %v4103_v38 = vadd.f32 %v4102_v52, %v4101_v15  ;;  %v2734_v22 = vmax.f32 %v2721_v36, 0.0  ;;  %v10268_v28 = vld [vmem:[%s11710_s3 + $0x7] ss:$0 sm:$0xff]  ;;  %v3268_v15 = vsel %vm169_vm2, %v10153_v24, 0.0 }
 0x28e   :  { %v2989_v50 = vsel %vm2988_vm9, %v10171_v46, %v2985_v19  ;;  %v10256_v46 = vsel %vm5303_vm6, %v10163_v16, %v4678_v17  ;;  %v4405_v19 = vadd.f32 %v4404_v14, %v4403_v58  ;;  %v3510_v59 = vsel %vm169_vm2, %v10249_v2, 0.0  ;;  %v12391_v36 = vld [vmem:[#allocation30_spill] sm:$0xff] }
 0x28f   :  { %v2990_v12 = vmul.f32 %v6173_v47, %v2989_v50  ;;  %v3818_v16 = vrot.slane %v3817_v54, 4  ;;  %v3511_v13 = vadd.f32 %v3510_v59, %v3509_v43  ;;  %v2733_v47 = vmax.f32 %v2720_v3, 0.0  ;;  %4947 = vrot.lane.b32.xlu0 %v2734_v22, %s6760_s20  ;;  %v12392_v52 = vld [vmem:[#allocation46_spill] sm:$0xff] }
 0x290   :  { %v5299_v58 = vsel %vm5289_vm12, %v10109_v0, %v9858_v21  ;;  %v2390_v62 = vmul.f32 %v10057_v4, %v12391_v36  ;;  %v2392_v14 = vmul.f32 %v10057_v4, %v12392_v52  ;;  %v3269_v59 = vadd.f32 %v3268_v15, %v3267_v32  ;;  %v12394_v32 = vld [vmem:[#allocation44_spill] sm:$0xff]  ;;  %v12399_v52 = vld [vmem:[#allocation10_spill] sm:$0xff] }
 0x291   :  { %v10270_v10 = vperm.slane %v2990_v12, 0  ;;  %v4106_v24 = vsel %vm169_vm2, %v10049_v25, 0.0  ;;  %v3819_v3 = vadd.f32 %v3818_v16, %v3817_v54  ;;  %4945 = vrot.lane.b32.xlu2 %v2733_v47, %s6760_s20  ;;  %v4105_v21 = vadd.f32 %v4104_v40, %v4103_v38  ;;  %v4684_v12 = vpop.permute.xlu2 %4683  ;;  %v4670_v43 = vpop.permute.xlu1 %4669 }
 0x292   :  { %v4407_v0 = vadd.f32 %v4406_v51, %v4405_v19  ;;  %v4408_v17 = vsel %vm169_vm2, %v10113_v1, 0.0  ;;  %v2408_v63 = vadd.f32 %v10268_v28, %v2390_v62  ;;  %v2735_v8 = vmax.f32 %v2722_v35, 0.0  ;;  %v10302_v51 = vpop.permute.xlu0 %4741  ;;  %v12396_v19 = vld [vmem:[#allocation29_spill] sm:$0xff]  ;;  %v10314_v62 = vpop.f32.mrf.mxu2 }
 0x293   :  { %v10284_v48 = vmul.f32 %v10270_v10, %v9742_v60  ;;  %v3820_v50 = vrot.slane %v3819_v3, 2  ;;  %v2410_v60 = vadd.f32 %v10268_v28, %v2392_v14  ;;  %v2391_v22 = vmul.f32 %v10057_v4, %v12394_v32  ;;  %12395 = vst [vmem:[#allocation61_spill] sm:$0xff] %v10302_v51  ;;  %v12397_v35 = vld [vmem:[#allocation17_spill] sm:$0xff] }
 0x294   :  { %v10296_v54 = vsel %vm5303_vm6, %v5299_v58, %v4684_v12  ;;  %v10300_v40 = vsel %vm5303_vm6, %v10158_v18, %v4670_v43  ;;  %v2393_v16 = vmul.f32 %v10057_v4, %v12396_v19  ;;  %v2395_v47 = vmul.f32 %v10057_v4, %v12397_v35  ;;  %v12398_v18 = vld [vmem:[#allocation32_spill] sm:$0xff]  ;;  %v10326_v19 = vpop.f32.mrf.mxu1 }
 0x295   :  { %12393 = vst [vmem:[#allocation7_spill] sm:$0xff] %v10284_v48  ;;  %v10304_v38 = vpop.f32.mrf.mxu3  ;;  %v3270_v15 = vsel %vm193_vm3, %v10167_v39, 0.0  ;;  %v3821_v36 = vadd.f32 %v3820_v50, %v3819_v3  ;;  %v10319_v14 = vsel %vm5289_vm12, %v12399_v52, %v12398_v18  ;;  %4949 = vrot.lane.b32.xlu1 %v2735_v8, %s6760_s20  ;;  %v4107_v43 = vadd.f32 %v4106_v24, %v4105_v21  ;;  %v12400_v24 = vld [vmem:[#allocation55_spill] sm:$0xff]  ;;  %v12401_v21 = vld [vmem:[#allocation64_spill] sm:$0xff]  ;;  %s6766_s20 = smov 104  }
 0x296   :  { %v3512_v58 = vsel %vm169_vm2, %v10304_v38, 0.0  ;;  %v10322_v12 = vadd.f32 %v3270_v15, %v3269_v59  ;;  %v2421_v39 = vmax.f32 %v2408_v63, 0.0  ;;  %v4409_v3 = vadd.f32 %v4408_v17, %v4407_v0  ;;  %v12402_v63 = vld [vmem:[#allocation14_spill] sm:$0xff]  ;;  %v12422_v15 = vld [vmem:[#allocation92_spill] sm:$0xff] }
 0x297   :  { %v10324_v32 = vadd.f32 %v3512_v58, %v3511_v13  ;;  %v3822_v50 = vrot.slane %v3821_v36, 1  ;;  %v2423_v35 = vmax.f32 %v2410_v60, 0.0  ;;  %v2409_v1 = vadd.f32 %v10268_v28, %v2391_v22  ;;  %v12403_v60 = vld [vmem:[#allocation42_spill] sm:$0xff]  ;;  %v12404_v58 = vld [vmem:[#allocation27_spill] sm:$0xff] }
 0x298   :  { %v4108_v56 = vsel %vm169_vm2, %v10126_v23, 0.0  ;;  %v4410_v18 = vsel %vm169_vm2, %v10200_v49, 0.0  ;;  %4873 = vrot.lane.b32.xlu0 %v2421_v39, %s6761_s25  ;;  %v2411_v13 = vadd.f32 %v10268_v28, %v2393_v16  ;;  %v2413_v59 = vadd.f32 %v10268_v28, %v2395_v47  ;;  %v12424_v49 = vld [vmem:[#allocation78_spill] sm:$0xff] }
 0x299   :  { %v5295_v0 = vsel %vm5289_vm12, %v12401_v21, %v12400_v24  ;;  %v3823_v17 = vadd.f32 %v3822_v50, %v3821_v36  ;;  %4877 = vrot.lane.b32.xlu2 %v2423_v35, %s6761_s25  ;;  %v2394_v8 = vmul.f32 %v10057_v4, %v12402_v63  ;;  %v2396_v22 = vmul.f32 %v10057_v4, %v12403_v60  ;;  %v12405_v36 = vld [vmem:[#allocation21_spill] sm:$0xff]  ;;  %v4690_v24 = vpop.permute.xlu2 %4689  ;;  %v4676_v21 = vpop.permute.xlu1 %4675 }
 0x29a   :  { %v10348_v16 = vsel %vm5289_vm12, %v12404_v58, %v9886_v61  ;;  %v5302_v47 = vsel %vm5289_vm12, %v10141_v9, %v9963_v5  ;;  %v10356_v52 = vsel %vm5289_vm12, %v12405_v36, %v9970_v30  ;;  %v10358_v39 = vadd.f32 %v4108_v56, %v4107_v43  ;;  %v10368_v5 = vpop.permute.xlu0 %4667  ;;  %v12408_v56 = vld [vmem:[#allocation28_spill] sm:$0xff] }
 0x29b   :  { %v10360_v50 = vadd.f32 %v4410_v18, %v4409_v3  ;;  %v3824_v35 = vmul.f32 0.010204081, %v3823_v17  ;;  %v2422_v63 = vmax.f32 %v2409_v1, 0.0  ;;  %v10363_v61 = vsel %vm5303_vm6, %v5302_v47, %v4690_v24  ;;  %v12410_v3 = vld [vmem:[#allocation31_spill] sm:$0xff]  ;;  %v10378_v17 = vpop.f32.mrf.mxu2 }
 0x29c   :  { %12406 = vst [vmem:[#allocation19_spill] sm:$0xff] %v10363_v61  ;;  %v10366_v60 = vsel %vm5303_vm6, %v5295_v0, %v4676_v21  ;;  %v2424_v30 = vmax.f32 %v2411_v13, 0.0  ;;  %v2426_v58 = vmax.f32 %v2413_v59, 0.0  ;;  %v2412_v1 = vadd.f32 %v10268_v28, %v2394_v8  ;;  %v10392_v36 = vpop.f32.mrf.mxu1  ;;  %v12415_v24 = vld [vmem:[#allocation47_spill] sm:$0xff]  ;;  %v12418_v8 = vld [vmem:[#allocation74_spill] sm:$0xff]  ;;  %v12430_v61 = vld [vmem:[#allocation12_spill] sm:$0xff] }
 0x29d   :  { %12407 = vst [vmem:[#allocation51_spill] sm:$0xff] %v10366_v60  ;;  %v10370_v9 = vpop.f32.mrf.mxu3  ;;  %v10373_v43 = vsub.f32 %v12408_v56, %v3824_v35  ;;  %v10376_v18 = vsub.f32 %v12410_v3, %v3824_v35  ;;  %4875 = vrot.lane.b32.xlu1 %v2422_v63, %s6761_s25  ;;  %v2414_v0 = vadd.f32 %v10268_v28, %v2396_v22  ;;  %v12416_v56 = vld [vmem:[#allocation43_spill] sm:$0xff]  ;;  %v12420_v22 = vld [vmem:[#allocation86_spill] sm:$0xff] }
 0x29e   :  { %v10384_v47 = vsub.f32 %v9384_v44, %v3824_v35  ;;  %v10387_v13 = vsub.f32 %v9492_v34, %v3824_v35  ;;  %v10390_v59 = vsub.f32 %v9571_v6, %v3824_v35  ;;  %v2398_v21 = vmul.f32 %v10057_v4, %v12415_v24 }
 0x29f   :  { %12409 = vst [vmem:[#allocation13_spill] sm:$0xff] %v10373_v43  ;;  %v10397_v63 = vsub.f32 %v12416_v56, %v3824_v35  ;;  %v10400_v3 = vsub.f32 %v12418_v8, %v3824_v35  ;;  %v10403_v44 = vsub.f32 %v12420_v22, %v3824_v35  ;;  %v10406_v34 = vsub.f32 %v12422_v15, %v3824_v35  ;;  %v12429_v22 = vld [vmem:[#allocation41_spill] sm:$0xff] }
 0x2a0   :  { %12411 = vst [vmem:[#allocation37_spill] sm:$0xff] %v10376_v18  ;;  %v10409_v6 = vsub.f32 %v12424_v49, %v3824_v35  ;;  %v10412_v48 = vsub.f32 %v12426_v55, %v3824_v35  ;;  %v10415_v24 = vsub.f32 %v10063_v29, %v3824_v35  ;;  %v10418_v56 = vsub.f32 %v10204_v11, %v3824_v35  ;;  %v12428_v49 = vld [vmem:[#allocation25_spill] sm:$0xff] }
 0x2a1   :  { %12412 = vst [vmem:[#allocation56_spill] sm:$0xff] %v10384_v47  ;;  %4879 = vrot.lane.b32.xlu0 %v2424_v30, %s6761_s25  ;;  %v3838_v8 = vmul.f32 %v10373_v43, %v10373_v43  ;;  %v3839_v15 = vmul.f32 %v10376_v18, %v10376_v18  ;;  %4883 = vrot.lane.b32.xlu2 %v2426_v58, %s6761_s25  ;;  %v2425_v30 = vmax.f32 %v2412_v1, 0.0  ;;  %v4772_v18 = vpop.permute.xlu2 %4771  ;;  %v2427_v51 = vmax.f32 %v2414_v0, 0.0 }
 0x2a2   :  { %12413 = vst [vmem:[#allocation66_spill] sm:$0xff] %v10387_v13  ;;  %v2397_v55 = vmul.f32 %v10057_v4, %v12428_v49  ;;  %v2399_v29 = vmul.f32 %v10057_v4, %v12429_v22  ;;  %v3840_v11 = vmul.f32 %v10384_v47, %v10384_v47  ;;  %v3841_v35 = vmul.f32 %v10387_v13, %v10387_v13  ;;  %v4682_v47 = vpop.permute.xlu1 %4681  ;;  %v4674_v23 = vpop.permute.xlu0 %4673 }
 0x2a3   :  { %12414 = vst [vmem:[#allocation9_spill] sm:$0xff] %v10390_v59  ;;  %v10436_v43 = vmul.f32 %v10057_v4, %v12430_v61  ;;  %v3842_v58 = vmul.f32 %v10390_v59, %v10390_v59  ;;  %v3843_v49 = vmul.f32 %v10397_v63, %v10397_v63  ;;  %v3844_v22 = vmul.f32 %v10400_v3, %v10400_v3  ;;  %v10453_v31 = vpop.f32.mrf.mxu2 }
 0x2a4   :  { %12417 = vst [vmem:[#allocation30_spill] sm:$0xff] %v10397_v63  ;;  %v3845_v1 = vmul.f32 %v10409_v6, %v10409_v6  ;;  %v3851_v13 = vsel %vm169_vm2, %v3838_v8, 0.0  ;;  %v3852_v61 = vsel %vm169_vm2, %v3839_v15, 0.0  ;;  %v10449_v59 = vadd.f32 %v10268_v28, %v2398_v21 }
 0x2a5   :  { %12419 = vst [vmem:[#allocation46_spill] sm:$0xff] %v10400_v3  ;;  %v3489_v25 = vpop.f32.mrf.mxu3  ;;  %v3846_v63 = vmul.f32 %v10403_v44, %v10403_v44  ;;  %v3853_v3 = vadd.f32 %v3852_v61, %v3851_v13  ;;  %4881 = vrot.lane.b32.xlu1 %v2425_v30, %s6761_s25  ;;  %v10457_v0 = vadd.f32 %v10268_v28, %v2397_v55  ;;  %v3854_v13 = vsel %vm169_vm2, %v3840_v11, 0.0  ;;  %v10472_v61 = vpop.f32.mrf.mxu1 }
 0x2a6   :  { %12421 = vst [vmem:[#allocation44_spill] sm:$0xff] %v10403_v44  ;;  %v10460_v8 = vadd.f32 %v10268_v28, %v2399_v29  ;;  %v10464_v15 = vmul.f32 %v10406_v34, %v10406_v34  ;;  %v10468_v25 = vmul.f32 %v10412_v48, %v10412_v48  ;;  %v3856_v21 = vsel %vm169_vm2, %v3841_v35, 0.0 }
 0x2a7   :  { %12423 = vst [vmem:[#allocation29_spill] sm:$0xff] %v10406_v34  ;;  %v3855_v30 = vadd.f32 %v3854_v13, %v3853_v3  ;;  %v3858_v55 = vsel %vm169_vm2, %v3842_v58, 0.0  ;;  %v3860_v29 = vsel %vm169_vm2, %v3843_v49, 0.0  ;;  %v3864_v34 = vsel %vm169_vm2, %v3845_v1, 0.0 }
 0x2a8   :  { %12425 = vst [vmem:[#allocation17_spill] sm:$0xff] %v10409_v6  ;;  %v3862_v6 = vsel %vm169_vm2, %v3844_v22, 0.0  ;;  %v4110_v44 = vsel %vm169_vm2, %v10212_v57, 0.0  ;;  %v4112_v11 = vsel %vm169_vm2, %v10263_v45, 0.0  ;;  %v4414_v49 = vsel %vm169_vm2, %v10314_v62, 0.0 }
 0x2a9   :  { %12427 = vst [vmem:[#allocation32_spill] sm:$0xff] %v10412_v48  ;;  %v4412_v48 = vsel %vm169_vm2, %v10258_v7, 0.0  ;;  %4885 = vrot.lane.b32.xlu0 %v2427_v51, %s6761_s25  ;;  %v3857_v3 = vadd.f32 %v3856_v21, %v3855_v30  ;;  %v4111_v35 = vadd.f32 %v4110_v44, %v10358_v39  ;;  %v4114_v22 = vsel %vm169_vm2, %v10326_v19, 0.0  ;;  %v12431_v30 = vld [vmem:[#allocation52_spill] sm:$0xff] }
 0x2aa   :  { %v4413_v58 = vadd.f32 %v4412_v48, %v10360_v50  ;;  %v5305_v1 = vsel %vm5303_vm6, %v10319_v14, %v10368_v5  ;;  %v3514_v13 = vsel %vm193_vm3, %v10370_v9, 0.0  ;;  %v4416_v51 = vsel %vm169_vm2, %v10378_v17, 0.0  ;;  %v4778_v5 = vpop.permute.xlu2 %4777  ;;  %v4688_v41 = vpop.permute.xlu1 %4687 }
 0x2ab   :  { %v3859_v21 = vadd.f32 %v3858_v55, %v3857_v3  ;;  %v4113_v39 = vadd.f32 %v4112_v11, %v4111_v35  ;;  %v3515_v48 = vadd.f32 %v3514_v13, %v10324_v32  ;;  %v4116_v50 = vsel %vm169_vm2, %v10392_v36, 0.0  ;;  %v4680_v3 = vpop.permute.xlu0 %4679  ;;  %v10507_v35 = vpop.f32.mrf.mxu2 }
 0x2ac   :  { %v4415_v44 = vadd.f32 %v4414_v49, %v4413_v58  ;;  %v5319_v7 = vsel %vm5317_vm10, %v5305_v1, %v12431_v30  ;;  %v10505_v14 = vsel %vm5303_vm6, %v10348_v16, %v4682_v47  ;;  %v12432_v58 = vld [vmem:[#allocation59_spill] sm:$0xff]  ;;  %v4418_v1 = vsel %vm169_vm2, %v10453_v31, 0.0 }
 0x2ad   :  { %v3861_v27 = vadd.f32 %v3860_v29, %v3859_v21  ;;  %v4115_v60 = vadd.f32 %v4114_v22, %v4113_v39  ;;  %v3516_v55 = vrot.slane %v3515_v48, 4  ;;  %v10510_v32 = vsel %vm5331_vm11, %v5319_v7, %v4772_v18  ;;  %v4093_v47 = vpop.f32.mrf.mxu1  ;;  %v12433_v18 = vld [vmem:[#allocation100_spill] sm:$0xff] }
 0x2ae   :  { %v4417_v11 = vadd.f32 %v4416_v51, %v4415_v44  ;;  %v5308_v49 = vsel %vm5303_vm6, %v12432_v58, %v4674_v23  ;;  %v4118_v16 = vsel %vm193_vm3, %v10472_v61, 0.0  ;;  %v10522_v7 = vsel %vm5303_vm6, %v10356_v52, %v4688_v41 }
 0x2af   :  { %v3863_v29 = vadd.f32 %v3862_v6, %v3861_v27  ;;  %v3517_v22 = vadd.f32 %v3516_v55, %v3515_v48  ;;  %v4117_v13 = vadd.f32 %v4116_v50, %v4115_v60  ;;  %v5322_v21 = vsel %vm5317_vm10, %v5308_v49, %v10086_v42  ;;  %v12434_v50 = vld [vmem:[#allocation8_spill] sm:$0xff]  ;;  %v12435_v55 = vld [vmem:[#allocation98_spill] sm:$0xff] }
 0x2b0   :  { %v4419_v51 = vadd.f32 %v4418_v1, %v4417_v11  ;;  %v5311_v23 = vsel %vm5303_vm6, %v12433_v18, %v4680_v3  ;;  %v4420_v39 = vsel %vm193_vm3, %v10507_v35, 0.0  ;;  %v10529_v27 = vsel %vm5331_vm11, %v5322_v21, %v4778_v5 }
 0x2b1   :  { %v3865_v44 = vadd.f32 %v3864_v34, %v3863_v29  ;;  %v3518_v30 = vrot.slane %v3517_v22, 2  ;;  %v4119_v58 = vadd.f32 %v4118_v16, %v4117_v13  ;;  %v3866_v60 = vsel %vm169_vm2, %v3846_v63, 0.0  ;;  %v12437_v29 = vld [vmem:[#allocation57_spill] sm:$0xff] }
 0x2b2   :  { %v10532_v6 = vadd.f32 %v4420_v39, %v4419_v51  ;;  %v2429_v42 = vmax.f32 %v10449_v59, 0.0  ;;  %v2428_v41 = vmax.f32 %v10457_v0, 0.0  ;;  %v5318_v11 = vsel %vm5317_vm10, %v12435_v55, %v12434_v50  ;;  %v12436_v59 = vld [vmem:[#allocation20_spill] sm:$0xff]  ;;  %v4770_v47 = vpop.permute.xlu1 %4769  ;;  %v12440_v50 = vld [vmem:[#allocation99_spill] sm:$0xff] }
 0x2b3   :  { %v3867_v52 = vadd.f32 %v3866_v60, %v3865_v44  ;;  %v3519_v48 = vadd.f32 %v3518_v30, %v3517_v22  ;;  %v2430_v34 = vmax.f32 %v10460_v8, 0.0  ;;  %v3849_v5 = vmul.f32 %v10415_v24, %v10415_v24  ;;  %v4784_v8 = vpop.permute.xlu2 %4783  ;;  %v4686_v21 = vpop.permute.xlu0 %4685  ;;  %v12439_v60 = vld [vmem:[#allocation39_spill] sm:$0xff] }
 0x2b4   :  { %v3850_v63 = vmul.f32 %v10418_v56, %v10418_v56  ;;  %v3868_v3 = vsel %vm169_vm2, %v10464_v15, 0.0  ;;  %v5325_v0 = vsel %vm5317_vm10, %v5311_v23, %v12436_v59  ;;  %4889 = vrot.lane.b32.xlu2 %v2429_v42, %s6761_s25  ;;  %4887 = vrot.lane.b32.xlu1 %v2428_v41, %s6761_s25  ;;  %v4120_v16 = vrot.slane %v4119_v58, 4  ;;  %v4395_v23 = vpop.f32.mrf.mxu2 }
 0x2b5   :  { %v3869_v49 = vadd.f32 %v3868_v3, %v3867_v52  ;;  %v3520_v1 = vrot.slane %v3519_v48, 1  ;;  %4891 = vrot.lane.b32.xlu0 %v2430_v34, %s6761_s25  ;;  %v2400_v22 = vmul.f32 %v10057_v4, %v12437_v29  ;;  %v3870_v15 = vsel %vm169_vm2, %v10468_v25, 0.0 }
 0x2b6   :  { %v10556_v13 = vsel %vm5331_vm11, %v5325_v0, %v4784_v8  ;;  %v10559_v51 = vsel %vm5331_vm11, %v5318_v11, %v4770_v47  ;;  %v2419_v18 = vadd.f32 %v10268_v28, %v10436_v43  ;;  %v12438_v39 = vrot.slane %v10322_v12, 4 }
 0x2b7   :  { %v3871_v30 = vadd.f32 %v3870_v15, %v3869_v49  ;;  %v3521_v4 = vadd.f32 %v3520_v1, %v3519_v48  ;;  %v5314_v25 = vsel %vm5303_vm6, %v12439_v60, %v4686_v21  ;;  %v3872_v42 = vsel %vm169_vm2, %v3849_v5, 0.0 }
 0x2b8   :  { %v3273_v44 = vadd.f32 %v12438_v39, %v10322_v12  ;;  %v5328_v41 = vsel %vm5317_vm10, %v5314_v25, %v10240_v26  ;;  %v2418_v52 = vadd.f32 %v10268_v28, %v2400_v22  ;;  %v2420_v43 = vadd.f32 %v10268_v28, %v12440_v50  ;;  %v12441_v28 = vld [vmem:[#allocation11_spill] sm:$0xff] }
 0x2b9   :  { %v3873_v55 = vadd.f32 %v3872_v42, %v3871_v30  ;;  %v10574_v11 = vmul.f32 0.010204081, %v3521_v4  ;;  %v4121_v34 = vadd.f32 %v4120_v16, %v4119_v58  ;;  %v10579_v12 = vsel %vm5317_vm10, %v10296_v54, %v10247_v53  ;;  %v12442_v54 = vld [vmem:[#allocation16_spill] sm:$0xff] }
 0x2ba   :  { %v3874_v48 = vsel %vm193_vm3, %v3850_v63, 0.0  ;;  %v2432_v5 = vmax.f32 %v2419_v18, 0.0  ;;  %v2431_v59 = vmax.f32 %v2418_v52, 0.0  ;;  %v2433_v26 = vmax.f32 %v2420_v43, 0.0  ;;  %v4776_v60 = vpop.permute.xlu1 %4775 }
 0x2bb   :  { %v3875_v3 = vadd.f32 %v3874_v48, %v3873_v55  ;;  %v3274_v0 = vrot.slane %v3273_v44, 2  ;;  %v10585_v1 = vsub.f32 %v12441_v28, %v10574_v11  ;;  %v10589_v58 = vsub.f32 %v10197_v33, %v10574_v11  ;;  %v4790_v30 = vpop.permute.xlu2 %4789  ;;  %v4774_v42 = vpop.permute.xlu0 %4773  ;;  %v12446_v55 = vld [vmem:[#allocation60_spill] sm:$0xff] }
 0x2bc   :  { %4895 = vrot.lane.b32.xlu2 %v2432_v5, %s6761_s25  ;;  %v4122_v53 = vrot.slane %v4121_v34, 2  ;;  %4893 = vrot.lane.b32.xlu1 %v2431_v59, %s6761_s25  ;;  %v10595_v63 = vsub.f32 %v12442_v54, %v10574_v11  ;;  %v10599_v16 = vsub.f32 %v10249_v2, %v10574_v11  ;;  %v10603_v8 = vsub.f32 %v10304_v38, %v10574_v11  ;;  %v12444_v38 = vld [vmem:[#allocation23_spill] sm:$0xff]  ;;  %v12447_v5 = vld [vmem:[#allocation45_spill] sm:$0xff] }
 0x2bd   :  { %v3876_v49 = vrot.slane %v3875_v3, 4  ;;  %4897 = vrot.lane.b32.xlu0 %v2433_v26, %s6761_s25  ;;  %v10607_v33 = vsub.f32 %v10370_v9, %v10574_v11  ;;  %v3275_v29 = vadd.f32 %v3274_v0, %v3273_v44  ;;  %v3536_v15 = vmul.f32 %v10585_v1, %v10585_v1  ;;  %v12445_v44 = vld [vmem:[#allocation69_spill] sm:$0xff]  ;;  %v12448_v54 = vld [vmem:[#allocation35_spill] sm:$0xff] }
 0x2be   :  { %12443 = vst [vmem:[#allocation10_spill] sm:$0xff] %v10599_v16  ;;  %v3537_v21 = vmul.f32 %v10595_v63, %v10595_v63  ;;  %v4123_v18 = vadd.f32 %v4122_v53, %v4121_v34  ;;  %v4422_v23 = vrot.slane %v10532_v6, 4  ;;  %v10616_v39 = vsub.f32 %v12444_v38, %v10574_v11 }
 0x2bf   :  { %v3877_v47 = vadd.f32 %v3876_v49, %v3875_v3  ;;  %v3276_v9 = vrot.slane %v3275_v29, 1  ;;  %v5321_v25 = vsel %vm5317_vm10, %v10223_v20, %v12445_v44  ;;  %v3549_v52 = vsel %vm169_vm2, %v3536_v15, 0.0  ;;  %v12449_v15 = vld [vmem:[#allocation77_spill] sm:$0xff] }
 0x2c0   :  { %v3550_v50 = vsel %vm169_vm2, %v3537_v21, 0.0  ;;  %v4124_v43 = vrot.slane %v4123_v18, 1  ;;  %v5320_v34 = vsel %vm5317_vm10, %v10300_v40, %v12446_v55  ;;  %v10628_v3 = vsub.f32 %v12447_v5, %v10574_v11 }
 0x2c1   :  { %v3878_v22 = vrot.slane %v3877_v47, 2  ;;  %v4423_v59 = vadd.f32 %v4422_v23, %v10532_v6  ;;  %v10632_v26 = vsel %vm5331_vm11, %v5328_v41, %v4790_v30  ;;  %v3538_v20 = vmul.f32 %v10616_v39, %v10616_v39 }
 0x2c2   :  { %v4125_v0 = vadd.f32 %v4124_v43, %v4123_v18  ;;  %v10637_v49 = vsel %vm5331_vm11, %v5321_v25, %v4776_v60  ;;  %v10640_v28 = vsel %vm5331_vm11, %v5320_v34, %v4774_v42  ;;  %v3551_v53 = vadd.f32 %v3550_v50, %v3549_v52  ;;  %v12452_v25 = vld [vmem:[#allocation81_spill] sm:$0xff]  ;;  %v12454_v34 = vld [vmem:[#allocation91_spill] sm:$0xff] }
 0x2c3   :  { %v3879_v2 = vadd.f32 %v3878_v22, %v3877_v47  ;;  %v10644_v47 = vmul.f32 %v10270_v10, %v12448_v54  ;;  %v3277_v6 = vadd.f32 %v3276_v9, %v3275_v29  ;;  %v4424_v41 = vrot.slane %v4423_v59, 2 }
 0x2c4   :  { %v10648_v21 = vsub.f32 %v12449_v15, %v10574_v11  ;;  %v3539_v18 = vmul.f32 %v10628_v3, %v10628_v3  ;;  %v10653_v23 = vmul.f32 0.010204081, %v4125_v0  ;;  %v10673_v42 = vsub.f32 %v12452_v25, %v10574_v11 }
 0x2c5   :  { %v3880_v4 = vrot.slane %v3879_v2, 1  ;;  %v3278_v30 = vmul.f32 0.010204081, %v3277_v6  ;;  %v4425_v44 = vadd.f32 %v4424_v41, %v4423_v59 }
 0x2c6   :  { %v10661_v29 = vsub.f32 %v10263_v45, %v10653_v23  ;;  %v10665_v9 = vsub.f32 %v10326_v19, %v10653_v23  ;;  %v10669_v60 = vsub.f32 %v10392_v36, %v10653_v23  ;;  %v3554_v52 = vsel %vm169_vm2, %v3539_v18, 0.0 }
 0x2c7   :  { %v3881_v48 = vadd.f32 %v3880_v4, %v3879_v2  ;;  %v3552_v2 = vsel %vm169_vm2, %v3538_v20, 0.0  ;;  %v10657_v4 = vsub.f32 %v10212_v57, %v10653_v23  ;;  %v3540_v57 = vmul.f32 %v10648_v21, %v10648_v21 }
 0x2c8   :  { %v3553_v38 = vadd.f32 %v3552_v2, %v3551_v53  ;;  %12451 = vst [vmem:[#allocation64_spill] sm:$0xff] %v10661_v29  ;;  %v10680_v45 = vsub.f32 %v10472_v61, %v10653_v23  ;;  %v10682_v50 = vadd.f32 1e-05, %v3278_v30  ;;  %v4426_v36 = vrot.slane %v4425_v44, 1  ;;  %v12455_v53 = vld [vmem:[#allocation5_spill] sm:$0xff] }
 0x2c9   :  { %v3882_v40 = vmul.f32 0.010204081, %v3881_v48  ;;  %12450 = vst [vmem:[#allocation55_spill] sm:$0xff] %v10657_v4  ;;  %v10686_v48 = vsub.f32 %v12454_v34, %v10574_v11  ;;  %v3541_v5 = vmul.f32 %v10673_v42, %v10673_v42  ;;  %v3556_v59 = vsel %vm169_vm2, %v3540_v57, 0.0 }
 0x2ca   :  { %12453 = vst [vmem:[#allocation14_spill] sm:$0xff] %v10680_v45  ;;  %v3555_v19 = vadd.f32 %v3554_v52, %v3553_v38  ;;  %v4427_v0 = vadd.f32 %v4426_v36, %v4425_v44  ;;  %v10694_v54 = vsub.f32 %v12455_v53, %v10574_v11  ;;  %v10701_v2 = vsub.f32 %v10094_v37, %v10574_v11  ;;  %v6386_v44 = vld [vmem:[%s11711_s2 + $0xc] sm:$0x1]  ;;  %v4822_v36 = vpop.permute.xlu2 %4821 }
 0x2cb   :  { %v3885_v22 = vadd.f32 1e-05, %v3882_v40  ;;  %v3542_v6 = vmul.f32 %v10686_v48, %v10686_v48  ;;  %v3558_v41 = vsel %vm169_vm2, %v3541_v5, 0.0  ;;  %vm3288_vm4 = vweird.f32 %v10682_v50 }
 0x2cc   :  { %v3557_v20 = vadd.f32 %v3556_v59, %v3555_v19  ;;  %12456 = vst [vmem:[#allocation42_spill] sm:$0xff] %v10694_v54  ;;  %v10703_v38 = vmul.f32 0.010204081, %v4427_v0  ;;  %v3543_v57 = vmul.f32 %v10694_v54, %v10694_v54 }
 0x2cd   :  { %6744 = vrsqrt.f32 %v3885_v22  ;;  %vm3892_vm13 = vweird.f32 %v3885_v22  ;;  %v3560_v52 = vsel %vm169_vm2, %v3542_v6, 0.0  ;;  %v12460_v6 = vld [vmem:[#allocation22_spill] sm:$0xff] }
 0x2ce   :  { %6746 = vrsqrt.f32 %v10682_v50  ;;  %v3559_v15 = vadd.f32 %v3558_v41, %v3557_v20  ;;  %v10715_v37 = vsub.f32 %v10314_v62, %v10703_v38  ;;  %v10719_v11 = vsub.f32 %v10378_v17, %v10703_v38  ;;  %v4782_v62 = vpop.permute.xlu1 %4781  ;;  %v4780_v20 = vpop.permute.xlu0 %4779 }
 0x2cf   :  { %v10727_v34 = vsub.f32 %v10507_v35, %v10703_v38  ;;  %v3544_v17 = vmul.f32 %v10701_v2, %v10701_v2  ;;  %v2994_v41 = vmul.f32 %v10270_v10, %v12460_v6  ;;  %v3546_v6 = vmul.f32 %v10599_v16, %v10599_v16 }
 0x2d0   :  { %v3561_v19 = vadd.f32 %v3560_v52, %v3559_v15  ;;  %12457 = vst [vmem:[#allocation27_spill] sm:$0xff] %v10719_v11  ;;  %v10749_v15 = vld [vmem:[%s11710_s3 + $0x9] ss:$0 sm:$0xff] }
 0x2d1   :  { %12459 = vst [vmem:[#allocation28_spill] sm:$0xff] %v10727_v34  ;;  %v3564_v53 = vsel %vm169_vm2, %v3544_v17, 0.0  ;;  %v12466_v17 = vld [vmem:[#allocation80_spill] sm:$0xff] }
 0x2d3   :  { %v6745_v43 = vpop.eup %6744 }
 0x2d4   :  { %v3887_v55 = vmul.f32 %v6745_v43, %v3885_v22  ;;  %vm3893_vm12 = vweird.f32 %v6745_v43  ;;  %v10705_v30 = vpop.eup %6746  ;;  %v10723_v22 = vsub.f32 %v10453_v31, %v10703_v38 }
 0x2d5   :  { %vm3894_vm14 = vmor %vm3892_vm13, %vm3893_vm12  ;;  %v3283_v5 = vmul.f32 %v10705_v30, %v10682_v50  ;;  %vm3289_vm0 = vweird.f32 %v10705_v30 }
 0x2d6   :  { %v3888_v61 = vmul.f32 %v6745_v43, %v3887_v55  ;;  %12458 = vst [vmem:[#allocation21_spill] sm:$0xff] %v10723_v22  ;;  %v4786_v54 = vpop.permute.xlu0 %4785  ;;  %vm3290_vm5 = vmor %vm3288_vm4, %vm3289_vm0  ;;  %vm5428_vm0 = vcmask 785408   ;;  %vm5456_vm4 = vcmask 916480  }
 0x2d7   :  { %v3284_v31 = vmul.f32 %v10705_v30, %v3283_v5  ;;  %v4828_v5 = vpop.permute.xlu2 %4827 }
 0x2d8   :  { %v3889_v40 = vmul.f32 0.5, %v3888_v61  ;;  %v3562_v61 = vsel %vm169_vm2, %v3543_v57, 0.0 }
 0x2d9   :  { %v3563_v0 = vadd.f32 %v3562_v61, %v3561_v19  ;;  %v12465_v19 = vld [vmem:[#allocation38_spill] sm:$0xff]  ;;  %v12467_v61 = vld [vmem:[#allocation51_spill] sm:$0xff] }
 0x2da   :  { %v3890_v18 = vsub.f32 1.5, %v3889_v40  ;;  %v3545_v40 = vmul.f32 %v10589_v58, %v10589_v58 }
 0x2dc   :  { %v3891_v25 = vmul.f32 %v6745_v43, %v3890_v18  ;;  %v3565_v18 = vadd.f32 %v3564_v53, %v3563_v0  ;;  %v5323_v0 = vsel %vm5317_vm10, %v12467_v61, %v12466_v17  ;;  %v3014_v53 = vadd.f32 %v10749_v15, %v10644_v47  ;;  %v12469_v61 = vld [vmem:[#allocation90_spill] sm:$0xff] }
 0x2dd   :  { %v10785_v47 = vsel %vm5345_vm15, %v10637_v49, %v4828_v5  ;;  %v3568_v5 = vsel %vm169_vm2, %v3546_v6, 0.0 }
 0x2de   :  { %v3895_v55 = vsel %vm3894_vm14, %v6745_v43, %v3891_v25  ;;  %v12461_v25 = vld [vmem:[#allocation40_spill] sm:$0xff]  ;;  %v3027_v49 = vmax.f32 %v3014_v53, 0.0 }
 0x2df   :  { %v3896_v59 = vmul.f32 %v6386_v44, %v3895_v55  ;;  %v3285_v44 = vmul.f32 0.5, %v3284_v31  ;;  %v10753_v57 = vsub.f32 %v12461_v25, %v10653_v23  ;;  %v5324_v55 = vsel %vm5317_vm10, %v10256_v46, %v12465_v19  ;;  %v12468_v46 = vld [vmem:[#allocation33_spill] sm:$0xff] }
 0x2e0   :  { %v3012_v31 = vadd.f32 %v10749_v15, %v2994_v41  ;;  %v2995_v19 = vmul.f32 %v10270_v10, %v12468_v46  ;;  %v10778_v17 = vsel %vm5331_vm11, %v5324_v55, %v4782_v62  ;;  %v10781_v41 = vsel %vm5331_vm11, %v5323_v0, %v4780_v20  ;;  %v12470_v0 = vld [vmem:[#allocation75_spill] sm:$0xff]  ;;  %4981 = vrot.lane.b32.xlu1 %v3027_v49, %s6762_s30 }
 0x2e1   :  { %v10734_v43 = vperm.slane %v3896_v59, 0  ;;  %12462 = vst [vmem:[#allocation31_spill] sm:$0xff] %v10753_v57  ;;  %v3566_v59 = vsel %vm169_vm2, %v3545_v40, 0.0  ;;  %v10775_v40 = vsel %vm5345_vm15, %v10559_v51, %v4822_v36  ;;  %v5326_v51 = vsel %vm5317_vm10, %v10505_v14, %v12469_v61 }
 0x2e2   :  { %v3567_v25 = vadd.f32 %v3566_v59, %v3565_v18  ;;  %v4140_v18 = vmul.f32 %v10753_v57, %v10753_v57  ;;  %v10799_v62 = vsel %vm5331_vm11, %v5326_v51, %v4786_v54  ;;  %v3025_v20 = vmax.f32 %v3012_v31, 0.0  ;;  %v12473_v31 = vld [vmem:[#allocation65_spill] sm:$0xff] }
 0x2e3   :  { %v10739_v35 = vmul.f32 %v10734_v43, %v10418_v56  ;;  %v12463_v56 = vld [vmem:[#allocation53_spill] sm:$0xff]  ;;  %v3547_v55 = vmul.f32 %v10603_v8, %v10603_v8  ;;  %v10806_v46 = vsub.f32 %v12470_v0, %v10653_v23  ;;  %v3013_v14 = vadd.f32 %v10749_v15, %v2995_v19  ;;  %v12474_v0 = vld [vmem:[#allocation36_spill] sm:$0xff] }
 0x2e4   :  { %v10757_v52 = vsub.f32 %v12463_v56, %v10653_v23  ;;  %v4788_v56 = vpop.permute.xlu1 %4787  ;;  %v3286_v61 = vsub.f32 1.5, %v3285_v44  ;;  %v3569_v57 = vadd.f32 %v3568_v5, %v3567_v25  ;;  %4977 = vrot.lane.b32.xlu2 %v3025_v20, %s6762_s30  ;;  %v2999_v53 = vmul.f32 %v10270_v10, %v12473_v31  ;;  %v12475_v5 = vld [vmem:[#allocation79_spill] sm:$0xff]  ;;  %v12477_v31 = vld [vmem:[#allocation88_spill] sm:$0xff] }
 0x2e5   :  { %v10796_v36 = vsel %vm5331_vm11, %v10579_v12, %v4788_v56  ;;  %12471 = vst [vmem:[#allocation43_spill] sm:$0xff] %v10806_v46  ;;  %v12472_v12 = vld [vmem:[#allocation48_spill] sm:$0xff]  ;;  %v4153_v6 = vsel %vm169_vm2, %v4140_v18, 0.0  ;;  %v3026_v51 = vmax.f32 %v3013_v14, 0.0  ;;  %v2998_v44 = vmul.f32 %v10270_v10, %v12474_v0 }
 0x2e6   :  { %12464 = vst [vmem:[#allocation47_spill] sm:$0xff] %v10757_v52  ;;  %v4141_v59 = vmul.f32 %v10757_v52, %v10757_v52  ;;  %v2997_v54 = vmul.f32 %v10270_v10, %v12472_v12  ;;  %v3017_v19 = vadd.f32 %v10749_v15, %v2999_v53  ;;  %v3548_v20 = vmul.f32 %v10607_v33, %v10607_v33  ;;  %v12478_v52 = vld [vmem:[#allocation34_spill] sm:$0xff] }
 0x2e7   :  { %v3570_v49 = vsel %vm169_vm2, %v3547_v55, 0.0  ;;  %v10826_v12 = vsub.f32 %v12475_v5, %v10653_v23  ;;  %v4142_v18 = vmul.f32 %v10806_v46, %v10806_v46  ;;  %4979 = vrot.lane.b32.xlu0 %v3026_v51, %s6762_s30  ;;  %v10835_v53 = vsub.f32 %v12477_v31, %v10653_v23  ;;  %v12479_v46 = vld [vmem:[#allocation71_spill] sm:$0xff] }
 0x2e8   :  { %v4154_v56 = vsel %vm169_vm2, %v4141_v59, 0.0  ;;  %v3015_v25 = vadd.f32 %v10749_v15, %v2997_v54  ;;  %v3571_v59 = vadd.f32 %v3570_v49, %v3569_v57  ;;  %v3287_v54 = vmul.f32 %v10705_v30, %v3286_v61 }
 0x2e9   :  { %12476 = vst [vmem:[#allocation74_spill] sm:$0xff] %v10826_v12  ;;  %v4155_v14 = vadd.f32 %v4154_v56, %v4153_v6  ;;  %v3016_v55 = vadd.f32 %v10749_v15, %v2998_v44  ;;  %v3030_v5 = vmax.f32 %v3017_v19, 0.0  ;;  %v3000_v16 = vmul.f32 %v10270_v10, %v12478_v52  ;;  %v12480_v52 = vld [vmem:[#allocation95_spill] sm:$0xff]  ;;  %v12481_v19 = vld [vmem:[#allocation49_spill] sm:$0xff] }
 0x2ea   :  { %v3028_v0 = vmax.f32 %v3015_v25, 0.0  ;;  %v3002_v51 = vmul.f32 %v10270_v10, %v12479_v46  ;;  %v3572_v57 = vsel %vm193_vm3, %v3548_v20, 0.0  ;;  %v4143_v61 = vmul.f32 %v10826_v12, %v10826_v12  ;;  %v6244_v20 = vld [vmem:[%s11711_s2 + $0xa] sm:$0x1] }
 0x2eb   :  { %v4156_v6 = vsel %vm169_vm2, %v4142_v18, 0.0  ;;  %v3573_v56 = vadd.f32 %v3572_v57, %v3571_v59  ;;  %4987 = vrot.lane.b32.xlu1 %v3030_v5, %s6762_s30  ;;  %v10853_v46 = vsub.f32 %v12480_v52, %v10653_v23  ;;  %v4144_v44 = vmul.f32 %v10835_v53, %v10835_v53 }
 0x2ec   :  { %v4157_v49 = vadd.f32 %v4156_v6, %v4155_v14  ;;  %4983 = vrot.lane.b32.xlu2 %v3028_v0, %s6762_s30  ;;  %v3029_v25 = vmax.f32 %v3016_v55, 0.0  ;;  %v3001_v50 = vmul.f32 %v10270_v10, %v12481_v19  ;;  %v3291_v18 = vsel %vm3290_vm5, %v10705_v30, %v3287_v54  ;;  %v12482_v54 = vld [vmem:[#allocation24_spill] sm:$0xff] }
 0x2ed   :  { %v3018_v59 = vadd.f32 %v10749_v15, %v3000_v16  ;;  %v3020_v14 = vadd.f32 %v10749_v15, %v3002_v51  ;;  %v4158_v31 = vsel %vm169_vm2, %v4143_v61, 0.0  ;;  %v3574_v0 = vrot.slane %v3573_v56, 4  ;;  %v12483_v51 = vld [vmem:[#allocation73_spill] sm:$0xff] }
 0x2ee   :  { %v4159_v5 = vadd.f32 %v4158_v31, %v4157_v49  ;;  %v3292_v55 = vmul.f32 %v6244_v20, %v3291_v18  ;;  %v4145_v57 = vmul.f32 %v10853_v46, %v10853_v46  ;;  %v4160_v6 = vsel %vm169_vm2, %v4144_v44, 0.0  ;;  %v12486_v18 = vld [vmem:[#allocation72_spill] sm:$0xff] }
 0x2ef   :  { %4985 = vrot.lane.b32.xlu0 %v3029_v25, %s6762_s30  ;;  %v3019_v52 = vadd.f32 %v10749_v15, %v3001_v50  ;;  %v3031_v19 = vmax.f32 %v3018_v59, 0.0  ;;  %v3033_v30 = vmax.f32 %v3020_v14, 0.0  ;;  %v3003_v16 = vmul.f32 %v10270_v10, %v12482_v54  ;;  %v12484_v25 = vld [vmem:[#allocation15_spill] sm:$0xff] }
 0x2f0   :  { %v3005_v61 = vmul.f32 %v10270_v10, %v12483_v51  ;;  %v10877_v12 = vsub.f32 %v12484_v25, %v10653_v23  ;;  %v3575_v49 = vadd.f32 %v3574_v0, %v3573_v56  ;;  %v4161_v20 = vadd.f32 %v4160_v6, %v4159_v5  ;;  %v12487_v51 = vld [vmem:[#allocation70_spill] sm:$0xff] }
 0x2f1   :  { %v4162_v44 = vsel %vm169_vm2, %v4145_v57, 0.0  ;;  %v3032_v50 = vmax.f32 %v3019_v52, 0.0  ;;  %v3004_v59 = vmul.f32 %v10270_v10, %v12486_v18  ;;  %v10884_v14 = vperm.slane %v3292_v55, 0  ;;  %v12488_v52 = vld [vmem:[#allocation4_spill] sm:$0xff] }
 0x2f2   :  { %12485 = vst [vmem:[#allocation86_spill] sm:$0xff] %v10877_v12  ;;  %v3021_v31 = vadd.f32 %v10749_v15, %v3003_v16  ;;  %v3023_v54 = vadd.f32 %v10749_v15, %v3005_v61  ;;  %v10890_v56 = vsub.f32 %v12487_v51, %v10653_v23  ;;  %v4146_v0 = vmul.f32 %v10877_v12, %v10877_v12  ;;  %v12489_v61 = vld [vmem:[#allocation26_spill] sm:$0xff]  ;;  %v12494_v51 = vld [vmem:[#allocation19_spill] sm:$0xff] }
 0x2f3   :  { %4993 = vrot.lane.b32.xlu1 %v3033_v30, %s6762_s30  ;;  %v3576_v5 = vrot.slane %v3575_v49, 2  ;;  %v4163_v57 = vadd.f32 %v4162_v44, %v4161_v20  ;;  %v3022_v6 = vadd.f32 %v10749_v15, %v3004_v59  ;;  %v10901_v30 = vld [vmem:[%s11710_s3 + $0xa] ss:$0 sm:$0xff]  ;;  %v10908_v25 = vsub.f32 %v12489_v61, %v10703_v38  ;;  %v4834_v59 = vpop.permute.xlu2 %4833 }
 0x2f4   :  { %4989 = vrot.lane.b32.xlu2 %v3031_v19, %s6762_s30  ;;  %v3034_v10 = vmax.f32 %v3021_v31, 0.0  ;;  %v3036_v55 = vmax.f32 %v3023_v54, 0.0  ;;  %v3297_v19 = vmul.f32 %v10884_v14, %v12488_v52  ;;  %v4147_v23 = vmul.f32 %v10890_v56, %v10890_v56  ;;  %v4794_v31 = vpop.permute.xlu1 %4793  ;;  %v12493_v54 = vld [vmem:[#allocation61_spill] sm:$0xff]  ;;  %v12495_v52 = vld [vmem:[#allocation96_spill] sm:$0xff] }
 0x2f5   :  { %v4164_v16 = vsel %vm169_vm2, %v4146_v0, 0.0  ;;  %12490 = vst [vmem:[#allocation92_spill] sm:$0xff] %v10908_v25  ;;  %v3577_v20 = vadd.f32 %v3576_v5, %v3575_v49  ;;  %v5330_v0 = vsel %vm5317_vm10, %v12494_v51, %v12493_v54  ;;  %v5329_v61 = vsel %vm5317_vm10, %v10522_v7, %v12495_v52  ;;  %v12496_v5 = vld [vmem:[#allocation50_spill] sm:$0xff] }
 0x2f6   :  { %v4165_v44 = vadd.f32 %v4164_v16, %v4163_v57  ;;  %v3035_v49 = vmax.f32 %v3022_v6, 0.0  ;;  %v3296_v57 = vmul.f32 %v10884_v14, %v12496_v5  ;;  %v10926_v16 = vsel %vm5345_vm15, %v10778_v17, %v4834_v59 }
 0x2f7   :  { %4991 = vrot.lane.b32.xlu0 %v3032_v50, %s6762_s30  ;;  %v12491_v50 = vld [vmem:[#allocation58_spill] sm:$0xff]  ;;  %v3315_v54 = vadd.f32 %v10901_v30, %v3297_v19  ;;  %v4148_v7 = vmul.f32 %v10657_v4, %v10657_v4  ;;  %v4166_v6 = vsel %vm169_vm2, %v4147_v23, 0.0  ;;  %v3578_v17 = vrot.slane %v3577_v20, 1 }
 0x2f8   :  { %v10912_v18 = vsub.f32 %v12491_v50, %v10703_v38  ;;  %v12497_v50 = vld [vmem:[#allocation7_spill] sm:$0xff]  ;;  %v4167_v59 = vadd.f32 %v4166_v6, %v4165_v44  ;;  %v3314_v52 = vadd.f32 %v10901_v30, %v3296_v57  ;;  %vm5442_vm5 = vcmask 850944  }
 0x2f9   :  { %v3024_v12 = vadd.f32 %v10749_v15, %v12497_v50  ;;  %v4442_v15 = vmul.f32 %v10908_v25, %v10908_v25  ;;  %v3328_v5 = vmax.f32 %v3315_v54, 0.0  ;;  %v4149_v50 = vmul.f32 %v10661_v29, %v10661_v29  ;;  %v12504_v29 = vld [vmem:[#allocation2_spill] sm:$0xff] }
 0x2fa   :  { %12492 = vst [vmem:[#allocation78_spill] sm:$0xff] %v10912_v18  ;;  %v4443_v19 = vmul.f32 %v10912_v18, %v10912_v18  ;;  %v4168_v6 = vsel %vm169_vm2, %v4148_v7, 0.0  ;;  %v3579_v18 = vadd.f32 %v3578_v17, %v3577_v20 }
 0x2fb   :  { %4999 = vrot.lane.b32.xlu1 %v3036_v55, %s6762_s30  ;;  %v4792_v55 = vpop.permute.xlu0 %4791  ;;  %v3037_v23 = vmax.f32 %v3024_v12, 0.0  ;;  %v4169_v4 = vadd.f32 %v4168_v6, %v4167_v59  ;;  %v4455_v57 = vsel %vm169_vm2, %v4442_v15, 0.0  ;;  %v12505_v6 = vld [vmem:[#allocation93_spill] sm:$0xff] }
 0x2fc   :  { %4995 = vrot.lane.b32.xlu2 %v3034_v10, %s6762_s30  ;;  %v10929_v10 = vsel %vm5331_vm11, %v5330_v0, %v4794_v31  ;;  %v10938_v51 = vsel %vm5331_vm11, %v5329_v61, %v4792_v55  ;;  %v12498_v31 = vld [vmem:[#allocation76_spill] sm:$0xff]  ;;  %v12500_v61 = vld [vmem:[#allocation3_spill] sm:$0xff]  ;;  %v4456_v54 = vsel %vm169_vm2, %v4443_v19, 0.0  ;;  %v4826_v7 = vpop.permute.xlu1 %4825  ;;  %v4150_v19 = vmul.f32 %v10665_v9, %v10665_v9 }
 0x2fd   :  { %v10943_v0 = vsub.f32 %v12498_v31, %v10703_v38  ;;  %v3298_v55 = vmul.f32 %v10884_v14, %v12500_v61  ;;  %v12502_v31 = vld [vmem:[#allocation82_spill] sm:$0xff]  ;;  %v4840_v61 = vpop.permute.xlu2 %4839  ;;  %v10975_v17 = vsel %vm5345_vm15, %v10640_v28, %v4826_v7  ;;  %v4457_v28 = vadd.f32 %v4456_v54, %v4455_v57 }
 0x2fe   :  { %v10959_v25 = vsub.f32 %v12502_v31, %v10703_v38  ;;  %v3299_v31 = vmul.f32 %v10884_v14, %v12504_v29  ;;  %v10971_v20 = vsel %vm5345_vm15, %v10796_v36, %v4840_v61  ;;  %v3580_v36 = vmul.f32 0.010204081, %v3579_v18 }
 0x2ff   :  { %4997 = vrot.lane.b32.xlu0 %v3035_v49, %s6762_s30  ;;  %12499 = vst [vmem:[#allocation62_spill] sm:$0xff] %v10943_v0  ;;  %v12501_v49 = vld [vmem:[#allocation6_spill] sm:$0xff]  ;;  %v4444_v12 = vmul.f32 %v10943_v0, %v10943_v0  ;;  %v10989_v61 = vsub.f32 %v12505_v6, %v10703_v38  ;;  %v4151_v18 = vmul.f32 %v10669_v60, %v10669_v60  ;;  %v4172_v57 = vsel %vm169_vm2, %v4150_v19, 0.0 }
 0x300   :  { %v3300_v44 = vmul.f32 %v10884_v14, %v12501_v49  ;;  %12503 = vst [vmem:[#allocation25_spill] sm:$0xff] %v10959_v25  ;;  %v3327_v49 = vmax.f32 %v3314_v52, 0.0  ;;  %v4170_v52 = vsel %vm169_vm2, %v4149_v50, 0.0  ;;  %v3317_v50 = vadd.f32 %v10901_v30, %v3299_v31 }
 0x301   :  { %12506 = vst [vmem:[#allocation41_spill] sm:$0xff] %v10989_v61  ;;  %v11002_v54 = vadd.f32 1e-05, %v3580_v36  ;;  %v12511_v36 = vld [vmem:[#allocation89_spill] sm:$0xff] }
 0x302   :  { %v3318_v15 = vadd.f32 %v10901_v30, %v3300_v44  ;;  %v4458_v44 = vsel %vm169_vm2, %v4444_v12, 0.0  ;;  %v12509_v12 = vld [vmem:[#allocation97_spill] sm:$0xff]  ;;  %v3330_v19 = vmax.f32 %v3317_v50, 0.0  ;;  %v4174_v50 = vsel %vm169_vm2, %v4151_v18, 0.0 }
 0x303   :  { %5031 = vrot.lane.b32.xlu1 %v3328_v5, %s6763_s9  ;;  %v4824_v59 = vpop.permute.xlu0 %4823  ;;  %v4171_v5 = vadd.f32 %v4170_v52, %v4169_v4  ;;  %v11006_v6 = vsub.f32 %v12509_v12, %v10703_v38  ;;  %v4459_v31 = vadd.f32 %v4458_v44, %v4457_v28  ;;  %6748 = vrsqrt.f32 %v11002_v54 }
 0x304   :  { %5001 = vrot.lane.b32.xlu2 %v3037_v23, %s6762_s30  ;;  %v3316_v23 = vadd.f32 %v10901_v30, %v3298_v55  ;;  %v10984_v29 = vsel %vm5345_vm15, %v10510_v32, %v4824_v59  ;;  %v4445_v55 = vmul.f32 %v10959_v25, %v10959_v25  ;;  %v3331_v0 = vmax.f32 %v3318_v15, 0.0  ;;  %v12507_v32 = vld [vmem:[#allocation54_spill] sm:$0xff]  ;;  %v12522_v25 = vld [vmem:[#allocation85_spill] sm:$0xff] }
 0x305   :  { %v3301_v59 = vmul.f32 %v10884_v14, %v12507_v32  ;;  %v4173_v52 = vadd.f32 %v4172_v57, %v4171_v5  ;;  %12510 = vst [vmem:[#allocation12_spill] sm:$0xff] %v11006_v6  ;;  %v4846_v32 = vpop.permute.xlu2 %4845  ;;  %v3302_v5 = vmul.f32 %v10884_v14, %v12511_v36  ;;  %vm3590_vm7 = vweird.f32 %v11002_v54 }
 0x306   :  { %v3329_v7 = vmax.f32 %v3316_v23, 0.0  ;;  %v4446_v23 = vmul.f32 %v10989_v61, %v10989_v61  ;;  %v4460_v15 = vsel %vm169_vm2, %v4445_v55, 0.0  ;;  %v11017_v57 = vsel %vm5345_vm15, %v10929_v10, %v4846_v32  ;;  %v12512_v32 = vld [vmem:[#allocation67_spill] sm:$0xff]  ;;  %v12515_v61 = vld [vmem:[#allocation84_spill] sm:$0xff] }
 0x307   :  { %5029 = vrot.lane.b32.xlu0 %v3327_v49, %s6763_s9  ;;  %v12508_v49 = vld [vmem:[#allocation94_spill] sm:$0xff]  ;;  %v3319_v44 = vadd.f32 %v10901_v30, %v3301_v59  ;;  %v4152_v55 = vmul.f32 %v10680_v45, %v10680_v45  ;;  %v4461_v10 = vadd.f32 %v4460_v15, %v4459_v31  ;;  %v11036_v59 = vsub.f32 %v12512_v32, %v10703_v38 }
 0x308   :  { %v3303_v4 = vmul.f32 %v10884_v14, %v12508_v49  ;;  %v4832_v49 = vpop.permute.xlu1 %4831  ;;  %v3320_v18 = vadd.f32 %v10901_v30, %v3302_v5 }
 0x309   :  { %v11021_v28 = vsel %vm5345_vm15, %v10781_v41, %v4832_v49  ;;  %v4175_v41 = vadd.f32 %v4174_v50, %v4173_v52  ;;  %12513 = vst [vmem:[#allocation52_spill] sm:$0xff] %v11036_v59  ;;  %v4462_v49 = vsel %vm169_vm2, %v4446_v23, 0.0  ;;  %v3332_v36 = vmax.f32 %v3319_v44, 0.0  ;;  %v12516_v50 = vld [vmem:[#allocation63_spill] sm:$0xff] }
 0x30a   :  { %v3306_v52 = vmul.f32 %v10884_v14, %v12515_v61  ;;  %v4176_v31 = vsel %vm193_vm3, %v4152_v55, 0.0  ;;  %v11049_v32 = vsub.f32 %v12516_v50, %v10703_v38  ;;  %v4448_v23 = vmul.f32 %v11036_v59, %v11036_v59  ;;  %v12518_v55 = vld [vmem:[#allocation83_spill] sm:$0xff] }
 0x30b   :  { %5037 = vrot.lane.b32.xlu1 %v3331_v0, %s6763_s9  ;;  %v4830_v0 = vpop.permute.xlu0 %4829  ;;  %v4177_v15 = vadd.f32 %v4176_v31, %v4175_v41  ;;  %v3305_v41 = vmul.f32 %v10884_v14, %v12518_v55  ;;  %v12519_v31 = vld [vmem:[#allocation56_spill] sm:$0xff] }
 0x30c   :  { %5033 = vrot.lane.b32.xlu2 %v3329_v7, %s6763_s9  ;;  %v3321_v7 = vadd.f32 %v10901_v30, %v3303_v4  ;;  %v11030_v12 = vsel %vm5345_vm15, %v10529_v27, %v4830_v0  ;;  %v4447_v4 = vmul.f32 %v11006_v6, %v11006_v6  ;;  %v12514_v0 = vld [vmem:[#allocation18_spill] sm:$0xff]  ;;  %12517 = vst [vmem:[#allocation59_spill] sm:$0xff] %v11049_v32  ;;  %v12520_v55 = vld [vmem:[#allocation68_spill] sm:$0xff] }
 0x30d   :  { %v4463_v6 = vadd.f32 %v4462_v49, %v4461_v10  ;;  %v11056_v44 = vpop.permute.xlu2 %4927  ;;  %v4178_v50 = vrot.slane %v4177_v15, 4  ;;  %v11077_v59 = vsub.f32 %v12520_v55, %v10703_v38  ;;  %v11090_v38 = vld [vmem:[%s11710_s3 + $0xc] ss:$0 sm:$0xff] }
 0x30e   :  { %v3334_v27 = vmax.f32 %v3321_v7, 0.0  ;;  %v4464_v5 = vsel %vm169_vm2, %v4447_v4, 0.0  ;;  %v3333_v7 = vmax.f32 %v3320_v18, 0.0  ;;  %v3902_v4 = vmul.f32 %v10734_v43, %v12519_v31 }
 0x30f   :  { %5035 = vrot.lane.b32.xlu0 %v3330_v19, %s6763_s9  ;;  %v3304_v19 = vmul.f32 %v10884_v14, %v12514_v0  ;;  %v11060_v0 = vpop.eup %6748  ;;  %12521 = vst [vmem:[#allocation100_spill] sm:$0xff] %v11077_v59  ;;  %v3323_v31 = vadd.f32 %v10901_v30, %v3305_v41  ;;  %v4179_v55 = vadd.f32 %v4178_v50, %v4177_v15 }
 0x310   :  { %v4838_v61 = vpop.permute.xlu1 %4837  ;;  %v4450_v41 = vmul.f32 %v11077_v59, %v11077_v59  ;;  %v12525_v59 = vld [vmem:[#allocation30_spill] sm:$0xff]  ;;  %vm3591_vm6 = vweird.f32 %v11060_v0 }
 0x311   :  { %v11064_v10 = vsel %vm5345_vm15, %v10799_v62, %v4838_v61  ;;  %v4465_v62 = vadd.f32 %v4464_v5, %v4463_v6  ;;  %v4466_v61 = vsel %vm169_vm2, %v4448_v23, 0.0  ;;  %v12523_v6 = vld [vmem:[#allocation87_spill] sm:$0xff]  ;;  %vm3592_vm8 = vmor %vm3590_vm7, %vm3591_vm6  ;;  %vm5470_vm6 = vcmask 982016  }
 0x312   :  { %v3308_v5 = vmul.f32 %v10884_v14, %v12523_v6  ;;  %vm5483_vm7 = vcmask 975872  }
 0x313   :  { %5043 = vrot.lane.b32.xlu1 %v3334_v27, %s6763_s9  ;;  %v4836_v49 = vpop.permute.xlu0 %4835  ;;  %v3324_v27 = vadd.f32 %v10901_v30, %v3306_v52  ;;  %v4449_v52 = vmul.f32 %v11049_v32, %v11049_v32  ;;  %v4467_v45 = vadd.f32 %v4466_v61, %v4465_v62  ;;  %v3336_v32 = vmax.f32 %v3323_v31, 0.0 }
 0x314   :  { %5039 = vrot.lane.b32.xlu2 %v3332_v36, %s6763_s9  ;;  %v3322_v36 = vadd.f32 %v10901_v30, %v3304_v19  ;;  %v11072_v18 = vsel %vm5345_vm15, %v10556_v13, %v4836_v49  ;;  %v3585_v19 = vmul.f32 %v11060_v0, %v11002_v54  ;;  %v3920_v62 = vadd.f32 %v11090_v38, %v3902_v4 }
 0x315   :  { %v3337_v49 = vmax.f32 %v3324_v27, 0.0  ;;  %v4451_v31 = vmul.f32 %v10715_v37, %v10715_v37 }
 0x316   :  { %v3335_v13 = vmax.f32 %v3322_v36, 0.0  ;;  %v3586_v23 = vmul.f32 %v11060_v0, %v3585_v19  ;;  %v11100_v36 = vpop.permute.xlu2 %4933 }
 0x317   :  { %5041 = vrot.lane.b32.xlu0 %v3333_v7, %s6763_s9  ;;  %v3307_v7 = vmul.f32 %v10884_v14, %v12522_v25  ;;  %v4468_v25 = vsel %vm169_vm2, %v4449_v52, 0.0  ;;  %v4180_v52 = vrot.slane %v4179_v55, 2 }
 0x318   :  { %v4844_v27 = vpop.permute.xlu1 %4843  ;;  %v4469_v61 = vadd.f32 %v4468_v25, %v4467_v45  ;;  %v4452_v45 = vmul.f32 %v10719_v11, %v10719_v11 }
 0x319   :  { %v11104_v14 = vsel %vm5345_vm15, %v10938_v51, %v4844_v27  ;;  %v3325_v50 = vadd.f32 %v10901_v30, %v3307_v7  ;;  %v4470_v51 = vsel %vm169_vm2, %v4450_v41, 0.0  ;;  %v3933_v7 = vmax.f32 %v3920_v62, 0.0  ;;  %v12524_v27 = vld [vmem:[#allocation13_spill] sm:$0xff] }
 0x31a   :  { %v3900_v4 = vmul.f32 %v10734_v43, %v12524_v27 }
 0x31b   :  { %5049 = vrot.lane.b32.xlu1 %v3337_v49, %s6763_s9  ;;  %v4842_v15 = vpop.permute.xlu0 %4841  ;;  %v3326_v49 = vadd.f32 %v10901_v30, %v3308_v5  ;;  %v3338_v6 = vmax.f32 %v3325_v50, 0.0  ;;  %v4472_v30 = vsel %vm169_vm2, %v4451_v31, 0.0  ;;  %v12526_v50 = vld [vmem:[#allocation37_spill] sm:$0xff] }
 0x31c   :  { %5045 = vrot.lane.b32.xlu2 %v3335_v13, %s6763_s9  ;;  %v11110_v19 = vsel %vm5345_vm15, %v10632_v26, %v4842_v15  ;;  %v3587_v13 = vmul.f32 0.5, %v3586_v23  ;;  %v3905_v26 = vmul.f32 %v10734_v43, %v12525_v59  ;;  %v4181_v15 = vadd.f32 %v4180_v52, %v4179_v55 }
 0x31d   :  { %v3339_v25 = vmax.f32 %v3326_v49, 0.0  ;;  %v3901_v59 = vmul.f32 %v10734_v43, %v12526_v50  ;;  %v3918_v62 = vadd.f32 %v11090_v38, %v3900_v4  ;;  %v4474_v49 = vsel %vm169_vm2, %v4452_v45, 0.0  ;;  %v12527_v4 = vld [vmem:[#allocation66_spill] sm:$0xff]  ;;  %v12528_v50 = vld [vmem:[#allocation44_spill] sm:$0xff] }
 0x31e   :  { %v3588_v23 = vsub.f32 1.5, %v3587_v13  ;;  %v11126_v5 = vpop.permute.xlu2 %4939  ;;  %v3923_v52 = vadd.f32 %v11090_v38, %v3905_v26  ;;  %v4453_v13 = vmul.f32 %v10723_v22, %v10723_v22  ;;  %v3903_v26 = vmul.f32 %v10734_v43, %v12527_v4 }
 0x31f   :  { %5047 = vrot.lane.b32.xlu0 %v3336_v32, %s6763_s9  ;;  %v4471_v32 = vadd.f32 %v4470_v51, %v4469_v61  ;;  %v4182_v61 = vrot.slane %v4181_v15, 1  ;;  %v4454_v45 = vmul.f32 %v10727_v34, %v10727_v34  ;;  %v12530_v34 = vld [vmem:[#allocation46_spill] sm:$0xff]  ;;  %vm5400_vm15 = vcmask 654336  }
 0x320   :  { %v11128_v41 = vpop.permute.xlu1 %4925  ;;  %v3589_v51 = vmul.f32 %v11060_v0, %v3588_v23  ;;  %v3936_v27 = vmax.f32 %v3923_v52, 0.0  ;;  %v4476_v23 = vsel %vm169_vm2, %v4453_v13, 0.0  ;;  %v12529_v52 = vld [vmem:[#allocation9_spill] sm:$0xff]  ;;  %vm5359_vm2 = vcmask 457728  }
 0x321   :  { %v4473_v31 = vadd.f32 %v4472_v30, %v4471_v32  ;;  %v4183_v22 = vadd.f32 %v4182_v61, %v4181_v15  ;;  %v3904_v54 = vmul.f32 %v10734_v43, %v12529_v52  ;;  %v6315_v15 = vld [vmem:[%s11711_s2 + $0xb] sm:$0x1]  ;;  %v4478_v4 = vsel %vm193_vm3, %v4454_v45, 0.0 }
 0x322   :  { %v3593_v61 = vsel %vm3592_vm8, %v11060_v0, %v3589_v51  ;;  %v3906_v0 = vmul.f32 %v10734_v43, %v12530_v34  ;;  %v3911_v51 = vmul.f32 %v10734_v43, %v10415_v24  ;;  %vm5373_vm3 = vcmask 523264  }
 0x323   :  { %5137 = vrot.lane.b32.xlu1 %v3933_v7, %s6764_s11  ;;  %v11132_v55 = vpop.permute.xlu0 %4929  ;;  %v3931_v7 = vmax.f32 %v3918_v62, 0.0  ;;  %v4475_v32 = vadd.f32 %v4474_v49, %v4473_v31  ;;  %v3921_v49 = vadd.f32 %v11090_v38, %v3903_v26 }
 0x324   :  { %5051 = vrot.lane.b32.xlu2 %v3338_v6, %s6763_s9  ;;  %v3919_v6 = vadd.f32 %v11090_v38, %v3901_v59 }
 0x325   :  { %v3934_v52 = vmax.f32 %v3921_v49, 0.0 }
 0x326   :  { %v11153_v30 = vpop.permute.xlu2 %4945  ;;  %v3932_v62 = vmax.f32 %v3919_v6, 0.0  ;;  %v3594_v6 = vmul.f32 %v6315_v15, %v3593_v61  ;;  %v3924_v15 = vadd.f32 %v11090_v38, %v3906_v0  ;;  %v3929_v61 = vadd.f32 %v11090_v38, %v3911_v51 }
 0x327   :  { %5053 = vrot.lane.b32.xlu0 %v3339_v25, %s6763_s9  ;;  %v3908_v25 = vmul.f32 %v10734_v43, %v12528_v50  ;;  %v3922_v50 = vadd.f32 %v11090_v38, %v3904_v54 }
 0x328   :  { %v11155_v59 = vpop.permute.xlu1 %4931  ;;  %v11182_v54 = vperm.slane %v3594_v6, 0 }
 0x329   :  { %v3926_v13 = vadd.f32 %v11090_v38, %v3908_v25  ;;  %v3935_v45 = vmax.f32 %v3922_v50, 0.0 }
 0x32b   :  { %5143 = vrot.lane.b32.xlu1 %v3936_v27, %s6764_s11  ;;  %v11163_v31 = vpop.permute.xlu0 %4935  ;;  %v4477_v27 = vadd.f32 %v4476_v23, %v4475_v32  ;;  %v3939_v11 = vmax.f32 %v3926_v13, 0.0  ;;  %v12531_v23 = vld [vmem:[#allocation17_spill] sm:$0xff]  ;;  %v11198_v13 = vld [vmem:[%s11710_s3 + $0xb] ss:$0 sm:$0xff] }
 0x32c   :  { %5133 = vrot.lane.b32.xlu2 %v3931_v7, %s6764_s11  ;;  %v4184_v7 = vmul.f32 0.010204081, %v4183_v22 }
 0x32d   :  { %v4479_v25 = vadd.f32 %v4478_v4, %v4477_v27  ;;  %v12532_v27 = vld [vmem:[#allocation29_spill] sm:$0xff]  ;;  %v3598_v4 = vmul.f32 %v11182_v54, %v10585_v1 }
 0x32e   :  { %v11174_v26 = vadd.f32 1e-05, %v4184_v7  ;;  %v4878_v22 = vpop.permute.xlu2 %4877  ;;  %v3942_v7 = vmax.f32 %v3929_v61, 0.0  ;;  %v3909_v6 = vmul.f32 %v10734_v43, %v12532_v27 }
 0x32f   :  { %5135 = vrot.lane.b32.xlu0 %v3932_v62, %s6764_s11  ;;  %v3907_v62 = vmul.f32 %v10734_v43, %v12531_v23  ;;  %v11186_v24 = vsel %vm5359_vm2, %v10975_v17, %v4878_v22  ;;  %v3937_v17 = vmax.f32 %v3924_v15, 0.0  ;;  %v12533_v22 = vld [vmem:[#allocation32_spill] sm:$0xff] }
 0x330   :  { %v11178_v32 = vpop.permute.xlu1 %4937  ;;  %6750 = vrsqrt.f32 %v11174_v26  ;;  %v3927_v1 = vadd.f32 %v11090_v38, %v3909_v6  ;;  %vm4194_vm10 = vweird.f32 %v11174_v26 }
 0x331   :  { %v3925_v49 = vadd.f32 %v11090_v38, %v3907_v62 }
 0x333   :  { %5149 = vrot.lane.b32.xlu1 %v3939_v11, %s6764_s11  ;;  %v11188_v34 = vpop.permute.xlu0 %4941  ;;  %v4480_v11 = vrot.slane %v4479_v25, 4  ;;  %v3938_v51 = vmax.f32 %v3925_v49, 0.0  ;;  %v3940_v49 = vmax.f32 %v3927_v1, 0.0 }
 0x334   :  { %5139 = vrot.lane.b32.xlu2 %v3934_v52, %s6764_s11 }
 0x335   :  { %v4481_v50 = vadd.f32 %v4480_v11, %v4479_v25  ;;  %v3616_v25 = vadd.f32 %v11198_v13, %v3598_v4 }
 0x336   :  { %v4884_v52 = vpop.permute.xlu2 %4883  ;;  %v11210_v23 = vpop.eup %6750 }
 0x337   :  { %5141 = vrot.lane.b32.xlu0 %v3935_v45, %s6764_s11  ;;  %v3910_v45 = vmul.f32 %v10734_v43, %v12533_v22  ;;  %v11214_v62 = vsel %vm5359_vm2, %v11021_v28, %v4884_v52  ;;  %v4482_v61 = vrot.slane %v4481_v50, 2  ;;  %v4189_v11 = vmul.f32 %v11210_v23, %v11174_v26 }
 0x338   :  { %v11206_v0 = vpop.permute.xlu1 %4943  ;;  %v3601_v28 = vmul.f32 %v11182_v54, %v10628_v3  ;;  %vm4195_vm9 = vweird.f32 %v11210_v23  ;;  %v3606_v26 = vmul.f32 %v11182_v54, %v10701_v2 }
 0x339   :  { %v3928_v43 = vadd.f32 %v11090_v38, %v3910_v45  ;;  %v4190_v27 = vmul.f32 %v11210_v23, %v4189_v11  ;;  %v3599_v11 = vmul.f32 %v11182_v54, %v10595_v63  ;;  %vm11284_vm11 = vmor %vm4194_vm10, %vm4195_vm9 }
 0x33a   :  { %v3619_v45 = vadd.f32 %v11198_v13, %v3601_v28 }
 0x33b   :  { %5155 = vrot.lane.b32.xlu1 %v3942_v7, %s6764_s11  ;;  %v11216_v15 = vpop.permute.xlu0 %4947  ;;  %v4483_v7 = vadd.f32 %v4482_v61, %v4481_v50  ;;  %v3941_v52 = vmax.f32 %v3928_v43, 0.0  ;;  %v3930_v50 = vadd.f32 %v11090_v38, %v10739_v35  ;;  %v4191_v61 = vmul.f32 0.5, %v4190_v27 }
 0x33c   :  { %5145 = vrot.lane.b32.xlu2 %v3937_v17, %s6764_s11  ;;  %v3629_v17 = vmax.f32 %v3616_v25, 0.0  ;;  %v3632_v35 = vmax.f32 %v3619_v45, 0.0  ;;  %v3604_v38 = vmul.f32 %v11182_v54, %v10686_v48  ;;  %v3617_v27 = vadd.f32 %v11198_v13, %v3599_v11  ;;  %v6457_v11 = vld [vmem:[%s11711_s2 + $0xd] sm:$0x1] }
 0x33d   :  { %v4484_v25 = vrot.slane %v4483_v7, 1  ;;  %v3943_v43 = vmax.f32 %v3930_v50, 0.0 }
 0x33e   :  { %v4890_v6 = vpop.permute.xlu2 %4889 }
 0x33f   :  { %5147 = vrot.lane.b32.xlu0 %v3938_v51, %s6764_s11  ;;  %v3600_v51 = vmul.f32 %v11182_v54, %v10616_v39  ;;  %v11235_v22 = vsel %vm5359_vm2, %v11064_v10, %v4890_v6  ;;  %v3603_v6 = vmul.f32 %v11182_v54, %v10673_v42 }
 0x340   :  { %v11229_v4 = vpop.permute.xlu1 %4949 }
 0x341   :  { %v3618_v10 = vadd.f32 %v11198_v13, %v3600_v51  ;;  %v11265_v51 = vsel %vm5373_vm3, %v11186_v24, %v11132_v55  ;;  %v3621_v55 = vadd.f32 %v11198_v13, %v3603_v6  ;;  %v3602_v24 = vmul.f32 %v11182_v54, %v10648_v21 }
 0x343   :  { %5081 = vrot.lane.b32.xlu1 %v3629_v17, %s6765_s16  ;;  %v4874_v3 = vpop.permute.xlu0 %4873 }
 0x344   :  { %5151 = vrot.lane.b32.xlu2 %v3940_v49, %s6764_s11  ;;  %v5360_v1 = vsel %vm5359_vm2, %v10775_v40, %v4874_v3  ;;  %v4485_v49 = vadd.f32 %v4484_v25, %v4483_v7  ;;  %v4192_v40 = vsub.f32 1.5, %v4191_v61 }
 0x345   :  { %v5374_v39 = vsel %vm5373_vm3, %v5360_v1, %v11128_v41  ;;  %v3631_v41 = vmax.f32 %v3618_v10, 0.0  ;;  %v3607_v1 = vmul.f32 %v11182_v54, %v10589_v58  ;;  %v3634_v10 = vmax.f32 %v3621_v55, 0.0 }
 0x346   :  { %v4896_v17 = vpop.permute.xlu2 %4895  ;;  %v4193_v50 = vmul.f32 %v11210_v23, %v4192_v40  ;;  %v3620_v58 = vadd.f32 %v11198_v13, %v3602_v24  ;;  %v3610_v40 = vmul.f32 %v11182_v54, %v10607_v33  ;;  %v3609_v33 = vmul.f32 %v11182_v54, %v10603_v8 }
 0x347   :  { %5153 = vrot.lane.b32.xlu0 %v3941_v52, %s6764_s11  ;;  %v11257_v63 = vsel %vm5359_vm2, %v11104_v14, %v4896_v17  ;;  %v3622_v52 = vadd.f32 %v11198_v13, %v3604_v38  ;;  %v4486_v14 = vmul.f32 0.010204081, %v4485_v49  ;;  %v11310_v49 = vsel %vm5373_vm3, %v11214_v62, %v11163_v31 }
 0x348   :  { %v4876_v28 = vpop.permute.xlu1 %4875  ;;  %v4197_v21 = vsel %vm11284_vm11, %v11210_v23, %v4193_v50  ;;  %v3625_v23 = vadd.f32 %v11198_v13, %v3607_v1  ;;  %v3624_v31 = vadd.f32 %v11198_v13, %v3606_v26  ;;  %v3633_v62 = vmax.f32 %v3620_v58, 0.0 }
 0x349   :  { %v5361_v48 = vsel %vm5359_vm2, %v10984_v29, %v4876_v28  ;;  %v3635_v45 = vmax.f32 %v3622_v52, 0.0  ;;  %v4198_v17 = vmul.f32 %v6457_v11, %v4197_v21  ;;  %v11345_v55 = vsel %vm5373_vm3, %v11235_v22, %v11188_v34 }
 0x34a   :  { %v11272_v42 = vsel %vm5373_vm3, %v5361_v48, %v11056_v44  ;;  %v3638_v28 = vmax.f32 %v3625_v23, 0.0  ;;  %v3637_v48 = vmax.f32 %v3624_v31, 0.0  ;;  %v11383_v23 = vsel %vm5373_vm3, %v11257_v63, %v11216_v15 }
 0x34b   :  { %5087 = vrot.lane.b32.xlu1 %v3632_v35, %s6765_s16  ;;  %v4880_v7 = vpop.permute.xlu0 %4879 }
 0x34c   :  { %5157 = vrot.lane.b32.xlu2 %v3943_v43, %s6764_s11  ;;  %v5363_v3 = vsel %vm5359_vm2, %v10785_v47, %v4880_v7  ;;  %v3630_v47 = vmax.f32 %v3617_v27, 0.0  ;;  %v11330_v27 = vperm.slane %v4198_v17, 0 }
 0x34d   :  { %v5377_v29 = vsel %vm5373_vm3, %v5363_v3, %v11155_v59  ;;  %v11288_v59 = vadd.f32 1e-05, %v4486_v14 }
 0x34e   :  { %v4978_v25 = vpop.permute.xlu2 %4977 }
 0x34f   :  { %5085 = vrot.lane.b32.xlu0 %v3631_v41, %s6765_s16  ;;  %v11302_v43 = vsel %vm100_vm1, %v5374_v39, %v4978_v25  ;;  %6752 = vrsqrt.f32 %v11288_v59  ;;  %vm4496_vm13 = vweird.f32 %v11288_v59 }
 0x350   :  { %v4882_v61 = vpop.permute.xlu1 %4881 }
 0x351   :  { %v5364_v35 = vsel %vm5359_vm2, %v11030_v12, %v4882_v61 }
 0x352   :  { %v11317_v39 = vsel %vm5373_vm3, %v5364_v35, %v11100_v36  ;;  %v3628_v36 = vadd.f32 %v11198_v13, %v3610_v40 }
 0x353   :  { %5093 = vrot.lane.b32.xlu1 %v3635_v45, %s6765_s16  ;;  %v4886_v38 = vpop.permute.xlu0 %4885  ;;  %v12537_v45 = vld [vmem:[#allocation10_spill] sm:$0xff] }
 0x354   :  { %5083 = vrot.lane.b32.xlu2 %v3630_v47, %s6765_s16  ;;  %v5366_v2 = vsel %vm5359_vm2, %v10926_v16, %v4886_v38  ;;  %v12536_v16 = vld [vmem:[#allocation42_spill] sm:$0xff]  ;;  %v3627_v47 = vadd.f32 %v11198_v13, %v3609_v33  ;;  %v3608_v34 = vmul.f32 %v11182_v54, %v12537_v45  ;;  %v3641_v22 = vmax.f32 %v3628_v36, 0.0 }
 0x355   :  { %v5380_v12 = vsel %vm5373_vm3, %v5366_v2, %v11178_v32  ;;  %v3605_v41 = vmul.f32 %v11182_v54, %v12536_v16  ;;  %v11334_v7 = vpop.eup %6752  ;;  %v12541_v16 = vld [vmem:[#allocation74_spill] sm:$0xff] }
 0x356   :  { %v4984_v32 = vpop.permute.xlu2 %4983  ;;  %v3640_v61 = vmax.f32 %v3627_v47, 0.0  ;;  %v3626_v54 = vadd.f32 %v11198_v13, %v3608_v34  ;;  %vm4497_vm12 = vweird.f32 %v11334_v7  ;;  %v12544_v34 = vld [vmem:[#allocation86_spill] sm:$0xff] }
 0x357   :  { %5091 = vrot.lane.b32.xlu0 %v3634_v10, %s6765_s16  ;;  %v11337_v52 = vsel %vm100_vm1, %v5377_v29, %v4984_v32  ;;  %v3623_v50 = vadd.f32 %v11198_v13, %v3605_v41  ;;  %v4491_v29 = vmul.f32 %v11334_v7, %v11288_v59  ;;  %v12539_v10 = vld [vmem:[#allocation31_spill] sm:$0xff]  ;;  %v4205_v41 = vmul.f32 %v11330_v27, %v12541_v16  ;;  %vm11423_vm14 = vmor %vm4496_vm13, %vm4497_vm12 }
 0x358   :  { %v4888_v6 = vpop.permute.xlu1 %4887  ;;  %v4202_v58 = vmul.f32 %v11330_v27, %v12539_v10  ;;  %v3639_v17 = vmax.f32 %v3626_v54, 0.0  ;;  %v6528_v59 = vld [vmem:[%s11711_s2 + $0xe] sm:$0x1] }
 0x359   :  { %v5367_v3 = vsel %vm5359_vm2, %v11072_v18, %v4888_v6  ;;  %v3636_v1 = vmax.f32 %v3623_v50, 0.0  ;;  %v12545_v10 = vld [vmem:[#allocation55_spill] sm:$0xff] }
 0x35a   :  { %v11352_v8 = vsel %vm5373_vm3, %v5367_v3, %v11126_v5  ;;  %v12538_v5 = vld [vmem:[#allocation47_spill] sm:$0xff] }
 0x35b   :  { %5099 = vrot.lane.b32.xlu1 %v3638_v28, %s6765_s16  ;;  %v4892_v14 = vpop.permute.xlu0 %4891  ;;  %v4203_v44 = vmul.f32 %v11330_v27, %v12538_v5 }
 0x35c   :  { %5089 = vrot.lane.b32.xlu2 %v3633_v62, %s6765_s16  ;;  %v5369_v24 = vsel %vm5359_vm2, %v10971_v20, %v4892_v14  ;;  %v11364_v20 = vld [vmem:[%s11710_s3 + $0xd] ss:$0 sm:$0xff] }
 0x35d   :  { %v5383_v18 = vsel %vm5373_vm3, %v5369_v24, %v11206_v0  ;;  %v4492_v0 = vmul.f32 %v11334_v7, %v4491_v29  ;;  %v4221_v38 = vadd.f32 %v11364_v20, %v4203_v44  ;;  %v4220_v40 = vadd.f32 %v11364_v20, %v4202_v58  ;;  %v12540_v62 = vld [vmem:[#allocation43_spill] sm:$0xff] }
 0x35e   :  { %v4990_v21 = vpop.permute.xlu2 %4989  ;;  %v4204_v15 = vmul.f32 %v11330_v27, %v12540_v62  ;;  %v4223_v14 = vadd.f32 %v11364_v20, %v4205_v41  ;;  %v4210_v58 = vmul.f32 %v11330_v27, %v12545_v10 }
 0x35f   :  { %5097 = vrot.lane.b32.xlu0 %v3637_v48, %s6765_s16  ;;  %v11375_v26 = vsel %vm100_vm1, %v5380_v12, %v4990_v21  ;;  %v4493_v12 = vmul.f32 0.5, %v4492_v0  ;;  %v4234_v31 = vmax.f32 %v4221_v38, 0.0 }
 0x360   :  { %v4894_v25 = vpop.permute.xlu1 %4893 }
 0x361   :  { %v5370_v11 = vsel %vm5359_vm2, %v11110_v19, %v4894_v25 }
 0x362   :  { %v11390_v2 = vsel %vm5373_vm3, %v5370_v11, %v11153_v30  ;;  %v4494_v30 = vsub.f32 1.5, %v4493_v12 }
 0x363   :  { %5105 = vrot.lane.b32.xlu1 %v3641_v22, %s6765_s16  ;;  %v4898_v35 = vpop.permute.xlu0 %4897 }
 0x364   :  { %5095 = vrot.lane.b32.xlu2 %v3636_v1, %s6765_s16  ;;  %v5372_v13 = vsel %vm5359_vm2, %v11017_v57, %v4898_v35  ;;  %v4206_v57 = vmul.f32 %v11330_v27, %v10835_v53  ;;  %v4222_v53 = vadd.f32 %v11364_v20, %v4204_v15  ;;  %v4495_v3 = vmul.f32 %v11334_v7, %v4494_v30 }
 0x365   :  { %v5386_v19 = vsel %vm5373_vm3, %v5372_v13, %v11229_v4  ;;  %v4233_v4 = vmax.f32 %v4220_v40, 0.0  ;;  %v12546_v13 = vld [vmem:[#allocation64_spill] sm:$0xff] }
 0x366   :  { %v4996_v63 = vpop.permute.xlu2 %4995  ;;  %v4224_v48 = vadd.f32 %v11364_v20, %v4206_v57  ;;  %v4235_v50 = vmax.f32 %v4222_v53, 0.0  ;;  %v4499_v29 = vsel %vm11423_vm14, %v11334_v7, %v4495_v3  ;;  %v11476_v57 = vld [vmem:[%s11710_s3 + $0xe] ss:$0 sm:$0xff]  ;;  %s6767_s3 = smov 112  }
 0x367   :  { %5103 = vrot.lane.b32.xlu0 %v3640_v61, %s6765_s16  ;;  %v11404_v36 = vsel %vm100_vm1, %v5383_v18, %v4996_v63  ;;  %v4209_v18 = vmul.f32 %v11330_v27, %v10890_v56  ;;  %v4208_v56 = vmul.f32 %v11330_v27, %v12544_v34  ;;  %v4500_v21 = vmul.f32 %v6528_v59, %v4499_v29  ;;  %v12550_v29 = vld [vmem:[#allocation25_spill] sm:$0xff] }
 0x368   :  { %v4982_v28 = vpop.permute.xlu1 %4981  ;;  %v4237_v24 = vmax.f32 %v4224_v48, 0.0  ;;  %v4213_v63 = vmul.f32 %v11330_v27, %v10669_v60 }
 0x369   :  { %v5389_v32 = vsel %vm100_vm1, %v11265_v51, %v4982_v28  ;;  %v4207_v51 = vmul.f32 %v11330_v27, %v10853_v46  ;;  %v4236_v46 = vmax.f32 %v4223_v14, 0.0  ;;  %v4227_v7 = vadd.f32 %v11364_v20, %v4209_v18  ;;  %v12547_v28 = vld [vmem:[#allocation92_spill] sm:$0xff]  ;;  %v12549_v18 = vld [vmem:[#allocation78_spill] sm:$0xff] }
 0x36a   :  { %v4226_v25 = vadd.f32 %v11364_v20, %v4208_v56  ;;  %v4231_v3 = vadd.f32 %v11364_v20, %v4213_v63 }
 0x36b   :  { %5187 = vrot.lane.b32.xlu1 %v4234_v31, %s6766_s20  ;;  %v4980_v6 = vpop.permute.xlu0 %4979  ;;  %v4225_v44 = vadd.f32 %v11364_v20, %v4207_v51  ;;  %v4240_v54 = vmax.f32 %v4227_v7, 0.0 }
 0x36c   :  { %5101 = vrot.lane.b32.xlu2 %v3639_v17, %s6765_s16  ;;  %v11412_v33 = vsel %vm100_vm1, %v11272_v42, %v4980_v6  ;;  %v4239_v38 = vmax.f32 %v4226_v25, 0.0  ;;  %v4228_v17 = vadd.f32 %v11364_v20, %v4210_v58 }
 0x36d   :  { %v4238_v61 = vmax.f32 %v4225_v44, 0.0 }
 0x36e   :  { %v5002_v47 = vpop.permute.xlu2 %5001  ;;  %v4241_v30 = vmax.f32 %v4228_v17, 0.0 }
 0x36f   :  { %5185 = vrot.lane.b32.xlu0 %v4233_v4, %s6766_s20  ;;  %v11438_v22 = vsel %vm100_vm1, %v5386_v19, %v5002_v47  ;;  %v4211_v19 = vmul.f32 %v11330_v27, %v12546_v13 }
 0x370   :  { %v4988_v45 = vpop.permute.xlu1 %4987 }
 0x371   :  { %v5392_v1 = vsel %vm100_vm1, %v11310_v49, %v4988_v45  ;;  %v4212_v49 = vmul.f32 %v11330_v27, %v10665_v9  ;;  %v4229_v15 = vadd.f32 %v11364_v20, %v4211_v19 }
 0x373   :  { %5193 = vrot.lane.b32.xlu1 %v4237_v24, %s6766_s20  ;;  %v4986_v5 = vpop.permute.xlu0 %4985  ;;  %v4230_v31 = vadd.f32 %v11364_v20, %v4212_v49  ;;  %v4242_v6 = vmax.f32 %v4229_v15, 0.0  ;;  %v4244_v24 = vmax.f32 %v4231_v3, 0.0  ;;  %v12557_v3 = vld [vmem:[#allocation28_spill] sm:$0xff] }
 0x374   :  { %5189 = vrot.lane.b32.xlu2 %v4235_v50, %s6766_s20  ;;  %v11446_v0 = vsel %vm100_vm1, %v11317_v39, %v4986_v5  ;;  %v11456_v39 = vperm.slane %v4500_v21, 0 }
 0x376   :  { %v5034_v11 = vpop.permute.xlu2 %5033  ;;  %v4504_v4 = vmul.f32 %v11456_v39, %v12547_v28  ;;  %v4505_v42 = vmul.f32 %v11456_v39, %v12549_v18 }
 0x377   :  { %5191 = vrot.lane.b32.xlu0 %v4236_v46, %s6766_s20  ;;  %v11461_v12 = vsel %vm5400_vm15, %v5389_v32, %v5034_v11  ;;  %v12551_v46 = vld [vmem:[#allocation62_spill] sm:$0xff]  ;;  %v12554_v11 = vld [vmem:[#allocation12_spill] sm:$0xff] }
 0x378   :  { %v4994_v35 = vpop.permute.xlu1 %4993  ;;  %v4522_v14 = vadd.f32 %v11476_v57, %v4504_v4  ;;  %v4506_v34 = vmul.f32 %v11456_v39, %v12551_v46 }
 0x379   :  { %v5395_v40 = vsel %vm100_vm1, %v11345_v55, %v4994_v35  ;;  %v4243_v55 = vmax.f32 %v4230_v31, 0.0  ;;  %v4509_v35 = vmul.f32 %v11456_v39, %v12554_v11 }
 0x37a   :  { %v4535_v51 = vmax.f32 %v4522_v14, 0.0  ;;  %v4524_v7 = vadd.f32 %v11476_v57, %v4506_v34  ;;  %v4516_v14 = vmul.f32 %v11456_v39, %v12557_v3 }
 0x37b   :  { %5199 = vrot.lane.b32.xlu1 %v4240_v54, %s6766_s20  ;;  %v4992_v9 = vpop.permute.xlu0 %4991  ;;  %v4527_v31 = vadd.f32 %v11476_v57, %v4509_v35 }
 0x37c   :  { %5195 = vrot.lane.b32.xlu2 %v4238_v61, %s6766_s20  ;;  %v11469_v62 = vsel %vm100_vm1, %v11352_v8, %v4992_v9  ;;  %v12548_v8 = vld [vmem:[#allocation14_spill] sm:$0xff]  ;;  %v12552_v61 = vld [vmem:[#allocation41_spill] sm:$0xff] }
 0x37d   :  { %v4214_v16 = vmul.f32 %v11330_v27, %v12548_v8  ;;  %v4508_v54 = vmul.f32 %v11456_v39, %v12552_v61  ;;  %v12556_v8 = vld [vmem:[#allocation100_spill] sm:$0xff] }
 0x37e   :  { %v5040_v41 = vpop.permute.xlu2 %5039 }
 0x37f   :  { %5197 = vrot.lane.b32.xlu0 %v4239_v38, %s6766_s20  ;;  %v11487_v53 = vsel %vm5400_vm15, %v5392_v1, %v5040_v41  ;;  %v4232_v27 = vadd.f32 %v11364_v20, %v4214_v16  ;;  %v4523_v1 = vadd.f32 %v11476_v57, %v4505_v42  ;;  %v4512_v16 = vmul.f32 %v11456_v39, %v12556_v8 }
 0x380   :  { %v5000_v32 = vpop.permute.xlu1 %4999 }
 0x381   :  { %v5398_v48 = vsel %vm100_vm1, %v11383_v23, %v5000_v32  ;;  %v4507_v23 = vmul.f32 %v11456_v39, %v12550_v29  ;;  %v4245_v47 = vmax.f32 %v4232_v27, 0.0  ;;  %v4536_v21 = vmax.f32 %v4523_v1, 0.0 }
 0x383   :  { %5205 = vrot.lane.b32.xlu1 %v4243_v55, %s6766_s20  ;;  %v4998_v60 = vpop.permute.xlu0 %4997  ;;  %v4525_v5 = vadd.f32 %v11476_v57, %v4507_v23  ;;  %v12555_v55 = vld [vmem:[#allocation59_spill] sm:$0xff] }
 0x384   :  { %5201 = vrot.lane.b32.xlu2 %v4241_v30, %s6766_s20  ;;  %v11495_v50 = vsel %vm100_vm1, %v11390_v2, %v4998_v60  ;;  %v4511_v63 = vmul.f32 %v11456_v39, %v12555_v55  ;;  %v4530_v60 = vadd.f32 %v11476_v57, %v4512_v16  ;;  %vm5414_vm1 = vcmask 719872  }
 0x385   :  { %v4538_v25 = vmax.f32 %v4525_v5, 0.0 }
 0x386   :  { %v5046_v2 = vpop.permute.xlu2 %5045  ;;  %v4543_v29 = vmax.f32 %v4530_v60, 0.0 }
 0x387   :  { %5203 = vrot.lane.b32.xlu0 %v4242_v6, %s6766_s20  ;;  %v11508_v20 = vsel %vm5400_vm15, %v5395_v40, %v5046_v2  ;;  %v4526_v40 = vadd.f32 %v11476_v57, %v4508_v54  ;;  %v4529_v6 = vadd.f32 %v11476_v57, %v4511_v63 }
 0x388   :  { %v5032_v45 = vpop.permute.xlu1 %5031 }
 0x389   :  { %v11512_v56 = vsel %vm5400_vm15, %v11412_v33, %v5032_v45  ;;  %v12553_v33 = vld [vmem:[#allocation52_spill] sm:$0xff]  ;;  %v4539_v15 = vmax.f32 %v4526_v40, 0.0  ;;  %v4542_v27 = vmax.f32 %v4529_v6, 0.0 }
 0x38a   :  { %v4510_v10 = vmul.f32 %v11456_v39, %v12553_v33 }
 0x38b   :  { %5237 = vrot.lane.b32.xlu1 %v4535_v51, %s6767_s3  ;;  %v5030_v59 = vpop.permute.xlu0 %5029  ;;  %v12558_v51 = vld [vmem:[#allocation27_spill] sm:$0xff] }
 0x38c   :  { %5207 = vrot.lane.b32.xlu2 %v4244_v24, %s6766_s20  ;;  %v11518_v44 = vsel %vm5400_vm15, %v11302_v43, %v5030_v59  ;;  %v4537_v43 = vmax.f32 %v4524_v7, 0.0  ;;  %v4528_v9 = vadd.f32 %v11476_v57, %v4510_v10 }
 0x38e   :  { %v5052_v58 = vpop.permute.xlu2 %5051  ;;  %v4541_v30 = vmax.f32 %v4528_v9, 0.0 }
 0x38f   :  { %5209 = vrot.lane.b32.xlu0 %v4245_v47, %s6766_s20  ;;  %v11531_v38 = vsel %vm5400_vm15, %v5398_v48, %v5052_v58  ;;  %v4534_v47 = vadd.f32 %v11476_v57, %v4516_v14 }
 0x390   :  { %v5038_v49 = vpop.permute.xlu1 %5037 }
 0x391   :  { %v11535_v13 = vsel %vm5400_vm15, %v11446_v0, %v5038_v49  ;;  %v4513_v0 = vmul.f32 %v11456_v39, %v10715_v37  ;;  %v4547_v1 = vmax.f32 %v4534_v47, 0.0 }
 0x393   :  { %5243 = vrot.lane.b32.xlu1 %v4538_v25, %s6767_s3  ;;  %v5036_v19 = vpop.permute.xlu0 %5035  ;;  %v4531_v48 = vadd.f32 %v11476_v57, %v4513_v0 }
 0x394   :  { %5239 = vrot.lane.b32.xlu2 %v4536_v21, %s6767_s3  ;;  %v11541_v17 = vsel %vm5400_vm15, %v11337_v52, %v5036_v19  ;;  %v4540_v52 = vmax.f32 %v4527_v31, 0.0 }
 0x395   :  { %v4544_v24 = vmax.f32 %v4531_v48, 0.0 }
 0x396   :  { %v5134_v28 = vpop.permute.xlu2 %5133 }
 0x397   :  { %5241 = vrot.lane.b32.xlu0 %v4537_v43, %s6767_s3 }
 0x398   :  { %v5044_v4 = vpop.permute.xlu1 %5043 }
 0x399   :  { %v11555_v41 = vsel %vm5400_vm15, %v11469_v62, %v5044_v4  ;;  %v4514_v62 = vmul.f32 %v11456_v39, %v12558_v51 }
 0x39b   :  { %5249 = vrot.lane.b32.xlu1 %v4541_v30, %s6767_s3  ;;  %v5042_v32 = vpop.permute.xlu0 %5041  ;;  %v4532_v46 = vadd.f32 %v11476_v57, %v4514_v62 }
 0x39c   :  { %5245 = vrot.lane.b32.xlu2 %v4539_v15, %s6767_s3  ;;  %v5407_v37 = vsel %vm5400_vm15, %v11375_v26, %v5042_v32  ;;  %v12559_v26 = vld [vmem:[#allocation21_spill] sm:$0xff] }
 0x39d   :  { %v4515_v23 = vmul.f32 %v11456_v39, %v12559_v26  ;;  %v4545_v5 = vmax.f32 %v4532_v46, 0.0 }
 0x39e   :  { %v5140_v18 = vpop.permute.xlu2 %5139 }
 0x39f   :  { %5247 = vrot.lane.b32.xlu0 %v4540_v52, %s6767_s3  ;;  %v4533_v59 = vadd.f32 %v11476_v57, %v4515_v23 }
 0x3a0   :  { %v5050_v42 = vpop.permute.xlu1 %5049 }
 0x3a1   :  { %v5411_v2 = vsel %vm5400_vm15, %v11495_v50, %v5050_v42  ;;  %v4546_v21 = vmax.f32 %v4533_v59, 0.0 }
 0x3a3   :  { %5255 = vrot.lane.b32.xlu1 %v4544_v24, %s6767_s3  ;;  %v5048_v45 = vpop.permute.xlu0 %5047 }
 0x3a4   :  { %5251 = vrot.lane.b32.xlu2 %v4542_v27, %s6767_s3  ;;  %v5410_v34 = vsel %vm5400_vm15, %v11404_v36, %v5048_v45 }
 0x3a6   :  { %v5146_v39 = vpop.permute.xlu2 %5145 }
 0x3a7   :  { %5253 = vrot.lane.b32.xlu0 %v4543_v29, %s6767_s3 }
 0x3a8   :  { %v5138_v7 = vpop.permute.xlu1 %5137 }
 0x3ab   :  { %5261 = vrot.lane.b32.xlu1 %v4547_v1, %s6767_s3  ;;  %v5054_v50 = vpop.permute.xlu0 %5053 }
 0x3ac   :  { %5257 = vrot.lane.b32.xlu2 %v4545_v5, %s6767_s3  ;;  %v5413_v25 = vsel %vm5400_vm15, %v11438_v22, %v5054_v50 }
 0x3ae   :  { %v5152_v36 = vpop.permute.xlu2 %5151 }
 0x3af   :  { %5259 = vrot.lane.b32.xlu0 %v4546_v21, %s6767_s3 }
 0x3b0   :  { %v5144_v61 = vpop.permute.xlu1 %5143 }
 0x3b3   :  { %v5136_v54 = vpop.permute.xlu0 %5135 }
 0x3b6   :  { %v5158_v33 = vpop.permute.xlu2 %5157 }
 0x3b8   :  { %v5150_v57 = vpop.permute.xlu1 %5149 }
 0x3bb   :  { %v5142_v10 = vpop.permute.xlu0 %5141 }
 0x3be   :  { %v5084_v58 = vpop.permute.xlu2 %5083 }
 0x3bf   :  { %v5416_v22 = vsel %vm5414_vm1, %v11512_v56, %v5084_v58 }
 0x3c0   :  { %v5156_v49 = vpop.permute.xlu1 %5155  ;;  %v5430_v55 = vsel %vm5428_vm0, %v5416_v22, %v5136_v54 }
 0x3c3   :  { %v5148_v43 = vpop.permute.xlu0 %5147 }
 0x3c6   :  { %v5090_v11 = vpop.permute.xlu2 %5089 }
 0x3c7   :  { %v5419_v56 = vsel %vm5414_vm1, %v11535_v13, %v5090_v11 }
 0x3c8   :  { %v5082_v35 = vpop.permute.xlu1 %5081 }
 0x3c9   :  { %v5415_v19 = vsel %vm5414_vm1, %v11518_v44, %v5082_v35 }
 0x3ca   :  { %v5429_v63 = vsel %vm5428_vm0, %v5415_v19, %v5134_v28 }
 0x3cb   :  { %v5154_v40 = vpop.permute.xlu0 %5153 }
 0x3ce   :  { %v5096_v9 = vpop.permute.xlu2 %5095 }
 0x3cf   :  { %v5422_v6 = vsel %vm5414_vm1, %v11555_v41, %v5096_v9 }
 0x3d0   :  { %v5088_v31 = vpop.permute.xlu1 %5087  ;;  %v5436_v14 = vsel %vm5428_vm0, %v5422_v6, %v5148_v43 }
 0x3d1   :  { %v5418_v15 = vsel %vm5414_vm1, %v11541_v17, %v5088_v31  ;;  %v5433_v17 = vsel %vm5428_vm0, %v5419_v56, %v5142_v10 }
 0x3d2   :  { %v5432_v32 = vsel %vm5428_vm0, %v5418_v15, %v5140_v18 }
 0x3d3   :  { %v5086_v30 = vpop.permute.xlu0 %5085 }
 0x3d4   :  { %v5417_v0 = vsel %vm5414_vm1, %v11461_v12, %v5086_v30 }
 0x3d5   :  { %v11595_v44 = vsel %vm5428_vm0, %v5417_v0, %v5138_v7 }
 0x3d6   :  { %v5102_v4 = vpop.permute.xlu2 %5101 }
 0x3d7   :  { %v5425_v24 = vsel %vm5414_vm1, %v5411_v2, %v5102_v4 }
 0x3d8   :  { %v5094_v52 = vpop.permute.xlu1 %5093  ;;  %v5439_v29 = vsel %vm5428_vm0, %v5425_v24, %v5154_v40 }
 0x3d9   :  { %v5421_v8 = vsel %vm5414_vm1, %v5407_v37, %v5094_v52 }
 0x3da   :  { %v5435_v27 = vsel %vm5428_vm0, %v5421_v8, %v5146_v39 }
 0x3db   :  { %v5092_v16 = vpop.permute.xlu0 %5091 }
 0x3dc   :  { %v5420_v28 = vsel %vm5414_vm1, %v11487_v53, %v5092_v16 }
 0x3dd   :  { %v11605_v12 = vsel %vm5428_vm0, %v5420_v28, %v5144_v61 }
 0x3de   :  { %v5190_v48 = vpop.permute.xlu2 %5189 }
 0x3df   :  { %v5445_v22 = vsel %vm5442_vm5, %v11595_v44, %v5190_v48 }
 0x3e0   :  { %v5100_v13 = vpop.permute.xlu1 %5099 }
 0x3e1   :  { %v5424_v60 = vsel %vm5414_vm1, %v5410_v34, %v5100_v13 }
 0x3e3   :  { %v5098_v3 = vpop.permute.xlu0 %5097 }
 0x3e4   :  { %v5423_v37 = vsel %vm5414_vm1, %v11508_v20, %v5098_v3  ;;  %v5438_v20 = vsel %vm5428_vm0, %v5424_v60, %v5152_v36 }
 0x3e5   :  { %v11615_v53 = vsel %vm5428_vm0, %v5423_v37, %v5150_v57 }
 0x3e6   :  { %v5196_v51 = vpop.permute.xlu2 %5195 }
 0x3e7   :  { %v5448_v0 = vsel %vm5442_vm5, %v11605_v12, %v5196_v51 }
 0x3e8   :  { %v5106_v62 = vpop.permute.xlu1 %5105 }
 0x3e9   :  { %v5427_v41 = vsel %vm5414_vm1, %v5413_v25, %v5106_v62 }
 0x3ea   :  { %v5441_v2 = vsel %vm5428_vm0, %v5427_v41, %v5158_v33 }
 0x3eb   :  { %v5104_v18 = vpop.permute.xlu0 %5103 }
 0x3ec   :  { %v5426_v42 = vsel %vm5414_vm1, %v11531_v38, %v5104_v18 }
 0x3ed   :  { %v11624_v26 = vsel %vm5428_vm0, %v5426_v42, %v5156_v49 }
 0x3ee   :  { %v5202_v23 = vpop.permute.xlu2 %5201 }
 0x3ef   :  { %v5451_v16 = vsel %vm5442_vm5, %v11615_v53, %v5202_v23 }
 0x3f0   :  { %v5188_v47 = vpop.permute.xlu1 %5187 }
 0x3f1   :  { %v5444_v38 = vsel %vm5442_vm5, %v5430_v55, %v5188_v47 }
 0x3f3   :  { %v5186_v45 = vpop.permute.xlu0 %5185 }
 0x3f4   :  { %v5443_v54 = vsel %vm5442_vm5, %v5429_v63, %v5186_v45 }
 0x3f6   :  { %v5208_v46 = vpop.permute.xlu2 %5207 }
 0x3f7   :  { %v5454_v48 = vsel %vm5442_vm5, %v11624_v26, %v5208_v46 }
 0x3f8   :  { %v5194_v34 = vpop.permute.xlu1 %5193 }
 0x3f9   :  { %v5447_v21 = vsel %vm5442_vm5, %v5433_v17, %v5194_v34 }
 0x3fb   :  { %v5192_v59 = vpop.permute.xlu0 %5191 }
 0x3fc   :  { %v5446_v11 = vsel %vm5442_vm5, %v5432_v32, %v5192_v59 }
 0x3fe   :  { %v5240_v1 = vpop.permute.xlu2 %5239 }
 0x3ff   :  { %v5458_v39 = vsel %vm5456_vm4, %v5444_v38, %v5240_v1 }
 0x400   :  { %v5200_v5 = vpop.permute.xlu1 %5199  ;;  %5472 = vst.msk [vmem:[%s11712_s4 + $0x8] sm:$0xff] %vm5470_vm6, %v5458_v39 }
 0x401   :  { %v5450_v33 = vsel %vm5442_vm5, %v5436_v14, %v5200_v5 }
 0x403   :  { %v5198_v7 = vpop.permute.xlu0 %5197 }
 0x404   :  { %v5449_v55 = vsel %vm5442_vm5, %v5435_v27, %v5198_v7 }
 0x406   :  { %v5246_v50 = vpop.permute.xlu2 %5245 }
 0x407   :  { %v5461_v36 = vsel %vm5456_vm4, %v5447_v21, %v5246_v50 }
 0x408   :  { %v5206_v25 = vpop.permute.xlu1 %5205  ;;  %5475 = vst.msk [vmem:[%s11712_s4 + $0x20] sm:$0xff] %vm5470_vm6, %v5461_v36 }
 0x409   :  { %v5453_v35 = vsel %vm5442_vm5, %v5439_v29, %v5206_v25 }
 0x40b   :  { %v5204_v61 = vpop.permute.xlu0 %5203 }
 0x40c   :  { %v5452_v52 = vsel %vm5442_vm5, %v5438_v20, %v5204_v61 }
 0x40e   :  { %v5252_v57 = vpop.permute.xlu2 %5251 }
 0x40f   :  { %v5464_v58 = vsel %vm5456_vm4, %v5450_v33, %v5252_v57 }
 0x410   :  { %v5238_v10 = vpop.permute.xlu1 %5237  ;;  %5478 = vst.msk [vmem:[%s11712_s4 + $0x38] sm:$0xff] %vm5470_vm6, %v5464_v58 }
 0x411   :  { %v5457_v49 = vsel %vm5456_vm4, %v5443_v54, %v5238_v10 }
 0x412   :  { %5471 = vst.msk [vmem:[%s11712_s4] sm:$0xff] %vm5470_vm6, %v5457_v49 }
 0x413   :  { %v5210_v43 = vpop.permute.xlu0 %5209 }
 0x414   :  { %v5455_v12 = vsel %vm5442_vm5, %v5441_v2, %v5210_v43 }
 0x416   :  { %v5258_v19 = vpop.permute.xlu2 %5257 }
 0x417   :  { %v5467_v9 = vsel %vm5456_vm4, %v5453_v35, %v5258_v19 }
 0x418   :  { %v5244_v40 = vpop.permute.xlu1 %5243  ;;  %5481 = vst.msk [vmem:[%s11712_s4 + $0x50] sm:$0xff] %vm5470_vm6, %v5467_v9 }
 0x419   :  { %v5460_v31 = vsel %vm5456_vm4, %v5446_v11, %v5244_v40 }
 0x41a   :  { %5474 = vst.msk [vmem:[%s11712_s4 + $0x18] sm:$0xff] %vm5470_vm6, %v5460_v31 }
 0x41b   :  { %v5242_v15 = vpop.permute.xlu0 %5241 }
 0x41c   :  { %v5459_v30 = vsel %vm5456_vm4, %v5445_v22, %v5242_v15 }
 0x41d   :  { %5473 = vst.msk [vmem:[%s11712_s4 + $0x10] sm:$0xff] %vm5470_vm6, %v5459_v30 }
 0x420   :  { %v5250_v63 = vpop.permute.xlu1 %5249 }
 0x421   :  { %v5463_v44 = vsel %vm5456_vm4, %v5449_v55, %v5250_v63 }
 0x422   :  { %5477 = vst.msk [vmem:[%s11712_s4 + $0x30] sm:$0xff] %vm5470_vm6, %v5463_v44 }
 0x423   :  { %v5248_v56 = vpop.permute.xlu0 %5247 }
 0x424   :  { %v5462_v4 = vsel %vm5456_vm4, %v5448_v0, %v5248_v56 }
 0x425   :  { %5476 = vst.msk [vmem:[%s11712_s4 + $0x28] sm:$0xff] %vm5470_vm6, %v5462_v4 }
 0x428   :  { %v5256_v8 = vpop.permute.xlu1 %5255 }
 0x429   :  { %v5466_v17 = vsel %vm5456_vm4, %v5452_v52, %v5256_v8 }
 0x42a   :  { %5480 = vst.msk [vmem:[%s11712_s4 + $0x48] sm:$0xff] %vm5470_vm6, %v5466_v17 }
 0x42b   :  { %v5254_v32 = vpop.permute.xlu0 %5253 }
 0x42c   :  { %v5465_v28 = vsel %vm5456_vm4, %v5451_v16, %v5254_v32 }
 0x42d   :  { %5479 = vst.msk [vmem:[%s11712_s4 + $0x40] sm:$0xff] %vm5470_vm6, %v5465_v28 }
 0x430   :  { %v5262_v6 = vpop.permute.xlu1 %5261 }
 0x431   :  { %v5469_v13 = vsel %vm5456_vm4, %v5455_v12, %v5262_v6 }
 0x432   :  { %5484 = vst.msk [vmem:[%s11712_s4 + $0x60] sm:$0x3] %vm5483_vm7, %v5469_v13 }
 0x433   :  { %v5260_v60 = vpop.permute.xlu0 %5259 }
 0x434   :  { %v5468_v3 = vsel %vm5456_vm4, %v5454_v48, %v5260_v60 }
 0x435   :  { %5482 = vst.msk [vmem:[%s11712_s4 + $0x58] sm:$0xff] %vm5470_vm6, %v5468_v3 }

</bundles_post_ra>
